<compile_context>
chip_gen: v7x
topology: tpu7x:2x2x1
jax: 0.10.0
libtpu: 0.0.40
codegen_flags: <defaults>
</compile_context>

<pallas_src>
import math

import jax
import jax.numpy as jnp
from jax import lax
from jax.experimental import pallas as pl
from jax.experimental.pallas import tpu as pltpu

ONEHOT_DIM = 21
LN_EPS = 1e-5

# Row layout of the fused per-feature parameter block.
_B1, _B2, _B3, _GAMMA, _BETA = range(5)


def _round_up(x, m):
    return ((x + m - 1) // m) * m


def _cdiv(x, m):
    return (x + m - 1) // m


# ----------------------------------------------------------------------------
# Pallas kernel: one [tile_n, L] slab of MSA rows for a single batch element
# through the whole MSA_add forward pass.  Weights are VMEM-resident across the
# 2-D grid; peproj is re-fetched only when the batch index changes.
# ----------------------------------------------------------------------------
def msa_add_kernel(
    onehot_ref,   # [TN, TL, 21] bf16  mask-folded soft one-hot rows
    peproj_ref,   # [TL, D]      bf16  precomputed PE(residue) @ ws (per (b, l))
    wfold_ref,    # [21, D]      bf16  fused (wcat @ ws)
    w1_ref,       # [D, D]       bf16  transition linear_1
    w2_ref,       # [D, D]       bf16  transition linear_2
    w3_ref,       # [D, D]       bf16  transition linear_3
    vecs_ref,     # [5, D]       f32   rows: b1, b2, b3, gamma, beta
    out_ref,      # [TN, TL, D]  out_dtype
):
    tn, tl, a = onehot_ref.shape
    d = out_ref.shape[-1]
    r = tn * tl

    b1 = vecs_ref[_B1:_B1 + 1, :]
    b2 = vecs_ref[_B2:_B2 + 1, :]
    b3 = vecs_ref[_B3:_B3 + 1, :]
    gamma = vecs_ref[_GAMMA:_GAMMA + 1, :]
    beta = vecs_ref[_BETA:_BETA + 1, :]

    # --- MSA_features_emb (mask already folded into onehot) ----------------
    #   (mask*onehot) @ (wcat @ ws) + PE @ ws
    # Leading-dim merge only (TL % 16 == 0, last dims untouched) -> no relayout.
    x = onehot_ref[...].reshape(r, a)
    s0 = jnp.dot(x, wfold_ref[...], preferred_element_type=jnp.float32)   # [r, D] f32
    pe = peproj_ref[...].astype(jnp.float32)                              # [TL, D]
    s0 = (s0.reshape(tn, tl, d) + pe[None, :, :]).reshape(r, d)

    # --- StructureModuleTransition (1 layer, inference) --------------------
    h = jnp.dot(s0.astype(jnp.bfloat16), w1_ref[...],
                preferred_element_type=jnp.float32) + b1
    h = jnp.maximum(h, 0.0)
    h = jnp.dot(h.astype(jnp.bfloat16), w2_ref[...],
                preferred_element_type=jnp.float32) + b2
    h = jnp.maximum(h, 0.0)
    h = jnp.dot(h.astype(jnp.bfloat16), w3_ref[...],
                preferred_element_type=jnp.float32) + b3
    s = s0 + h
    # Dropout: inference mode -> identity.

    # LayerNorm over the feature dim (f32); centered value computed once.
    mu = jnp.mean(s, axis=-1, keepdims=True)
    xc = s - mu
    var = jnp.mean(xc * xc, axis=-1, keepdims=True)
    y = xc * lax.rsqrt(var + LN_EPS) * gamma + beta
    out_ref[...] = y.reshape(tn, tl, d).astype(out_ref.dtype)


# ----------------------------------------------------------------------------
# Wrapper
# ----------------------------------------------------------------------------
def _positional_encoding(residue_indexs, d2):
    """Row-invariant positional encoding, computed once per (B, L) position.

    TODO(synk): light_PositionalEncoding source is unavailable; standard
    sin/cos interleaved encoding is used here.
    """
    pos = residue_indexs.astype(jnp.float32)[:, :, None]            # [B, L, 1]
    j = jnp.arange(d2)
    inv_freq = jnp.exp(-(2 * (j // 2)).astype(jnp.float32) * (math.log(10000.0) / d2))
    angle = pos * inv_freq[None, None, :]
    return jnp.where(j % 2 == 0, jnp.sin(angle), jnp.cos(angle))    # [B, L, 2D]


def msa_add_forward(msa_onehot, residue_indexs, params, *,
                    rows_per_step=2048, out_dtype=jnp.bfloat16):
    """msa_onehot: [B, N, L, 21] float32; residue_indexs: [B, L] int32."""
    B, N, L, A = msa_onehot.shape
    assert A == ONEHOT_DIM
    d2, D = params["ws"].shape

    # ---- row-invariant precompute (XLA side) ------------------------------
    # Fold the onehot/chem embedding straight through msa_s: [21, D] bf16.
    wfold = (params["wcat"] @ params["ws"]).astype(jnp.bfloat16)
    # PE(residue) @ ws per unique (B, L) position; never broadcast over N.
    pe = _positional_encoding(residue_indexs, d2)                   # [B, L, 2D]
    pe_proj = jnp.einsum("ble,ed->bld", pe, params["ws"]).astype(jnp.bfloat16)  # [B, L, D]

    # Fold the padding mask into the onehot (integer compare, bf16 stream).
    mask = (residue_indexs != -100)                                  # [B, L] bool
    onehot = (msa_onehot * mask[:, None, :, None]).astype(jnp.bfloat16)  # [B, N, L, 21]

    w1 = params["w1"].astype(jnp.bfloat16)
    w2 = params["w2"].astype(jnp.bfloat16)
    w3 = params["w3"].astype(jnp.bfloat16)
    vecs = jnp.concatenate(
        [params["b1"], params["b2"], params["b3"], params["gamma"], params["beta"]],
        axis=0,
    ).astype(jnp.float32)                                           # [5, D]

    # ---- tiling: whole (padded) L per step, tile over the MSA-depth axis ---
    Lp = _round_up(L, 16)                       # bf16 sublane packing (16 rows)
    tile_n = max(1, min(N, rows_per_step // Lp))
    # v7x has 2 TensorCores and both grid axes are "parallel": keep >= 2 steps.
    while B * _cdiv(N, tile_n) < 2 and tile_n > 1:
        tile_n = max(1, tile_n // 2)
    Np = _round_up(N, tile_n)

    if Lp != L or Np != N:
        # Only the small onehot ([.., 21]) and the N-free peproj ([B, L, D])
        # ever get padded; the old [M, D] broadcast+pad HBM pass is gone.
        onehot = jnp.pad(onehot, ((0, 0), (0, Np - N), (0, Lp - L), (0, 0)))
        pe_proj = jnp.pad(pe_proj, ((0, 0), (0, Lp - L), (0, 0)))

    # N-tile axis innermost: peproj block index is constant across it, so its
    # DMA is skipped on consecutive steps (fetched once per batch element).
    grid = (B, Np // tile_n)
    resident = lambda arr: pl.BlockSpec(arr.shape, lambda b, j: (0, 0))

    out = pl.pallas_call(
        msa_add_kernel,
        out_shape=jax.ShapeDtypeStruct((B, Np, Lp, D), out_dtype),
        grid_spec=pltpu.PrefetchScalarGridSpec(
            num_scalar_prefetch=0,
            grid=grid,
            in_specs=[
                pl.BlockSpec((None, tile_n, Lp, A), lambda b, j: (b, j, 0, 0)),
                pl.BlockSpec((None, Lp, D), lambda b, j: (b, 0, 0)),
                resident(wfold),    # [21, D] bf16
                resident(w1),       # [D, D]  bf16
                resident(w2),
                resident(w3),
                resident(vecs),     # [5, D]  f32 fused biases / LN params
            ],
            out_specs=pl.BlockSpec((None, tile_n, Lp, D), lambda b, j: (b, j, 0, 0)),
        ),
        compiler_params=pltpu.CompilerParams(
            dimension_semantics=("parallel", "parallel"),
            vmem_limit_bytes=32 * 1024 * 1024,
        ),
    )(onehot, pe_proj, wfold, w1, w2, w3, vecs)

    return out[:, :N, :L, :]


# ----------------------------------------------------------------------------
# Pure-JAX f32 reference (original, unfolded math) for a correctness check.
# ----------------------------------------------------------------------------
def msa_add_reference(msa_onehot, residue_indexs, params):
    B, N, L, A = msa_onehot.shape
    d2, D = params["ws"].shape
    msa_cat = jnp.einsum("bnla,ad->bnld", msa_onehot, params["wcat"])
    mask = (residue_indexs != -100).astype(jnp.float32)[:, None, :, None]
    msa_cat = msa_cat * mask
    pe = _positional_encoding(residue_indexs, d2)                   # [B, L, 2D]
    x = msa_cat + pe[:, None, :, :]
    s0 = jnp.einsum("bnle,ed->bnld", x, params["ws"])
    h = jax.nn.relu(s0 @ params["w1"] + params["b1"][0])
    h = jax.nn.relu(h @ params["w2"] + params["b2"][0])
    h = h @ params["w3"] + params["b3"][0]
    s = s0 + h
    mu = jnp.mean(s, axis=-1, keepdims=True)
    var = jnp.mean((s - mu) ** 2, axis=-1, keepdims=True)
    s = (s - mu) / jnp.sqrt(var + LN_EPS)
    return s * params["gamma"][0] + params["beta"][0]


# ----------------------------------------------------------------------------
# Deterministic parameter construction (synthetic init, no checkpoint).
# ----------------------------------------------------------------------------
def make_params(key, d_msa):
    ks = jax.random.split(key, 8)
    scale = 0.1
    w_emb = scale * jax.random.normal(ks[0], (ONEHOT_DIM, d_msa), jnp.float32)
    # TODO(synk): add_chem_features source is unavailable; modeled as a fixed
    # per-amino-acid chemical feature table (linear in the soft onehot).
    chem_table = scale * jax.random.normal(ks[1], (ONEHOT_DIM, d_msa), jnp.float32)
    return {
        "wcat": jnp.concatenate([w_emb, chem_table], axis=1),         # [21, 2D]
        "ws": scale * jax.random.normal(ks[2], (2 * d_msa, d_msa), jnp.float32),
        "w1": scale * jax.random.normal(ks[3], (d_msa, d_msa), jnp.float32),
        "b1": 0.01 * jnp.ones((1, d_msa), jnp.float32),
        "w2": scale * jax.random.normal(ks[4], (d_msa, d_msa), jnp.float32),
        "b2": 0.01 * jnp.ones((1, d_msa), jnp.float32),
        "w3": scale * jax.random.normal(ks[5], (d_msa, d_msa), jnp.float32),
        "b3": 0.01 * jnp.ones((1, d_msa), jnp.float32),
        "gamma": 1.0 + 0.05 * jax.random.normal(ks[6], (1, d_msa), jnp.float32),
        "beta": 0.05 * jax.random.normal(ks[7], (1, d_msa), jnp.float32),
    }


if __name__ == "__main__":
    # batch, msa depth, seq len, d_msa.  D=128 keeps the output lane-dense;
    # tile_n=4, L=256 gives 1024 rows/step and a 2-step grid (v7x 2-TC friendly).
    B, N, L, D = 2, 4, 256, 128
    key = jax.random.PRNGKey(0)
    k_p, k_x = jax.random.split(key)

    params = make_params(k_p, D)

    # soft one-hot over 21 symbols
    logits = jax.random.normal(k_x, (B, N, L, ONEHOT_DIM), jnp.float32)
    msa_onehot = jax.nn.softmax(logits, axis=-1)

    # residue indices; mark a few padded positions with -100
    residue_indexs = jnp.broadcast_to(jnp.arange(L, dtype=jnp.int32), (B, L))
    residue_indexs = residue_indexs.at[1, L - 3:].set(-100)

    out = msa_add_forward(msa_onehot, residue_indexs, params)
    out = jax.block_until_ready(out)

    ref = msa_add_reference(msa_onehot, residue_indexs, params)
    assert out.shape == (B, N, L, D)
    out_f32 = out.astype(jnp.float32)
    max_err = float(jnp.max(jnp.abs(out_f32 - ref)))
    # bf16 streamed operands + bf16 output vs f32 reference -> relaxed tolerance.
    assert jnp.allclose(out_f32, ref, rtol=3e-2, atol=8e-2), (
        f"mismatch vs reference (max abs err {max_err})"
    )

    print("KERNEL_OK")
</pallas_src>

<mosaic_0001>
module attributes {stable_mosaic.version = 11 : i64} {
  func.func @msa_add_kernel(%arg0: i32, %arg1: i32, %arg2: memref<1x4x256x21xbf16, #tpu.memory_space<vmem>>, %arg3: memref<1x256x128xbf16, #tpu.memory_space<vmem>>, %arg4: memref<21x128xbf16, #tpu.memory_space<vmem>>, %arg5: memref<128x128xbf16, #tpu.memory_space<vmem>>, %arg6: memref<128x128xbf16, #tpu.memory_space<vmem>>, %arg7: memref<128x128xbf16, #tpu.memory_space<vmem>>, %arg8: memref<5x128xf32, #tpu.memory_space<vmem>>, %arg9: memref<1x4x256x128xbf16, #tpu.memory_space<vmem>>) attributes {dimension_semantics = [#tpu.dimension_semantics<parallel>, #tpu.dimension_semantics<parallel>], iteration_bounds = array<i64: 2, 1>, scalar_prefetch = 0 : i64, scratch_operands = 0 : i64, tpu.core_type = #tpu.core_type<tc>, window_params = [{transform_indices = @transform_0, window_bounds = array<i64: 1, 4, 256, 21>}, {transform_indices = @transform_1, window_bounds = array<i64: 1, 256, 128>}, {pipeline_mode = #tpu.pipeline_mode<synchronous>, transform_indices = @transform_2, window_bounds = array<i64: 21, 128>}, {pipeline_mode = #tpu.pipeline_mode<synchronous>, transform_indices = @transform_3, window_bounds = array<i64: 128, 128>}, {pipeline_mode = #tpu.pipeline_mode<synchronous>, transform_indices = @transform_4, window_bounds = array<i64: 128, 128>}, {pipeline_mode = #tpu.pipeline_mode<synchronous>, transform_indices = @transform_5, window_bounds = array<i64: 128, 128>}, {pipeline_mode = #tpu.pipeline_mode<synchronous>, transform_indices = @transform_6, window_bounds = array<i64: 5, 128>}, {transform_indices = @transform_7, window_bounds = array<i64: 1, 4, 256, 128>}]} {
    %c0 = arith.constant 0 : index
    %c0_0 = arith.constant 0 : index
    %0 = vector.load %arg8[%c0, %c0_0] : memref<5x128xf32, #tpu.memory_space<vmem>>, vector<1x128xf32>
    %c1 = arith.constant 1 : index
    %c0_1 = arith.constant 0 : index
    %1 = vector.load %arg8[%c1, %c0_1] : memref<5x128xf32, #tpu.memory_space<vmem>>, vector<1x128xf32>
    %c2 = arith.constant 2 : index
    %c0_2 = arith.constant 0 : index
    %2 = vector.load %arg8[%c2, %c0_2] : memref<5x128xf32, #tpu.memory_space<vmem>>, vector<1x128xf32>
    %c3 = arith.constant 3 : index
    %c0_3 = arith.constant 0 : index
    %3 = vector.load %arg8[%c3, %c0_3] : memref<5x128xf32, #tpu.memory_space<vmem>>, vector<1x128xf32>
    %c4 = arith.constant 4 : index
    %c0_4 = arith.constant 0 : index
    %4 = vector.load %arg8[%c4, %c0_4] : memref<5x128xf32, #tpu.memory_space<vmem>>, vector<1x128xf32>
    %c0_5 = arith.constant 0 : index
    %c0_6 = arith.constant 0 : index
    %c0_7 = arith.constant 0 : index
    %c0_8 = arith.constant 0 : index
    %5 = vector.load %arg2[%c0_5, %c0_6, %c0_7, %c0_8] : memref<1x4x256x21xbf16, #tpu.memory_space<vmem>>, vector<1x4x256x21xbf16>
    %6 = vector.shape_cast %5 : vector<1x4x256x21xbf16> to vector<4x256x21xbf16>
    %7 = vector.shape_cast %6 : vector<4x256x21xbf16> to vector<1024x21xbf16>
    %c0_9 = arith.constant 0 : index
    %c0_10 = arith.constant 0 : index
    %8 = vector.load %arg4[%c0_9, %c0_10] : memref<21x128xbf16, #tpu.memory_space<vmem>>, vector<21x128xbf16>
    %cst = arith.constant dense<0.000000e+00> : vector<1024x128xf32>
    %9 = tpu.matmul %7, %8, %cst {dimension_numbers = #tpu.dot_dimension_numbers<[1], [0], [0], [1], [0, 0, 1, 1], [], []>} : vector<1024x21xbf16>, vector<21x128xbf16>, vector<1024x128xf32> -> vector<1024x128xf32>
    %c0_11 = arith.constant 0 : index
    %c0_12 = arith.constant 0 : index
    %c0_13 = arith.constant 0 : index
    %10 = vector.load %arg3[%c0_11, %c0_12, %c0_13] : memref<1x256x128xbf16, #tpu.memory_space<vmem>>, vector<1x256x128xbf16>
    %11 = vector.shape_cast %10 : vector<1x256x128xbf16> to vector<256x128xbf16>
    %12 = arith.extf %11 : vector<256x128xbf16> to vector<256x128xf32>
    %13 = vector.shape_cast %9 : vector<1024x128xf32> to vector<4x256x128xf32>
    %14 = vector.shape_cast %12 : vector<256x128xf32> to vector<1x256x128xf32>
    %15 = vector.broadcast %14 : vector<1x256x128xf32> to vector<4x256x128xf32>
    %16 = arith.addf %13, %15 : vector<4x256x128xf32>
    %17 = vector.shape_cast %16 : vector<4x256x128xf32> to vector<1024x128xf32>
    %18 = arith.truncf %17 : vector<1024x128xf32> to vector<1024x128xbf16>
    %c0_14 = arith.constant 0 : index
    %c0_15 = arith.constant 0 : index
    %19 = vector.load %arg5[%c0_14, %c0_15] : memref<128x128xbf16, #tpu.memory_space<vmem>>, vector<128x128xbf16>
    %cst_16 = arith.constant dense<0.000000e+00> : vector<1024x128xf32>
    %20 = tpu.matmul %18, %19, %cst_16 {dimension_numbers = #tpu.dot_dimension_numbers<[1], [0], [0], [1], [0, 0, 1, 1], [], []>} : vector<1024x128xbf16>, vector<128x128xbf16>, vector<1024x128xf32> -> vector<1024x128xf32>
    %21 = vector.broadcast %0 : vector<1x128xf32> to vector<1024x128xf32>
    %22 = arith.addf %20, %21 : vector<1024x128xf32>
    %cst_17 = arith.constant 0.000000e+00 : f32
    %23 = vector.broadcast %cst_17 : f32 to vector<1024x128xf32>
    %24 = arith.maximumf %22, %23 : vector<1024x128xf32>
    %25 = arith.truncf %24 : vector<1024x128xf32> to vector<1024x128xbf16>
    %c0_18 = arith.constant 0 : index
    %c0_19 = arith.constant 0 : index
    %26 = vector.load %arg6[%c0_18, %c0_19] : memref<128x128xbf16, #tpu.memory_space<vmem>>, vector<128x128xbf16>
    %cst_20 = arith.constant dense<0.000000e+00> : vector<1024x128xf32>
    %27 = tpu.matmul %25, %26, %cst_20 {dimension_numbers = #tpu.dot_dimension_numbers<[1], [0], [0], [1], [0, 0, 1, 1], [], []>} : vector<1024x128xbf16>, vector<128x128xbf16>, vector<1024x128xf32> -> vector<1024x128xf32>
    %28 = vector.broadcast %1 : vector<1x128xf32> to vector<1024x128xf32>
    %29 = arith.addf %27, %28 : vector<1024x128xf32>
    %cst_21 = arith.constant 0.000000e+00 : f32
    %30 = vector.broadcast %cst_21 : f32 to vector<1024x128xf32>
    %31 = arith.maximumf %29, %30 : vector<1024x128xf32>
    %32 = arith.truncf %31 : vector<1024x128xf32> to vector<1024x128xbf16>
    %c0_22 = arith.constant 0 : index
    %c0_23 = arith.constant 0 : index
    %33 = vector.load %arg7[%c0_22, %c0_23] : memref<128x128xbf16, #tpu.memory_space<vmem>>, vector<128x128xbf16>
    %cst_24 = arith.constant dense<0.000000e+00> : vector<1024x128xf32>
    %34 = tpu.matmul %32, %33, %cst_24 {dimension_numbers = #tpu.dot_dimension_numbers<[1], [0], [0], [1], [0, 0, 1, 1], [], []>} : vector<1024x128xbf16>, vector<128x128xbf16>, vector<1024x128xf32> -> vector<1024x128xf32>
    %35 = vector.broadcast %2 : vector<1x128xf32> to vector<1024x128xf32>
    %36 = arith.addf %34, %35 : vector<1024x128xf32>
    %37 = arith.addf %17, %36 : vector<1024x128xf32>
    %cst_25 = arith.constant dense<0.000000e+00> : vector<1024xf32>
    %38 = vector.multi_reduction <add>, %37, %cst_25 [1] : vector<1024x128xf32> to vector<1024xf32>
    %39 = vector.shape_cast %38 : vector<1024xf32> to vector<1024x1xf32>
    %cst_26 = arith.constant 1.280000e+02 : f32
    %40 = vector.broadcast %cst_26 : f32 to vector<1024x1xf32>
    %41 = arith.divf %39, %40 : vector<1024x1xf32>
    %42 = vector.broadcast %41 : vector<1024x1xf32> to vector<1024x128xf32>
    %43 = arith.subf %37, %42 : vector<1024x128xf32>
    %44 = arith.mulf %43, %43 : vector<1024x128xf32>
    %cst_27 = arith.constant dense<0.000000e+00> : vector<1024xf32>
    %45 = vector.multi_reduction <add>, %44, %cst_27 [1] : vector<1024x128xf32> to vector<1024xf32>
    %46 = vector.shape_cast %45 : vector<1024xf32> to vector<1024x1xf32>
    %cst_28 = arith.constant 1.280000e+02 : f32
    %47 = vector.broadcast %cst_28 : f32 to vector<1024x1xf32>
    %48 = arith.divf %46, %47 : vector<1024x1xf32>
    %cst_29 = arith.constant 9.99999974E-6 : f32
    %49 = vector.broadcast %cst_29 : f32 to vector<1024x1xf32>
    %50 = arith.addf %48, %49 : vector<1024x1xf32>
    %51 = math.rsqrt %50 : vector<1024x1xf32>
    %52 = vector.broadcast %51 : vector<1024x1xf32> to vector<1024x128xf32>
    %53 = arith.mulf %43, %52 : vector<1024x128xf32>
    %54 = vector.broadcast %3 : vector<1x128xf32> to vector<1024x128xf32>
    %55 = arith.mulf %53, %54 : vector<1024x128xf32>
    %56 = vector.broadcast %4 : vector<1x128xf32> to vector<1024x128xf32>
    %57 = arith.addf %55, %56 : vector<1024x128xf32>
    %58 = vector.shape_cast %57 : vector<1024x128xf32> to vector<4x256x128xf32>
    %59 = arith.truncf %58 : vector<4x256x128xf32> to vector<4x256x128xbf16>
    %c0_30 = arith.constant 0 : index
    %c0_31 = arith.constant 0 : index
    %c0_32 = arith.constant 0 : index
    %c0_33 = arith.constant 0 : index
    %60 = vector.load %arg9[%c0_30, %c0_31, %c0_32, %c0_33] : memref<1x4x256x128xbf16, #tpu.memory_space<vmem>>, vector<1x4x256x128xbf16>
    %61 = vector.shape_cast %60 : vector<1x4x256x128xbf16> to vector<4x256x128xbf16>
    %62 = vector.shape_cast %59 : vector<4x256x128xbf16> to vector<1x4x256x128xbf16>
    tpu.vector_store %arg9[%c0_30, %c0_31, %c0_32, %c0_33], %62 {strides = array<i32>} : memref<1x4x256x128xbf16, #tpu.memory_space<vmem>>, vector<1x4x256x128xbf16>,
    return
  }
  func.func @transform_0(%arg0: i32, %arg1: i32) -> (i32, i32, i32, i32) {
    %c0_i32 = arith.constant 0 : i32
    %c0_i32_0 = arith.constant 0 : i32
    %c0_i32_1 = arith.constant 0 : i32
    return %arg0, %arg1, %c0_i32, %c0_i32_0 : i32, i32, i32, i32
  }
  func.func @transform_1(%arg0: i32, %arg1: i32) -> (i32, i32, i32) {
    %c0_i32 = arith.constant 0 : i32
    %c0_i32_0 = arith.constant 0 : i32
    %c0_i32_1 = arith.constant 0 : i32
    return %arg0, %c0_i32, %c0_i32_0 : i32, i32, i32
  }
  func.func @transform_2(%arg0: i32, %arg1: i32) -> (i32, i32) {
    %c0_i32 = arith.constant 0 : i32
    %c0_i32_0 = arith.constant 0 : i32
    %c0_i32_1 = arith.constant 0 : i32
    return %c0_i32, %c0_i32_0 : i32, i32
  }
  func.func @transform_3(%arg0: i32, %arg1: i32) -> (i32, i32) {
    %c0_i32 = arith.constant 0 : i32
    %c0_i32_0 = arith.constant 0 : i32
    %c0_i32_1 = arith.constant 0 : i32
    return %c0_i32, %c0_i32_0 : i32, i32
  }
  func.func @transform_4(%arg0: i32, %arg1: i32) -> (i32, i32) {
    %c0_i32 = arith.constant 0 : i32
    %c0_i32_0 = arith.constant 0 : i32
    %c0_i32_1 = arith.constant 0 : i32
    return %c0_i32, %c0_i32_0 : i32, i32
  }
  func.func @transform_5(%arg0: i32, %arg1: i32) -> (i32, i32) {
    %c0_i32 = arith.constant 0 : i32
    %c0_i32_0 = arith.constant 0 : i32
    %c0_i32_1 = arith.constant 0 : i32
    return %c0_i32, %c0_i32_0 : i32, i32
  }
  func.func @transform_6(%arg0: i32, %arg1: i32) -> (i32, i32) {
    %c0_i32 = arith.constant 0 : i32
    %c0_i32_0 = arith.constant 0 : i32
    %c0_i32_1 = arith.constant 0 : i32
    return %c0_i32, %c0_i32_0 : i32, i32
  }
  func.func @transform_7(%arg0: i32, %arg1: i32) -> (i32, i32, i32, i32) {
    %c0_i32 = arith.constant 0 : i32
    %c0_i32_0 = arith.constant 0 : i32
    %c0_i32_1 = arith.constant 0 : i32
    return %arg0, %arg1, %c0_i32, %c0_i32_0 : i32, i32, i32, i32
  }
}

</mosaic_0001>

<bundles_post_ra>
// kernel: tpu_custom_call.1
= control target key start
LH: loop header
LB: loop body
LE: loop exit
PB: predicated region body
PF: predicated region fallthrough
CT: control target
= control target key end

     0   :  { %12 = vsyncpa [#allocation3], 0  ;;  %s12337_s0 = inlined_call_operand.vmem [shape: bf16[2,4,256,21], index: 0, kind: input, shape index: {}]   ;;  %s12338_s1 = inlined_call_operand.vmem [shape: bf16[2,256,128], index: 1, kind: input, shape index: {}]   ;;  %s12339_s2 = inlined_call_operand.vmem [shape: bf16[21,128], index: 2, kind: input, shape index: {}]   ;;  %s12340_s3 = inlined_call_operand.vmem [shape: bf16[128,128], index: 3, kind: input, shape index: {}]   ;;  %s12341_s4 = inlined_call_operand.vmem [shape: bf16[128,128], index: 4, kind: input, shape index: {}]   ;;  %s12342_s5 = inlined_call_operand.vmem [shape: bf16[128,128], index: 5, kind: input, shape index: {}]   ;;  %s12343_s6 = inlined_call_operand.vmem [shape: f32[5,128], index: 6, kind: input, shape index: {}]   ;;  %s12344_s7 = inlined_call_operand.hbm [shape: bf16[2,4,256,128], index: 7, kind: output, shape index: {}]  }
   0x1   :  { %14 = vsyncpa [#allocation3 + $0x1], 0  ;;  %s8866_s24 = smov 0   ;;  %s8868_s25 = smov 0  }
   0x2   :  { %s8870_s26 = smov 0   ;;  %s8872_s27 = smov 0  }
   0x3   :  { %s8874_s28 = smov 0   ;;  %s8876_s29 = smov 0  }
   0x4 LB: > { %s6573_s30 = sadd.s32 4294967295, %s8820_s29   ;;  %s6574_s8 = sadd.s32 4294967294, %s8820_s29   ;;  %s8820_s29 = sphi %s8876_s29, %s20_s29   ;;  %s8816_s28 = sphi %s8874_s28, %s13248_s28   ;;  %s8812_s27 = sphi %s8872_s27, %s13247_s27   ;;  %s8808_s26 = sphi %s8870_s26, %s13246_s26   ;;  %s8804_s25 = sphi %s8868_s25, %s13245_s25   ;;  %s8800_s24 = sphi %s8866_s24, %s13244_s24  }
   0x5   : > { %s32_s9 = sadd.s32 1, %s8816_s28  ;;  %s200_s10 = sadd.s32 1, %s8808_s26 }
   0x6   : > { %p34_p0 = scmp.ge.s32.totalorder %s32_s9, 2  ;;  %p210_p1 = scmp.ne.s32.totalorder %s8808_s26, %s8804_s25 }
   0x7   : > { %p211_p2 = scmp.eq.s32.totalorder %s6573_s30, 1  ;;  %p216_p3 = scmp.ne.s32.totalorder %s8804_s25, %s8800_s24 }
   0x8   : > { %s13250_s9 = smov (%p34_p0, %s32_s9), 0  ;;  %p217_p5 = scmp.eq.s32.totalorder %s6574_s8, 1 }
   0x9   : > { %p8906_p4 = por %p211_p2, %p210_p1  ;;  %s195_s12 = ssub.s32 %s8816_s28, %s13250_s9 }
   0xa   : > { %p6577_p6 = scmp.ge.s32.totalorder %s8820_s29, 1  ;;  %p198_p7 = scmp.eq.s32.totalorder %s195_s12, 0 }
   0xb   : > { %p8913_p8 = por %p217_p5, %p216_p3  ;;  %p272_p9 = scmp.lt.s32.totalorder %s8820_s29, 3 }
   0xc   : > { %s8919_s14 = scalar_select %p198_p7, %s8808_s26, %s200_s10  }
   0xd   : > { %p273_p10 = pnand %p6577_p6, %p272_p9 }
   0xf   : > { %276 = sbr.rel (%p273_p10) target bundleno = 1610 (0x64a), region = 48 }
  0x16   : > { %v8388_v0 = vld [vmem:[%s12339_s2] sm:$0xff]   ;;  %vm990_vm0 = vcmask 1041408   ;;  %v8389_v1 = vld [vmem:[%s12339_s2 + $0x8] ss:$0 sps:$4 sm:$0x77]   ;;  %vm991_vm1 = vcmask 1042432  }
  0x17   : > { %7750 = vmatprep.subr.bf16.mxu0 %v8388_v0  ;;  %p315_p11 = scmp.lt.s32.totalorder %s8812_s27, 1  ;;  %v8822_v2 = vmov 65535   ;;  %vm797_vm2 = vcmask 171008   ;;  %v8438_v23 = vld [vmem:[%s12341_s4] sm:$0xff]   ;;  %v8442_v27 = vld [vmem:[%s12340_s3 + $0x8] sm:$0xff]   ;;  %v8443_v28 = vld [vmem:[%s12340_s3 + $0x10] sm:$0xff]  }
  0x18   : > { %7751 = vmatpush3.bf16.msra.mxu0 %v8388_v0  ;;  %v992_v3 = vsel %vm990_vm0, 4294967295, %v8822_v2  ;;  %v8439_v24 = vld [vmem:[%s12340_s3] sm:$0xff]   ;;  %v8446_v31 = vld [vmem:[%s12340_s3 + $0x18] sm:$0xff]   ;;  %v8450_v35 = vld [vmem:[%s12340_s3 + $0x28] sm:$0xff]   ;;  %s311_s16 = sand.u32 1, %s8804_s25   ;;  %s8823_s10 = smov [#allocation2]  }
  0x19   : > { %v993_v4 = vsel %vm991_vm1, %v992_v3, 0  ;;  %s8929_s19 = scalar_select %p315_p11, %s8812_s27, 1  ;;  %7882 = vmatprep.subr.bf16.mxu1 %v8439_v24  ;;  %v8447_v32 = vld [vmem:[%s12340_s3 + $0x20] sm:$0xff]   ;;  %v8451_v36 = vld [vmem:[%s12340_s3 + $0x30] sm:$0xff]   ;;  %v8454_v39 = vld [vmem:[%s12340_s3 + $0x38] sm:$0xff]  }
  0x1a   : > { %v995_v5 = vand.u32 %v8389_v1, %v993_v4  ;;  %7883 = vmatpush3.bf16.msra.mxu1 %v8439_v24  ;;  %v8455_v40 = vld [vmem:[%s12341_s4 + $0x8] sm:$0xff]   ;;  %v8464_v49 = vld [vmem:[%s12341_s4 + $0x10] sm:$0xff]   ;;  %v8465_v58 = vld [vmem:[%s12341_s4 + $0x18] sm:$0xff]   ;;  %s8746_s12 = sshll.u32 %s8823_s10, 4  ;;  %s8747_s12 = int_to_ptr.vmem [resolvable:$false] %s8746_s12 }
  0x1b   : > { %s6875_s20 = sshll.u32 %s8929_s19, 9  ;;  %7884 = vmatprep.subr.bf16.mxu1 %v8442_v27  ;;  %v8466_v3 = vld [vmem:[%s12341_s4 + $0x20] sm:$0xff]   ;;  %s6876_s15 = sshll.u32 %s8929_s19, 7 }
  0x1c   : > { %7752 = vmatprep.subr.bf16.mxu0 %v995_v5  ;;  %s8935_s23 = scalar_lea.vmem %s12337_s0, %s6875_s20  ;;  %s9087_s18 = scalar_lea.vmem %s12338_s1, %s6876_s15 }
  0x1d   : > { %7753 = vmatpush3.bf16.msra.mxu0 %v995_v5  ;;  %v8390_v6 = vld [vmem:[%s8935_s23] sm:$0xff]   ;;  %v8391_v7 = vld [vmem:[%s8935_s23 + $0x8] sm:$0xff]   ;;  %v8392_v8 = vld [vmem:[%s8935_s23 + $0x10] sm:$0xff]   ;;  %s6578_s19 = sshll.u32 %s311_s16, 9  ;;  %s8748_s15 = scalar_lea.vmem %s8747_s12, 16384 }
  0x1e   : > { %7754 = vmatprep.mubr.msk.bf16.mxu0 %vm797_vm2, %v8390_v6  ;;  %v8393_v9 = vld [vmem:[%s8935_s23 + $0x18] sm:$0xff]   ;;  %v8394_v10 = vld [vmem:[%s8935_s23 + $0x20] sm:$0xff]   ;;  %v8395_v11 = vld [vmem:[%s8935_s23 + $0x28] sm:$0xff]   ;;  %8026 = vmatprep.subr.bf16.mxu0 %v8438_v23  ;;  %s11223_s20 = scalar_lea.vmem [#allocation2], %s6578_s19  ;;  %s7005_s19 = sshll.u32 %s8812_s27, 13 }
  0x1f   : > { %v8396_v12 = vld [vmem:[%s8935_s23 + $0x30] sm:$0xff]   ;;  %v8397_v13 = vld [vmem:[%s8935_s23 + $0x38] sm:$0xff]   ;;  %v8398_v14 = vld [vmem:[%s8935_s23 + $0x40] sm:$0xff]   ;;  %7885 = vmatpush3.bf16.msra.mxu1 %v8442_v27  ;;  %s12284_s30 = scalar_lea.hbm %s12344_s7, %s7005_s19  ;;  %s12291_s27 = scalar_lea.sflag [#allocation3], %s311_s16 }
  0x20   : > { %7755 = vmatmul.mubr.msk.bf16.vlgmr.msra.gmra.mrb[0].mxu0 %vm797_vm2, %v8391_v7  ;;  %v8399_v15 = vld [vmem:[%s8935_s23 + $0x48] sm:$0xff]   ;;  %v8400_v16 = vld [vmem:[%s8935_s23 + $0x50] sm:$0xff]   ;;  %v8401_v17 = vld [vmem:[%s8935_s23 + $0x58] sm:$0xff]   ;;  %7886 = vmatprep.subr.bf16.mxu1 %v8443_v28 }
  0x21   : > { %7758 = vmatprep.mubr.msk.bf16.mxu0 %vm797_vm2, %v8392_v8  ;;  %v8402_v18 = vld [vmem:[%s8935_s23 + $0x60] sm:$0xff]   ;;  %v8403_v19 = vld [vmem:[%s8935_s23 + $0x68] sm:$0xff]   ;;  %v8404_v20 = vld [vmem:[%s8935_s23 + $0x70] sm:$0xff]   ;;  %8027 = vmatpush3.bf16.msra.mxu0 %v8438_v23 }
  0x22   : > { %v8405_v21 = vld [vmem:[%s8935_s23 + $0x78] sm:$0xff]   ;;  %v8406_v22 = vld [vmem:[%s8935_s23 + $0x80] sm:$0xff]   ;;  %v8407_v25 = vld [vmem:[%s8935_s23 + $0x88] sm:$0xff]   ;;  %8028 = vmatprep.subr.bf16.mxu0 %v8455_v40 }
  0x23   : > { %v8408_v26 = vld [vmem:[%s8935_s23 + $0x90] sm:$0xff]   ;;  %v8409_v29 = vld [vmem:[%s8935_s23 + $0x98] sm:$0xff]   ;;  %v8410_v30 = vld [vmem:[%s8935_s23 + $0xa0] sm:$0xff]   ;;  %7887 = vmatpush3.bf16.msra.mxu1 %v8443_v28 }
  0x24   : > { %7888 = vmatprep.subr.bf16.mxu1 %v8446_v31  ;;  %v8411_v33 = vld [vmem:[%s8935_s23 + $0xa8] sm:$0xff]   ;;  %v8412_v34 = vld [vmem:[%s8935_s23 + $0xb0] sm:$0xff]   ;;  %v8413_v37 = vld [vmem:[%s8935_s23 + $0xb8] sm:$0xff]  }
  0x25   : > { %v8414_v38 = vld [vmem:[%s8935_s23 + $0xc0] sm:$0xff]   ;;  %8029 = vmatpush3.bf16.msra.mxu0 %v8455_v40  ;;  %v8415_v41 = vld [vmem:[%s8935_s23 + $0xc8] sm:$0xff]   ;;  %v8416_v42 = vld [vmem:[%s8935_s23 + $0xd0] sm:$0xff]  }
  0x26   : > { %v8417_v43 = vld [vmem:[%s8935_s23 + $0xd8] sm:$0xff]   ;;  %v8418_v44 = vld [vmem:[%s8935_s23 + $0xe0] sm:$0xff]   ;;  %v8419_v45 = vld [vmem:[%s8935_s23 + $0xe8] sm:$0xff]   ;;  %8030 = vmatprep.subr.bf16.mxu0 %v8464_v49 }
  0x27   : > { %7889 = vmatpush3.bf16.msra.mxu1 %v8446_v31  ;;  %v8420_v46 = vld [vmem:[%s8935_s23 + $0xf0] sm:$0xff]   ;;  %v8421_v47 = vld [vmem:[%s8935_s23 + $0xf8] sm:$0xff]   ;;  %v8422_v48 = vld [vmem:[%s8935_s23 + $0x100] sm:$0xff]  }
  0x28   : > { %7759 = vmatmul.mubr.msk.bf16.gmra.mrb[4].mxu0 %vm797_vm2, %v8393_v9  ;;  %7890 = vmatprep.subr.bf16.mxu1 %v8447_v32  ;;  %v8423_v50 = vld [vmem:[%s8935_s23 + $0x108] sm:$0xff]   ;;  %v8424_v51 = vld [vmem:[%s8935_s23 + $0x110] sm:$0xff]   ;;  %v8425_v52 = vld [vmem:[%s8935_s23 + $0x118] sm:$0xff]  }
  0x29   : > { %7762 = vmatprep.mubr.msk.bf16.mxu0 %vm797_vm2, %v8394_v10  ;;  %8031 = vmatpush3.bf16.msra.mxu0 %v8464_v49  ;;  %v8426_v53 = vld [vmem:[%s8935_s23 + $0x120] sm:$0xff]   ;;  %v8427_v54 = vld [vmem:[%s8935_s23 + $0x128] sm:$0xff]   ;;  %v8428_v55 = vld [vmem:[%s8935_s23 + $0x130] sm:$0xff]  }
  0x2a   : > { %v8429_v56 = vld [vmem:[%s8935_s23 + $0x138] sm:$0xff]   ;;  %v8430_v57 = vld [vmem:[%s8935_s23 + $0x140] sm:$0xff]   ;;  %8032 = vmatprep.subr.bf16.mxu0 %v8465_v58  ;;  %v8431_v59 = vld [vmem:[%s8935_s23 + $0x148] sm:$0xff]  }
  0x2b   : > { %7891 = vmatpush3.bf16.msra.mxu1 %v8447_v32  ;;  %v8432_v60 = vld [vmem:[%s8935_s23 + $0x150] sm:$0xff]   ;;  %v8433_v61 = vld [vmem:[%s8935_s23 + $0x158] sm:$0xff]   ;;  %v8434_v62 = vld [vmem:[%s8935_s23 + $0x160] sm:$0xff]  }
  0x2c   : > { %7892 = vmatprep.subr.bf16.mxu1 %v8450_v35  ;;  %v8435_v63 = vld [vmem:[%s8935_s23 + $0x168] sm:$0xff]   ;;  %v8436_v0 = vld [vmem:[%s8935_s23 + $0x170] sm:$0xff]   ;;  %v8437_v1 = vld [vmem:[%s8935_s23 + $0x178] sm:$0xff]  }
  0x2d   : > { %8033 = vmatpush3.bf16.msra.mxu0 %v8465_v58  ;;  %v8440_v2 = vld [vmem:[%s8935_s23 + $0x180] sm:$0xff]   ;;  %v8441_v4 = vld [vmem:[%s8935_s23 + $0x188] sm:$0xff]   ;;  %v8444_v5 = vld [vmem:[%s8935_s23 + $0x190] sm:$0xff]  }
  0x2e   : > { %8034 = vmatprep.subr.bf16.mxu0 %v8466_v3  ;;  %v8445_v6 = vld [vmem:[%s8935_s23 + $0x198] sm:$0xff]   ;;  %v8448_v7 = vld [vmem:[%s8935_s23 + $0x1a0] sm:$0xff]   ;;  %v8449_v8 = vld [vmem:[%s8935_s23 + $0x1a8] sm:$0xff]  }
  0x2f   : > { %7893 = vmatpush3.bf16.msra.mxu1 %v8450_v35  ;;  %v8452_v9 = vld [vmem:[%s8935_s23 + $0x1b0] sm:$0xff]   ;;  %v7007_v10 = vld [vmem:[%s9087_s18] sm:$0xff]   ;;  %v7392_v27 = vld [vmem:[%s9087_s18 + $0x18] sm:$0xff]  }
  0x30   : > { %7763 = vmatmul.mubr.msk.bf16.gmra.mrb[8].mxu0 %vm797_vm2, %v8395_v11  ;;  %7894 = vmatprep.subr.bf16.mxu1 %v8451_v36  ;;  %v7390_v11 = vld [vmem:[%s9087_s18 + $0x8] sm:$0xff]   ;;  %v9127_v31 = vunpack.c.h.bf16 %v7392_v27  ;;  %v9133_v35 = vunpack.c.l.bf16 %v7392_v27 }
  0x31   : > { %7766 = vmatprep.mubr.msk.bf16.mxu0 %vm797_vm2, %v8396_v12  ;;  %8035 = vmatpush3.bf16.msra.mxu0 %v8466_v3  ;;  %v9094_v12 = vunpack.c.h.bf16 %v7390_v11  ;;  %v7398_v27 = vld [vmem:[%s9087_s18 + $0x48] sm:$0xff]  }
  0x33   : > { %7895 = vmatpush3.bf16.msra.mxu1 %v8451_v36 }
  0x34   : > { %7896 = vmatprep.subr.bf16.mxu1 %v8454_v39 }
  0x37   : > { %7897 = vmatpush3.bf16.msra.mxu1 %v8454_v39  ;;  %v8458_v39 = vld [vmem:[%s8935_s23 + $0x1d0] sm:$0xff]  }
  0x38   : > { %7767 = vmatmul.mubr.msk.bf16.gmra.mrb[12].mxu0 %vm797_vm2, %v8397_v13 }
  0x39   : > { %7770 = vmatprep.mubr.msk.bf16.mxu0 %vm797_vm2, %v8398_v14  ;;  %v9096_v14 = vunpack.c.l.bf16 %v7007_v10 }
  0x40   : > { %7771 = vmatmul.mubr.msk.bf16.gmra.mrb[16].mxu0 %vm797_vm2, %v8399_v15  ;;  %v9098_v15 = vunpack.c.h.bf16 %v7007_v10 }
  0x41   : > { %7774 = vmatprep.mubr.msk.bf16.mxu0 %vm797_vm2, %v8400_v16  ;;  %v9100_v16 = vunpack.c.l.bf16 %v7390_v11  ;;  %v8462_v11 = vld [vmem:[%s8935_s23 + $0x1f0] sm:$0xff]  }
  0x48   : > { %7775 = vmatmul.mubr.msk.bf16.gmra.mrb[20].mxu0 %vm797_vm2, %v8401_v17 }
  0x49   : > { %7778 = vmatprep.mubr.msk.bf16.mxu0 %vm797_vm2, %v8402_v18  ;;  %v8453_v18 = vld [vmem:[%s8935_s23 + $0x1b8] sm:$0xff]  }
  0x50   : > { %7779 = vmatmul.mubr.msk.bf16.gmra.mrb[24].mxu0 %vm797_vm2, %v8403_v19 }
  0x51   : > { %7782 = vmatprep.mubr.msk.bf16.mxu0 %vm797_vm2, %v8404_v20  ;;  %v8456_v20 = vld [vmem:[%s8935_s23 + $0x1c0] sm:$0xff]  }
  0x58   : > { %7783 = vmatmul.mubr.msk.bf16.gmra.mrb[28].mxu0 %vm797_vm2, %v8405_v21 }
  0x59   : > { %7786 = vmatprep.mubr.msk.bf16.mxu0 %vm797_vm2, %v8406_v22 }
  0x60   : > { %7787 = vmatmul.mubr.msk.bf16.gmra.mrb[32].mxu0 %vm797_vm2, %v8407_v25 }
  0x61   : > { %7790 = vmatprep.mubr.msk.bf16.mxu0 %vm797_vm2, %v8408_v26  ;;  %v7391_v26 = vld [vmem:[%s9087_s18 + $0x10] sm:$0xff]  }
  0x68   : > { %7791 = vmatmul.mubr.msk.bf16.gmra.mrb[36].mxu0 %vm797_vm2, %v8409_v29  ;;  %v8467_v29 = vld [vmem:[%s12341_s4 + $0x28] sm:$0xff]  }
  0x69   : > { %7794 = vmatprep.mubr.msk.bf16.mxu0 %vm797_vm2, %v8410_v30  ;;  %8036 = vmatprep.subr.bf16.mxu0 %v8467_v29 }
  0x6a   : > { %8037 = vmatpush3.bf16.msra.mxu0 %v8467_v29  ;;  %v9217_v29 = vunpack.c.h.bf16 %v7398_v27 }
  0x70   : > { %7795 = vmatmul.mubr.msk.bf16.gmra.mrb[40].mxu0 %vm797_vm2, %v8411_v33  ;;  %v9129_v33 = vunpack.c.l.bf16 %v7391_v26 }
  0x71   : > { %7798 = vmatprep.mubr.msk.bf16.mxu0 %vm797_vm2, %v8412_v34  ;;  %v9131_v34 = vunpack.c.h.bf16 %v7391_v26 }
  0x78   : > { %7799 = vmatmul.mubr.msk.bf16.gmra.mrb[44].mxu0 %vm797_vm2, %v8413_v37  ;;  %v8457_v37 = vld [vmem:[%s8935_s23 + $0x1c8] sm:$0xff]  }
  0x79   : > { %7802 = vmatprep.mubr.msk.bf16.mxu0 %vm797_vm2, %v8414_v38 }
  0x80   : > { %7803 = vmatmul.mubr.msk.bf16.gmra.mrb[48].mxu0 %vm797_vm2, %v8415_v41 }
  0x81   : > { %7806 = vmatprep.mubr.msk.bf16.mxu0 %vm797_vm2, %v8416_v42 }
  0x88   : > { %7807 = vmatmul.mubr.msk.bf16.gmra.mrb[52].mxu0 %vm797_vm2, %v8417_v43 }
  0x89   : > { %7810 = vmatprep.mubr.msk.bf16.mxu0 %vm797_vm2, %v8418_v44 }
  0x90   : > { %7811 = vmatmul.mubr.msk.bf16.gmra.mrb[56].mxu0 %vm797_vm2, %v8419_v45  ;;  %v7393_v45 = vld [vmem:[%s9087_s18 + $0x20] sm:$0xff]  }
  0x91   : > { %7814 = vmatprep.mubr.msk.bf16.mxu0 %vm797_vm2, %v8420_v46 }
  0x98   : > { %7815 = vmatmul.mubr.msk.bf16.gmra.mrb[60].mxu0 %vm797_vm2, %v8421_v47  ;;  %v7394_v47 = vld [vmem:[%s9087_s18 + $0x28] sm:$0xff]  }
  0x99   : > { %7818 = vmatprep.mubr.msk.bf16.mxu0 %vm797_vm2, %v8422_v48  ;;  %v9157_v49 = vunpack.c.h.bf16 %v7394_v47 }
  0xa0   : > { %7819 = vmatmul.mubr.msk.bf16.gmra.mrb[64].mxu0 %vm797_vm2, %v8423_v50 }
  0xa1   : > { %7822 = vmatprep.mubr.msk.bf16.mxu0 %vm797_vm2, %v8424_v51  ;;  %v9159_v51 = vunpack.c.l.bf16 %v7393_v45 }
  0xa8   : > { %7823 = vmatmul.mubr.msk.bf16.gmra.mrb[68].mxu0 %vm797_vm2, %v8425_v52  ;;  %v9161_v52 = vunpack.c.h.bf16 %v7393_v45 }
  0xa9   : > { %7826 = vmatprep.mubr.msk.bf16.mxu0 %vm797_vm2, %v8426_v53  ;;  %v9163_v53 = vunpack.c.l.bf16 %v7394_v47 }
  0xb0   : > { %7827 = vmatmul.mubr.msk.bf16.gmra.mrb[72].mxu0 %vm797_vm2, %v8427_v54 }
  0xb1   : > { %7830 = vmatprep.mubr.msk.bf16.mxu0 %vm797_vm2, %v8428_v55  ;;  %v8459_v55 = vld [vmem:[%s8935_s23 + $0x1d8] sm:$0xff]  }
  0xb8   : > { %7831 = vmatmul.mubr.msk.bf16.gmra.mrb[76].mxu0 %vm797_vm2, %v8429_v56 }
  0xb9   : > { %7834 = vmatprep.mubr.msk.bf16.mxu0 %vm797_vm2, %v8430_v57  ;;  %v8460_v57 = vld [vmem:[%s8935_s23 + $0x1e0] sm:$0xff]  }
  0xc0   : > { %7835 = vmatmul.mubr.msk.bf16.gmra.mrb[80].mxu0 %vm797_vm2, %v8431_v59 }
  0xc1   : > { %7838 = vmatprep.mubr.msk.bf16.mxu0 %vm797_vm2, %v8432_v60 }
  0xc8   : > { %7839 = vmatmul.mubr.msk.bf16.gmra.mrb[84].mxu0 %vm797_vm2, %v8433_v61 }
  0xc9   : > { %7842 = vmatprep.mubr.msk.bf16.mxu0 %vm797_vm2, %v8434_v62 }
  0xd0   : > { %7843 = vmatmul.mubr.msk.bf16.gmra.mrb[88].mxu0 %vm797_vm2, %v8435_v63  ;;  %v7395_v63 = vld [vmem:[%s9087_s18 + $0x30] sm:$0xff]  }
  0xd1   : > { %7846 = vmatprep.mubr.msk.bf16.mxu0 %vm797_vm2, %v8436_v0 }
  0xd8   : > { %7847 = vmatmul.mubr.msk.bf16.gmra.mrb[92].mxu0 %vm797_vm2, %v8437_v1  ;;  %v7396_v1 = vld [vmem:[%s9087_s18 + $0x38] sm:$0xff]  }
  0xd9   : > { %7850 = vmatprep.mubr.msk.bf16.mxu0 %vm797_vm2, %v8440_v2  ;;  %v9187_v3 = vunpack.c.h.bf16 %v7396_v1 }
  0xe0   : > { %7851 = vmatmul.mubr.msk.bf16.gmra.mrb[96].mxu0 %vm797_vm2, %v8441_v4 }
  0xe1   : > { %7854 = vmatprep.mubr.msk.bf16.mxu0 %vm797_vm2, %v8444_v5  ;;  %v9189_v5 = vunpack.c.l.bf16 %v7395_v63 }
  0xe8   : > { %7855 = vmatmul.mubr.msk.bf16.gmra.mrb[100].mxu0 %vm797_vm2, %v8445_v6  ;;  %v9191_v6 = vunpack.c.h.bf16 %v7395_v63 }
  0xe9   : > { %7858 = vmatprep.mubr.msk.bf16.mxu0 %vm797_vm2, %v8448_v7  ;;  %v9193_v7 = vunpack.c.l.bf16 %v7396_v1 }
  0xf0   : > { %7859 = vmatmul.mubr.msk.bf16.gmra.mrb[104].mxu0 %vm797_vm2, %v8449_v8 }
  0xf1   : > { %7862 = vmatprep.mubr.msk.bf16.mxu0 %vm797_vm2, %v8452_v9  ;;  %v8461_v9 = vld [vmem:[%s8935_s23 + $0x1e8] sm:$0xff]  }
  0xf3   : > { %v7756_v13 = vpop.f32.mrb[0].mxu0 }
  0xf4   : > { %v1031_v17 = vpop.f32.mrb[1].mxu0  ;;  %v9114_v25 = vadd.f32 %v7756_v13, %v9100_v16 }
  0xf5   : > { %v7757_v19 = vpop.f32.mrb[2].mxu0  ;;  %v9108_v23 = vadd.f32 %v9096_v14, %v1031_v17 }
  0xf6   : > { %v9105_v21 = vadd.f32 %v7757_v19, %v9094_v12  ;;  %v1034_v22 = vpop.f32.mrb[3].mxu0 }
  0xf7   : > { %12637 = vst [vmem:[#allocation6_spill] sm:$0xff] %v9108_v23  ;;  %v9111_v24 = vadd.f32 %v9098_v15, %v1034_v22  ;;  %v7397_v22 = vld [vmem:[%s9087_s18 + $0x40] sm:$0xff]  }
  0xf8   : > { %12636 = vst [vmem:[#allocation5_spill] sm:$0xff] %v9105_v21  ;;  %7863 = vmatmul.mubr.msk.bf16.gmra.mrb[108].mxu0 %vm797_vm2, %v8453_v18  ;;  %v1735_v30 = vpack.c.bf16 %v9105_v21, %v9114_v25 }
  0xf9   : > { %12638 = vst [vmem:[#allocation7_spill] sm:$0xff] %v9111_v24  ;;  %v1734_v28 = vpack.c.bf16 %v9111_v24, %v9108_v23  ;;  %7866 = vmatprep.mubr.msk.bf16.mxu0 %vm797_vm2, %v8456_v20 }
  0xfb   : > { %v7760_v32 = vpop.f32.mrb[4].mxu0  ;;  %7898 = vmatprep.mubr.bf16.mxu1 %v1734_v28 }
  0xfc   : > { %v1047_v36 = vpop.f32.mrb[5].mxu0  ;;  %7899 = vmatmul.mubr.bf16.vlgmr.msra.gmra.mrb[0].mxu1 %v1735_v30  ;;  %v9147_v44 = vadd.f32 %v7760_v32, %v9133_v35  ;;  %v9219_v32 = vunpack.c.l.bf16 %v7397_v22 }
  0xfd   : > { %v7761_v38 = vpop.f32.mrb[6].mxu0  ;;  %v9141_v42 = vadd.f32 %v9129_v33, %v1047_v36  ;;  %v9221_v36 = vunpack.c.h.bf16 %v7397_v22 }
  0xfe   : > { %v9138_v40 = vadd.f32 %v7761_v38, %v9127_v31  ;;  %v1050_v41 = vpop.f32.mrb[7].mxu0 }
  0xff   : > { %v9144_v43 = vadd.f32 %v9131_v34, %v1050_v41 }
 0x100   : > { %7867 = vmatmul.mubr.msk.bf16.gmra.mrb[112].mxu0 %vm797_vm2, %v8457_v37  ;;  %v1737_v48 = vpack.c.bf16 %v9138_v40, %v9147_v44  ;;  %v9223_v37 = vunpack.c.l.bf16 %v7398_v27  ;;  %v7401_v27 = vld [vmem:[%s9087_s18 + $0x60] sm:$0xff]  }
 0x101   : > { %v1736_v46 = vpack.c.bf16 %v9144_v43, %v9141_v42  ;;  %7870 = vmatprep.mubr.msk.bf16.mxu0 %vm797_vm2, %v8458_v39  ;;  %v8463_v39 = vld [vmem:[%s8935_s23 + $0x1f8] sm:$0xff]   ;;  %s6479_s23 = sshll.u32 %s11223_s20, 4  ;;  %s12286_s23 = int_to_ptr.vmem [resolvable:$true] %s6479_s23 }
 0x102   : > { %s8742_s8 = scalar_lea.vmem %s12286_s23, 8192  ;;  %p8749_p1 = scmp.lt.s32.totalorder %s12286_s23, %s8747_s12 }
 0x103   : > { %v7764_v50 = vpop.f32.mrb[8].mxu0  ;;  %7902 = vmatprep.mubr.bf16.mxu1 %v1736_v46  ;;  %p8743_p12 = scmp.ne.s32.totalorder %s12286_s23, %s8742_s8  ;;  %p8750_p2 = scmp.lt.s32.totalorder %s8748_s15, %s8742_s8 }
 0x104   : > { %v1063_v54 = vpop.f32.mrb[9].mxu0  ;;  %7903 = vmatmul.mubr.bf16.gmra.mrb[4].mxu1 %v1737_v48  ;;  %v9177_v62 = vadd.f32 %v7764_v50, %v9163_v53 }
 0x105   : > { %v7765_v56 = vpop.f32.mrb[10].mxu0  ;;  %v9171_v60 = vadd.f32 %v9159_v51, %v1063_v54  ;;  %v7399_v54 = vld [vmem:[%s9087_s18 + $0x50] sm:$0xff]   ;;  %p8744_p13 = pnand %p8743_p12, %p8906_p4  ;;  %p8751_p3 = por %p8750_p2, %p8749_p1 }
 0x106   : > { %v9168_v58 = vadd.f32 %v7765_v56, %v9157_v49  ;;  %v1066_v59 = vpop.f32.mrb[11].mxu0  ;;  %v7400_v56 = vld [vmem:[%s9087_s18 + $0x58] sm:$0xff]   ;;  %v9250_v1 = vunpack.c.l.bf16 %v7399_v54 }
 0x107   : > { %v9174_v61 = vadd.f32 %v9161_v52, %v1066_v59  ;;  %v9248_v63 = vunpack.c.h.bf16 %v7400_v56  ;;  %p8745_p0 = pneg %p8744_p13 }
 0x108   : > { %7871 = vmatmul.mubr.msk.bf16.gmra.mrb[116].mxu0 %vm797_vm2, %v8459_v55  ;;  %v1739_v2 = vpack.c.bf16 %v9168_v58, %v9177_v62 }
 0x109   : > { %v1738_v0 = vpack.c.bf16 %v9174_v61, %v9171_v60  ;;  %7874 = vmatprep.mubr.msk.bf16.mxu0 %vm797_vm2, %v8460_v57  ;;  %v8468_v57 = vld [vmem:[%s12341_s4 + $0x30] sm:$0xff]   ;;  %p8752_p5 = pnand %p8751_p3, %p8745_p0 }
 0x10a   : > { %8038 = vmatprep.subr.bf16.mxu0 %v8468_v57 }
 0x10b   : > { %v7768_v4 = vpop.f32.mrb[12].mxu0  ;;  %7906 = vmatprep.mubr.bf16.mxu1 %v1738_v0  ;;  %8039 = vmatpush3.bf16.msra.mxu0 %v8468_v57 }
 0x10c   : > { %v1079_v8 = vpop.f32.mrb[13].mxu0  ;;  %7907 = vmatmul.mubr.bf16.gmra.mrb[8].mxu1 %v1739_v2  ;;  %v9207_v20 = vadd.f32 %v7768_v4, %v9193_v7  ;;  %v9252_v2 = vunpack.c.h.bf16 %v7399_v54  ;;  %v9254_v4 = vunpack.c.l.bf16 %v7400_v56  ;;  %v9278_v54 = vunpack.c.h.bf16 %v7401_v27 }
 0x10d   : > { %v7769_v10 = vpop.f32.mrb[14].mxu0  ;;  %v9201_v18 = vadd.f32 %v9189_v5, %v1079_v8 }
 0x10e   : > { %v9198_v13 = vadd.f32 %v7769_v10, %v9187_v3  ;;  %v1082_v17 = vpop.f32.mrb[15].mxu0 }
 0x10f   : > { %v9204_v19 = vadd.f32 %v9191_v6, %v1082_v17 }
 0x110   : > { %7875 = vmatmul.mubr.msk.bf16.gmra.mrb[120].mxu0 %vm797_vm2, %v8461_v9  ;;  %v1741_v28 = vpack.c.bf16 %v9198_v13, %v9207_v20 }
 0x111   : > { %v1740_v26 = vpack.c.bf16 %v9204_v19, %v9201_v18  ;;  %7878 = vmatprep.mubr.msk.bf16.mxu0 %vm797_vm2, %v8462_v11 }
 0x113   : > { %v7772_v30 = vpop.f32.mrb[16].mxu0  ;;  %7910 = vmatprep.mubr.bf16.mxu1 %v1740_v26 }
 0x114   : > { %v1095_v38 = vpop.f32.mrb[17].mxu0  ;;  %7911 = vmatmul.mubr.bf16.gmra.mrb[12].mxu1 %v1741_v28  ;;  %v9236_v50 = vadd.f32 %v7772_v30, %v9223_v37  ;;  %v7402_v30 = vld [vmem:[%s9087_s18 + $0x68] sm:$0xff]  }
 0x115   : > { %v7773_v41 = vpop.f32.mrb[18].mxu0  ;;  %v9230_v47 = vadd.f32 %v9219_v32, %v1095_v38 }
 0x116   : > { %v9227_v45 = vadd.f32 %v7773_v41, %v9217_v29  ;;  %v1098_v46 = vpop.f32.mrb[19].mxu0 }
 0x117   : > { %v9233_v48 = vadd.f32 %v9221_v36, %v1098_v46  ;;  %v9276_v46 = vunpack.c.l.bf16 %v7401_v27  ;;  %v7403_v27 = vld [vmem:[%s9087_s18 + $0x70] sm:$0xff]  }
 0x118   : > { %12639 = vst [vmem:[#allocation8_spill] sm:$0xff] %v9227_v45  ;;  %7879 = vmatmul.mubr.msk.bf16.gmra.mrb[124].mxu0 %vm797_vm2, %v8463_v39  ;;  %v1743_v59 = vpack.c.bf16 %v9227_v45, %v9236_v50  ;;  %v9274_v39 = vunpack.c.h.bf16 %v7402_v30 }
 0x119   : > { %12640 = vst [vmem:[#allocation9_spill] sm:$0xff] %v9233_v48  ;;  %v1742_v55 = vpack.c.bf16 %v9233_v48, %v9230_v47 }
 0x11b   : > { %v7776_v0 = vpop.f32.mrb[20].mxu0  ;;  %7914 = vmatprep.mubr.bf16.mxu1 %v1742_v55  ;;  %v9280_v55 = vunpack.c.l.bf16 %v7402_v30  ;;  %v7404_v30 = vld [vmem:[%s9087_s18 + $0x78] sm:$0xff]  }
 0x11c   : > { %v1111_v8 = vpop.f32.mrb[21].mxu0  ;;  %7915 = vmatmul.mubr.bf16.gmra.mrb[16].mxu1 %v1743_v59  ;;  %v9266_v26 = vadd.f32 %v7776_v0, %v9254_v4 }
 0x11d   : > { %v7777_v9 = vpop.f32.mrb[22].mxu0  ;;  %v9260_v17 = vadd.f32 %v9250_v1, %v1111_v8 }
 0x11e   : > { %v9257_v10 = vadd.f32 %v7777_v9, %v9248_v63  ;;  %v1114_v11 = vpop.f32.mrb[23].mxu0  ;;  %12644 = vst [vmem:[#allocation13_spill] sm:$0xff] %v9266_v26 }
 0x11f   : > { %12642 = vst [vmem:[#allocation11_spill] sm:$0xff] %v9260_v17  ;;  %v9263_v22 = vadd.f32 %v9252_v2, %v1114_v11 }
 0x120   : > { %12641 = vst [vmem:[#allocation10_spill] sm:$0xff] %v9257_v10  ;;  %v1745_v38 = vpack.c.bf16 %v9257_v10, %v9266_v26 }
 0x121   : > { %12643 = vst [vmem:[#allocation12_spill] sm:$0xff] %v9263_v22  ;;  %v1744_v28 = vpack.c.bf16 %v9263_v22, %v9260_v17  ;;  %v9304_v17 = vunpack.c.h.bf16 %v7403_v27 }
 0x123   : > { %v7780_v41 = vpop.f32.mrb[24].mxu0  ;;  %7918 = vmatprep.mubr.bf16.mxu1 %v1744_v28 }
 0x124   : > { %v1127_v56 = vpop.f32.mrb[25].mxu0  ;;  %7919 = vmatmul.mubr.bf16.gmra.mrb[20].mxu1 %v1745_v38  ;;  %v9292_v11 = vadd.f32 %v7780_v41, %v9280_v55 }
 0x125   : > { %v7781_v57 = vpop.f32.mrb[26].mxu0  ;;  %v9286_v8 = vadd.f32 %v9276_v46, %v1127_v56  ;;  %v9302_v56 = vunpack.c.l.bf16 %v7403_v27 }
 0x126   : > { %v9283_v59 = vadd.f32 %v7781_v57, %v9274_v39  ;;  %v1130_v0 = vpop.f32.mrb[27].mxu0  ;;  %12648 = vst [vmem:[#allocation17_spill] sm:$0xff] %v9292_v11  ;;  %v9300_v57 = vunpack.c.h.bf16 %v7404_v30 }
 0x127   : > { %12646 = vst [vmem:[#allocation15_spill] sm:$0xff] %v9286_v8  ;;  %v9289_v9 = vadd.f32 %v9278_v54, %v1130_v0  ;;  %v9306_v0 = vunpack.c.l.bf16 %v7404_v30 }
 0x128   : > { %12645 = vst [vmem:[#allocation14_spill] sm:$0xff] %v9283_v59  ;;  %v1747_v38 = vpack.c.bf16 %v9283_v59, %v9292_v11 }
 0x129   : > { %12647 = vst [vmem:[#allocation16_spill] sm:$0xff] %v9289_v9  ;;  %v1746_v28 = vpack.c.bf16 %v9289_v9, %v9286_v8 }
 0x12b   : > { %v7784_v22 = vpop.f32.mrb[28].mxu0  ;;  %7922 = vmatprep.mubr.bf16.mxu1 %v1746_v28 }
 0x12c   : > { %v1143_v41 = vpop.f32.mrb[29].mxu0  ;;  %7923 = vmatmul.mubr.bf16.gmra.mrb[24].mxu1 %v1747_v38  ;;  %v9318_v28 = vadd.f32 %v7784_v22, %v9306_v0 }
 0x12d   : > { %v7785_v10 = vpop.f32.mrb[30].mxu0  ;;  %v9312_v8 = vadd.f32 %v9302_v56, %v1143_v41 }
 0x12e   : > { %v9309_v26 = vadd.f32 %v7785_v10, %v9300_v57  ;;  %v1146_v9 = vpop.f32.mrb[31].mxu0  ;;  %12652 = vst [vmem:[#allocation21_spill] sm:$0xff] %v9318_v28 }
 0x12f   : > { %12650 = vst [vmem:[#allocation19_spill] sm:$0xff] %v9312_v8  ;;  %v9315_v59 = vadd.f32 %v9304_v17, %v1146_v9 }
 0x130   : > { %12649 = vst [vmem:[#allocation18_spill] sm:$0xff] %v9309_v26  ;;  %v1749_v30 = vpack.c.bf16 %v9309_v26, %v9318_v28 }
 0x131   : > { %12651 = vst [vmem:[#allocation20_spill] sm:$0xff] %v9315_v59  ;;  %v1748_v27 = vpack.c.bf16 %v9315_v59, %v9312_v8 }
 0x133   : > { %v7788_v38 = vpop.f32.mrb[32].mxu0  ;;  %7926 = vmatprep.mubr.bf16.mxu1 %v1748_v27  ;;  %v8469_v27 = vld [vmem:[%s12341_s4 + $0x38] sm:$0xff]  }
 0x134   : > { %v1159_v10 = vpop.f32.mrb[33].mxu0  ;;  %7927 = vmatmul.mubr.bf16.gmra.mrb[28].mxu1 %v1749_v30  ;;  %v9334_v59 = vadd.f32 %v7788_v38, %v9100_v16  ;;  %8040 = vmatprep.subr.bf16.mxu0 %v8469_v27 }
 0x135   : > { %v7789_v11 = vpop.f32.mrb[34].mxu0  ;;  %v9328_v9 = vadd.f32 %v9096_v14, %v1159_v10  ;;  %8041 = vmatpush3.bf16.msra.mxu0 %v8469_v27  ;;  %v9360_v27 = vld [vmem:[%s12342_s5] sm:$0xff]  }
 0x136   : > { %v9325_v41 = vadd.f32 %v7789_v11, %v9094_v12  ;;  %v1162_v21 = vpop.f32.mrb[35].mxu0  ;;  %12656 = vst [vmem:[#allocation25_spill] sm:$0xff] %v9334_v59  ;;  %8314 = vmatprep.subr.bf16.mxu1 %v9360_v27  ;;  %8170 = vmatprep.subr.bf16.mxu0 %v9360_v27 }
 0x137   : > { %12654 = vst [vmem:[#allocation23_spill] sm:$0xff] %v9328_v9  ;;  %v9331_v22 = vadd.f32 %v9098_v15, %v1162_v21  ;;  %8322 = vmatpush3.bf16.msra.mxu1 %v9360_v27 }
 0x138   : > { %12653 = vst [vmem:[#allocation22_spill] sm:$0xff] %v9325_v41  ;;  %v1751_v11 = vpack.c.bf16 %v9325_v41, %v9334_v59 }
 0x139   : > { %12655 = vst [vmem:[#allocation24_spill] sm:$0xff] %v9331_v22  ;;  %v1750_v8 = vpack.c.bf16 %v9331_v22, %v9328_v9 }
 0x13b   : > { %v7792_v30 = vpop.f32.mrb[36].mxu0  ;;  %7930 = vmatprep.mubr.bf16.mxu1 %v1750_v8 }
 0x13c   : > { %v1175_v10 = vpop.f32.mrb[37].mxu0  ;;  %7931 = vmatmul.mubr.bf16.gmra.mrb[32].mxu1 %v1751_v11  ;;  %v9353_v28 = vadd.f32 %v7792_v30, %v9133_v35 }
 0x13d   : > { %v7793_v21 = vpop.f32.mrb[38].mxu0  ;;  %v9347_v22 = vadd.f32 %v9129_v33, %v1175_v10 }
 0x13e   : > { %v9344_v38 = vadd.f32 %v7793_v21, %v9127_v31  ;;  %v1178_v26 = vpop.f32.mrb[39].mxu0  ;;  %12660 = vst [vmem:[#allocation29_spill] sm:$0xff] %v9353_v28 }
 0x13f   : > { %12658 = vst [vmem:[#allocation27_spill] sm:$0xff] %v9347_v22  ;;  %v9350_v9 = vadd.f32 %v9131_v34, %v1178_v26 }
 0x140   : > { %12657 = vst [vmem:[#allocation26_spill] sm:$0xff] %v9344_v38  ;;  %v1753_v11 = vpack.c.bf16 %v9344_v38, %v9353_v28 }
 0x141   : > { %12659 = vst [vmem:[#allocation28_spill] sm:$0xff] %v9350_v9  ;;  %v1752_v8 = vpack.c.bf16 %v9350_v9, %v9347_v22 }
 0x143   : > { %v7796_v21 = vpop.f32.mrb[40].mxu0  ;;  %7934 = vmatprep.mubr.bf16.mxu1 %v1752_v8 }
 0x144   : > { %v1191_v26 = vpop.f32.mrb[41].mxu0  ;;  %7935 = vmatmul.mubr.bf16.gmra.mrb[36].mxu1 %v1753_v11  ;;  %v9377_v8 = vadd.f32 %v7796_v21, %v9163_v53 }
 0x145   : > { %v7797_v30 = vpop.f32.mrb[42].mxu0  ;;  %v9371_v22 = vadd.f32 %v9159_v51, %v1191_v26 }
 0x146   : > { %v9368_v10 = vadd.f32 %v7797_v30, %v9157_v49  ;;  %v1194_v9 = vpop.f32.mrb[43].mxu0  ;;  %12664 = vst [vmem:[#allocation33_spill] sm:$0xff] %v9377_v8 }
 0x147   : > { %12662 = vst [vmem:[#allocation31_spill] sm:$0xff] %v9371_v22  ;;  %v9374_v38 = vadd.f32 %v9161_v52, %v1194_v9 }
 0x148   : > { %12661 = vst [vmem:[#allocation30_spill] sm:$0xff] %v9368_v10  ;;  %v1755_v28 = vpack.c.bf16 %v9368_v10, %v9377_v8 }
 0x149   : > { %12663 = vst [vmem:[#allocation32_spill] sm:$0xff] %v9374_v38  ;;  %v1754_v11 = vpack.c.bf16 %v9374_v38, %v9371_v22 }
 0x14b   : > { %v7800_v41 = vpop.f32.mrb[44].mxu0  ;;  %7938 = vmatprep.mubr.bf16.mxu1 %v1754_v11 }
 0x14c   : > { %v1207_v30 = vpop.f32.mrb[45].mxu0  ;;  %7939 = vmatmul.mubr.bf16.gmra.mrb[40].mxu1 %v1755_v28  ;;  %v9393_v38 = vadd.f32 %v7800_v41, %v9193_v7 }
 0x14d   : > { %v7801_v59 = vpop.f32.mrb[46].mxu0  ;;  %v9387_v9 = vadd.f32 %v9189_v5, %v1207_v30 }
 0x14e   : > { %v9384_v26 = vadd.f32 %v7801_v59, %v9187_v3  ;;  %v1210_v24 = vpop.f32.mrb[47].mxu0  ;;  %12668 = vst [vmem:[#allocation37_spill] sm:$0xff] %v9393_v38 }
 0x14f   : > { %12666 = vst [vmem:[#allocation35_spill] sm:$0xff] %v9387_v9  ;;  %v9390_v21 = vadd.f32 %v9191_v6, %v1210_v24 }
 0x150   : > { %12665 = vst [vmem:[#allocation34_spill] sm:$0xff] %v9384_v26  ;;  %v1757_v28 = vpack.c.bf16 %v9384_v26, %v9393_v38 }
 0x151   : > { %12667 = vst [vmem:[#allocation36_spill] sm:$0xff] %v9390_v21  ;;  %v1756_v22 = vpack.c.bf16 %v9390_v21, %v9387_v9 }
 0x153   : > { %v7804_v11 = vpop.f32.mrb[48].mxu0  ;;  %7942 = vmatprep.mubr.bf16.mxu1 %v1756_v22 }
 0x154   : > { %v1223_v59 = vpop.f32.mrb[49].mxu0  ;;  %7943 = vmatmul.mubr.bf16.gmra.mrb[44].mxu1 %v1757_v28  ;;  %v9409_v21 = vadd.f32 %v7804_v11, %v9223_v37 }
 0x155   : > { %v7805_v10 = vpop.f32.mrb[50].mxu0  ;;  %v9403_v24 = vadd.f32 %v9219_v32, %v1223_v59 }
 0x156   : > { %v9400_v30 = vadd.f32 %v7805_v10, %v9217_v29  ;;  %v1226_v8 = vpop.f32.mrb[51].mxu0  ;;  %12672 = vst [vmem:[#allocation41_spill] sm:$0xff] %v9409_v21 }
 0x157   : > { %12670 = vst [vmem:[#allocation39_spill] sm:$0xff] %v9403_v24  ;;  %v9406_v41 = vadd.f32 %v9221_v36, %v1226_v8 }
 0x158   : > { %12669 = vst [vmem:[#allocation38_spill] sm:$0xff] %v9400_v30  ;;  %v1759_v22 = vpack.c.bf16 %v9400_v30, %v9409_v21 }
 0x159   : > { %12671 = vst [vmem:[#allocation40_spill] sm:$0xff] %v9406_v41  ;;  %v1758_v9 = vpack.c.bf16 %v9406_v41, %v9403_v24 }
 0x15b   : > { %v7808_v28 = vpop.f32.mrb[52].mxu0  ;;  %7946 = vmatprep.mubr.bf16.mxu1 %v1758_v9 }
 0x15c   : > { %v1239_v10 = vpop.f32.mrb[53].mxu0  ;;  %7947 = vmatmul.mubr.bf16.gmra.mrb[48].mxu1 %v1759_v22  ;;  %v9425_v41 = vadd.f32 %v7808_v28, %v9254_v4 }
 0x15d   : > { %v7809_v26 = vpop.f32.mrb[54].mxu0  ;;  %v9419_v8 = vadd.f32 %v9250_v1, %v1239_v10 }
 0x15e   : > { %v9416_v59 = vadd.f32 %v7809_v26, %v9248_v63  ;;  %v1242_v38 = vpop.f32.mrb[55].mxu0  ;;  %12676 = vst [vmem:[#allocation45_spill] sm:$0xff] %v9425_v41  ;;  %v9434_v26 = vld [vmem:[%s12342_s5 + $0x8] sm:$0xff]  }
 0x15f   : > { %12674 = vst [vmem:[#allocation43_spill] sm:$0xff] %v9419_v8  ;;  %v9422_v11 = vadd.f32 %v9252_v2, %v1242_v38  ;;  %8315 = vmatprep.subr.bf16.mxu1 %v9434_v26 }
 0x160   : > { %12673 = vst [vmem:[#allocation42_spill] sm:$0xff] %v9416_v59  ;;  %v1761_v9 = vpack.c.bf16 %v9416_v59, %v9425_v41  ;;  %8323 = vmatpush3.bf16.msra.mxu1 %v9434_v26 }
 0x161   : > { %12675 = vst [vmem:[#allocation44_spill] sm:$0xff] %v9422_v11  ;;  %v1760_v24 = vpack.c.bf16 %v9422_v11, %v9419_v8 }
 0x163   : > { %v7812_v22 = vpop.f32.mrb[56].mxu0  ;;  %7950 = vmatprep.mubr.bf16.mxu1 %v1760_v24 }
 0x164   : > { %v1255_v10 = vpop.f32.mrb[57].mxu0  ;;  %7951 = vmatmul.mubr.bf16.gmra.mrb[52].mxu1 %v1761_v9  ;;  %v9448_v41 = vadd.f32 %v7812_v22, %v9280_v55 }
 0x165   : > { %v7813_v38 = vpop.f32.mrb[58].mxu0  ;;  %v9442_v8 = vadd.f32 %v9276_v46, %v1255_v10 }
 0x166   : > { %v9439_v28 = vadd.f32 %v7813_v38, %v9274_v39  ;;  %v1258_v11 = vpop.f32.mrb[59].mxu0  ;;  %12680 = vst [vmem:[#allocation49_spill] sm:$0xff] %v9448_v41 }
 0x167   : > { %12678 = vst [vmem:[#allocation47_spill] sm:$0xff] %v9442_v8  ;;  %v9445_v59 = vadd.f32 %v9278_v54, %v1258_v11 }
 0x168   : > { %12677 = vst [vmem:[#allocation46_spill] sm:$0xff] %v9439_v28  ;;  %v1763_v9 = vpack.c.bf16 %v9439_v28, %v9448_v41 }
 0x169   : > { %12679 = vst [vmem:[#allocation48_spill] sm:$0xff] %v9445_v59  ;;  %v1762_v24 = vpack.c.bf16 %v9445_v59, %v9442_v8 }
 0x16b   : > { %v7816_v30 = vpop.f32.mrb[60].mxu0  ;;  %7954 = vmatprep.mubr.bf16.mxu1 %v1762_v24 }
 0x16c   : > { %v1271_v38 = vpop.f32.mrb[61].mxu0  ;;  %7955 = vmatmul.mubr.bf16.gmra.mrb[56].mxu1 %v1763_v9  ;;  %v9464_v59 = vadd.f32 %v7816_v30, %v9306_v0 }
 0x16d   : > { %v7817_v21 = vpop.f32.mrb[62].mxu0  ;;  %v9458_v11 = vadd.f32 %v9302_v56, %v1271_v38 }
 0x16e   : > { %v9455_v10 = vadd.f32 %v7817_v21, %v9300_v57  ;;  %v1274_v48 = vpop.f32.mrb[63].mxu0  ;;  %12684 = vst [vmem:[#allocation53_spill] sm:$0xff] %v9464_v59 }
 0x16f   : > { %12682 = vst [vmem:[#allocation51_spill] sm:$0xff] %v9458_v11  ;;  %v9461_v22 = vadd.f32 %v9304_v17, %v1274_v48 }
 0x170   : > { %12681 = vst [vmem:[#allocation50_spill] sm:$0xff] %v9455_v10  ;;  %v1765_v24 = vpack.c.bf16 %v9455_v10, %v9464_v59 }
 0x171   : > { %12683 = vst [vmem:[#allocation52_spill] sm:$0xff] %v9461_v22  ;;  %v1764_v8 = vpack.c.bf16 %v9461_v22, %v9458_v11 }
 0x173   : > { %v7820_v9 = vpop.f32.mrb[64].mxu0  ;;  %7958 = vmatprep.mubr.bf16.mxu1 %v1764_v8 }
 0x174   : > { %v1287_v21 = vpop.f32.mrb[65].mxu0  ;;  %7959 = vmatmul.mubr.bf16.gmra.mrb[60].mxu1 %v1765_v24  ;;  %v9480_v22 = vadd.f32 %v7820_v9, %v9100_v16 }
 0x175   : > { %v7821_v28 = vpop.f32.mrb[66].mxu0  ;;  %v9474_v48 = vadd.f32 %v9096_v14, %v1287_v21 }
 0x176   : > { %v9471_v38 = vadd.f32 %v7821_v28, %v9094_v12  ;;  %v1290_v41 = vpop.f32.mrb[67].mxu0  ;;  %12688 = vst [vmem:[#allocation57_spill] sm:$0xff] %v9480_v22 }
 0x177   : > { %12686 = vst [vmem:[#allocation55_spill] sm:$0xff] %v9474_v48  ;;  %v9477_v30 = vadd.f32 %v9098_v15, %v1290_v41 }
 0x178   : > { %12685 = vst [vmem:[#allocation54_spill] sm:$0xff] %v9471_v38  ;;  %v1767_v8 = vpack.c.bf16 %v9471_v38, %v9480_v22 }
 0x179   : > { %12687 = vst [vmem:[#allocation56_spill] sm:$0xff] %v9477_v30  ;;  %v1766_v11 = vpack.c.bf16 %v9477_v30, %v9474_v48 }
 0x17b   : > { %v7824_v24 = vpop.f32.mrb[68].mxu0  ;;  %7962 = vmatprep.mubr.bf16.mxu1 %v1766_v11 }
 0x17c   : > { %v1303_v28 = vpop.f32.mrb[69].mxu0  ;;  %7963 = vmatmul.mubr.bf16.gmra.mrb[64].mxu1 %v1767_v8  ;;  %v9496_v30 = vadd.f32 %v7824_v24, %v9133_v35 }
 0x17d   : > { %v7825_v10 = vpop.f32.mrb[70].mxu0  ;;  %v9490_v41 = vadd.f32 %v9129_v33, %v1303_v28 }
 0x17e   : > { %v9487_v21 = vadd.f32 %v7825_v10, %v9127_v31  ;;  %v1306_v59 = vpop.f32.mrb[71].mxu0  ;;  %12692 = vst [vmem:[#allocation61_spill] sm:$0xff] %v9496_v30  ;;  %v9505_v10 = vld [vmem:[%s12342_s5 + $0x10] sm:$0xff]  }
 0x17f   : > { %12690 = vst [vmem:[#allocation59_spill] sm:$0xff] %v9490_v41  ;;  %v9493_v9 = vadd.f32 %v9131_v34, %v1306_v59  ;;  %8316 = vmatprep.subr.bf16.mxu1 %v9505_v10 }
 0x180   : > { %12689 = vst [vmem:[#allocation58_spill] sm:$0xff] %v9487_v21  ;;  %v1769_v11 = vpack.c.bf16 %v9487_v21, %v9496_v30  ;;  %8324 = vmatpush3.bf16.msra.mxu1 %v9505_v10 }
 0x181   : > { %12691 = vst [vmem:[#allocation60_spill] sm:$0xff] %v9493_v9  ;;  %v1768_v48 = vpack.c.bf16 %v9493_v9, %v9490_v41 }
 0x183   : > { %v7828_v8 = vpop.f32.mrb[72].mxu0  ;;  %7966 = vmatprep.mubr.bf16.mxu1 %v1768_v48 }
 0x184   : > { %v1319_v28 = vpop.f32.mrb[73].mxu0  ;;  %7967 = vmatmul.mubr.bf16.gmra.mrb[68].mxu1 %v1769_v11  ;;  %v9519_v30 = vadd.f32 %v7828_v8, %v9163_v53 }
 0x185   : > { %v7829_v59 = vpop.f32.mrb[74].mxu0  ;;  %v9513_v41 = vadd.f32 %v9159_v51, %v1319_v28 }
 0x186   : > { %v9510_v24 = vadd.f32 %v7829_v59, %v9157_v49  ;;  %v1322_v9 = vpop.f32.mrb[75].mxu0  ;;  %12696 = vst [vmem:[#allocation65_spill] sm:$0xff] %v9519_v30 }
 0x187   : > { %12694 = vst [vmem:[#allocation63_spill] sm:$0xff] %v9513_v41  ;;  %v9516_v21 = vadd.f32 %v9161_v52, %v1322_v9 }
 0x188   : > { %12693 = vst [vmem:[#allocation62_spill] sm:$0xff] %v9510_v24  ;;  %v1771_v11 = vpack.c.bf16 %v9510_v24, %v9519_v30 }
 0x189   : > { %12695 = vst [vmem:[#allocation64_spill] sm:$0xff] %v9516_v21  ;;  %v1770_v48 = vpack.c.bf16 %v9516_v21, %v9513_v41 }
 0x18b   : > { %v7832_v38 = vpop.f32.mrb[76].mxu0  ;;  %7970 = vmatprep.mubr.bf16.mxu1 %v1770_v48 }
 0x18c   : > { %v1335_v59 = vpop.f32.mrb[77].mxu0  ;;  %7971 = vmatmul.mubr.bf16.gmra.mrb[72].mxu1 %v1771_v11  ;;  %v9535_v21 = vadd.f32 %v7832_v38, %v9193_v7 }
 0x18d   : > { %v7833_v22 = vpop.f32.mrb[78].mxu0  ;;  %v9529_v9 = vadd.f32 %v9189_v5, %v1335_v59 }
 0x18e   : > { %v9526_v28 = vadd.f32 %v7833_v22, %v9187_v3  ;;  %v1338_v23 = vpop.f32.mrb[79].mxu0  ;;  %12700 = vst [vmem:[#allocation69_spill] sm:$0xff] %v9535_v21 }
 0x18f   : > { %12698 = vst [vmem:[#allocation67_spill] sm:$0xff] %v9529_v9  ;;  %v9532_v8 = vadd.f32 %v9191_v6, %v1338_v23 }
 0x190   : > { %12697 = vst [vmem:[#allocation66_spill] sm:$0xff] %v9526_v28  ;;  %v1773_v48 = vpack.c.bf16 %v9526_v28, %v9535_v21 }
 0x191   : > { %12699 = vst [vmem:[#allocation68_spill] sm:$0xff] %v9532_v8  ;;  %v1772_v41 = vpack.c.bf16 %v9532_v8, %v9529_v9 }
 0x193   : > { %v7836_v11 = vpop.f32.mrb[80].mxu0  ;;  %7974 = vmatprep.mubr.bf16.mxu1 %v1772_v41 }
 0x194   : > { %v1351_v22 = vpop.f32.mrb[81].mxu0  ;;  %7975 = vmatmul.mubr.bf16.gmra.mrb[76].mxu1 %v1773_v48  ;;  %v9551_v8 = vadd.f32 %v7836_v11, %v9223_v37 }
 0x195   : > { %v7837_v24 = vpop.f32.mrb[82].mxu0  ;;  %v9545_v23 = vadd.f32 %v9219_v32, %v1351_v22 }
 0x196   : > { %v9542_v59 = vadd.f32 %v7837_v24, %v9217_v29  ;;  %v1354_v30 = vpop.f32.mrb[83].mxu0  ;;  %12704 = vst [vmem:[#allocation73_spill] sm:$0xff] %v9551_v8 }
 0x197   : > { %12702 = vst [vmem:[#allocation71_spill] sm:$0xff] %v9545_v23  ;;  %v9548_v38 = vadd.f32 %v9221_v36, %v1354_v30 }
 0x198   : > { %12701 = vst [vmem:[#allocation70_spill] sm:$0xff] %v9542_v59  ;;  %v1775_v41 = vpack.c.bf16 %v9542_v59, %v9551_v8 }
 0x199   : > { %12703 = vst [vmem:[#allocation72_spill] sm:$0xff] %v9548_v38  ;;  %v1774_v9 = vpack.c.bf16 %v9548_v38, %v9545_v23 }
 0x19b   : > { %v7840_v48 = vpop.f32.mrb[84].mxu0  ;;  %7978 = vmatprep.mubr.bf16.mxu1 %v1774_v9 }
 0x19c   : > { %v1367_v24 = vpop.f32.mrb[85].mxu0  ;;  %7979 = vmatmul.mubr.bf16.gmra.mrb[80].mxu1 %v1775_v41  ;;  %v9567_v38 = vadd.f32 %v7840_v48, %v9254_v4 }
 0x19d   : > { %v7841_v28 = vpop.f32.mrb[86].mxu0  ;;  %v9561_v30 = vadd.f32 %v9250_v1, %v1367_v24 }
 0x19e   : > { %v9558_v22 = vadd.f32 %v7841_v28, %v9248_v63  ;;  %v1370_v21 = vpop.f32.mrb[87].mxu0  ;;  %12708 = vst [vmem:[#allocation77_spill] sm:$0xff] %v9567_v38  ;;  %v9576_v28 = vld [vmem:[%s12342_s5 + $0x18] sm:$0xff]  }
 0x19f   : > { %12706 = vst [vmem:[#allocation75_spill] sm:$0xff] %v9561_v30  ;;  %v9564_v11 = vadd.f32 %v9252_v2, %v1370_v21  ;;  %8317 = vmatprep.subr.bf16.mxu1 %v9576_v28 }
 0x1a0   : > { %12705 = vst [vmem:[#allocation74_spill] sm:$0xff] %v9558_v22  ;;  %v1777_v9 = vpack.c.bf16 %v9558_v22, %v9567_v38  ;;  %8325 = vmatpush3.bf16.msra.mxu1 %v9576_v28 }
 0x1a1   : > { %12707 = vst [vmem:[#allocation76_spill] sm:$0xff] %v9564_v11  ;;  %v1776_v23 = vpack.c.bf16 %v9564_v11, %v9561_v30 }
 0x1a3   : > { %v7844_v41 = vpop.f32.mrb[88].mxu0  ;;  %7982 = vmatprep.mubr.bf16.mxu1 %v1776_v23 }
 0x1a4   : > { %v1383_v24 = vpop.f32.mrb[89].mxu0  ;;  %7983 = vmatmul.mubr.bf16.gmra.mrb[84].mxu1 %v1777_v9  ;;  %v9590_v38 = vadd.f32 %v7844_v41, %v9280_v55 }
 0x1a5   : > { %v7845_v21 = vpop.f32.mrb[90].mxu0  ;;  %v9584_v30 = vadd.f32 %v9276_v46, %v1383_v24 }
 0x1a6   : > { %v9581_v48 = vadd.f32 %v7845_v21, %v9274_v39  ;;  %v1386_v11 = vpop.f32.mrb[91].mxu0  ;;  %12712 = vst [vmem:[#allocation81_spill] sm:$0xff] %v9590_v38 }
 0x1a7   : > { %12710 = vst [vmem:[#allocation79_spill] sm:$0xff] %v9584_v30  ;;  %v9587_v22 = vadd.f32 %v9278_v54, %v1386_v11 }
 0x1a8   : > { %12709 = vst [vmem:[#allocation78_spill] sm:$0xff] %v9581_v48  ;;  %v1779_v9 = vpack.c.bf16 %v9581_v48, %v9590_v38 }
 0x1a9   : > { %12711 = vst [vmem:[#allocation80_spill] sm:$0xff] %v9587_v22  ;;  %v1778_v23 = vpack.c.bf16 %v9587_v22, %v9584_v30 }
 0x1ab   : > { %v7848_v59 = vpop.f32.mrb[92].mxu0  ;;  %7986 = vmatprep.mubr.bf16.mxu1 %v1778_v23 }
 0x1ac   : > { %v1399_v21 = vpop.f32.mrb[93].mxu0  ;;  %7987 = vmatmul.mubr.bf16.gmra.mrb[88].mxu1 %v1779_v9  ;;  %v9606_v22 = vadd.f32 %v7848_v59, %v9306_v0 }
 0x1ad   : > { %v7849_v8 = vpop.f32.mrb[94].mxu0  ;;  %v9600_v11 = vadd.f32 %v9302_v56, %v1399_v21 }
 0x1ae   : > { %v9597_v24 = vadd.f32 %v7849_v8, %v9300_v57  ;;  %v1402_v45 = vpop.f32.mrb[95].mxu0 }
 0x1af   : > { %12713 = vst [vmem:[#allocation82_spill] sm:$0xff] %v9600_v11  ;;  %v9603_v41 = vadd.f32 %v9304_v17, %v1402_v45 }
 0x1b0   : > { %v1781_v23 = vpack.c.bf16 %v9597_v24, %v9606_v22 }
 0x1b1   : > { %12714 = vst [vmem:[#allocation83_spill] sm:$0xff] %v9603_v41  ;;  %v1780_v30 = vpack.c.bf16 %v9603_v41, %v9600_v11 }
 0x1b3   : > { %v7852_v9 = vpop.f32.mrb[96].mxu0  ;;  %7990 = vmatprep.mubr.bf16.mxu1 %v1780_v30 }
 0x1b4   : > { %v1415_v8 = vpop.f32.mrb[97].mxu0  ;;  %7991 = vmatmul.mubr.bf16.gmra.mrb[92].mxu1 %v1781_v23  ;;  %v9622_v41 = vadd.f32 %v7852_v9, %v9100_v16 }
 0x1b5   : > { %v7853_v48 = vpop.f32.mrb[98].mxu0  ;;  %v9616_v45 = vadd.f32 %v9096_v14, %v1415_v8 }
 0x1b6   : > { %v9613_v21 = vadd.f32 %v7853_v48, %v9094_v12  ;;  %v1418_v38 = vpop.f32.mrb[99].mxu0 }
 0x1b7   : > { %v9619_v59 = vadd.f32 %v9098_v15, %v1418_v38 }
 0x1b8   : > { %v1783_v30 = vpack.c.bf16 %v9613_v21, %v9622_v41 }
 0x1b9   : > { %v1782_v11 = vpack.c.bf16 %v9619_v59, %v9616_v45 }
 0x1bb   : > { %v7856_v23 = vpop.f32.mrb[100].mxu0  ;;  %7994 = vmatprep.mubr.bf16.mxu1 %v1782_v11 }
 0x1bc   : > { %v1431_v12 = vpop.f32.mrb[101].mxu0  ;;  %7995 = vmatmul.mubr.bf16.gmra.mrb[96].mxu1 %v1783_v30  ;;  %v9638_v38 = vadd.f32 %v7856_v23, %v9133_v35 }
 0x1bd   : > { %v7857_v48 = vpop.f32.mrb[102].mxu0  ;;  %v9632_v15 = vadd.f32 %v9129_v33, %v1431_v12 }
 0x1be   : > { %v9629_v14 = vadd.f32 %v7857_v48, %v9127_v31  ;;  %v1434_v8 = vpop.f32.mrb[103].mxu0  ;;  %12718 = vst [vmem:[#allocation87_spill] sm:$0xff] %v9638_v38  ;;  %v9647_v31 = vld [vmem:[%s12342_s5 + $0x20] sm:$0xff]  }
 0x1bf   : > { %12716 = vst [vmem:[#allocation85_spill] sm:$0xff] %v9632_v15  ;;  %v9635_v16 = vadd.f32 %v9131_v34, %v1434_v8  ;;  %8318 = vmatprep.subr.bf16.mxu1 %v9647_v31 }
 0x1c0   : > { %12715 = vst [vmem:[#allocation84_spill] sm:$0xff] %v9629_v14  ;;  %v1785_v11 = vpack.c.bf16 %v9629_v14, %v9638_v38  ;;  %8326 = vmatpush3.bf16.msra.mxu1 %v9647_v31 }
 0x1c1   : > { %12717 = vst [vmem:[#allocation86_spill] sm:$0xff] %v9635_v16  ;;  %v1784_v9 = vpack.c.bf16 %v9635_v16, %v9632_v15 }
 0x1c3   : > { %v7860_v30 = vpop.f32.mrb[104].mxu0  ;;  %7998 = vmatprep.mubr.bf16.mxu1 %v1784_v9 }
 0x1c4   : > { %v1447_v33 = vpop.f32.mrb[105].mxu0  ;;  %7999 = vmatmul.mubr.bf16.gmra.mrb[100].mxu1 %v1785_v11  ;;  %v9661_v8 = vadd.f32 %v7860_v30, %v9163_v53 }
 0x1c5   : > { %v7861_v34 = vpop.f32.mrb[106].mxu0  ;;  %v9655_v12 = vadd.f32 %v9159_v51, %v1447_v33  ;;  %v9670_v51 = vld [vmem:[%s12343_s6] ss:$0 sm:$0xff] }
 0x1c6   : > { %v9652_v35 = vadd.f32 %v7861_v34, %v9157_v49  ;;  %v1450_v23 = vpop.f32.mrb[107].mxu0  ;;  %12722 = vst [vmem:[#allocation91_spill] sm:$0xff] %v9661_v8 }
 0x1c7   : > { %12720 = vst [vmem:[#allocation89_spill] sm:$0xff] %v9655_v12  ;;  %v9658_v48 = vadd.f32 %v9161_v52, %v1450_v23 }
 0x1c8   : > { %12719 = vst [vmem:[#allocation88_spill] sm:$0xff] %v9652_v35  ;;  %v1787_v11 = vpack.c.bf16 %v9652_v35, %v9661_v8 }
 0x1c9   : > { %12721 = vst [vmem:[#allocation90_spill] sm:$0xff] %v9658_v48  ;;  %v1786_v9 = vpack.c.bf16 %v9658_v48, %v9655_v12 }
 0x1cb   : > { %v7864_v16 = vpop.f32.mrb[108].mxu0  ;;  %8002 = vmatprep.mubr.bf16.mxu1 %v1786_v9 }
 0x1cc   : > { %v1463_v49 = vpop.f32.mrb[109].mxu0  ;;  %8003 = vmatmul.mubr.bf16.gmra.mrb[104].mxu1 %v1787_v11  ;;  %v9682_v9 = vadd.f32 %v7864_v16, %v9193_v7 }
 0x1cd   : > { %v7865_v34 = vpop.f32.mrb[110].mxu0  ;;  %v9676_v30 = vadd.f32 %v9189_v5, %v1463_v49 }
 0x1ce   : > { %v9673_v52 = vadd.f32 %v7865_v34, %v9187_v3  ;;  %v1466_v53 = vpop.f32.mrb[111].mxu0  ;;  %12726 = vst [vmem:[#allocation95_spill] sm:$0xff] %v9682_v9 }
 0x1cf   : > { %12724 = vst [vmem:[#allocation93_spill] sm:$0xff] %v9676_v30  ;;  %v9679_v33 = vadd.f32 %v9191_v6, %v1466_v53  ;;  %v7900_v23 = vpop.f32.mrb[0].mxu1 }
 0x1d0   : > { %12723 = vst [vmem:[#allocation92_spill] sm:$0xff] %v9673_v52  ;;  %v1909_v11 = vadd.f32 %v7900_v23, %v9670_v51  ;;  %v1900_v48 = vpop.f32.mrb[1].mxu1  ;;  %v1789_v5 = vpack.c.bf16 %v9673_v52, %v9682_v9 }
 0x1d1   : > { %12725 = vst [vmem:[#allocation94_spill] sm:$0xff] %v9679_v33  ;;  %v1788_v12 = vpack.c.bf16 %v9679_v33, %v9676_v30  ;;  %v1901_v3 = vadd.f32 %v9670_v51, %v1900_v48  ;;  %v7901_v34 = vpop.f32.mrb[2].mxu1 }
 0x1d2   : > { %v1912_v49 = vadd.f32 %v7901_v34, %v9670_v51  ;;  %v1903_v6 = vpop.f32.mrb[3].mxu1  ;;  %v2413_v7 = vmax.f32 %v1909_v11, 0.0 }
 0x1d3   : > { %v1904_v53 = vadd.f32 %v9670_v51, %v1903_v6  ;;  %v7868_v35 = vpop.f32.mrb[112].mxu0  ;;  %8006 = vmatprep.mubr.bf16.mxu1 %v1788_v12  ;;  %v2411_v8 = vmax.f32 %v1901_v3, 0.0 }
 0x1d4   : > { %v2414_v16 = vmax.f32 %v1912_v49, 0.0  ;;  %v1479_v23 = vpop.f32.mrb[113].mxu0  ;;  %8007 = vmatmul.mubr.bf16.gmra.mrb[108].mxu1 %v1789_v5  ;;  %v9702_v11 = vadd.f32 %v7868_v35, %v9223_v37 }
 0x1d5   : > { %v2412_v15 = vmax.f32 %v1904_v53, 0.0  ;;  %v7869_v33 = vpop.f32.mrb[114].mxu0  ;;  %v9696_v34 = vadd.f32 %v9219_v32, %v1479_v23 }
 0x1d6   : > { %v2540_v30 = vpack.c.bf16 %v2414_v16, %v2413_v7  ;;  %v9693_v48 = vadd.f32 %v7869_v33, %v9217_v29  ;;  %v1482_v14 = vpop.f32.mrb[115].mxu0  ;;  %12730 = vst [vmem:[#allocation99_spill] sm:$0xff] %v9702_v11 }
 0x1d7   : > { %v2539_v52 = vpack.c.bf16 %v2412_v15, %v2411_v8  ;;  %12728 = vst [vmem:[#allocation97_spill] sm:$0xff] %v9696_v34  ;;  %v9699_v6 = vadd.f32 %v9221_v36, %v1482_v14  ;;  %v7904_v12 = vpop.f32.mrb[4].mxu1 }
 0x1d8   : > { %12727 = vst [vmem:[#allocation96_spill] sm:$0xff] %v9693_v48  ;;  %v1925_v3 = vadd.f32 %v7904_v12, %v9670_v51  ;;  %v1916_v5 = vpop.f32.mrb[5].mxu1  ;;  %v1791_v32 = vpack.c.bf16 %v9693_v48, %v9702_v11 }
 0x1d9   : > { %12729 = vst [vmem:[#allocation98_spill] sm:$0xff] %v9699_v6  ;;  %v1790_v49 = vpack.c.bf16 %v9699_v6, %v9696_v34  ;;  %v1917_v29 = vadd.f32 %v9670_v51, %v1916_v5  ;;  %v7905_v33 = vpop.f32.mrb[6].mxu1  ;;  %8042 = vmatprep.mubr.bf16.mxu0 %v2539_v52 }
 0x1da   : > { %v1928_v36 = vadd.f32 %v7905_v33, %v9670_v51  ;;  %v1919_v14 = vpop.f32.mrb[7].mxu1  ;;  %8043 = vmatmul.mubr.bf16.vlgmr.msra.gmra.mrb[128].mxu0 %v2540_v30  ;;  %v2417_v35 = vmax.f32 %v1925_v3, 0.0 }
 0x1db   : > { %v1920_v37 = vadd.f32 %v9670_v51, %v1919_v14  ;;  %8171 = vmatpush3.bf16.msra.mxu0 %v9360_v27  ;;  %v7872_v15 = vpop.f32.mrb[116].mxu0  ;;  %8010 = vmatprep.mubr.bf16.mxu1 %v1790_v49  ;;  %v2415_v52 = vmax.f32 %v1917_v29, 0.0 }
 0x1dc   : > { %v2418_v8 = vmax.f32 %v1928_v36, 0.0  ;;  %v1495_v53 = vpop.f32.mrb[117].mxu0  ;;  %8011 = vmatmul.mubr.bf16.gmra.mrb[112].mxu1 %v1791_v32  ;;  %8172 = vmatprep.subr.bf16.mxu0 %v9434_v26  ;;  %v9725_v49 = vadd.f32 %v7872_v15, %v9254_v4  ;;  %v8475_v4 = vld [vmem:[%s12342_s5 + $0x28] sm:$0xff]  }
 0x1dd   : > { %v2416_v7 = vmax.f32 %v1920_v37, 0.0  ;;  %v7873_v16 = vpop.f32.mrb[118].mxu0  ;;  %v9718_v33 = vadd.f32 %v9250_v1, %v1495_v53  ;;  %8319 = vmatprep.subr.bf16.mxu1 %v8475_v4 }
 0x1de   : > { %v2542_v23 = vpack.c.bf16 %v2418_v8, %v2417_v35  ;;  %v9715_v12 = vadd.f32 %v7873_v16, %v9248_v63  ;;  %v1498_v30 = vpop.f32.mrb[119].mxu0  ;;  %12734 = vst [vmem:[#allocation103_spill] sm:$0xff] %v9725_v49  ;;  %8327 = vmatpush3.bf16.msra.mxu1 %v8475_v4 }
 0x1df   : > { %v2541_v5 = vpack.c.bf16 %v2416_v7, %v2415_v52  ;;  %12732 = vst [vmem:[#allocation101_spill] sm:$0xff] %v9718_v33  ;;  %v9721_v27 = vadd.f32 %v9252_v2, %v1498_v30  ;;  %v7908_v3 = vpop.f32.mrb[8].mxu1  ;;  %8173 = vmatpush3.bf16.msra.mxu0 %v9434_v26 }
 0x1e0   : > { %12731 = vst [vmem:[#allocation100_spill] sm:$0xff] %v9715_v12  ;;  %v1941_v29 = vadd.f32 %v7908_v3, %v9670_v51  ;;  %v1932_v32 = vpop.f32.mrb[9].mxu1  ;;  %8174 = vmatprep.subr.bf16.mxu0 %v9505_v10  ;;  %v1793_v2 = vpack.c.bf16 %v9715_v12, %v9725_v49 }
 0x1e1   : > { %12733 = vst [vmem:[#allocation102_spill] sm:$0xff] %v9721_v27  ;;  %v1792_v63 = vpack.c.bf16 %v9721_v27, %v9718_v33  ;;  %v1933_v1 = vadd.f32 %v9670_v51, %v1932_v32  ;;  %v7909_v36 = vpop.f32.mrb[10].mxu1  ;;  %8046 = vmatprep.mubr.bf16.mxu0 %v2541_v5 }
 0x1e2   : > { %v1944_v26 = vadd.f32 %v7909_v36, %v9670_v51  ;;  %v1935_v14 = vpop.f32.mrb[11].mxu1  ;;  %8047 = vmatmul.mubr.bf16.gmra.mrb[132].mxu0 %v2542_v23  ;;  %v2421_v35 = vmax.f32 %v1941_v29, 0.0 }
 0x1e3   : > { %v1936_v37 = vadd.f32 %v9670_v51, %v1935_v14  ;;  %v7876_v15 = vpop.f32.mrb[120].mxu0  ;;  %8014 = vmatprep.mubr.bf16.mxu1 %v1792_v63  ;;  %8175 = vmatpush3.bf16.msra.mxu0 %v9505_v10  ;;  %v2419_v52 = vmax.f32 %v1933_v1, 0.0 }
 0x1e4   : > { %v2422_v8 = vmax.f32 %v1944_v26, 0.0  ;;  %v1511_v53 = vpop.f32.mrb[121].mxu0  ;;  %8015 = vmatmul.mubr.bf16.gmra.mrb[116].mxu1 %v1793_v2  ;;  %8176 = vmatprep.subr.bf16.mxu0 %v9576_v28  ;;  %v9752_v63 = vadd.f32 %v7876_v15, %v9280_v55 }
 0x1e5   : > { %v2420_v7 = vmax.f32 %v1936_v37, 0.0  ;;  %v7877_v16 = vpop.f32.mrb[122].mxu0  ;;  %v9745_v32 = vadd.f32 %v9276_v46, %v1511_v53 }
 0x1e6   : > { %v2544_v23 = vpack.c.bf16 %v2422_v8, %v2421_v35  ;;  %v9742_v30 = vadd.f32 %v7877_v16, %v9274_v39  ;;  %v1514_v5 = vpop.f32.mrb[123].mxu0  ;;  %12738 = vst [vmem:[#allocation107_spill] sm:$0xff] %v9752_v63 }
 0x1e7   : > { %v2543_v3 = vpack.c.bf16 %v2420_v7, %v2419_v52  ;;  %12736 = vst [vmem:[#allocation105_spill] sm:$0xff] %v9745_v32  ;;  %v9748_v10 = vadd.f32 %v9278_v54, %v1514_v5  ;;  %v7912_v29 = vpop.f32.mrb[12].mxu1  ;;  %8177 = vmatpush3.bf16.msra.mxu0 %v9576_v28 }
 0x1e8   : > { %12735 = vst [vmem:[#allocation104_spill] sm:$0xff] %v9742_v30  ;;  %v1957_v1 = vadd.f32 %v7912_v29, %v9670_v51  ;;  %v1948_v36 = vpop.f32.mrb[13].mxu1  ;;  %8178 = vmatprep.subr.bf16.mxu0 %v9647_v31  ;;  %v1795_v54 = vpack.c.bf16 %v9742_v30, %v9752_v63 }
 0x1e9   : > { %12737 = vst [vmem:[#allocation106_spill] sm:$0xff] %v9748_v10  ;;  %v1794_v39 = vpack.c.bf16 %v9748_v10, %v9745_v32  ;;  %v1949_v46 = vadd.f32 %v9670_v51, %v1948_v36  ;;  %v7913_v2 = vpop.f32.mrb[14].mxu1  ;;  %8050 = vmatprep.mubr.bf16.mxu0 %v2543_v3 }
 0x1ea   : > { %v1960_v28 = vadd.f32 %v7913_v2, %v9670_v51  ;;  %v1951_v26 = vpop.f32.mrb[15].mxu1  ;;  %8051 = vmatmul.mubr.bf16.gmra.mrb[136].mxu0 %v2544_v23  ;;  %v2425_v37 = vmax.f32 %v1957_v1, 0.0 }
 0x1eb   : > { %v1952_v55 = vadd.f32 %v9670_v51, %v1951_v26  ;;  %v7880_v14 = vpop.f32.mrb[124].mxu0  ;;  %8018 = vmatprep.mubr.bf16.mxu1 %v1794_v39  ;;  %8179 = vmatpush3.bf16.msra.mxu0 %v9647_v31  ;;  %v2423_v8 = vmax.f32 %v1949_v46, 0.0 }
 0x1ec   : > { %v2426_v15 = vmax.f32 %v1960_v28, 0.0  ;;  %v1527_v35 = vpop.f32.mrb[125].mxu0  ;;  %8019 = vmatmul.mubr.bf16.gmra.mrb[120].mxu1 %v1795_v54  ;;  %8180 = vmatprep.subr.bf16.mxu0 %v8475_v4  ;;  %v9774_v1 = vadd.f32 %v7880_v14, %v9306_v0 }
 0x1ed   : > { %v2424_v53 = vmax.f32 %v1952_v55, 0.0  ;;  %v7881_v52 = vpop.f32.mrb[126].mxu0  ;;  %v9768_v3 = vadd.f32 %v9302_v56, %v1527_v35 }
 0x1ee   : > { %v2546_v7 = vpack.c.bf16 %v2426_v15, %v2425_v37  ;;  %v9765_v16 = vadd.f32 %v7881_v52, %v9300_v57  ;;  %v1530_v5 = vpop.f32.mrb[127].mxu0  ;;  %12742 = vst [vmem:[#allocation111_spill] sm:$0xff] %v9774_v1 }
 0x1ef   : > { %v2545_v23 = vpack.c.bf16 %v2424_v53, %v2423_v8  ;;  %12740 = vst [vmem:[#allocation109_spill] sm:$0xff] %v9768_v3  ;;  %v9771_v29 = vadd.f32 %v9304_v17, %v1530_v5  ;;  %v7916_v31 = vpop.f32.mrb[16].mxu1  ;;  %8181 = vmatpush3.bf16.msra.mxu0 %v8475_v4 }
 0x1f0   : > { %12739 = vst [vmem:[#allocation108_spill] sm:$0xff] %v9765_v16  ;;  %v1973_v36 = vadd.f32 %v7916_v31, %v9670_v51  ;;  %v1964_v39 = vpop.f32.mrb[17].mxu1  ;;  %v1797_v56 = vpack.c.bf16 %v9765_v16, %v9774_v1 }
 0x1f1   : > { %12741 = vst [vmem:[#allocation110_spill] sm:$0xff] %v9771_v29  ;;  %v1796_v57 = vpack.c.bf16 %v9771_v29, %v9768_v3  ;;  %v1965_v46 = vadd.f32 %v9670_v51, %v1964_v39  ;;  %v7917_v2 = vpop.f32.mrb[18].mxu1  ;;  %8054 = vmatprep.mubr.bf16.mxu0 %v2545_v23 }
 0x1f2   : > { %v1976_v17 = vadd.f32 %v7917_v2, %v9670_v51  ;;  %v1967_v54 = vpop.f32.mrb[19].mxu1  ;;  %8055 = vmatmul.mubr.bf16.gmra.mrb[140].mxu0 %v2546_v7  ;;  %v2429_v4 = vmax.f32 %v1973_v36, 0.0 }
 0x1f3   : > { %v1968_v0 = vadd.f32 %v9670_v51, %v1967_v54  ;;  %8022 = vmatprep.mubr.bf16.mxu1 %v1796_v57  ;;  %v2427_v26 = vmax.f32 %v1965_v46, 0.0 }
 0x1f4   : > { %v2430_v28 = vmax.f32 %v1976_v17, 0.0  ;;  %8023 = vmatmul.mubr.bf16.gmra.mrb[124].mxu1 %v1797_v56 }
 0x1f5   : > { %v2428_v55 = vmax.f32 %v1968_v0, 0.0 }
 0x1f6   : > { %v2548_v14 = vpack.c.bf16 %v2430_v28, %v2429_v4 }
 0x1f7   : > { %v2547_v37 = vpack.c.bf16 %v2428_v55, %v2427_v26  ;;  %v7920_v15 = vpop.f32.mrb[20].mxu1  ;;  %v8476_v55 = vld [vmem:[%s12342_s5 + $0x30] sm:$0xff]  }
 0x1f8   : > { %v1989_v35 = vadd.f32 %v7920_v15, %v9670_v51  ;;  %v1980_v8 = vpop.f32.mrb[21].mxu1  ;;  %8320 = vmatprep.subr.bf16.mxu1 %v8476_v55  ;;  %8182 = vmatprep.subr.bf16.mxu0 %v8476_v55 }
 0x1f9   : > { %v1981_v53 = vadd.f32 %v9670_v51, %v1980_v8  ;;  %v7921_v52 = vpop.f32.mrb[22].mxu1  ;;  %8058 = vmatprep.mubr.bf16.mxu0 %v2547_v37  ;;  %8328 = vmatpush3.bf16.msra.mxu1 %v8476_v55 }
 0x1fa   : > { %v1992_v7 = vadd.f32 %v7921_v52, %v9670_v51  ;;  %v1983_v5 = vpop.f32.mrb[23].mxu1  ;;  %8059 = vmatmul.mubr.bf16.gmra.mrb[144].mxu0 %v2548_v14  ;;  %v2433_v31 = vmax.f32 %v1989_v35, 0.0 }
 0x1fb   : > { %v1984_v23 = vadd.f32 %v9670_v51, %v1983_v5  ;;  %v2431_v39 = vmax.f32 %v1981_v53, 0.0  ;;  %8183 = vmatpush3.bf16.msra.mxu0 %v8476_v55 }
 0x1fc   : > { %v2434_v36 = vmax.f32 %v1992_v7, 0.0 }
 0x1fd   : > { %v2432_v57 = vmax.f32 %v1984_v23, 0.0 }
 0x1fe   : > { %v2550_v46 = vpack.c.bf16 %v2434_v36, %v2433_v31 }
 0x1ff   : > { %v2549_v2 = vpack.c.bf16 %v2432_v57, %v2431_v39  ;;  %v7924_v56 = vpop.f32.mrb[24].mxu1 }
 0x200   : > { %v2005_v17 = vadd.f32 %v7924_v56, %v9670_v51  ;;  %v1996_v54 = vpop.f32.mrb[25].mxu1 }
 0x201   : > { %v1997_v0 = vadd.f32 %v9670_v51, %v1996_v54  ;;  %v7925_v4 = vpop.f32.mrb[26].mxu1  ;;  %8062 = vmatprep.mubr.bf16.mxu0 %v2549_v2 }
 0x202   : > { %v2008_v28 = vadd.f32 %v7925_v4, %v9670_v51  ;;  %v1999_v26 = vpop.f32.mrb[27].mxu1  ;;  %8063 = vmatmul.mubr.bf16.gmra.mrb[148].mxu0 %v2550_v46  ;;  %v2437_v37 = vmax.f32 %v2005_v17, 0.0 }
 0x203   : > { %v2000_v14 = vadd.f32 %v9670_v51, %v1999_v26  ;;  %v2435_v35 = vmax.f32 %v1997_v0, 0.0 }
 0x204   : > { %v2438_v15 = vmax.f32 %v2008_v28, 0.0 }
 0x205   : > { %v2436_v8 = vmax.f32 %v2000_v14, 0.0 }
 0x206   : > { %v2552_v53 = vpack.c.bf16 %v2438_v15, %v2437_v37 }
 0x207   : > { %v2551_v52 = vpack.c.bf16 %v2436_v8, %v2435_v35  ;;  %v7928_v7 = vpop.f32.mrb[28].mxu1 }
 0x208   : > { %v2021_v5 = vadd.f32 %v7928_v7, %v9670_v51  ;;  %v2012_v23 = vpop.f32.mrb[29].mxu1 }
 0x209   : > { %v2013_v31 = vadd.f32 %v9670_v51, %v2012_v23  ;;  %v7929_v36 = vpop.f32.mrb[30].mxu1  ;;  %8066 = vmatprep.mubr.bf16.mxu0 %v2551_v52 }
 0x20a   : > { %v2024_v39 = vadd.f32 %v7929_v36, %v9670_v51  ;;  %v2015_v57 = vpop.f32.mrb[31].mxu1  ;;  %8067 = vmatmul.mubr.bf16.gmra.mrb[152].mxu0 %v2552_v53  ;;  %v2441_v2 = vmax.f32 %v2021_v5, 0.0 }
 0x20b   : > { %v2016_v46 = vadd.f32 %v9670_v51, %v2015_v57  ;;  %v2439_v17 = vmax.f32 %v2013_v31, 0.0 }
 0x20c   : > { %v2442_v56 = vmax.f32 %v2024_v39, 0.0 }
 0x20d   : > { %v2440_v54 = vmax.f32 %v2016_v46, 0.0 }
 0x20e   : > { %v2554_v0 = vpack.c.bf16 %v2442_v56, %v2441_v2 }
 0x20f   : > { %v2553_v4 = vpack.c.bf16 %v2440_v54, %v2439_v17  ;;  %v7932_v28 = vpop.f32.mrb[32].mxu1 }
 0x210   : > { %v2037_v26 = vadd.f32 %v7932_v28, %v9670_v51  ;;  %v2028_v55 = vpop.f32.mrb[33].mxu1 }
 0x211   : > { %v2029_v14 = vadd.f32 %v9670_v51, %v2028_v55  ;;  %v7933_v37 = vpop.f32.mrb[34].mxu1  ;;  %8070 = vmatprep.mubr.bf16.mxu0 %v2553_v4 }
 0x212   : > { %v2040_v15 = vadd.f32 %v7933_v37, %v9670_v51  ;;  %v2031_v35 = vpop.f32.mrb[35].mxu1  ;;  %8071 = vmatmul.mubr.bf16.gmra.mrb[156].mxu0 %v2554_v0  ;;  %v2445_v53 = vmax.f32 %v2037_v26, 0.0 }
 0x213   : > { %v2032_v8 = vadd.f32 %v9670_v51, %v2031_v35  ;;  %v2443_v7 = vmax.f32 %v2029_v14, 0.0 }
 0x214   : > { %v2446_v52 = vmax.f32 %v2040_v15, 0.0 }
 0x215   : > { %v2444_v5 = vmax.f32 %v2032_v8, 0.0 }
 0x216   : > { %v2556_v23 = vpack.c.bf16 %v2446_v52, %v2445_v53 }
 0x217   : > { %v2555_v31 = vpack.c.bf16 %v2444_v5, %v2443_v7  ;;  %v7936_v36 = vpop.f32.mrb[36].mxu1  ;;  %v8477_v5 = vld [vmem:[%s12342_s5 + $0x38] sm:$0xff]  }
 0x218   : > { %v2053_v39 = vadd.f32 %v7936_v36, %v9670_v51  ;;  %v2044_v57 = vpop.f32.mrb[37].mxu1  ;;  %8321 = vmatprep.subr.bf16.mxu1 %v8477_v5  ;;  %8184 = vmatprep.subr.bf16.mxu0 %v8477_v5 }
 0x219   : > { %v2045_v46 = vadd.f32 %v9670_v51, %v2044_v57  ;;  %v7937_v2 = vpop.f32.mrb[38].mxu1  ;;  %8074 = vmatprep.mubr.bf16.mxu0 %v2555_v31  ;;  %8329 = vmatpush3.bf16.msra.mxu1 %v8477_v5 }
 0x21a   : > { %v2056_v56 = vadd.f32 %v7937_v2, %v9670_v51  ;;  %v2047_v17 = vpop.f32.mrb[39].mxu1  ;;  %8075 = vmatmul.mubr.bf16.gmra.mrb[160].mxu0 %v2556_v23  ;;  %v2449_v0 = vmax.f32 %v2053_v39, 0.0 }
 0x21b   : > { %v2048_v54 = vadd.f32 %v9670_v51, %v2047_v17  ;;  %v2447_v28 = vmax.f32 %v2045_v46, 0.0  ;;  %8185 = vmatpush3.bf16.msra.mxu0 %v8477_v5 }
 0x21c   : > { %v2450_v4 = vmax.f32 %v2056_v56, 0.0 }
 0x21d   : > { %v2448_v26 = vmax.f32 %v2048_v54, 0.0 }
 0x21e   : > { %v2558_v55 = vpack.c.bf16 %v2450_v4, %v2449_v0 }
 0x21f   : > { %v2557_v14 = vpack.c.bf16 %v2448_v26, %v2447_v28  ;;  %v7940_v37 = vpop.f32.mrb[40].mxu1 }
 0x220   : > { %v2069_v15 = vadd.f32 %v7940_v37, %v9670_v51  ;;  %v2060_v35 = vpop.f32.mrb[41].mxu1 }
 0x221   : > { %v2061_v8 = vadd.f32 %v9670_v51, %v2060_v35  ;;  %v7941_v53 = vpop.f32.mrb[42].mxu1  ;;  %8078 = vmatprep.mubr.bf16.mxu0 %v2557_v14 }
 0x222   : > { %v2072_v52 = vadd.f32 %v7941_v53, %v9670_v51  ;;  %v2063_v7 = vpop.f32.mrb[43].mxu1  ;;  %8079 = vmatmul.mubr.bf16.gmra.mrb[164].mxu0 %v2558_v55  ;;  %v2453_v31 = vmax.f32 %v2069_v15, 0.0 }
 0x223   : > { %v2064_v23 = vadd.f32 %v9670_v51, %v2063_v7  ;;  %v2451_v39 = vmax.f32 %v2061_v8, 0.0 }
 0x224   : > { %v2454_v36 = vmax.f32 %v2072_v52, 0.0 }
 0x225   : > { %v2452_v57 = vmax.f32 %v2064_v23, 0.0 }
 0x226   : > { %v2560_v46 = vpack.c.bf16 %v2454_v36, %v2453_v31 }
 0x227   : > { %v2559_v2 = vpack.c.bf16 %v2452_v57, %v2451_v39  ;;  %v7944_v56 = vpop.f32.mrb[44].mxu1 }
 0x228   : > { %v2085_v17 = vadd.f32 %v7944_v56, %v9670_v51  ;;  %v2076_v54 = vpop.f32.mrb[45].mxu1 }
 0x229   : > { %v2077_v0 = vadd.f32 %v9670_v51, %v2076_v54  ;;  %v7945_v4 = vpop.f32.mrb[46].mxu1  ;;  %8082 = vmatprep.mubr.bf16.mxu0 %v2559_v2 }
 0x22a   : > { %v2088_v28 = vadd.f32 %v7945_v4, %v9670_v51  ;;  %v2079_v26 = vpop.f32.mrb[47].mxu1  ;;  %8083 = vmatmul.mubr.bf16.gmra.mrb[168].mxu0 %v2560_v46  ;;  %v2457_v14 = vmax.f32 %v2085_v17, 0.0 }
 0x22b   : > { %v2080_v55 = vadd.f32 %v9670_v51, %v2079_v26  ;;  %v2455_v15 = vmax.f32 %v2077_v0, 0.0 }
 0x22c   : > { %v2458_v37 = vmax.f32 %v2088_v28, 0.0 }
 0x22d   : > { %v2456_v35 = vmax.f32 %v2080_v55, 0.0 }
 0x22e   : > { %v2562_v8 = vpack.c.bf16 %v2458_v37, %v2457_v14 }
 0x22f   : > { %v2561_v53 = vpack.c.bf16 %v2456_v35, %v2455_v15  ;;  %v7948_v52 = vpop.f32.mrb[48].mxu1 }
 0x230   : > { %v2101_v7 = vadd.f32 %v7948_v52, %v9670_v51  ;;  %v2092_v5 = vpop.f32.mrb[49].mxu1 }
 0x231   : > { %v2093_v23 = vadd.f32 %v9670_v51, %v2092_v5  ;;  %v7949_v31 = vpop.f32.mrb[50].mxu1  ;;  %8086 = vmatprep.mubr.bf16.mxu0 %v2561_v53 }
 0x232   : > { %v2104_v36 = vadd.f32 %v7949_v31, %v9670_v51  ;;  %v2095_v39 = vpop.f32.mrb[51].mxu1  ;;  %8087 = vmatmul.mubr.bf16.gmra.mrb[172].mxu0 %v2562_v8  ;;  %v2461_v46 = vmax.f32 %v2101_v7, 0.0 }
 0x233   : > { %v2096_v57 = vadd.f32 %v9670_v51, %v2095_v39  ;;  %v2459_v56 = vmax.f32 %v2093_v23, 0.0 }
 0x234   : > { %v2462_v2 = vmax.f32 %v2104_v36, 0.0 }
 0x235   : > { %v2460_v17 = vmax.f32 %v2096_v57, 0.0 }
 0x236   : > { %v2564_v54 = vpack.c.bf16 %v2462_v2, %v2461_v46 }
 0x237   : > { %v2563_v0 = vpack.c.bf16 %v2460_v17, %v2459_v56  ;;  %v7952_v4 = vpop.f32.mrb[52].mxu1 }
 0x238   : > { %v2117_v28 = vadd.f32 %v7952_v4, %v9670_v51  ;;  %v2108_v26 = vpop.f32.mrb[53].mxu1 }
 0x239   : > { %v2109_v55 = vadd.f32 %v9670_v51, %v2108_v26  ;;  %v7953_v14 = vpop.f32.mrb[54].mxu1  ;;  %8090 = vmatprep.mubr.bf16.mxu0 %v2563_v0 }
 0x23a   : > { %v2120_v37 = vadd.f32 %v7953_v14, %v9670_v51  ;;  %v2111_v15 = vpop.f32.mrb[55].mxu1  ;;  %8091 = vmatmul.mubr.bf16.gmra.mrb[176].mxu0 %v2564_v54  ;;  %v2465_v8 = vmax.f32 %v2117_v28, 0.0 }
 0x23b   : > { %v2112_v35 = vadd.f32 %v9670_v51, %v2111_v15  ;;  %v2463_v52 = vmax.f32 %v2109_v55, 0.0 }
 0x23c   : > { %v2466_v53 = vmax.f32 %v2120_v37, 0.0 }
 0x23d   : > { %v2464_v7 = vmax.f32 %v2112_v35, 0.0 }
 0x23e   : > { %v2566_v5 = vpack.c.bf16 %v2466_v53, %v2465_v8 }
 0x23f   : > { %v2565_v23 = vpack.c.bf16 %v2464_v7, %v2463_v52  ;;  %v7956_v31 = vpop.f32.mrb[56].mxu1 }
 0x240   : > { %v2133_v36 = vadd.f32 %v7956_v31, %v9670_v51  ;;  %v2124_v39 = vpop.f32.mrb[57].mxu1 }
 0x241   : > { %v2125_v57 = vadd.f32 %v9670_v51, %v2124_v39  ;;  %v7957_v46 = vpop.f32.mrb[58].mxu1  ;;  %8094 = vmatprep.mubr.bf16.mxu0 %v2565_v23 }
 0x242   : > { %v2136_v2 = vadd.f32 %v7957_v46, %v9670_v51  ;;  %v2127_v56 = vpop.f32.mrb[59].mxu1  ;;  %8095 = vmatmul.mubr.bf16.gmra.mrb[180].mxu0 %v2566_v5  ;;  %v2469_v54 = vmax.f32 %v2133_v36, 0.0 }
 0x243   : > { %v2128_v17 = vadd.f32 %v9670_v51, %v2127_v56  ;;  %v2467_v4 = vmax.f32 %v2125_v57, 0.0 }
 0x244   : > { %v2470_v0 = vmax.f32 %v2136_v2, 0.0 }
 0x245   : > { %v2468_v28 = vmax.f32 %v2128_v17, 0.0 }
 0x246   : > { %v2568_v26 = vpack.c.bf16 %v2470_v0, %v2469_v54 }
 0x247   : > { %v2567_v55 = vpack.c.bf16 %v2468_v28, %v2467_v4  ;;  %v7960_v14 = vpop.f32.mrb[60].mxu1 }
 0x248   : > { %v2149_v37 = vadd.f32 %v7960_v14, %v9670_v51  ;;  %v2140_v15 = vpop.f32.mrb[61].mxu1 }
 0x249   : > { %v2141_v35 = vadd.f32 %v9670_v51, %v2140_v15  ;;  %v7961_v8 = vpop.f32.mrb[62].mxu1  ;;  %8098 = vmatprep.mubr.bf16.mxu0 %v2567_v55 }
 0x24a   : > { %v2152_v53 = vadd.f32 %v7961_v8, %v9670_v51  ;;  %v2143_v52 = vpop.f32.mrb[63].mxu1  ;;  %8099 = vmatmul.mubr.bf16.gmra.mrb[184].mxu0 %v2568_v26  ;;  %v2473_v5 = vmax.f32 %v2149_v37, 0.0 }
 0x24b   : > { %v2144_v7 = vadd.f32 %v9670_v51, %v2143_v52  ;;  %v2471_v31 = vmax.f32 %v2141_v35, 0.0 }
 0x24c   : > { %v2474_v23 = vmax.f32 %v2152_v53, 0.0 }
 0x24d   : > { %v2472_v36 = vmax.f32 %v2144_v7, 0.0 }
 0x24e   : > { %v2570_v39 = vpack.c.bf16 %v2474_v23, %v2473_v5 }
 0x24f   : > { %v2569_v57 = vpack.c.bf16 %v2472_v36, %v2471_v31  ;;  %v7964_v46 = vpop.f32.mrb[64].mxu1 }
 0x250   : > { %v2165_v2 = vadd.f32 %v7964_v46, %v9670_v51  ;;  %v2156_v56 = vpop.f32.mrb[65].mxu1 }
 0x251   : > { %v2157_v17 = vadd.f32 %v9670_v51, %v2156_v56  ;;  %v7965_v54 = vpop.f32.mrb[66].mxu1  ;;  %8102 = vmatprep.mubr.bf16.mxu0 %v2569_v57 }
 0x252   : > { %v2168_v0 = vadd.f32 %v7965_v54, %v9670_v51  ;;  %v2159_v4 = vpop.f32.mrb[67].mxu1  ;;  %8103 = vmatmul.mubr.bf16.gmra.mrb[188].mxu0 %v2570_v39  ;;  %v2477_v26 = vmax.f32 %v2165_v2, 0.0 }
 0x253   : > { %v2160_v28 = vadd.f32 %v9670_v51, %v2159_v4  ;;  %v2475_v14 = vmax.f32 %v2157_v17, 0.0 }
 0x254   : > { %v2478_v55 = vmax.f32 %v2168_v0, 0.0 }
 0x255   : > { %v2476_v37 = vmax.f32 %v2160_v28, 0.0 }
 0x256   : > { %v2572_v15 = vpack.c.bf16 %v2478_v55, %v2477_v26 }
 0x257   : > { %v2571_v35 = vpack.c.bf16 %v2476_v37, %v2475_v14  ;;  %v7968_v8 = vpop.f32.mrb[68].mxu1 }
 0x258   : > { %v2181_v53 = vadd.f32 %v7968_v8, %v9670_v51  ;;  %v2172_v52 = vpop.f32.mrb[69].mxu1 }
 0x259   : > { %v2173_v7 = vadd.f32 %v9670_v51, %v2172_v52  ;;  %v7969_v5 = vpop.f32.mrb[70].mxu1  ;;  %8106 = vmatprep.mubr.bf16.mxu0 %v2571_v35 }
 0x25a   : > { %v2184_v23 = vadd.f32 %v7969_v5, %v9670_v51  ;;  %v2175_v31 = vpop.f32.mrb[71].mxu1  ;;  %8107 = vmatmul.mubr.bf16.gmra.mrb[192].mxu0 %v2572_v15  ;;  %v2481_v39 = vmax.f32 %v2181_v53, 0.0 }
 0x25b   : > { %v2176_v36 = vadd.f32 %v9670_v51, %v2175_v31  ;;  %v2479_v46 = vmax.f32 %v2173_v7, 0.0 }
 0x25c   : > { %v2482_v57 = vmax.f32 %v2184_v23, 0.0 }
 0x25d   : > { %v2480_v2 = vmax.f32 %v2176_v36, 0.0 }
 0x25e   : > { %v2574_v56 = vpack.c.bf16 %v2482_v57, %v2481_v39 }
 0x25f   : > { %v2573_v17 = vpack.c.bf16 %v2480_v2, %v2479_v46  ;;  %v7972_v54 = vpop.f32.mrb[72].mxu1 }
 0x260   : > { %v2197_v0 = vadd.f32 %v7972_v54, %v9670_v51  ;;  %v2188_v4 = vpop.f32.mrb[73].mxu1 }
 0x261   : > { %v2189_v28 = vadd.f32 %v9670_v51, %v2188_v4  ;;  %v7973_v26 = vpop.f32.mrb[74].mxu1  ;;  %8110 = vmatprep.mubr.bf16.mxu0 %v2573_v17 }
 0x262   : > { %v2200_v55 = vadd.f32 %v7973_v26, %v9670_v51  ;;  %v2191_v14 = vpop.f32.mrb[75].mxu1  ;;  %8111 = vmatmul.mubr.bf16.gmra.mrb[196].mxu0 %v2574_v56  ;;  %v2485_v15 = vmax.f32 %v2197_v0, 0.0 }
 0x263   : > { %v2192_v37 = vadd.f32 %v9670_v51, %v2191_v14  ;;  %v2483_v8 = vmax.f32 %v2189_v28, 0.0 }
 0x264   : > { %v2486_v35 = vmax.f32 %v2200_v55, 0.0 }
 0x265   : > { %v2484_v53 = vmax.f32 %v2192_v37, 0.0 }
 0x266   : > { %v2576_v52 = vpack.c.bf16 %v2486_v35, %v2485_v15 }
 0x267   : > { %v2575_v7 = vpack.c.bf16 %v2484_v53, %v2483_v8  ;;  %v7976_v5 = vpop.f32.mrb[76].mxu1 }
 0x268   : > { %v2213_v23 = vadd.f32 %v7976_v5, %v9670_v51  ;;  %v2204_v31 = vpop.f32.mrb[77].mxu1 }
 0x269   : > { %v2205_v36 = vadd.f32 %v9670_v51, %v2204_v31  ;;  %v7977_v39 = vpop.f32.mrb[78].mxu1  ;;  %8114 = vmatprep.mubr.bf16.mxu0 %v2575_v7 }
 0x26a   : > { %v2216_v57 = vadd.f32 %v7977_v39, %v9670_v51  ;;  %v2207_v46 = vpop.f32.mrb[79].mxu1  ;;  %8115 = vmatmul.mubr.bf16.gmra.mrb[200].mxu0 %v2576_v52  ;;  %v2489_v56 = vmax.f32 %v2213_v23, 0.0 }
 0x26b   : > { %v2208_v2 = vadd.f32 %v9670_v51, %v2207_v46  ;;  %v2487_v54 = vmax.f32 %v2205_v36, 0.0 }
 0x26c   : > { %v2490_v17 = vmax.f32 %v2216_v57, 0.0 }
 0x26d   : > { %v2488_v0 = vmax.f32 %v2208_v2, 0.0 }
 0x26e   : > { %v2578_v4 = vpack.c.bf16 %v2490_v17, %v2489_v56 }
 0x26f   : > { %v2577_v28 = vpack.c.bf16 %v2488_v0, %v2487_v54  ;;  %v7980_v26 = vpop.f32.mrb[80].mxu1 }
 0x270   : > { %v2229_v55 = vadd.f32 %v7980_v26, %v9670_v51  ;;  %v2220_v14 = vpop.f32.mrb[81].mxu1 }
 0x271   : > { %v2221_v37 = vadd.f32 %v9670_v51, %v2220_v14  ;;  %v7981_v15 = vpop.f32.mrb[82].mxu1  ;;  %8118 = vmatprep.mubr.bf16.mxu0 %v2577_v28 }
 0x272   : > { %v2232_v35 = vadd.f32 %v7981_v15, %v9670_v51  ;;  %v2223_v8 = vpop.f32.mrb[83].mxu1  ;;  %8119 = vmatmul.mubr.bf16.gmra.mrb[204].mxu0 %v2578_v4  ;;  %v2493_v52 = vmax.f32 %v2229_v55, 0.0 }
 0x273   : > { %v2224_v53 = vadd.f32 %v9670_v51, %v2223_v8  ;;  %v2491_v5 = vmax.f32 %v2221_v37, 0.0 }
 0x274   : > { %v2494_v7 = vmax.f32 %v2232_v35, 0.0 }
 0x275   : > { %v2492_v23 = vmax.f32 %v2224_v53, 0.0 }
 0x276   : > { %v2580_v31 = vpack.c.bf16 %v2494_v7, %v2493_v52 }
 0x277   : > { %v2579_v36 = vpack.c.bf16 %v2492_v23, %v2491_v5  ;;  %v7984_v39 = vpop.f32.mrb[84].mxu1 }
 0x278   : > { %v2245_v57 = vadd.f32 %v7984_v39, %v9670_v51  ;;  %v2236_v46 = vpop.f32.mrb[85].mxu1 }
 0x279   : > { %v2237_v2 = vadd.f32 %v9670_v51, %v2236_v46  ;;  %v7985_v56 = vpop.f32.mrb[86].mxu1  ;;  %8122 = vmatprep.mubr.bf16.mxu0 %v2579_v36 }
 0x27a   : > { %v2248_v17 = vadd.f32 %v7985_v56, %v9670_v51  ;;  %v2239_v54 = vpop.f32.mrb[87].mxu1  ;;  %8123 = vmatmul.mubr.bf16.gmra.mrb[208].mxu0 %v2580_v31  ;;  %v2497_v4 = vmax.f32 %v2245_v57, 0.0 }
 0x27b   : > { %v2240_v0 = vadd.f32 %v9670_v51, %v2239_v54  ;;  %v2495_v26 = vmax.f32 %v2237_v2, 0.0 }
 0x27c   : > { %v2498_v28 = vmax.f32 %v2248_v17, 0.0 }
 0x27d   : > { %v2496_v55 = vmax.f32 %v2240_v0, 0.0 }
 0x27e   : > { %v2582_v14 = vpack.c.bf16 %v2498_v28, %v2497_v4 }
 0x27f   : > { %v2581_v37 = vpack.c.bf16 %v2496_v55, %v2495_v26  ;;  %v7988_v15 = vpop.f32.mrb[88].mxu1 }
 0x280   : > { %v2261_v35 = vadd.f32 %v7988_v15, %v9670_v51  ;;  %v2252_v8 = vpop.f32.mrb[89].mxu1 }
 0x281   : > { %v2253_v53 = vadd.f32 %v9670_v51, %v2252_v8  ;;  %v7989_v52 = vpop.f32.mrb[90].mxu1  ;;  %8126 = vmatprep.mubr.bf16.mxu0 %v2581_v37 }
 0x282   : > { %v2264_v7 = vadd.f32 %v7989_v52, %v9670_v51  ;;  %v2255_v5 = vpop.f32.mrb[91].mxu1  ;;  %8127 = vmatmul.mubr.bf16.gmra.mrb[212].mxu0 %v2582_v14  ;;  %v2501_v31 = vmax.f32 %v2261_v35, 0.0 }
 0x283   : > { %v2256_v23 = vadd.f32 %v9670_v51, %v2255_v5  ;;  %v2499_v39 = vmax.f32 %v2253_v53, 0.0 }
 0x284   : > { %v2502_v36 = vmax.f32 %v2264_v7, 0.0 }
 0x285   : > { %v2500_v57 = vmax.f32 %v2256_v23, 0.0 }
 0x286   : > { %v2584_v46 = vpack.c.bf16 %v2502_v36, %v2501_v31 }
 0x287   : > { %v2583_v2 = vpack.c.bf16 %v2500_v57, %v2499_v39  ;;  %v7992_v56 = vpop.f32.mrb[92].mxu1 }
 0x288   : > { %v2277_v17 = vadd.f32 %v7992_v56, %v9670_v51  ;;  %v2268_v54 = vpop.f32.mrb[93].mxu1 }
 0x289   : > { %v2269_v0 = vadd.f32 %v9670_v51, %v2268_v54  ;;  %v7993_v4 = vpop.f32.mrb[94].mxu1  ;;  %8130 = vmatprep.mubr.bf16.mxu0 %v2583_v2 }
 0x28a   : > { %v2280_v28 = vadd.f32 %v7993_v4, %v9670_v51  ;;  %v2271_v26 = vpop.f32.mrb[95].mxu1  ;;  %8131 = vmatmul.mubr.bf16.gmra.mrb[216].mxu0 %v2584_v46  ;;  %v2505_v14 = vmax.f32 %v2277_v17, 0.0 }
 0x28b   : > { %v2272_v55 = vadd.f32 %v9670_v51, %v2271_v26  ;;  %v2503_v15 = vmax.f32 %v2269_v0, 0.0 }
 0x28c   : > { %v2506_v37 = vmax.f32 %v2280_v28, 0.0 }
 0x28d   : > { %v2504_v35 = vmax.f32 %v2272_v55, 0.0 }
 0x28e   : > { %v2586_v8 = vpack.c.bf16 %v2506_v37, %v2505_v14 }
 0x28f   : > { %v2585_v53 = vpack.c.bf16 %v2504_v35, %v2503_v15  ;;  %v7996_v52 = vpop.f32.mrb[96].mxu1 }
 0x290   : > { %v2293_v7 = vadd.f32 %v7996_v52, %v9670_v51  ;;  %v2284_v5 = vpop.f32.mrb[97].mxu1 }
 0x291   : > { %v2285_v23 = vadd.f32 %v9670_v51, %v2284_v5  ;;  %v7997_v31 = vpop.f32.mrb[98].mxu1  ;;  %8134 = vmatprep.mubr.bf16.mxu0 %v2585_v53 }
 0x292   : > { %v2296_v36 = vadd.f32 %v7997_v31, %v9670_v51  ;;  %v2287_v39 = vpop.f32.mrb[99].mxu1  ;;  %8135 = vmatmul.mubr.bf16.gmra.mrb[220].mxu0 %v2586_v8  ;;  %v2509_v46 = vmax.f32 %v2293_v7, 0.0 }
 0x293   : > { %v2288_v57 = vadd.f32 %v9670_v51, %v2287_v39  ;;  %v2507_v56 = vmax.f32 %v2285_v23, 0.0 }
 0x294   : > { %v2510_v2 = vmax.f32 %v2296_v36, 0.0 }
 0x295   : > { %v2508_v17 = vmax.f32 %v2288_v57, 0.0 }
 0x296   : > { %v2588_v54 = vpack.c.bf16 %v2510_v2, %v2509_v46 }
 0x297   : > { %v2587_v0 = vpack.c.bf16 %v2508_v17, %v2507_v56  ;;  %v8000_v4 = vpop.f32.mrb[100].mxu1 }
 0x298   : > { %v2309_v28 = vadd.f32 %v8000_v4, %v9670_v51  ;;  %v2300_v26 = vpop.f32.mrb[101].mxu1 }
 0x299   : > { %v2301_v55 = vadd.f32 %v9670_v51, %v2300_v26  ;;  %v8001_v14 = vpop.f32.mrb[102].mxu1  ;;  %8138 = vmatprep.mubr.bf16.mxu0 %v2587_v0 }
 0x29a   : > { %v2312_v37 = vadd.f32 %v8001_v14, %v9670_v51  ;;  %v2303_v15 = vpop.f32.mrb[103].mxu1  ;;  %8139 = vmatmul.mubr.bf16.gmra.mrb[224].mxu0 %v2588_v54  ;;  %v2513_v8 = vmax.f32 %v2309_v28, 0.0 }
 0x29b   : > { %v2304_v35 = vadd.f32 %v9670_v51, %v2303_v15  ;;  %v2511_v52 = vmax.f32 %v2301_v55, 0.0 }
 0x29c   : > { %v2514_v53 = vmax.f32 %v2312_v37, 0.0  ;;  %v9881_v37 = vld [vmem:[%s12343_s6] ss:$0 sm:$0xff] }
 0x29d   : > { %v2512_v7 = vmax.f32 %v2304_v35, 0.0 }
 0x29e   : > { %v2590_v5 = vpack.c.bf16 %v2514_v53, %v2513_v8 }
 0x29f   : > { %v2589_v23 = vpack.c.bf16 %v2512_v7, %v2511_v52  ;;  %v8004_v31 = vpop.f32.mrb[104].mxu1 }
 0x2a0   : > { %v2325_v36 = vadd.f32 %v8004_v31, %v9670_v51  ;;  %v2316_v39 = vpop.f32.mrb[105].mxu1 }
 0x2a1   : > { %v2317_v57 = vadd.f32 %v9670_v51, %v2316_v39  ;;  %v8005_v46 = vpop.f32.mrb[106].mxu1  ;;  %8142 = vmatprep.mubr.bf16.mxu0 %v2589_v23 }
 0x2a2   : > { %v2328_v2 = vadd.f32 %v8005_v46, %v9670_v51  ;;  %v2319_v56 = vpop.f32.mrb[107].mxu1  ;;  %8143 = vmatmul.mubr.bf16.gmra.mrb[228].mxu0 %v2590_v5  ;;  %v2517_v54 = vmax.f32 %v2325_v36, 0.0  ;;  %v9890_v5 = vld [vmem:[%s12343_s6 + $0x1] ss:$0 sm:$0xff] }
 0x2a3   : > { %v2320_v17 = vadd.f32 %v9670_v51, %v2319_v56  ;;  %v2515_v4 = vmax.f32 %v2317_v57, 0.0 }
 0x2a4   : > { %v2518_v0 = vmax.f32 %v2328_v2, 0.0 }
 0x2a5   : > { %v2516_v28 = vmax.f32 %v2320_v17, 0.0 }
 0x2a6   : > { %v2592_v26 = vpack.c.bf16 %v2518_v0, %v2517_v54 }
 0x2a7   : > { %v2591_v55 = vpack.c.bf16 %v2516_v28, %v2515_v4  ;;  %v8008_v14 = vpop.f32.mrb[108].mxu1 }
 0x2a8   : > { %v2341_v15 = vadd.f32 %v9881_v37, %v8008_v14  ;;  %v2332_v35 = vpop.f32.mrb[109].mxu1 }
 0x2a9   : > { %v2333_v8 = vadd.f32 %v9881_v37, %v2332_v35  ;;  %v8009_v53 = vpop.f32.mrb[110].mxu1  ;;  %8146 = vmatprep.mubr.bf16.mxu0 %v2591_v55 }
 0x2aa   : > { %v2344_v51 = vadd.f32 %v9881_v37, %v8009_v53  ;;  %v2335_v52 = vpop.f32.mrb[111].mxu1  ;;  %8147 = vmatmul.mubr.bf16.gmra.mrb[232].mxu0 %v2592_v26  ;;  %v2521_v23 = vmax.f32 %v2341_v15, 0.0 }
 0x2ab   : > { %v2336_v7 = vadd.f32 %v9881_v37, %v2335_v52  ;;  %v2519_v36 = vmax.f32 %v2333_v8, 0.0 }
 0x2ac   : > { %v2522_v31 = vmax.f32 %v2344_v51, 0.0 }
 0x2ad   : > { %v2520_v39 = vmax.f32 %v2336_v7, 0.0  ;;  %v8044_v57 = vpop.f32.mrb[128].mxu0 }
 0x2ae   : > { %v2594_v46 = vpack.c.bf16 %v2522_v31, %v2521_v23  ;;  %v2714_v2 = vadd.f32 %v8044_v57, %v9890_v5  ;;  %v2705_v56 = vpop.f32.mrb[129].mxu0 }
 0x2af   : > { %v2593_v17 = vpack.c.bf16 %v2520_v39, %v2519_v36  ;;  %v2706_v54 = vadd.f32 %v9890_v5, %v2705_v56  ;;  %v8012_v0 = vpop.f32.mrb[112].mxu1  ;;  %v8045_v4 = vpop.f32.mrb[130].mxu0 }
 0x2b0   : > { %v2357_v28 = vadd.f32 %v9881_v37, %v8012_v0  ;;  %v2717_v26 = vadd.f32 %v8045_v4, %v9890_v5  ;;  %v2348_v55 = vpop.f32.mrb[113].mxu1  ;;  %v2708_v14 = vpop.f32.mrb[131].mxu0  ;;  %v3218_v53 = vmax.f32 %v2714_v2, 0.0 }
 0x2b1   : > { %v2349_v15 = vadd.f32 %v9881_v37, %v2348_v55  ;;  %v2709_v35 = vadd.f32 %v9890_v5, %v2708_v14  ;;  %v8013_v8 = vpop.f32.mrb[114].mxu1  ;;  %8150 = vmatprep.mubr.bf16.mxu0 %v2593_v17  ;;  %v3216_v23 = vmax.f32 %v2706_v54, 0.0 }
 0x2b2   : > { %v3219_v51 = vmax.f32 %v2717_v26, 0.0  ;;  %v2360_v52 = vadd.f32 %v9881_v37, %v8013_v8  ;;  %v2351_v7 = vpop.f32.mrb[115].mxu1  ;;  %8151 = vmatmul.mubr.bf16.gmra.mrb[236].mxu0 %v2594_v46  ;;  %v2525_v39 = vmax.f32 %v2357_v28, 0.0 }
 0x2b3   : > { %v3217_v31 = vmax.f32 %v2709_v35, 0.0  ;;  %v2352_v36 = vadd.f32 %v9881_v37, %v2351_v7  ;;  %v2523_v0 = vmax.f32 %v2349_v15, 0.0 }
 0x2b4   : > { %v9900_v57 = vpack.c.bf16 %v3219_v51, %v3218_v53  ;;  %v2526_v56 = vmax.f32 %v2360_v52, 0.0 }
 0x2b5   : > { %v9902_v4 = vpack.c.bf16 %v3217_v31, %v3216_v23  ;;  %v2524_v55 = vmax.f32 %v2352_v36, 0.0  ;;  %v8048_v14 = vpop.f32.mrb[132].mxu0 }
 0x2b6   : > { %v2596_v17 = vpack.c.bf16 %v2526_v56, %v2525_v39  ;;  %v2730_v2 = vadd.f32 %v8048_v14, %v9890_v5  ;;  %v2721_v26 = vpop.f32.mrb[133].mxu0 }
 0x2b7   : > { %v2595_v8 = vpack.c.bf16 %v2524_v55, %v2523_v0  ;;  %v2722_v46 = vadd.f32 %v9890_v5, %v2721_v26  ;;  %v8016_v54 = vpop.f32.mrb[116].mxu1  ;;  %v8049_v35 = vpop.f32.mrb[134].mxu0 }
 0x2b8   : > { %v2373_v7 = vadd.f32 %v9881_v37, %v8016_v54  ;;  %v2733_v28 = vadd.f32 %v8049_v35, %v9890_v5  ;;  %v2364_v53 = vpop.f32.mrb[117].mxu1  ;;  %v2724_v51 = vpop.f32.mrb[135].mxu0  ;;  %v3222_v31 = vmax.f32 %v2730_v2, 0.0 }
 0x2b9   : > { %v2365_v15 = vadd.f32 %v9881_v37, %v2364_v53  ;;  %v2725_v52 = vadd.f32 %v9890_v5, %v2724_v51  ;;  %v8017_v23 = vpop.f32.mrb[118].mxu1  ;;  %8154 = vmatprep.mubr.bf16.mxu0 %v2595_v8  ;;  %v3220_v0 = vmax.f32 %v2722_v46, 0.0 }
 0x2ba   : > { %v3223_v36 = vmax.f32 %v2733_v28, 0.0  ;;  %v2376_v39 = vadd.f32 %v9881_v37, %v8017_v23  ;;  %v2367_v56 = vpop.f32.mrb[119].mxu1  ;;  %8155 = vmatmul.mubr.bf16.gmra.mrb[240].mxu0 %v2596_v17  ;;  %v2529_v26 = vmax.f32 %v2373_v7, 0.0 }
 0x2bb   : > { %v3221_v55 = vmax.f32 %v2725_v52, 0.0  ;;  %v2368_v14 = vadd.f32 %v9881_v37, %v2367_v56  ;;  %v2527_v29 = vmax.f32 %v2365_v15, 0.0 }
 0x2bc   : > { %v3347_v54 = vpack.c.bf16 %v3223_v36, %v3222_v31  ;;  %v2530_v35 = vmax.f32 %v2376_v39, 0.0 }
 0x2bd   : > { %v3346_v16 = vpack.c.bf16 %v3221_v55, %v3220_v0  ;;  %v2528_v53 = vmax.f32 %v2368_v14, 0.0  ;;  %v8052_v3 = vpop.f32.mrb[136].mxu0 }
 0x2be   : > { %v2598_v51 = vpack.c.bf16 %v2530_v35, %v2529_v26  ;;  %v2746_v8 = vadd.f32 %v8052_v3, %v9890_v5  ;;  %v2737_v2 = vpop.f32.mrb[137].mxu0 }
 0x2bf   : > { %v2597_v28 = vpack.c.bf16 %v2528_v53, %v2527_v29  ;;  %v2738_v23 = vadd.f32 %v9890_v5, %v2737_v2  ;;  %v8020_v1 = vpop.f32.mrb[120].mxu1  ;;  %v8053_v17 = vpop.f32.mrb[138].mxu0  ;;  %8190 = vmatprep.mubr.bf16.mxu1 %v3346_v16 }
 0x2c0   : > { %v2389_v46 = vadd.f32 %v9881_v37, %v8020_v1  ;;  %v2749_v7 = vadd.f32 %v8053_v17, %v9890_v5  ;;  %v2380_v52 = vpop.f32.mrb[121].mxu1  ;;  %v2740_v31 = vpop.f32.mrb[139].mxu0  ;;  %8191 = vmatmul.mubr.bf16.vlgmr.msra.gmra.mrb[128].mxu1 %v3347_v54  ;;  %v3226_v3 = vmax.f32 %v2746_v8, 0.0 }
 0x2c1   : > { %v2381_v15 = vadd.f32 %v9881_v37, %v2380_v52  ;;  %v2741_v36 = vadd.f32 %v9890_v5, %v2740_v31  ;;  %v8021_v39 = vpop.f32.mrb[122].mxu1  ;;  %8158 = vmatprep.mubr.bf16.mxu0 %v2597_v28  ;;  %v3224_v16 = vmax.f32 %v2738_v23, 0.0 }
 0x2c2   : > { %v3227_v29 = vmax.f32 %v2749_v7, 0.0  ;;  %v2392_v56 = vadd.f32 %v9881_v37, %v8021_v39  ;;  %v2383_v0 = vpop.f32.mrb[123].mxu1  ;;  %8159 = vmatmul.mubr.bf16.gmra.mrb[244].mxu0 %v2598_v51  ;;  %v2533_v14 = vmax.f32 %v2389_v46, 0.0 }
 0x2c3   : > { %v3225_v55 = vmax.f32 %v2741_v36, 0.0  ;;  %v2384_v1 = vadd.f32 %v9881_v37, %v2383_v0  ;;  %v2531_v54 = vmax.f32 %v2381_v15, 0.0 }
 0x2c4   : > { %v3349_v26 = vpack.c.bf16 %v3227_v29, %v3226_v3  ;;  %v2534_v35 = vmax.f32 %v2392_v56, 0.0 }
 0x2c5   : > { %v3348_v53 = vpack.c.bf16 %v3225_v55, %v3224_v16  ;;  %v2532_v2 = vmax.f32 %v2384_v1, 0.0  ;;  %v8056_v17 = vpop.f32.mrb[140].mxu0 }
 0x2c6   : > { %v2600_v52 = vpack.c.bf16 %v2534_v35, %v2533_v14  ;;  %v2762_v28 = vadd.f32 %v8056_v17, %v9890_v5  ;;  %v2753_v8 = vpop.f32.mrb[141].mxu0 }
 0x2c7   : > { %v2599_v7 = vpack.c.bf16 %v2532_v2, %v2531_v54  ;;  %v2754_v31 = vadd.f32 %v9890_v5, %v2753_v8  ;;  %v8024_v39 = vpop.f32.mrb[124].mxu1  ;;  %v8057_v51 = vpop.f32.mrb[142].mxu0  ;;  %8194 = vmatprep.mubr.bf16.mxu1 %v3348_v53 }
 0x2c8   : > { %v2405_v23 = vadd.f32 %v9881_v37, %v8024_v39  ;;  %v2765_v46 = vadd.f32 %v8057_v51, %v9890_v5  ;;  %v2396_v36 = vpop.f32.mrb[125].mxu1  ;;  %v2756_v3 = vpop.f32.mrb[143].mxu0  ;;  %8195 = vmatmul.mubr.bf16.gmra.mrb[132].mxu1 %v3349_v26  ;;  %v3230_v0 = vmax.f32 %v2762_v28, 0.0 }
 0x2c9   : > { %v2397_v15 = vadd.f32 %v9881_v37, %v2396_v36  ;;  %v2757_v29 = vadd.f32 %v9890_v5, %v2756_v3  ;;  %v8025_v56 = vpop.f32.mrb[126].mxu1  ;;  %8162 = vmatprep.mubr.bf16.mxu0 %v2599_v7  ;;  %v3228_v14 = vmax.f32 %v2754_v31, 0.0 }
 0x2ca   : > { %v3231_v16 = vmax.f32 %v2765_v46, 0.0  ;;  %v2408_v55 = vadd.f32 %v9881_v37, %v8025_v56  ;;  %v2399_v1 = vpop.f32.mrb[127].mxu1  ;;  %8163 = vmatmul.mubr.bf16.gmra.mrb[248].mxu0 %v2600_v52  ;;  %v2537_v53 = vmax.f32 %v2405_v23, 0.0 }
 0x2cb   : > { %v3229_v35 = vmax.f32 %v2757_v29, 0.0  ;;  %v2400_v54 = vadd.f32 %v9881_v37, %v2399_v1  ;;  %v2535_v26 = vmax.f32 %v2397_v15, 0.0 }
 0x2cc   : > { %v3351_v2 = vpack.c.bf16 %v3231_v16, %v3230_v0  ;;  %v2538_v17 = vmax.f32 %v2408_v55, 0.0 }
 0x2cd   : > { %v3350_v8 = vpack.c.bf16 %v3229_v35, %v3228_v14  ;;  %v2536_v39 = vmax.f32 %v2400_v54, 0.0  ;;  %v8060_v51 = vpop.f32.mrb[144].mxu0 }
 0x2ce   : > { %v2602_v36 = vpack.c.bf16 %v2538_v17, %v2537_v53  ;;  %v2778_v7 = vadd.f32 %v8060_v51, %v9890_v5  ;;  %v2769_v28 = vpop.f32.mrb[145].mxu0 }
 0x2cf   : > { %v2601_v46 = vpack.c.bf16 %v2536_v39, %v2535_v26  ;;  %v2770_v3 = vadd.f32 %v9890_v5, %v2769_v28  ;;  %v8061_v56 = vpop.f32.mrb[146].mxu0  ;;  %8198 = vmatprep.mubr.bf16.mxu1 %v3350_v8 }
 0x2d0   : > { %v2781_v52 = vadd.f32 %v8061_v56, %v9890_v5  ;;  %v2772_v31 = vpop.f32.mrb[147].mxu0  ;;  %8199 = vmatmul.mubr.bf16.gmra.mrb[136].mxu1 %v3351_v2  ;;  %v3234_v23 = vmax.f32 %v2778_v7, 0.0 }
 0x2d1   : > { %v2773_v37 = vadd.f32 %v9890_v5, %v2772_v31  ;;  %8166 = vmatprep.mubr.bf16.mxu0 %v2601_v46  ;;  %v3232_v29 = vmax.f32 %v2770_v3, 0.0 }
 0x2d2   : > { %v3235_v15 = vmax.f32 %v2781_v52, 0.0  ;;  %8167 = vmatmul.mubr.bf16.gmra.mrb[252].mxu0 %v2602_v36 }
 0x2d3   : > { %v3233_v0 = vmax.f32 %v2773_v37, 0.0  ;;  %8186 = vmatprep.mubr.bf16.mxu0 %v9902_v4 }
 0x2d4   : > { %v3353_v16 = vpack.c.bf16 %v3235_v15, %v3234_v23 }
 0x2d5   : > { %v3352_v55 = vpack.c.bf16 %v3233_v0, %v3232_v29  ;;  %v8064_v1 = vpop.f32.mrb[148].mxu0 }
 0x2d6   : > { %v2794_v14 = vadd.f32 %v8064_v1, %v9890_v5  ;;  %v2785_v35 = vpop.f32.mrb[149].mxu0 }
 0x2d7   : > { %v2786_v54 = vadd.f32 %v9890_v5, %v2785_v35  ;;  %v8065_v53 = vpop.f32.mrb[150].mxu0  ;;  %8202 = vmatprep.mubr.bf16.mxu1 %v3352_v55 }
 0x2d8   : > { %v2797_v2 = vadd.f32 %v8065_v53, %v9890_v5  ;;  %v2788_v17 = vpop.f32.mrb[151].mxu0  ;;  %8203 = vmatmul.mubr.bf16.gmra.mrb[140].mxu1 %v3353_v16  ;;  %v3238_v8 = vmax.f32 %v2794_v14, 0.0 }
 0x2d9   : > { %v2789_v26 = vadd.f32 %v9890_v5, %v2788_v17  ;;  %v3236_v4 = vmax.f32 %v2786_v54, 0.0 }
 0x2da   : > { %v3239_v39 = vmax.f32 %v2797_v2, 0.0  ;;  %8187 = vmatmul.mubr.bf16.vlgmr.msra.gmra.mrb[0].mxu0 %v9900_v57 }
 0x2db   : > { %v3237_v51 = vmax.f32 %v2789_v26, 0.0 }
 0x2dc   : > { %v3355_v36 = vpack.c.bf16 %v3239_v39, %v3238_v8 }
 0x2dd   : > { %v3354_v7 = vpack.c.bf16 %v3237_v51, %v3236_v4  ;;  %v8068_v28 = vpop.f32.mrb[152].mxu0 }
 0x2de   : > { %v2810_v46 = vadd.f32 %v8068_v28, %v9890_v5  ;;  %v2801_v3 = vpop.f32.mrb[153].mxu0 }
 0x2df   : > { %v2802_v56 = vadd.f32 %v9890_v5, %v2801_v3  ;;  %v8069_v52 = vpop.f32.mrb[154].mxu0  ;;  %8206 = vmatprep.mubr.bf16.mxu1 %v3354_v7 }
 0x2e0   : > { %v2813_v31 = vadd.f32 %v8069_v52, %v9890_v5  ;;  %v2804_v37 = vpop.f32.mrb[155].mxu0  ;;  %8207 = vmatmul.mubr.bf16.gmra.mrb[144].mxu1 %v3355_v36  ;;  %v3242_v15 = vmax.f32 %v2810_v46, 0.0 }
 0x2e1   : > { %v2805_v23 = vadd.f32 %v9890_v5, %v2804_v37  ;;  %v3240_v29 = vmax.f32 %v2802_v56, 0.0 }
 0x2e2   : > { %v3243_v57 = vmax.f32 %v2813_v31, 0.0 }
 0x2e3   : > { %v3241_v0 = vmax.f32 %v2805_v23, 0.0 }
 0x2e4   : > { %v3357_v16 = vpack.c.bf16 %v3243_v57, %v3242_v15 }
 0x2e5   : > { %v3356_v55 = vpack.c.bf16 %v3241_v0, %v3240_v29  ;;  %v8072_v1 = vpop.f32.mrb[156].mxu0 }
 0x2e6   : > { %v2826_v14 = vadd.f32 %v8072_v1, %v9890_v5  ;;  %v2817_v35 = vpop.f32.mrb[157].mxu0 }
 0x2e7   : > { %v2818_v54 = vadd.f32 %v9890_v5, %v2817_v35  ;;  %v8073_v53 = vpop.f32.mrb[158].mxu0  ;;  %8210 = vmatprep.mubr.bf16.mxu1 %v3356_v55 }
 0x2e8   : > { %v2829_v2 = vadd.f32 %v8073_v53, %v9890_v5  ;;  %v2820_v17 = vpop.f32.mrb[159].mxu0  ;;  %8211 = vmatmul.mubr.bf16.gmra.mrb[148].mxu1 %v3357_v16  ;;  %v3246_v8 = vmax.f32 %v2826_v14, 0.0 }
 0x2e9   : > { %v2821_v26 = vadd.f32 %v9890_v5, %v2820_v17  ;;  %v3244_v4 = vmax.f32 %v2818_v54, 0.0 }
 0x2ea   : > { %v3247_v39 = vmax.f32 %v2829_v2, 0.0 }
 0x2eb   : > { %v3245_v51 = vmax.f32 %v2821_v26, 0.0 }
 0x2ec   : > { %v3359_v36 = vpack.c.bf16 %v3247_v39, %v3246_v8 }
 0x2ed   : > { %v3358_v7 = vpack.c.bf16 %v3245_v51, %v3244_v4  ;;  %v8076_v28 = vpop.f32.mrb[160].mxu0 }
 0x2ee   : > { %v2842_v46 = vadd.f32 %v8076_v28, %v9890_v5  ;;  %v2833_v3 = vpop.f32.mrb[161].mxu0 }
 0x2ef   : > { %v2834_v56 = vadd.f32 %v9890_v5, %v2833_v3  ;;  %v8077_v52 = vpop.f32.mrb[162].mxu0  ;;  %8214 = vmatprep.mubr.bf16.mxu1 %v3358_v7 }
 0x2f0   : > { %v2845_v31 = vadd.f32 %v8077_v52, %v9890_v5  ;;  %v2836_v37 = vpop.f32.mrb[163].mxu0  ;;  %8215 = vmatmul.mubr.bf16.gmra.mrb[152].mxu1 %v3359_v36  ;;  %v3250_v15 = vmax.f32 %v2842_v46, 0.0 }
 0x2f1   : > { %v2837_v23 = vadd.f32 %v9890_v5, %v2836_v37  ;;  %v3248_v29 = vmax.f32 %v2834_v56, 0.0 }
 0x2f2   : > { %v3251_v57 = vmax.f32 %v2845_v31, 0.0 }
 0x2f3   : > { %v3249_v0 = vmax.f32 %v2837_v23, 0.0 }
 0x2f4   : > { %v3361_v16 = vpack.c.bf16 %v3251_v57, %v3250_v15 }
 0x2f5   : > { %v3360_v55 = vpack.c.bf16 %v3249_v0, %v3248_v29  ;;  %v8080_v1 = vpop.f32.mrb[164].mxu0 }
 0x2f6   : > { %v2858_v14 = vadd.f32 %v8080_v1, %v9890_v5  ;;  %v2849_v35 = vpop.f32.mrb[165].mxu0 }
 0x2f7   : > { %v2850_v54 = vadd.f32 %v9890_v5, %v2849_v35  ;;  %v8081_v53 = vpop.f32.mrb[166].mxu0  ;;  %8218 = vmatprep.mubr.bf16.mxu1 %v3360_v55 }
 0x2f8   : > { %v2861_v2 = vadd.f32 %v8081_v53, %v9890_v5  ;;  %v2852_v17 = vpop.f32.mrb[167].mxu0  ;;  %8219 = vmatmul.mubr.bf16.gmra.mrb[156].mxu1 %v3361_v16  ;;  %v3254_v8 = vmax.f32 %v2858_v14, 0.0 }
 0x2f9   : > { %v2853_v26 = vadd.f32 %v9890_v5, %v2852_v17  ;;  %v3252_v4 = vmax.f32 %v2850_v54, 0.0 }
 0x2fa   : > { %v3255_v39 = vmax.f32 %v2861_v2, 0.0 }
 0x2fb   : > { %v3253_v51 = vmax.f32 %v2853_v26, 0.0 }
 0x2fc   : > { %v3363_v36 = vpack.c.bf16 %v3255_v39, %v3254_v8 }
 0x2fd   : > { %v3362_v7 = vpack.c.bf16 %v3253_v51, %v3252_v4  ;;  %v8084_v28 = vpop.f32.mrb[168].mxu0 }
 0x2fe   : > { %v2874_v46 = vadd.f32 %v8084_v28, %v9890_v5  ;;  %v2865_v3 = vpop.f32.mrb[169].mxu0 }
 0x2ff   : > { %v2866_v56 = vadd.f32 %v9890_v5, %v2865_v3  ;;  %v8085_v52 = vpop.f32.mrb[170].mxu0  ;;  %8222 = vmatprep.mubr.bf16.mxu1 %v3362_v7 }
 0x300   : > { %v2877_v31 = vadd.f32 %v8085_v52, %v9890_v5  ;;  %v2868_v37 = vpop.f32.mrb[171].mxu0  ;;  %8223 = vmatmul.mubr.bf16.gmra.mrb[160].mxu1 %v3363_v36  ;;  %v3258_v15 = vmax.f32 %v2874_v46, 0.0 }
 0x301   : > { %v2869_v23 = vadd.f32 %v9890_v5, %v2868_v37  ;;  %v3256_v29 = vmax.f32 %v2866_v56, 0.0 }
 0x302   : > { %v3259_v57 = vmax.f32 %v2877_v31, 0.0 }
 0x303   : > { %v3257_v0 = vmax.f32 %v2869_v23, 0.0 }
 0x304   : > { %v3365_v16 = vpack.c.bf16 %v3259_v57, %v3258_v15 }
 0x305   : > { %v3364_v55 = vpack.c.bf16 %v3257_v0, %v3256_v29  ;;  %v8088_v1 = vpop.f32.mrb[172].mxu0 }
 0x306   : > { %v2890_v14 = vadd.f32 %v8088_v1, %v9890_v5  ;;  %v2881_v35 = vpop.f32.mrb[173].mxu0 }
 0x307   : > { %v2882_v54 = vadd.f32 %v9890_v5, %v2881_v35  ;;  %v8089_v53 = vpop.f32.mrb[174].mxu0  ;;  %8226 = vmatprep.mubr.bf16.mxu1 %v3364_v55 }
 0x308   : > { %v2893_v2 = vadd.f32 %v8089_v53, %v9890_v5  ;;  %v2884_v17 = vpop.f32.mrb[175].mxu0  ;;  %8227 = vmatmul.mubr.bf16.gmra.mrb[164].mxu1 %v3365_v16  ;;  %v3262_v8 = vmax.f32 %v2890_v14, 0.0 }
 0x309   : > { %v2885_v26 = vadd.f32 %v9890_v5, %v2884_v17  ;;  %v3260_v4 = vmax.f32 %v2882_v54, 0.0 }
 0x30a   : > { %v3263_v39 = vmax.f32 %v2893_v2, 0.0 }
 0x30b   : > { %v3261_v51 = vmax.f32 %v2885_v26, 0.0 }
 0x30c   : > { %v3367_v36 = vpack.c.bf16 %v3263_v39, %v3262_v8 }
 0x30d   : > { %v3366_v7 = vpack.c.bf16 %v3261_v51, %v3260_v4  ;;  %v8092_v28 = vpop.f32.mrb[176].mxu0 }
 0x30e   : > { %v2906_v46 = vadd.f32 %v8092_v28, %v9890_v5  ;;  %v2897_v3 = vpop.f32.mrb[177].mxu0 }
 0x30f   : > { %v2898_v56 = vadd.f32 %v9890_v5, %v2897_v3  ;;  %v8093_v52 = vpop.f32.mrb[178].mxu0  ;;  %8230 = vmatprep.mubr.bf16.mxu1 %v3366_v7 }
 0x310   : > { %v2909_v31 = vadd.f32 %v8093_v52, %v9890_v5  ;;  %v2900_v37 = vpop.f32.mrb[179].mxu0  ;;  %8231 = vmatmul.mubr.bf16.gmra.mrb[168].mxu1 %v3367_v36  ;;  %v3266_v15 = vmax.f32 %v2906_v46, 0.0 }
 0x311   : > { %v2901_v23 = vadd.f32 %v9890_v5, %v2900_v37  ;;  %v3264_v29 = vmax.f32 %v2898_v56, 0.0 }
 0x312   : > { %v3267_v57 = vmax.f32 %v2909_v31, 0.0 }
 0x313   : > { %v3265_v0 = vmax.f32 %v2901_v23, 0.0 }
 0x314   : > { %v3369_v16 = vpack.c.bf16 %v3267_v57, %v3266_v15 }
 0x315   : > { %v3368_v55 = vpack.c.bf16 %v3265_v0, %v3264_v29  ;;  %v8096_v1 = vpop.f32.mrb[180].mxu0 }
 0x316   : > { %v2922_v14 = vadd.f32 %v8096_v1, %v9890_v5  ;;  %v2913_v35 = vpop.f32.mrb[181].mxu0 }
 0x317   : > { %v2914_v54 = vadd.f32 %v9890_v5, %v2913_v35  ;;  %v8097_v53 = vpop.f32.mrb[182].mxu0  ;;  %8234 = vmatprep.mubr.bf16.mxu1 %v3368_v55 }
 0x318   : > { %v2925_v2 = vadd.f32 %v8097_v53, %v9890_v5  ;;  %v2916_v17 = vpop.f32.mrb[183].mxu0  ;;  %8235 = vmatmul.mubr.bf16.gmra.mrb[172].mxu1 %v3369_v16  ;;  %v3270_v8 = vmax.f32 %v2922_v14, 0.0 }
 0x319   : > { %v2917_v26 = vadd.f32 %v9890_v5, %v2916_v17  ;;  %v3268_v4 = vmax.f32 %v2914_v54, 0.0 }
 0x31a   : > { %v3271_v39 = vmax.f32 %v2925_v2, 0.0 }
 0x31b   : > { %v3269_v51 = vmax.f32 %v2917_v26, 0.0 }
 0x31c   : > { %v3371_v36 = vpack.c.bf16 %v3271_v39, %v3270_v8 }
 0x31d   : > { %v3370_v7 = vpack.c.bf16 %v3269_v51, %v3268_v4  ;;  %v8100_v28 = vpop.f32.mrb[184].mxu0 }
 0x31e   : > { %v2938_v46 = vadd.f32 %v8100_v28, %v9890_v5  ;;  %v2929_v3 = vpop.f32.mrb[185].mxu0 }
 0x31f   : > { %v2930_v56 = vadd.f32 %v9890_v5, %v2929_v3  ;;  %v8101_v52 = vpop.f32.mrb[186].mxu0  ;;  %8238 = vmatprep.mubr.bf16.mxu1 %v3370_v7 }
 0x320   : > { %v2941_v31 = vadd.f32 %v8101_v52, %v9890_v5  ;;  %v2932_v37 = vpop.f32.mrb[187].mxu0  ;;  %8239 = vmatmul.mubr.bf16.gmra.mrb[176].mxu1 %v3371_v36  ;;  %v3274_v15 = vmax.f32 %v2938_v46, 0.0 }
 0x321   : > { %v2933_v23 = vadd.f32 %v9890_v5, %v2932_v37  ;;  %v3272_v29 = vmax.f32 %v2930_v56, 0.0 }
 0x322   : > { %v3275_v57 = vmax.f32 %v2941_v31, 0.0 }
 0x323   : > { %v3273_v0 = vmax.f32 %v2933_v23, 0.0 }
 0x324   : > { %v3373_v16 = vpack.c.bf16 %v3275_v57, %v3274_v15 }
 0x325   : > { %v3372_v55 = vpack.c.bf16 %v3273_v0, %v3272_v29  ;;  %v8104_v1 = vpop.f32.mrb[188].mxu0 }
 0x326   : > { %v2954_v14 = vadd.f32 %v8104_v1, %v9890_v5  ;;  %v2945_v35 = vpop.f32.mrb[189].mxu0 }
 0x327   : > { %v2946_v54 = vadd.f32 %v9890_v5, %v2945_v35  ;;  %v8105_v53 = vpop.f32.mrb[190].mxu0  ;;  %8242 = vmatprep.mubr.bf16.mxu1 %v3372_v55 }
 0x328   : > { %v2957_v2 = vadd.f32 %v8105_v53, %v9890_v5  ;;  %v2948_v17 = vpop.f32.mrb[191].mxu0  ;;  %8243 = vmatmul.mubr.bf16.gmra.mrb[180].mxu1 %v3373_v16  ;;  %v3278_v8 = vmax.f32 %v2954_v14, 0.0 }
 0x329   : > { %v2949_v26 = vadd.f32 %v9890_v5, %v2948_v17  ;;  %v3276_v4 = vmax.f32 %v2946_v54, 0.0 }
 0x32a   : > { %v3279_v39 = vmax.f32 %v2957_v2, 0.0 }
 0x32b   : > { %v3277_v51 = vmax.f32 %v2949_v26, 0.0 }
 0x32c   : > { %v3375_v36 = vpack.c.bf16 %v3279_v39, %v3278_v8 }
 0x32d   : > { %v3374_v7 = vpack.c.bf16 %v3277_v51, %v3276_v4  ;;  %v8108_v28 = vpop.f32.mrb[192].mxu0 }
 0x32e   : > { %v2970_v46 = vadd.f32 %v8108_v28, %v9890_v5  ;;  %v2961_v3 = vpop.f32.mrb[193].mxu0 }
 0x32f   : > { %v2962_v56 = vadd.f32 %v9890_v5, %v2961_v3  ;;  %v8109_v52 = vpop.f32.mrb[194].mxu0  ;;  %8246 = vmatprep.mubr.bf16.mxu1 %v3374_v7 }
 0x330   : > { %v2973_v31 = vadd.f32 %v8109_v52, %v9890_v5  ;;  %v2964_v37 = vpop.f32.mrb[195].mxu0  ;;  %8247 = vmatmul.mubr.bf16.gmra.mrb[184].mxu1 %v3375_v36  ;;  %v3282_v15 = vmax.f32 %v2970_v46, 0.0 }
 0x331   : > { %v2965_v23 = vadd.f32 %v9890_v5, %v2964_v37  ;;  %v3280_v29 = vmax.f32 %v2962_v56, 0.0 }
 0x332   : > { %v3283_v57 = vmax.f32 %v2973_v31, 0.0 }
 0x333   : > { %v3281_v0 = vmax.f32 %v2965_v23, 0.0 }
 0x334   : > { %v3377_v16 = vpack.c.bf16 %v3283_v57, %v3282_v15 }
 0x335   : > { %v3376_v55 = vpack.c.bf16 %v3281_v0, %v3280_v29  ;;  %v8112_v1 = vpop.f32.mrb[196].mxu0 }
 0x336   : > { %v2986_v14 = vadd.f32 %v8112_v1, %v9890_v5  ;;  %v2977_v35 = vpop.f32.mrb[197].mxu0 }
 0x337   : > { %v2978_v54 = vadd.f32 %v9890_v5, %v2977_v35  ;;  %v8113_v53 = vpop.f32.mrb[198].mxu0  ;;  %8250 = vmatprep.mubr.bf16.mxu1 %v3376_v55 }
 0x338   : > { %v2989_v2 = vadd.f32 %v8113_v53, %v9890_v5  ;;  %v2980_v17 = vpop.f32.mrb[199].mxu0  ;;  %8251 = vmatmul.mubr.bf16.gmra.mrb[188].mxu1 %v3377_v16  ;;  %v3286_v8 = vmax.f32 %v2986_v14, 0.0 }
 0x339   : > { %v2981_v26 = vadd.f32 %v9890_v5, %v2980_v17  ;;  %v3284_v4 = vmax.f32 %v2978_v54, 0.0 }
 0x33a   : > { %v3287_v39 = vmax.f32 %v2989_v2, 0.0 }
 0x33b   : > { %v3285_v51 = vmax.f32 %v2981_v26, 0.0 }
 0x33c   : > { %v3379_v36 = vpack.c.bf16 %v3287_v39, %v3286_v8 }
 0x33d   : > { %v3378_v7 = vpack.c.bf16 %v3285_v51, %v3284_v4  ;;  %v8116_v28 = vpop.f32.mrb[200].mxu0 }
 0x33e   : > { %v3002_v46 = vadd.f32 %v8116_v28, %v9890_v5  ;;  %v2993_v3 = vpop.f32.mrb[201].mxu0 }
 0x33f   : > { %v2994_v56 = vadd.f32 %v9890_v5, %v2993_v3  ;;  %v8117_v52 = vpop.f32.mrb[202].mxu0  ;;  %8254 = vmatprep.mubr.bf16.mxu1 %v3378_v7 }
 0x340   : > { %v3005_v31 = vadd.f32 %v8117_v52, %v9890_v5  ;;  %v2996_v37 = vpop.f32.mrb[203].mxu0  ;;  %8255 = vmatmul.mubr.bf16.gmra.mrb[192].mxu1 %v3379_v36  ;;  %v3290_v15 = vmax.f32 %v3002_v46, 0.0 }
 0x341   : > { %v2997_v23 = vadd.f32 %v9890_v5, %v2996_v37  ;;  %v3288_v29 = vmax.f32 %v2994_v56, 0.0 }
 0x342   : > { %v3291_v57 = vmax.f32 %v3005_v31, 0.0 }
 0x343   : > { %v3289_v0 = vmax.f32 %v2997_v23, 0.0 }
 0x344   : > { %v3381_v16 = vpack.c.bf16 %v3291_v57, %v3290_v15 }
 0x345   : > { %v3380_v55 = vpack.c.bf16 %v3289_v0, %v3288_v29  ;;  %v8120_v1 = vpop.f32.mrb[204].mxu0 }
 0x346   : > { %v3018_v14 = vadd.f32 %v8120_v1, %v9890_v5  ;;  %v3009_v35 = vpop.f32.mrb[205].mxu0 }
 0x347   : > { %v3010_v54 = vadd.f32 %v9890_v5, %v3009_v35  ;;  %v8121_v53 = vpop.f32.mrb[206].mxu0  ;;  %8258 = vmatprep.mubr.bf16.mxu1 %v3380_v55 }
 0x348   : > { %v3021_v2 = vadd.f32 %v8121_v53, %v9890_v5  ;;  %v3012_v17 = vpop.f32.mrb[207].mxu0  ;;  %8259 = vmatmul.mubr.bf16.gmra.mrb[196].mxu1 %v3381_v16  ;;  %v3294_v8 = vmax.f32 %v3018_v14, 0.0 }
 0x349   : > { %v3013_v26 = vadd.f32 %v9890_v5, %v3012_v17  ;;  %v3292_v4 = vmax.f32 %v3010_v54, 0.0 }
 0x34a   : > { %v3295_v39 = vmax.f32 %v3021_v2, 0.0 }
 0x34b   : > { %v3293_v51 = vmax.f32 %v3013_v26, 0.0 }
 0x34c   : > { %v3383_v36 = vpack.c.bf16 %v3295_v39, %v3294_v8 }
 0x34d   : > { %v3382_v7 = vpack.c.bf16 %v3293_v51, %v3292_v4  ;;  %v8124_v28 = vpop.f32.mrb[208].mxu0 }
 0x34e   : > { %v3034_v46 = vadd.f32 %v8124_v28, %v9890_v5  ;;  %v3025_v3 = vpop.f32.mrb[209].mxu0 }
 0x34f   : > { %v3026_v56 = vadd.f32 %v9890_v5, %v3025_v3  ;;  %v8125_v52 = vpop.f32.mrb[210].mxu0  ;;  %8262 = vmatprep.mubr.bf16.mxu1 %v3382_v7 }
 0x350   : > { %v3037_v31 = vadd.f32 %v8125_v52, %v9890_v5  ;;  %v3028_v37 = vpop.f32.mrb[211].mxu0  ;;  %8263 = vmatmul.mubr.bf16.gmra.mrb[200].mxu1 %v3383_v36  ;;  %v3298_v15 = vmax.f32 %v3034_v46, 0.0 }
 0x351   : > { %v3029_v23 = vadd.f32 %v9890_v5, %v3028_v37  ;;  %v3296_v29 = vmax.f32 %v3026_v56, 0.0 }
 0x352   : > { %v3299_v57 = vmax.f32 %v3037_v31, 0.0 }
 0x353   : > { %v3297_v0 = vmax.f32 %v3029_v23, 0.0 }
 0x354   : > { %v3385_v16 = vpack.c.bf16 %v3299_v57, %v3298_v15 }
 0x355   : > { %v3384_v55 = vpack.c.bf16 %v3297_v0, %v3296_v29  ;;  %v8128_v1 = vpop.f32.mrb[212].mxu0 }
 0x356   : > { %v3050_v14 = vadd.f32 %v8128_v1, %v9890_v5  ;;  %v3041_v35 = vpop.f32.mrb[213].mxu0 }
 0x357   : > { %v3042_v54 = vadd.f32 %v9890_v5, %v3041_v35  ;;  %v8129_v53 = vpop.f32.mrb[214].mxu0  ;;  %8266 = vmatprep.mubr.bf16.mxu1 %v3384_v55 }
 0x358   : > { %v3053_v2 = vadd.f32 %v8129_v53, %v9890_v5  ;;  %v3044_v17 = vpop.f32.mrb[215].mxu0  ;;  %8267 = vmatmul.mubr.bf16.gmra.mrb[204].mxu1 %v3385_v16  ;;  %v3302_v8 = vmax.f32 %v3050_v14, 0.0 }
 0x359   : > { %v3045_v26 = vadd.f32 %v9890_v5, %v3044_v17  ;;  %v3300_v4 = vmax.f32 %v3042_v54, 0.0 }
 0x35a   : > { %v3303_v39 = vmax.f32 %v3053_v2, 0.0 }
 0x35b   : > { %v3301_v51 = vmax.f32 %v3045_v26, 0.0 }
 0x35c   : > { %v3387_v36 = vpack.c.bf16 %v3303_v39, %v3302_v8 }
 0x35d   : > { %v3386_v7 = vpack.c.bf16 %v3301_v51, %v3300_v4  ;;  %v8132_v28 = vpop.f32.mrb[216].mxu0 }
 0x35e   : > { %v3066_v46 = vadd.f32 %v8132_v28, %v9890_v5  ;;  %v3057_v3 = vpop.f32.mrb[217].mxu0 }
 0x35f   : > { %v3058_v56 = vadd.f32 %v9890_v5, %v3057_v3  ;;  %v8133_v52 = vpop.f32.mrb[218].mxu0  ;;  %8270 = vmatprep.mubr.bf16.mxu1 %v3386_v7 }
 0x360   : > { %v3069_v31 = vadd.f32 %v8133_v52, %v9890_v5  ;;  %v3060_v37 = vpop.f32.mrb[219].mxu0  ;;  %8271 = vmatmul.mubr.bf16.gmra.mrb[208].mxu1 %v3387_v36  ;;  %v3306_v15 = vmax.f32 %v3066_v46, 0.0 }
 0x361   : > { %v3061_v23 = vadd.f32 %v9890_v5, %v3060_v37  ;;  %v3304_v29 = vmax.f32 %v3058_v56, 0.0 }
 0x362   : > { %v3307_v57 = vmax.f32 %v3069_v31, 0.0 }
 0x363   : > { %v3305_v0 = vmax.f32 %v3061_v23, 0.0 }
 0x364   : > { %v3389_v16 = vpack.c.bf16 %v3307_v57, %v3306_v15 }
 0x365   : > { %v3388_v55 = vpack.c.bf16 %v3305_v0, %v3304_v29  ;;  %v8136_v1 = vpop.f32.mrb[220].mxu0 }
 0x366   : > { %v3082_v14 = vadd.f32 %v8136_v1, %v9890_v5  ;;  %v3073_v35 = vpop.f32.mrb[221].mxu0 }
 0x367   : > { %v3074_v54 = vadd.f32 %v9890_v5, %v3073_v35  ;;  %v8137_v53 = vpop.f32.mrb[222].mxu0  ;;  %8274 = vmatprep.mubr.bf16.mxu1 %v3388_v55 }
 0x368   : > { %v3085_v2 = vadd.f32 %v8137_v53, %v9890_v5  ;;  %v3076_v17 = vpop.f32.mrb[223].mxu0  ;;  %8275 = vmatmul.mubr.bf16.gmra.mrb[212].mxu1 %v3389_v16  ;;  %v3310_v8 = vmax.f32 %v3082_v14, 0.0 }
 0x369   : > { %v3077_v26 = vadd.f32 %v9890_v5, %v3076_v17  ;;  %v3308_v4 = vmax.f32 %v3074_v54, 0.0 }
 0x36a   : > { %v3311_v39 = vmax.f32 %v3085_v2, 0.0 }
 0x36b   : > { %v3309_v51 = vmax.f32 %v3077_v26, 0.0 }
 0x36c   : > { %v3391_v36 = vpack.c.bf16 %v3311_v39, %v3310_v8 }
 0x36d   : > { %v3390_v7 = vpack.c.bf16 %v3309_v51, %v3308_v4  ;;  %v8140_v28 = vpop.f32.mrb[224].mxu0 }
 0x36e   : > { %v3098_v46 = vadd.f32 %v8140_v28, %v9890_v5  ;;  %v3089_v3 = vpop.f32.mrb[225].mxu0 }
 0x36f   : > { %v3090_v56 = vadd.f32 %v9890_v5, %v3089_v3  ;;  %v8141_v52 = vpop.f32.mrb[226].mxu0  ;;  %8278 = vmatprep.mubr.bf16.mxu1 %v3390_v7 }
 0x370   : > { %v3101_v31 = vadd.f32 %v8141_v52, %v9890_v5  ;;  %v3092_v37 = vpop.f32.mrb[227].mxu0  ;;  %8279 = vmatmul.mubr.bf16.gmra.mrb[216].mxu1 %v3391_v36  ;;  %v3314_v15 = vmax.f32 %v3098_v46, 0.0 }
 0x371   : > { %v3093_v23 = vadd.f32 %v9890_v5, %v3092_v37  ;;  %v3312_v29 = vmax.f32 %v3090_v56, 0.0 }
 0x372   : > { %v3315_v57 = vmax.f32 %v3101_v31, 0.0 }
 0x373   : > { %v3313_v0 = vmax.f32 %v3093_v23, 0.0 }
 0x374   : > { %v3393_v16 = vpack.c.bf16 %v3315_v57, %v3314_v15 }
 0x375   : > { %v3392_v55 = vpack.c.bf16 %v3313_v0, %v3312_v29  ;;  %v8144_v1 = vpop.f32.mrb[228].mxu0 }
 0x376   : > { %v3114_v14 = vadd.f32 %v8144_v1, %v9890_v5  ;;  %v3105_v35 = vpop.f32.mrb[229].mxu0 }
 0x377   : > { %v3106_v54 = vadd.f32 %v9890_v5, %v3105_v35  ;;  %v8145_v53 = vpop.f32.mrb[230].mxu0  ;;  %8282 = vmatprep.mubr.bf16.mxu1 %v3392_v55 }
 0x378   : > { %v3117_v2 = vadd.f32 %v8145_v53, %v9890_v5  ;;  %v3108_v17 = vpop.f32.mrb[231].mxu0  ;;  %8283 = vmatmul.mubr.bf16.gmra.mrb[220].mxu1 %v3393_v16  ;;  %v3318_v8 = vmax.f32 %v3114_v14, 0.0 }
 0x379   : > { %v3109_v26 = vadd.f32 %v9890_v5, %v3108_v17  ;;  %v3316_v4 = vmax.f32 %v3106_v54, 0.0 }
 0x37a   : > { %v3319_v39 = vmax.f32 %v3117_v2, 0.0 }
 0x37b   : > { %v3317_v51 = vmax.f32 %v3109_v26, 0.0  ;;  %v10028_v26 = vld [vmem:[%s12343_s6 + $0x1] ss:$0 sm:$0xff] }
 0x37c   : > { %v3395_v36 = vpack.c.bf16 %v3319_v39, %v3318_v8 }
 0x37d   : > { %v3394_v7 = vpack.c.bf16 %v3317_v51, %v3316_v4  ;;  %v8148_v28 = vpop.f32.mrb[232].mxu0 }
 0x37e   : > { %v3130_v46 = vadd.f32 %v8148_v28, %v9890_v5  ;;  %v3121_v3 = vpop.f32.mrb[233].mxu0 }
 0x37f   : > { %v3122_v56 = vadd.f32 %v9890_v5, %v3121_v3  ;;  %v8149_v52 = vpop.f32.mrb[234].mxu0  ;;  %8286 = vmatprep.mubr.bf16.mxu1 %v3394_v7 }
 0x380   : > { %v3133_v31 = vadd.f32 %v8149_v52, %v9890_v5  ;;  %v3124_v37 = vpop.f32.mrb[235].mxu0  ;;  %8287 = vmatmul.mubr.bf16.gmra.mrb[224].mxu1 %v3395_v36  ;;  %v3322_v15 = vmax.f32 %v3130_v46, 0.0 }
 0x381   : > { %v3125_v23 = vadd.f32 %v9890_v5, %v3124_v37  ;;  %v3320_v29 = vmax.f32 %v3122_v56, 0.0 }
 0x382   : > { %v3323_v57 = vmax.f32 %v3133_v31, 0.0 }
 0x383   : > { %v3321_v0 = vmax.f32 %v3125_v23, 0.0 }
 0x384   : > { %v3397_v16 = vpack.c.bf16 %v3323_v57, %v3322_v15  ;;  %v10038_v15 = vld [vmem:[%s12343_s6 + $0x2] ss:$0 sm:$0xff] }
 0x385   : > { %v3396_v55 = vpack.c.bf16 %v3321_v0, %v3320_v29  ;;  %v8152_v1 = vpop.f32.mrb[236].mxu0 }
 0x386   : > { %v3146_v14 = vadd.f32 %v8152_v1, %v9890_v5  ;;  %v3137_v35 = vpop.f32.mrb[237].mxu0 }
 0x387   : > { %v3138_v54 = vadd.f32 %v9890_v5, %v3137_v35  ;;  %v8153_v53 = vpop.f32.mrb[238].mxu0  ;;  %8290 = vmatprep.mubr.bf16.mxu1 %v3396_v55 }
 0x388   : > { %v3149_v2 = vadd.f32 %v8153_v53, %v9890_v5  ;;  %v3140_v17 = vpop.f32.mrb[239].mxu0  ;;  %8291 = vmatmul.mubr.bf16.gmra.mrb[228].mxu1 %v3397_v16  ;;  %v3326_v39 = vmax.f32 %v3146_v14, 0.0 }
 0x389   : > { %v3141_v8 = vadd.f32 %v10028_v26, %v3140_v17  ;;  %v3324_v51 = vmax.f32 %v3138_v54, 0.0 }
 0x38a   : > { %v3327_v4 = vmax.f32 %v3149_v2, 0.0 }
 0x38b   : > { %v3325_v36 = vmax.f32 %v3141_v8, 0.0 }
 0x38c   : > { %v3399_v7 = vpack.c.bf16 %v3327_v4, %v3326_v39 }
 0x38d   : > { %v3398_v28 = vpack.c.bf16 %v3325_v36, %v3324_v51  ;;  %v8156_v46 = vpop.f32.mrb[240].mxu0 }
 0x38e   : > { %v3162_v3 = vadd.f32 %v10028_v26, %v8156_v46  ;;  %v3153_v56 = vpop.f32.mrb[241].mxu0 }
 0x38f   : > { %v3154_v5 = vadd.f32 %v10028_v26, %v3153_v56  ;;  %v8157_v52 = vpop.f32.mrb[242].mxu0  ;;  %8294 = vmatprep.mubr.bf16.mxu1 %v3398_v28 }
 0x390   : > { %v3165_v31 = vadd.f32 %v10028_v26, %v8157_v52  ;;  %v3156_v37 = vpop.f32.mrb[243].mxu0  ;;  %8295 = vmatmul.mubr.bf16.gmra.mrb[232].mxu1 %v3399_v7  ;;  %v3330_v57 = vmax.f32 %v3162_v3, 0.0 }
 0x391   : > { %v3157_v23 = vadd.f32 %v10028_v26, %v3156_v37  ;;  %v3328_v0 = vmax.f32 %v3154_v5, 0.0 }
 0x392   : > { %v3331_v29 = vmax.f32 %v3165_v31, 0.0 }
 0x393   : > { %v3329_v16 = vmax.f32 %v3157_v23, 0.0  ;;  %v8192_v55 = vpop.f32.mrb[128].mxu1 }
 0x394   : > { %v3401_v1 = vpack.c.bf16 %v3331_v29, %v3330_v57  ;;  %v3535_v14 = vadd.f32 %v8192_v55, %v10038_v15  ;;  %v3526_v35 = vpop.f32.mrb[129].mxu1 }
 0x395   : > { %v3400_v54 = vpack.c.bf16 %v3329_v16, %v3328_v0  ;;  %v8160_v53 = vpop.f32.mrb[244].mxu0  ;;  %v8193_v2 = vpop.f32.mrb[130].mxu1  ;;  %v3527_v17 = vadd.f32 %v10038_v15, %v3526_v35 }
 0x396   : > { %v3178_v8 = vadd.f32 %v10028_v26, %v8160_v53  ;;  %v3538_v39 = vadd.f32 %v8193_v2, %v10038_v15  ;;  %v3169_v4 = vpop.f32.mrb[245].mxu0  ;;  %v3529_v51 = vpop.f32.mrb[131].mxu1  ;;  %v10045_v36 = vadd.f32 %v3535_v14, %v9147_v44 }
 0x397   : > { %v3170_v7 = vadd.f32 %v10028_v26, %v3169_v4  ;;  %v8161_v28 = vpop.f32.mrb[246].mxu0  ;;  %8298 = vmatprep.mubr.bf16.mxu1 %v3400_v54  ;;  %v3530_v46 = vadd.f32 %v10038_v15, %v3529_v51  ;;  %v10057_v37 = vadd.f32 %v3527_v17, %v9141_v42 }
 0x398   : > { %v3181_v3 = vadd.f32 %v10028_v26, %v8161_v28  ;;  %v3172_v56 = vpop.f32.mrb[247].mxu0  ;;  %8299 = vmatmul.mubr.bf16.gmra.mrb[236].mxu1 %v3401_v1  ;;  %4161 = vadd.xlane.f32.xlu0 %v10045_v36  ;;  %v10052_v5 = vadd.f32 %v3538_v39, %v9138_v40  ;;  %v3334_v31 = vmax.f32 %v3178_v8, 0.0 }
 0x399   : > { %v3173_v52 = vadd.f32 %v10028_v26, %v3172_v56  ;;  %v3332_v23 = vmax.f32 %v3170_v7, 0.0  ;;  %v10062_v40 = vadd.f32 %v3530_v46, %v9144_v43 }
 0x39a   : > { %v3335_v44 = vmax.f32 %v3181_v3, 0.0  ;;  %4163 = vadd.xlane.f32.xlu1 %v10052_v5 }
 0x39b   : > { %v3333_v57 = vmax.f32 %v3173_v52, 0.0  ;;  %v8196_v29 = vpop.f32.mrb[132].mxu1 }
 0x39c   : > { %v3403_v0 = vpack.c.bf16 %v3335_v44, %v3334_v31  ;;  %v3551_v16 = vadd.f32 %v8196_v29, %v10038_v15  ;;  %v3542_v55 = vpop.f32.mrb[133].mxu1  ;;  %4157 = vadd.xlane.f32.xlu0 %v10057_v37 }
 0x39d   : > { %v3402_v1 = vpack.c.bf16 %v3333_v57, %v3332_v23  ;;  %v8164_v14 = vpop.f32.mrb[248].mxu0  ;;  %v8197_v35 = vpop.f32.mrb[134].mxu1  ;;  %v3543_v54 = vadd.f32 %v10038_v15, %v3542_v55 }
 0x39e   : > { %v3194_v42 = vadd.f32 %v10028_v26, %v8164_v14  ;;  %v3554_v53 = vadd.f32 %v8197_v35, %v10038_v15  ;;  %v3185_v2 = vpop.f32.mrb[249].mxu0  ;;  %v3545_v17 = vpop.f32.mrb[135].mxu1  ;;  %4159 = vadd.xlane.f32.xlu1 %v10062_v40  ;;  %v10069_v8 = vadd.f32 %v3551_v16, %v9177_v62 }
 0x39f   : > { %v3186_v39 = vadd.f32 %v10028_v26, %v3185_v2  ;;  %v8165_v43 = vpop.f32.mrb[250].mxu0  ;;  %8302 = vmatprep.mubr.bf16.mxu1 %v3402_v1  ;;  %v3546_v4 = vadd.f32 %v10038_v15, %v3545_v17  ;;  %v10081_v56 = vadd.f32 %v3543_v54, %v9171_v60 }
 0x3a0   : > { %v3197_v51 = vadd.f32 %v10028_v26, %v8165_v43  ;;  %v3188_v7 = vpop.f32.mrb[251].mxu0  ;;  %8303 = vmatmul.mubr.bf16.gmra.mrb[240].mxu1 %v3403_v0  ;;  %4169 = vadd.xlane.f32.xlu0 %v10069_v8  ;;  %v10076_v28 = vadd.f32 %v3554_v53, %v9168_v58  ;;  %v3338_v3 = vmax.f32 %v3194_v42, 0.0 }
 0x3a1   : > { %v3189_v46 = vadd.f32 %v10028_v26, %v3188_v7  ;;  %v3336_v52 = vmax.f32 %v3186_v39, 0.0  ;;  %v10086_v58 = vadd.f32 %v3546_v4, %v9174_v61 }
 0x3a2   : > { %v3339_v62 = vmax.f32 %v3197_v51, 0.0  ;;  %4171 = vadd.xlane.f32.xlu1 %v10076_v28 }
 0x3a3   : > { %v3337_v31 = vmax.f32 %v3189_v46, 0.0  ;;  %v8200_v44 = vpop.f32.mrb[136].mxu1 }
 0x3a4   : > { %v3405_v23 = vpack.c.bf16 %v3339_v62, %v3338_v3  ;;  %v3567_v57 = vadd.f32 %v8200_v44, %v10038_v15  ;;  %v3558_v29 = vpop.f32.mrb[137].mxu1  ;;  %4165 = vadd.xlane.f32.xlu0 %v10081_v56 }
 0x3a5   : > { %v3404_v0 = vpack.c.bf16 %v3337_v31, %v3336_v52  ;;  %v8168_v16 = vpop.f32.mrb[252].mxu0  ;;  %v8201_v55 = vpop.f32.mrb[138].mxu1  ;;  %v3559_v1 = vadd.f32 %v10038_v15, %v3558_v29 }
 0x3a6   : > { %v3210_v60 = vadd.f32 %v10028_v26, %v8168_v16  ;;  %v3570_v14 = vadd.f32 %v8201_v55, %v10038_v15  ;;  %v3561_v35 = vpop.f32.mrb[139].mxu1  ;;  %4167 = vadd.xlane.f32.xlu1 %v10086_v58  ;;  %v3201_v54 = vpop.f32.mrb[253].mxu0  ;;  %v10093_v42 = vadd.f32 %v3567_v57, %v9207_v20 }
 0x3a7   : > { %v3202_v53 = vadd.f32 %v10028_v26, %v3201_v54  ;;  %v8169_v61 = vpop.f32.mrb[254].mxu0  ;;  %8306 = vmatprep.mubr.bf16.mxu1 %v3404_v0  ;;  %v3562_v2 = vadd.f32 %v10038_v15, %v3561_v35  ;;  %v10105_v7 = vadd.f32 %v3559_v1, %v9201_v18 }
 0x3a8   : > { %v3213_v17 = vadd.f32 %v10028_v26, %v8169_v61  ;;  %8307 = vmatmul.mubr.bf16.gmra.mrb[244].mxu1 %v3405_v23  ;;  %4177 = vadd.xlane.f32.xlu0 %v10093_v42  ;;  %v3204_v39 = vpop.f32.mrb[255].mxu0  ;;  %v10100_v43 = vadd.f32 %v3570_v14, %v9198_v13  ;;  %v3342_v51 = vmax.f32 %v3210_v60, 0.0 }
 0x3a9   : > { %v3205_v4 = vadd.f32 %v10028_v26, %v3204_v39  ;;  %v3340_v46 = vmax.f32 %v3202_v53, 0.0  ;;  %v10110_v13 = vadd.f32 %v3562_v2, %v9204_v19  ;;  %v12743_v2 = vld [vmem:[#allocation8_spill] sm:$0xff] }
 0x3aa   : > { %v3343_v20 = vmax.f32 %v3213_v17, 0.0  ;;  %4179 = vadd.xlane.f32.xlu1 %v10100_v43 }
 0x3ab   : > { %v3341_v3 = vmax.f32 %v3205_v4, 0.0  ;;  %v8204_v62 = vpop.f32.mrb[140].mxu1 }
 0x3ac   : > { %v3407_v52 = vpack.c.bf16 %v3343_v20, %v3342_v51  ;;  %v3583_v31 = vadd.f32 %v8204_v62, %v10038_v15  ;;  %v3574_v44 = vpop.f32.mrb[141].mxu1  ;;  %4173 = vadd.xlane.f32.xlu0 %v10105_v7  ;;  %v12744_v51 = vld [vmem:[#allocation6_spill] sm:$0xff] }
 0x3ad   : > { %v3406_v26 = vpack.c.bf16 %v3341_v3, %v3340_v46  ;;  %v8188_v23 = vpop.f32.mrb[0].mxu0  ;;  %v8205_v57 = vpop.f32.mrb[142].mxu1  ;;  %v3575_v29 = vadd.f32 %v10038_v15, %v3574_v44  ;;  %v12745_v46 = vld [vmem:[#allocation9_spill] sm:$0xff] }
 0x3ae   : > { %v3519_v18 = vadd.f32 %v8188_v23, %v10038_v15  ;;  %v3577_v0 = vpop.f32.mrb[143].mxu1  ;;  %4175 = vadd.xlane.f32.xlu1 %v10110_v13  ;;  %v3510_v16 = vpop.f32.mrb[1].mxu0  ;;  %v10116_v55 = vadd.f32 %v3583_v31, %v9236_v50  ;;  %v3586_v60 = vadd.f32 %v8205_v57, %v10038_v15  ;;  %v12747_v57 = vld [vmem:[#allocation5_spill] sm:$0xff] }
 0x3af   : > { %v8189_v1 = vpop.f32.mrb[2].mxu0  ;;  %8310 = vmatprep.mubr.bf16.mxu1 %v3406_v26  ;;  %v3511_v35 = vadd.f32 %v10038_v15, %v3510_v16  ;;  %v10126_v54 = vadd.f32 %v3575_v29, %v9230_v47  ;;  %v3578_v53 = vadd.f32 %v10038_v15, %v3577_v0 }
 0x3b0   : > { %4185 = vadd.xlane.f32.xlu0 %v10116_v55  ;;  %v3513_v19 = vpop.f32.mrb[3].mxu0  ;;  %8311 = vmatmul.mubr.bf16.gmra.mrb[248].mxu1 %v3407_v52  ;;  %v10121_v14 = vadd.f32 %v3519_v18, %v9114_v25  ;;  %v10131_v17 = vadd.f32 %v3586_v60, %v12743_v2  ;;  %v3522_v47 = vadd.f32 %v8189_v1, %v10038_v15  ;;  %v12746_v52 = vld [vmem:[#allocation7_spill] sm:$0xff]  ;;  %v12748_v1 = vld [vmem:[#allocation13_spill] sm:$0xff] }
 0x3b1   : > { %v3514_v25 = vadd.f32 %v10038_v15, %v3513_v19  ;;  %v10136_v20 = vadd.f32 %v3511_v35, %v12744_v51  ;;  %v10141_v3 = vadd.f32 %v3578_v53, %v12745_v46  ;;  %v12749_v35 = vld [vmem:[#allocation10_spill] sm:$0xff]  ;;  %v12750_v2 = vld [vmem:[#allocation11_spill] sm:$0xff] }
 0x3b2   : > { %4153 = vadd.xlane.f32.xlu1 %v10121_v14  ;;  %v10151_v29 = vadd.f32 %v3522_v47, %v12747_v57  ;;  %v12751_v47 = vld [vmem:[#allocation12_spill] sm:$0xff] }
 0x3b3   : > { %v8208_v50 = vpop.f32.mrb[144].mxu1  ;;  %v10146_v31 = vadd.f32 %v3514_v25, %v12746_v52 }
 0x3b4   : > { %v3590_v61 = vpop.f32.mrb[145].mxu1  ;;  %4181 = vadd.xlane.f32.xlu0 %v10126_v54  ;;  %v3599_v62 = vadd.f32 %v8208_v50, %v10038_v15 }
 0x3b5   : > { %v8209_v39 = vpop.f32.mrb[146].mxu1  ;;  %v3591_v0 = vadd.f32 %v10038_v15, %v3590_v61 }
 0x3b6   : > { %v3593_v4 = vpop.f32.mrb[147].mxu1  ;;  %4187 = vadd.xlane.f32.xlu1 %v10131_v17  ;;  %v3602_v26 = vadd.f32 %v8209_v39, %v10038_v15  ;;  %v10156_v60 = vadd.f32 %v3599_v62, %v12748_v1 }
 0x3b7   : > { %v3594_v19 = vadd.f32 %v10038_v15, %v3593_v4  ;;  %v10166_v39 = vadd.f32 %v3591_v0, %v12750_v2 }
 0x3b8   : > { %4149 = vadd.xlane.f32.xlu0 %v10136_v20  ;;  %v10161_v50 = vadd.f32 %v3602_v26, %v12749_v35 }
 0x3b9   : > { %v10171_v4 = vadd.f32 %v3594_v19, %v12751_v47  ;;  %v12754_v19 = vld [vmem:[#allocation15_spill] sm:$0xff] }
 0x3ba   : > { %4183 = vadd.xlane.f32.xlu1 %v10141_v3 }
 0x3bb   : > { %v8212_v44 = vpop.f32.mrb[148].mxu1 }
 0x3bc   : > { %v3606_v23 = vpop.f32.mrb[149].mxu1  ;;  %4151 = vadd.xlane.f32.xlu0 %v10146_v31  ;;  %v3615_v53 = vadd.f32 %v8212_v44, %v10038_v15  ;;  %v12752_v44 = vld [vmem:[#allocation17_spill] sm:$0xff] }
 0x3bd   : > { %v8213_v18 = vpop.f32.mrb[150].mxu1  ;;  %v3607_v62 = vadd.f32 %v10038_v15, %v3606_v23 }
 0x3be   : > { %v3609_v16 = vpop.f32.mrb[151].mxu1  ;;  %4155 = vadd.xlane.f32.xlu1 %v10151_v29  ;;  %v3618_v25 = vadd.f32 %v8213_v18, %v10038_v15  ;;  %v10176_v26 = vadd.f32 %v3615_v53, %v12752_v44  ;;  %v12753_v18 = vld [vmem:[#allocation14_spill] sm:$0xff]  ;;  %v12756_v53 = vld [vmem:[#allocation16_spill] sm:$0xff] }
 0x3bf   : > { %v3610_v57 = vadd.f32 %v10038_v15, %v3609_v16  ;;  %v10186_v35 = vadd.f32 %v3607_v62, %v12754_v19 }
 0x3c0   : > { %4193 = vadd.xlane.f32.xlu0 %v10156_v60  ;;  %v10181_v0 = vadd.f32 %v3618_v25, %v12753_v18 }
 0x3c1   : > { %12755 = vst [vmem:[#allocation8_spill] sm:$0xff] %v10186_v35  ;;  %v10191_v16 = vadd.f32 %v3610_v57, %v12756_v53  ;;  %v12762_v57 = vld [vmem:[#allocation19_spill] sm:$0xff] }
 0x3c2   : > { %4195 = vadd.xlane.f32.xlu1 %v10161_v50 }
 0x3c3   : > { %v8216_v61 = vpop.f32.mrb[152].mxu1  ;;  %12757 = vst [vmem:[#allocation6_spill] sm:$0xff] %v10191_v16 }
 0x3c4   : > { %v3622_v51 = vpop.f32.mrb[153].mxu1  ;;  %4189 = vadd.xlane.f32.xlu0 %v10166_v39  ;;  %v3631_v1 = vadd.f32 %v8216_v61, %v10038_v15  ;;  %v12758_v61 = vld [vmem:[#allocation21_spill] sm:$0xff] }
 0x3c5   : > { %v8217_v46 = vpop.f32.mrb[154].mxu1  ;;  %v3623_v25 = vadd.f32 %v10038_v15, %v3622_v51 }
 0x3c6   : > { %v3625_v52 = vpop.f32.mrb[155].mxu1  ;;  %4191 = vadd.xlane.f32.xlu1 %v10171_v4  ;;  %v3634_v2 = vadd.f32 %v8217_v46, %v10038_v15  ;;  %v10196_v10 = vadd.f32 %v3631_v1, %v12758_v61  ;;  %v12760_v46 = vld [vmem:[#allocation18_spill] sm:$0xff]  ;;  %v12764_v1 = vld [vmem:[#allocation20_spill] sm:$0xff] }
 0x3c7   : > { %v3626_v62 = vadd.f32 %v10038_v15, %v3625_v52  ;;  %v10206_v53 = vadd.f32 %v3623_v25, %v12762_v57 }
 0x3c8   : > { %4201 = vadd.xlane.f32.xlu0 %v10176_v26  ;;  %12759 = vst [vmem:[#allocation9_spill] sm:$0xff] %v10196_v10  ;;  %v10201_v19 = vadd.f32 %v3634_v2, %v12760_v46 }
 0x3c9   : > { %12763 = vst [vmem:[#allocation5_spill] sm:$0xff] %v10206_v53  ;;  %v10211_v52 = vadd.f32 %v3626_v62, %v12764_v1  ;;  %v12770_v62 = vld [vmem:[#allocation23_spill] sm:$0xff] }
 0x3ca   : > { %4203 = vadd.xlane.f32.xlu1 %v10181_v0  ;;  %12761 = vst [vmem:[#allocation7_spill] sm:$0xff] %v10201_v19 }
 0x3cb   : > { %v8220_v23 = vpop.f32.mrb[156].mxu1  ;;  %12765 = vst [vmem:[#allocation13_spill] sm:$0xff] %v10211_v52 }
 0x3cc   : > { %v3638_v47 = vpop.f32.mrb[157].mxu1  ;;  %4197 = vadd.xlane.f32.xlu0 %v10186_v35  ;;  %v3647_v30 = vadd.f32 %v8220_v23, %v10038_v15  ;;  %v12766_v23 = vld [vmem:[#allocation25_spill] sm:$0xff] }
 0x3cd   : > { %v8221_v44 = vpop.f32.mrb[158].mxu1  ;;  %v3639_v2 = vadd.f32 %v10038_v15, %v3638_v47 }
 0x3ce   : > { %v3641_v18 = vpop.f32.mrb[159].mxu1  ;;  %4199 = vadd.xlane.f32.xlu1 %v10191_v16  ;;  %v3650_v32 = vadd.f32 %v8221_v44, %v10038_v15  ;;  %v10216_v27 = vadd.f32 %v3647_v30, %v12766_v23  ;;  %v12768_v44 = vld [vmem:[#allocation22_spill] sm:$0xff]  ;;  %v12772_v30 = vld [vmem:[#allocation24_spill] sm:$0xff] }
 0x3cf   : > { %v3642_v25 = vadd.f32 %v10038_v15, %v3641_v18  ;;  %v10226_v1 = vadd.f32 %v3639_v2, %v12770_v62  ;;  %v12880_v16 = vld [vmem:[#allocation74_spill] sm:$0xff] }
 0x3d0   : > { %4209 = vadd.xlane.f32.xlu0 %v10196_v10  ;;  %12767 = vst [vmem:[#allocation10_spill] sm:$0xff] %v10216_v27  ;;  %v10221_v57 = vadd.f32 %v3650_v32, %v12768_v44 }
 0x3d1   : > { %12771 = vst [vmem:[#allocation12_spill] sm:$0xff] %v10226_v1  ;;  %v10231_v18 = vadd.f32 %v3642_v25, %v12772_v30  ;;  %v12778_v25 = vld [vmem:[#allocation27_spill] sm:$0xff] }
 0x3d2   : > { %4211 = vadd.xlane.f32.xlu1 %v10201_v19  ;;  %12769 = vst [vmem:[#allocation11_spill] sm:$0xff] %v10221_v57 }
 0x3d3   : > { %v8224_v51 = vpop.f32.mrb[160].mxu1  ;;  %12773 = vst [vmem:[#allocation17_spill] sm:$0xff] %v10231_v18 }
 0x3d4   : > { %v3654_v63 = vpop.f32.mrb[161].mxu1  ;;  %4205 = vadd.xlane.f32.xlu0 %v10206_v53  ;;  %v3663_v12 = vadd.f32 %v8224_v51, %v10038_v15  ;;  %v12774_v51 = vld [vmem:[#allocation29_spill] sm:$0xff] }
 0x3d5   : > { %v8225_v61 = vpop.f32.mrb[162].mxu1  ;;  %v3655_v32 = vadd.f32 %v10038_v15, %v3654_v63 }
 0x3d6   : > { %v3657_v46 = vpop.f32.mrb[163].mxu1  ;;  %4207 = vadd.xlane.f32.xlu1 %v10211_v52  ;;  %v3666_v33 = vadd.f32 %v8225_v61, %v10038_v15  ;;  %v10236_v6 = vadd.f32 %v3663_v12, %v12774_v51  ;;  %v12776_v61 = vld [vmem:[#allocation26_spill] sm:$0xff]  ;;  %v12780_v12 = vld [vmem:[#allocation28_spill] sm:$0xff] }
 0x3d7   : > { %v3658_v2 = vadd.f32 %v10038_v15, %v3657_v46  ;;  %v10246_v30 = vadd.f32 %v3655_v32, %v12778_v25 }
 0x3d8   : > { %4217 = vadd.xlane.f32.xlu0 %v10216_v27  ;;  %12775 = vst [vmem:[#allocation14_spill] sm:$0xff] %v10236_v6  ;;  %v10241_v62 = vadd.f32 %v3666_v33, %v12776_v61 }
 0x3d9   : > { %12779 = vst [vmem:[#allocation16_spill] sm:$0xff] %v10246_v30  ;;  %v10251_v46 = vadd.f32 %v3658_v2, %v12780_v12  ;;  %v12786_v2 = vld [vmem:[#allocation31_spill] sm:$0xff] }
 0x3da   : > { %4219 = vadd.xlane.f32.xlu1 %v10221_v57  ;;  %12777 = vst [vmem:[#allocation15_spill] sm:$0xff] %v10241_v62 }
 0x3db   : > { %v8228_v47 = vpop.f32.mrb[164].mxu1  ;;  %12781 = vst [vmem:[#allocation21_spill] sm:$0xff] %v10251_v46 }
 0x3dc   : > { %v3670_v49 = vpop.f32.mrb[165].mxu1  ;;  %4213 = vadd.xlane.f32.xlu0 %v10226_v1  ;;  %v3679_v34 = vadd.f32 %v8228_v47, %v10038_v15  ;;  %v12782_v47 = vld [vmem:[#allocation33_spill] sm:$0xff] }
 0x3dd   : > { %v8229_v23 = vpop.f32.mrb[166].mxu1  ;;  %v3671_v33 = vadd.f32 %v10038_v15, %v3670_v49 }
 0x3de   : > { %v3673_v44 = vpop.f32.mrb[167].mxu1  ;;  %4215 = vadd.xlane.f32.xlu1 %v10231_v18  ;;  %v3682_v48 = vadd.f32 %v8229_v23, %v10038_v15  ;;  %v12784_v23 = vld [vmem:[#allocation30_spill] sm:$0xff] }
 0x3df   : > { %v3674_v32 = vadd.f32 %v10038_v15, %v3673_v44  ;;  %v10266_v12 = vadd.f32 %v3671_v33, %v12786_v2 }
 0x3e0   : > { %4225 = vadd.xlane.f32.xlu0 %v10236_v6  ;;  %v10261_v25 = vadd.f32 %v3682_v48, %v12784_v23 }
 0x3e1   : > { %12787 = vst [vmem:[#allocation20_spill] sm:$0xff] %v10266_v12 }
 0x3e2   : > { %4227 = vadd.xlane.f32.xlu1 %v10241_v62  ;;  %v10256_v62 = vadd.f32 %v3679_v34, %v12782_v47  ;;  %12785 = vst [vmem:[#allocation19_spill] sm:$0xff] %v10261_v25  ;;  %v12788_v34 = vld [vmem:[#allocation32_spill] sm:$0xff] }
 0x3e3   : > { %v8232_v63 = vpop.f32.mrb[168].mxu1  ;;  %v10271_v44 = vadd.f32 %v3674_v32, %v12788_v34  ;;  %v12794_v32 = vld [vmem:[#allocation35_spill] sm:$0xff] }
 0x3e4   : > { %v3686_v11 = vpop.f32.mrb[169].mxu1  ;;  %4221 = vadd.xlane.f32.xlu0 %v10246_v30  ;;  %12783 = vst [vmem:[#allocation18_spill] sm:$0xff] %v10256_v62  ;;  %v3695_v30 = vadd.f32 %v8232_v63, %v10038_v15  ;;  %v12790_v63 = vld [vmem:[#allocation37_spill] sm:$0xff] }
 0x3e5   : > { %v8233_v51 = vpop.f32.mrb[170].mxu1  ;;  %12789 = vst [vmem:[#allocation25_spill] sm:$0xff] %v10271_v44  ;;  %v3687_v48 = vadd.f32 %v10038_v15, %v3686_v11 }
 0x3e6   : > { %v3689_v61 = vpop.f32.mrb[171].mxu1  ;;  %4223 = vadd.xlane.f32.xlu1 %v10251_v46  ;;  %v3698_v46 = vadd.f32 %v8233_v51, %v10038_v15  ;;  %v12792_v51 = vld [vmem:[#allocation34_spill] sm:$0xff] }
 0x3e7   : > { %v3690_v33 = vadd.f32 %v10038_v15, %v3689_v61  ;;  %v10286_v34 = vadd.f32 %v3687_v48, %v12794_v32 }
 0x3e8   : > { %4233 = vadd.xlane.f32.xlu0 %v10256_v62  ;;  %v10281_v2 = vadd.f32 %v3698_v46, %v12792_v51 }
 0x3e9   : > { %12795 = vst [vmem:[#allocation24_spill] sm:$0xff] %v10286_v34 }
 0x3ea   : > { %4235 = vadd.xlane.f32.xlu1 %v10261_v25  ;;  %v10276_v25 = vadd.f32 %v3695_v30, %v12790_v63  ;;  %12793 = vst [vmem:[#allocation23_spill] sm:$0xff] %v10281_v2  ;;  %v12796_v30 = vld [vmem:[#allocation36_spill] sm:$0xff] }
 0x3eb   : > { %v8236_v49 = vpop.f32.mrb[172].mxu1  ;;  %v10291_v61 = vadd.f32 %v3690_v33, %v12796_v30  ;;  %v12802_v33 = vld [vmem:[#allocation39_spill] sm:$0xff] }
 0x3ec   : > { %v3702_v6 = vpop.f32.mrb[173].mxu1  ;;  %4229 = vadd.xlane.f32.xlu0 %v10266_v12  ;;  %12791 = vst [vmem:[#allocation22_spill] sm:$0xff] %v10276_v25  ;;  %v3711_v12 = vadd.f32 %v8236_v49, %v10038_v15  ;;  %v12798_v49 = vld [vmem:[#allocation41_spill] sm:$0xff] }
 0x3ed   : > { %v8237_v47 = vpop.f32.mrb[174].mxu1  ;;  %12797 = vst [vmem:[#allocation29_spill] sm:$0xff] %v10291_v61  ;;  %v3703_v46 = vadd.f32 %v10038_v15, %v3702_v6 }
 0x3ee   : > { %v3705_v23 = vpop.f32.mrb[175].mxu1  ;;  %4231 = vadd.xlane.f32.xlu1 %v10271_v44  ;;  %v3714_v44 = vadd.f32 %v8237_v47, %v10038_v15  ;;  %v12800_v47 = vld [vmem:[#allocation38_spill] sm:$0xff] }
 0x3ef   : > { %v3706_v48 = vadd.f32 %v10038_v15, %v3705_v23  ;;  %v10306_v30 = vadd.f32 %v3703_v46, %v12802_v33 }
 0x3f0   : > { %4241 = vadd.xlane.f32.xlu0 %v10276_v25  ;;  %v10301_v32 = vadd.f32 %v3714_v44, %v12800_v47 }
 0x3f1   : > { %12803 = vst [vmem:[#allocation28_spill] sm:$0xff] %v10306_v30 }
 0x3f2   : > { %4243 = vadd.xlane.f32.xlu1 %v10281_v2  ;;  %v10296_v2 = vadd.f32 %v3711_v12, %v12798_v49  ;;  %12801 = vst [vmem:[#allocation27_spill] sm:$0xff] %v10301_v32  ;;  %v12804_v12 = vld [vmem:[#allocation40_spill] sm:$0xff] }
 0x3f3   : > { %v8240_v11 = vpop.f32.mrb[176].mxu1  ;;  %v10311_v23 = vadd.f32 %v3706_v48, %v12804_v12  ;;  %v12810_v48 = vld [vmem:[#allocation43_spill] sm:$0xff] }
 0x3f4   : > { %v3718_v62 = vpop.f32.mrb[177].mxu1  ;;  %4237 = vadd.xlane.f32.xlu0 %v10286_v34  ;;  %12799 = vst [vmem:[#allocation26_spill] sm:$0xff] %v10296_v2  ;;  %v3727_v34 = vadd.f32 %v8240_v11, %v10038_v15  ;;  %v12806_v11 = vld [vmem:[#allocation45_spill] sm:$0xff] }
 0x3f5   : > { %v8241_v63 = vpop.f32.mrb[178].mxu1  ;;  %12805 = vst [vmem:[#allocation33_spill] sm:$0xff] %v10311_v23  ;;  %v3719_v44 = vadd.f32 %v10038_v15, %v3718_v62 }
 0x3f6   : > { %v3721_v51 = vpop.f32.mrb[179].mxu1  ;;  %4239 = vadd.xlane.f32.xlu1 %v10291_v61  ;;  %v3730_v61 = vadd.f32 %v8241_v63, %v10038_v15  ;;  %v12808_v63 = vld [vmem:[#allocation42_spill] sm:$0xff] }
 0x3f7   : > { %v3722_v46 = vadd.f32 %v10038_v15, %v3721_v51  ;;  %v10326_v12 = vadd.f32 %v3719_v44, %v12810_v48 }
 0x3f8   : > { %4249 = vadd.xlane.f32.xlu0 %v10296_v2  ;;  %v10321_v33 = vadd.f32 %v3730_v61, %v12808_v63 }
 0x3f9   : > { %12811 = vst [vmem:[#allocation32_spill] sm:$0xff] %v10326_v12 }
 0x3fa   : > { %4251 = vadd.xlane.f32.xlu1 %v10301_v32  ;;  %v10316_v32 = vadd.f32 %v3727_v34, %v12806_v11  ;;  %12809 = vst [vmem:[#allocation31_spill] sm:$0xff] %v10321_v33  ;;  %v12812_v34 = vld [vmem:[#allocation44_spill] sm:$0xff] }
 0x3fb   : > { %v8244_v6 = vpop.f32.mrb[180].mxu1  ;;  %v10331_v51 = vadd.f32 %v3722_v46, %v12812_v34  ;;  %v12818_v46 = vld [vmem:[#allocation47_spill] sm:$0xff] }
 0x3fc   : > { %v3734_v25 = vpop.f32.mrb[181].mxu1  ;;  %4245 = vadd.xlane.f32.xlu0 %v10306_v30  ;;  %12807 = vst [vmem:[#allocation30_spill] sm:$0xff] %v10316_v32  ;;  %v3743_v30 = vadd.f32 %v8244_v6, %v10038_v15  ;;  %v12814_v6 = vld [vmem:[#allocation49_spill] sm:$0xff] }
 0x3fd   : > { %v8245_v49 = vpop.f32.mrb[182].mxu1  ;;  %12813 = vst [vmem:[#allocation37_spill] sm:$0xff] %v10331_v51  ;;  %v3735_v61 = vadd.f32 %v10038_v15, %v3734_v25 }
 0x3fe   : > { %v3737_v47 = vpop.f32.mrb[183].mxu1  ;;  %4247 = vadd.xlane.f32.xlu1 %v10311_v23  ;;  %v3746_v23 = vadd.f32 %v8245_v49, %v10038_v15  ;;  %v12816_v49 = vld [vmem:[#allocation46_spill] sm:$0xff] }
 0x3ff   : > { %v3738_v44 = vadd.f32 %v10038_v15, %v3737_v47  ;;  %v10346_v34 = vadd.f32 %v3735_v61, %v12818_v46 }
 0x400   : > { %4257 = vadd.xlane.f32.xlu0 %v10316_v32  ;;  %v10341_v48 = vadd.f32 %v3746_v23, %v12816_v49 }
 0x401   : > { %12819 = vst [vmem:[#allocation36_spill] sm:$0xff] %v10346_v34 }
 0x402   : > { %4259 = vadd.xlane.f32.xlu1 %v10321_v33  ;;  %v10336_v33 = vadd.f32 %v3743_v30, %v12814_v6  ;;  %12817 = vst [vmem:[#allocation35_spill] sm:$0xff] %v10341_v48  ;;  %v12820_v30 = vld [vmem:[#allocation48_spill] sm:$0xff] }
 0x403   : > { %v8248_v62 = vpop.f32.mrb[184].mxu1  ;;  %v10351_v47 = vadd.f32 %v3738_v44, %v12820_v30  ;;  %v12826_v44 = vld [vmem:[#allocation51_spill] sm:$0xff] }
 0x404   : > { %v3750_v2 = vpop.f32.mrb[185].mxu1  ;;  %4253 = vadd.xlane.f32.xlu0 %v10326_v12  ;;  %12815 = vst [vmem:[#allocation34_spill] sm:$0xff] %v10336_v33  ;;  %v3759_v12 = vadd.f32 %v8248_v62, %v10038_v15  ;;  %v12822_v62 = vld [vmem:[#allocation53_spill] sm:$0xff] }
 0x405   : > { %v8249_v11 = vpop.f32.mrb[186].mxu1  ;;  %12821 = vst [vmem:[#allocation41_spill] sm:$0xff] %v10351_v47  ;;  %v3751_v23 = vadd.f32 %v10038_v15, %v3750_v2 }
 0x406   : > { %v3753_v63 = vpop.f32.mrb[187].mxu1  ;;  %4255 = vadd.xlane.f32.xlu1 %v10331_v51  ;;  %v3762_v51 = vadd.f32 %v8249_v11, %v10038_v15  ;;  %v12824_v11 = vld [vmem:[#allocation50_spill] sm:$0xff] }
 0x407   : > { %v3754_v61 = vadd.f32 %v10038_v15, %v3753_v63  ;;  %v10366_v30 = vadd.f32 %v3751_v23, %v12826_v44 }
 0x408   : > { %4265 = vadd.xlane.f32.xlu0 %v10336_v33  ;;  %v10361_v46 = vadd.f32 %v3762_v51, %v12824_v11 }
 0x409   : > { %12827 = vst [vmem:[#allocation40_spill] sm:$0xff] %v10366_v30 }
 0x40a   : > { %4267 = vadd.xlane.f32.xlu1 %v10341_v48  ;;  %v10356_v48 = vadd.f32 %v3759_v12, %v12822_v62  ;;  %12825 = vst [vmem:[#allocation39_spill] sm:$0xff] %v10361_v46  ;;  %v12828_v12 = vld [vmem:[#allocation52_spill] sm:$0xff] }
 0x40b   : > { %v8252_v25 = vpop.f32.mrb[188].mxu1  ;;  %v10371_v63 = vadd.f32 %v3754_v61, %v12828_v12  ;;  %v12834_v61 = vld [vmem:[#allocation55_spill] sm:$0xff] }
 0x40c   : > { %v3766_v32 = vpop.f32.mrb[189].mxu1  ;;  %4261 = vadd.xlane.f32.xlu0 %v10346_v34  ;;  %12823 = vst [vmem:[#allocation38_spill] sm:$0xff] %v10356_v48  ;;  %v3775_v34 = vadd.f32 %v8252_v25, %v10038_v15  ;;  %v12830_v25 = vld [vmem:[#allocation57_spill] sm:$0xff] }
 0x40d   : > { %v8253_v6 = vpop.f32.mrb[190].mxu1  ;;  %12829 = vst [vmem:[#allocation45_spill] sm:$0xff] %v10371_v63  ;;  %v3767_v51 = vadd.f32 %v10038_v15, %v3766_v32 }
 0x40e   : > { %v3769_v49 = vpop.f32.mrb[191].mxu1  ;;  %4263 = vadd.xlane.f32.xlu1 %v10351_v47  ;;  %v3778_v47 = vadd.f32 %v8253_v6, %v10038_v15  ;;  %v12832_v6 = vld [vmem:[#allocation54_spill] sm:$0xff] }
 0x40f   : > { %v3770_v23 = vadd.f32 %v10038_v15, %v3769_v49  ;;  %v10386_v12 = vadd.f32 %v3767_v51, %v12834_v61 }
 0x410   : > { %4273 = vadd.xlane.f32.xlu0 %v10356_v48  ;;  %v10381_v44 = vadd.f32 %v3778_v47, %v12832_v6 }
 0x411   : > { %12835 = vst [vmem:[#allocation44_spill] sm:$0xff] %v10386_v12 }
 0x412   : > { %4275 = vadd.xlane.f32.xlu1 %v10361_v46  ;;  %v10376_v46 = vadd.f32 %v3775_v34, %v12830_v25  ;;  %12833 = vst [vmem:[#allocation43_spill] sm:$0xff] %v10381_v44  ;;  %v12836_v34 = vld [vmem:[#allocation56_spill] sm:$0xff] }
 0x413   : > { %v8256_v2 = vpop.f32.mrb[192].mxu1  ;;  %v10391_v49 = vadd.f32 %v3770_v23, %v12836_v34  ;;  %v12842_v23 = vld [vmem:[#allocation59_spill] sm:$0xff] }
 0x414   : > { %v3782_v33 = vpop.f32.mrb[193].mxu1  ;;  %4269 = vadd.xlane.f32.xlu0 %v10366_v30  ;;  %12831 = vst [vmem:[#allocation42_spill] sm:$0xff] %v10376_v46  ;;  %v3791_v30 = vadd.f32 %v8256_v2, %v10038_v15  ;;  %v12838_v2 = vld [vmem:[#allocation61_spill] sm:$0xff] }
 0x415   : > { %v8257_v62 = vpop.f32.mrb[194].mxu1  ;;  %12837 = vst [vmem:[#allocation49_spill] sm:$0xff] %v10391_v49  ;;  %v3783_v47 = vadd.f32 %v10038_v15, %v3782_v33 }
 0x416   : > { %v3785_v11 = vpop.f32.mrb[195].mxu1  ;;  %4271 = vadd.xlane.f32.xlu1 %v10371_v63  ;;  %v3794_v63 = vadd.f32 %v8257_v62, %v10038_v15  ;;  %v12840_v62 = vld [vmem:[#allocation58_spill] sm:$0xff] }
 0x417   : > { %v3786_v51 = vadd.f32 %v10038_v15, %v3785_v11  ;;  %v10406_v34 = vadd.f32 %v3783_v47, %v12842_v23 }
 0x418   : > { %4281 = vadd.xlane.f32.xlu0 %v10376_v46  ;;  %v10401_v61 = vadd.f32 %v3794_v63, %v12840_v62 }
 0x419   : > { %12843 = vst [vmem:[#allocation48_spill] sm:$0xff] %v10406_v34 }
 0x41a   : > { %4283 = vadd.xlane.f32.xlu1 %v10381_v44  ;;  %v10396_v44 = vadd.f32 %v3791_v30, %v12838_v2  ;;  %12841 = vst [vmem:[#allocation47_spill] sm:$0xff] %v10401_v61  ;;  %v12844_v30 = vld [vmem:[#allocation60_spill] sm:$0xff] }
 0x41b   : > { %v8260_v32 = vpop.f32.mrb[196].mxu1  ;;  %v10411_v11 = vadd.f32 %v3786_v51, %v12844_v30 }
 0x41c   : > { %v3798_v48 = vpop.f32.mrb[197].mxu1  ;;  %4277 = vadd.xlane.f32.xlu0 %v10386_v12  ;;  %12839 = vst [vmem:[#allocation46_spill] sm:$0xff] %v10396_v44  ;;  %v3807_v12 = vadd.f32 %v8260_v32, %v10038_v15  ;;  %v12846_v32 = vld [vmem:[#allocation65_spill] sm:$0xff] }
 0x41d   : > { %v8261_v25 = vpop.f32.mrb[198].mxu1  ;;  %12845 = vst [vmem:[#allocation53_spill] sm:$0xff] %v10411_v11  ;;  %v3799_v63 = vadd.f32 %v10038_v15, %v3798_v48  ;;  %v12850_v48 = vld [vmem:[#allocation63_spill] sm:$0xff] }
 0x41e   : > { %v3801_v6 = vpop.f32.mrb[199].mxu1  ;;  %4279 = vadd.xlane.f32.xlu1 %v10391_v49  ;;  %v3810_v49 = vadd.f32 %v8261_v25, %v10038_v15  ;;  %v12848_v25 = vld [vmem:[#allocation62_spill] sm:$0xff] }
 0x41f   : > { %v3802_v23 = vadd.f32 %v10038_v15, %v3801_v6  ;;  %v10426_v9 = vadd.f32 %v3799_v63, %v12850_v48  ;;  %v12852_v6 = vld [vmem:[#allocation64_spill] sm:$0xff]  ;;  %v12854_v63 = vld [vmem:[#allocation69_spill] sm:$0xff] }
 0x420   : > { %4289 = vadd.xlane.f32.xlu0 %v10396_v44 }
 0x421   : > { %12851 = vst [vmem:[#allocation52_spill] sm:$0xff] %v10426_v9 }
 0x422   : > { %4291 = vadd.xlane.f32.xlu1 %v10401_v61  ;;  %v10416_v61 = vadd.f32 %v3807_v12, %v12846_v32 }
 0x423   : > { %v8264_v33 = vpop.f32.mrb[200].mxu1 }
 0x424   : > { %v3814_v46 = vpop.f32.mrb[201].mxu1  ;;  %4285 = vadd.xlane.f32.xlu0 %v10406_v34  ;;  %12847 = vst [vmem:[#allocation50_spill] sm:$0xff] %v10416_v61  ;;  %v10421_v34 = vadd.f32 %v3810_v49, %v12848_v25  ;;  %v3823_v30 = vadd.f32 %v8264_v33, %v10038_v15 }
 0x425   : > { %v4162_v2 = vpop.xlane.xlu0 %4161  ;;  %v8265_v44 = vpop.f32.mrb[202].mxu1  ;;  %v3815_v1 = vadd.f32 %v10038_v15, %v3814_v46  ;;  %v12858_v46 = vld [vmem:[#allocation67_spill] sm:$0xff] }
 0x426   : > { %v3817_v62 = vpop.f32.mrb[203].mxu1  ;;  %4287 = vadd.xlane.f32.xlu1 %v10411_v11  ;;  %12849 = vst [vmem:[#allocation51_spill] sm:$0xff] %v10421_v34  ;;  %v3826_v12 = vadd.f32 %v8265_v44, %v10038_v15  ;;  %v4412_v33 = vmul.f32 0.0078125, %v4162_v2  ;;  %v10436_v48 = vadd.f32 %v3823_v30, %v12854_v63 }
 0x427   : > { %v4164_v47 = vpop.xlane.xlu1 %4163  ;;  %v3818_v44 = vadd.f32 %v10038_v15, %v3817_v62  ;;  %v10445_v2 = vadd.f32 %v3815_v1, %v12858_v46 }
 0x428   : > { %4297 = vadd.xlane.f32.xlu0 %v10416_v61  ;;  %v10431_v61 = vadd.f32 %v3802_v23, %v12852_v6  ;;  %12855 = vst [vmem:[#allocation54_spill] sm:$0xff] %v10436_v48  ;;  %v4413_v27 = vmul.f32 0.0078125, %v4164_v47  ;;  %v12861_v47 = vld [vmem:[#allocation68_spill] sm:$0xff] }
 0x429   : > { %v4158_v51 = vpop.xlane.xlu0 %4157  ;;  %12859 = vst [vmem:[#allocation56_spill] sm:$0xff] %v10445_v2 }
 0x42a   : > { %4299 = vadd.xlane.f32.xlu1 %v10421_v34  ;;  %12853 = vst [vmem:[#allocation57_spill] sm:$0xff] %v10431_v61  ;;  %v4410_v52 = vmul.f32 0.0078125, %v4158_v51  ;;  %v10457_v51 = vsub.f32 %v10052_v5, %v4413_v27 }
 0x42b   : > { %v8268_v11 = vpop.f32.mrb[204].mxu1  ;;  %v4160_v18 = vpop.xlane.xlu1 %4159 }
 0x42c   : > { %v3830_v32 = vpop.f32.mrb[205].mxu1  ;;  %4293 = vadd.xlane.f32.xlu0 %v10426_v9  ;;  %v12856_v9 = vld [vmem:[#allocation66_spill] sm:$0xff]  ;;  %v4411_v53 = vmul.f32 0.0078125, %v4160_v18  ;;  %12863 = vst [vmem:[#allocation59_spill] sm:$0xff] %v10457_v51  ;;  %v10467_v18 = vsub.f32 %v10057_v37, %v4410_v52  ;;  %v4669_v27 = vmul.f32 %v10457_v51, %v10457_v51  ;;  %v3839_v46 = vadd.f32 %v8268_v11, %v10038_v15 }
 0x42d   : > { %v8269_v49 = vpop.f32.mrb[206].mxu1  ;;  %v4170_v25 = vpop.xlane.xlu0 %4169  ;;  %v10441_v23 = vadd.f32 %v3826_v12, %v12856_v9  ;;  %v10454_v9 = vadd.f32 %v3818_v44, %v12861_v47  ;;  %v3831_v11 = vadd.f32 %v10038_v15, %v3830_v32 }
 0x42e   : > { %v3833_v57 = vpop.f32.mrb[207].mxu1  ;;  %4295 = vadd.xlane.f32.xlu1 %v10431_v61  ;;  %v10448_v61 = vsub.f32 %v10045_v36, %v4412_v33  ;;  %12864 = vst [vmem:[#allocation60_spill] sm:$0xff] %v10467_v18  ;;  %v10474_v5 = vsub.f32 %v10062_v40, %v4411_v53  ;;  %v4666_v47 = vmul.f32 %v10467_v18, %v10467_v18  ;;  %v12866_v18 = vld [vmem:[#allocation73_spill] sm:$0xff] }
 0x42f   : > { %v4172_v34 = vpop.xlane.xlu1 %4171  ;;  %12857 = vst [vmem:[#allocation55_spill] sm:$0xff] %v10441_v23  ;;  %12862 = vst [vmem:[#allocation58_spill] sm:$0xff] %v10454_v9  ;;  %v3842_v52 = vadd.f32 %v8269_v49, %v10038_v15  ;;  %v10498_v51 = vadd.f32 %v3839_v46, %v12866_v18 }
 0x430   : > { %4305 = vadd.xlane.f32.xlu0 %v10436_v48  ;;  %12860 = vst [vmem:[#allocation61_spill] sm:$0xff] %v10448_v61  ;;  %v4668_v36 = vmul.f32 %v10448_v61, %v10448_v61  ;;  %12865 = vst [vmem:[#allocation65_spill] sm:$0xff] %v10474_v5  ;;  %v4667_v40 = vmul.f32 %v10474_v5, %v10474_v5  ;;  %v4417_v61 = vmul.f32 0.0078125, %v4172_v34  ;;  %v12868_v5 = vld [vmem:[#allocation70_spill] sm:$0xff] }
 0x431   : > { %v4166_v6 = vpop.xlane.xlu0 %4165  ;;  %12867 = vst [vmem:[#allocation62_spill] sm:$0xff] %v10498_v51  ;;  %v10505_v19 = vadd.f32 %v3842_v52, %v12868_v5  ;;  %v12873_v5 = vld [vmem:[#allocation72_spill] sm:$0xff] }
 0x432   : > { %4307 = vadd.xlane.f32.xlu1 %v10441_v23  ;;  %v4414_v32 = vmul.f32 0.0078125, %v4166_v6  ;;  %v10527_v6 = vsub.f32 %v10076_v28, %v4417_v61 }
 0x433   : > { %v8272_v30 = vpop.f32.mrb[208].mxu1  ;;  %v4168_v63 = vpop.xlane.xlu1 %4167  ;;  %12869 = vst [vmem:[#allocation63_spill] sm:$0xff] %v10505_v19 }
 0x434   : > { %v10450_v62 = vpop.f32.mrb[209].mxu1  ;;  %4301 = vadd.xlane.f32.xlu0 %v10445_v2  ;;  %v4415_v34 = vmul.f32 0.0078125, %v4168_v63  ;;  %12875 = vst [vmem:[#allocation67_spill] sm:$0xff] %v10527_v6  ;;  %v4673_v28 = vmul.f32 %v10527_v6, %v10527_v6 }
 0x435   : > { %v8273_v12 = vpop.f32.mrb[210].mxu1  ;;  %v10459_v23 = vpop.xlane.xlu0 %4177 }
 0x436   : > { %v10461_v1 = vpop.f32.mrb[211].mxu1  ;;  %4303 = vadd.xlane.f32.xlu1 %v10454_v9  ;;  %v10546_v61 = vsub.f32 %v10086_v58, %v4415_v34 }
 0x437   : > { %v10469_v33 = vpop.xlane.xlu1 %4179 }
 0x438   : > { %4802 = vadd.xlane.f32.xlu0 %v4668_v36  ;;  %12877 = vst [vmem:[#allocation73_spill] sm:$0xff] %v10546_v61  ;;  %v4671_v58 = vmul.f32 %v10546_v61, %v10546_v61  ;;  %v4421_v61 = vmul.f32 0.0078125, %v10469_v33 }
 0x439   : > { %v10476_v44 = vpop.xlane.xlu0 %4173 }
 0x43a   : > { %4804 = vadd.xlane.f32.xlu1 %v4669_v27  ;;  %v4416_v27 = vmul.f32 0.0078125, %v4170_v25  ;;  %v12870_v25 = vld [vmem:[#allocation71_spill] sm:$0xff] }
 0x43b   : > { %v10481_v9 = vpop.f32.mrb[212].mxu1  ;;  %v10483_v37 = vpop.xlane.xlu1 %4175 }
 0x43c   : > { %v10486_v36 = vpop.f32.mrb[213].mxu1  ;;  %4798 = vadd.xlane.f32.xlu0 %v4666_v47  ;;  %v3834_v47 = vadd.f32 %v10038_v15, %v3833_v57  ;;  %v10514_v18 = vsub.f32 %v10069_v8, %v4416_v27  ;;  %v10539_v27 = vsub.f32 %v10081_v56, %v4414_v32  ;;  %v3858_v32 = vadd.f32 %v8273_v12, %v10038_v15 }
 0x43d   : > { %v10490_v53 = vpop.f32.mrb[214].mxu1  ;;  %v10492_v2 = vpop.xlane.xlu0 %4185 }
 0x43e   : > { %v10495_v48 = vpop.f32.mrb[215].mxu1  ;;  %4800 = vadd.xlane.f32.xlu1 %v4667_v40  ;;  %v10511_v40 = vadd.f32 %v3831_v11, %v12870_v25  ;;  %12872 = vst [vmem:[#allocation69_spill] sm:$0xff] %v10514_v18  ;;  %v10524_v52 = vadd.f32 %v3834_v47, %v12873_v5  ;;  %v4672_v63 = vmul.f32 %v10514_v18, %v10514_v18  ;;  %12876 = vst [vmem:[#allocation68_spill] sm:$0xff] %v10539_v27  ;;  %v12878_v18 = vld [vmem:[#allocation77_spill] sm:$0xff] }
 0x43f   : > { %v10500_v49 = vpop.xlane.xlu1 %4153  ;;  %v3855_v5 = vadd.f32 %v8272_v30, %v10038_v15  ;;  %v3847_v30 = vadd.f32 %v10038_v15, %v10450_v62  ;;  %v10581_v35 = vadd.f32 %v3858_v32, %v12880_v16  ;;  %v12885_v32 = vld [vmem:[#allocation76_spill] sm:$0xff] }
 0x440   : > { %4313 = vadd.xlane.f32.xlu0 %v10498_v51  ;;  %12871 = vst [vmem:[#allocation64_spill] sm:$0xff] %v10511_v40  ;;  %12874 = vst [vmem:[#allocation66_spill] sm:$0xff] %v10524_v52 }
 0x441   : > { %v10507_v10 = vpop.xlane.xlu0 %4181  ;;  %v10572_v12 = vadd.f32 %v3855_v5, %v12878_v18  ;;  %12881 = vst [vmem:[#allocation71_spill] sm:$0xff] %v10581_v35  ;;  %v12882_v18 = vld [vmem:[#allocation75_spill] sm:$0xff] }
 0x442   : > { %4315 = vadd.xlane.f32.xlu1 %v10505_v19  ;;  %v10588_v5 = vadd.f32 %v3847_v30, %v12882_v18 }
 0x443   : > { %v10516_v46 = vpop.f32.mrb[216].mxu1  ;;  %v10518_v57 = vpop.xlane.xlu1 %4187  ;;  %12879 = vst [vmem:[#allocation70_spill] sm:$0xff] %v10572_v12 }
 0x444   : > { %v10520_v51 = vpop.f32.mrb[217].mxu1  ;;  %4309 = vadd.xlane.f32.xlu0 %v10511_v40  ;;  %12883 = vst [vmem:[#allocation72_spill] sm:$0xff] %v10588_v5 }
 0x445   : > { %v10529_v11 = vpop.f32.mrb[218].mxu1  ;;  %v10531_v25 = vpop.xlane.xlu0 %4149 }
 0x446   : > { %v10533_v8 = vpop.f32.mrb[219].mxu1  ;;  %4311 = vadd.xlane.f32.xlu1 %v10524_v52  ;;  %v4670_v52 = vmul.f32 %v10539_v27, %v10539_v27 }
 0x447   : > { %v10541_v40 = vpop.xlane.xlu1 %4183 }
 0x448   : > { %4810 = vadd.xlane.f32.xlu0 %v4672_v63 }
 0x449   : > { %v10548_v47 = vpop.xlane.xlu0 %4151 }
 0x44a   : > { %4812 = vadd.xlane.f32.xlu1 %v4673_v28  ;;  %v4420_v28 = vmul.f32 0.0078125, %v10459_v23  ;;  %v4418_v23 = vmul.f32 0.0078125, %v10476_v44 }
 0x44b   : > { %v10553_v19 = vpop.f32.mrb[220].mxu1  ;;  %v10555_v56 = vpop.xlane.xlu1 %4155 }
 0x44c   : > { %v10558_v63 = vpop.f32.mrb[221].mxu1  ;;  %4806 = vadd.xlane.f32.xlu0 %v4670_v52  ;;  %v3850_v52 = vadd.f32 %v10038_v15, %v10461_v1 }
 0x44d   : > { %v10562_v34 = vpop.f32.mrb[222].mxu1  ;;  %v10564_v6 = vpop.xlane.xlu0 %4193 }
 0x44e   : > { %v10569_v27 = vpop.f32.mrb[223].mxu1  ;;  %4808 = vadd.xlane.f32.xlu1 %v4671_v58  ;;  %v10591_v58 = vsub.f32 %v10093_v42, %v4420_v28  ;;  %v10602_v44 = vadd.f32 %v3850_v52, %v12885_v32  ;;  %v10612_v28 = vsub.f32 %v10105_v7, %v4418_v23  ;;  %v3871_v7 = vadd.f32 %v10481_v9, %v10038_v15 }
 0x44f   : > { %v10574_v38 = vpop.xlane.xlu1 %4195 }
 0x450   : > { %4321 = vadd.xlane.f32.xlu0 %v10572_v12  ;;  %12884 = vst [vmem:[#allocation77_spill] sm:$0xff] %v10591_v58  ;;  %v4419_v12 = vmul.f32 0.0078125, %v10483_v37  ;;  %12886 = vst [vmem:[#allocation74_spill] sm:$0xff] %v10602_v44  ;;  %v4676_v37 = vmul.f32 %v10591_v58, %v10591_v58  ;;  %v4674_v23 = vmul.f32 %v10612_v28, %v10612_v28 }
 0x451   : > { %v10583_v62 = vpop.xlane.xlu0 %4189  ;;  %12888 = vst [vmem:[#allocation76_spill] sm:$0xff] %v10612_v28  ;;  %v3863_v28 = vadd.f32 %v10038_v15, %v10486_v36  ;;  %v12898_v36 = vld [vmem:[#allocation79_spill] sm:$0xff] }
 0x452   : > { %4323 = vadd.xlane.f32.xlu1 %v10581_v35  ;;  %v10605_v35 = vsub.f32 %v10100_v43, %v4421_v61  ;;  %v10622_v52 = vsub.f32 %v10110_v13, %v4419_v12  ;;  %v3874_v13 = vadd.f32 %v10490_v53, %v10038_v15  ;;  %v4425_v15 = vmul.f32 0.0078125, %v10518_v57 }
 0x453   : > { %v10593_v1 = vpop.f32.mrb[224].mxu1  ;;  %v10595_v33 = vpop.xlane.xlu1 %4191 }
 0x454   : > { %v10598_v16 = vpop.f32.mrb[225].mxu1  ;;  %4317 = vadd.xlane.f32.xlu0 %v10588_v5  ;;  %12887 = vst [vmem:[#allocation75_spill] sm:$0xff] %v10605_v35  ;;  %12890 = vst [vmem:[#allocation113_spill] sm:$0xff] %v10622_v52  ;;  %v4677_v43 = vmul.f32 %v10605_v35, %v10605_v35 }
 0x455   : > { %v10607_v30 = vpop.f32.mrb[226].mxu1  ;;  %v10609_v42 = vpop.xlane.xlu0 %4201 }
 0x456   : > { %v10614_v18 = vpop.f32.mrb[227].mxu1  ;;  %4319 = vadd.xlane.f32.xlu1 %v10602_v44 }
 0x457   : > { %12889 = vst [vmem:[#allocation112_spill] sm:$0xff] %v10614_v18  ;;  %v10619_v5 = vpop.xlane.xlu1 %4203 }
 0x458   : > { %4818 = vadd.xlane.f32.xlu0 %v4676_v37  ;;  %v4675_v37 = vmul.f32 %v10622_v52, %v10622_v52  ;;  %v10662_v52 = vld [vmem:[%s12343_s6 + $0x2] ss:$0 sm:$0xff] }
 0x459   : > { %v10626_v61 = vpop.xlane.xlu0 %4197 }
 0x45a   : > { %4820 = vadd.xlane.f32.xlu1 %v4677_v43  ;;  %v12893_v43 = vld [vmem:[#allocation81_spill] sm:$0xff] }
 0x45b   : > { %v10632_v32 = vpop.f32.mrb[228].mxu1  ;;  %v10634_v44 = vpop.xlane.xlu1 %4199  ;;  %v10647_v58 = vadd.f32 %v3871_v7, %v12893_v43  ;;  %v3866_v7 = vadd.f32 %v10662_v52, %v10495_v48  ;;  %v4422_v43 = vmul.f32 0.0078125, %v10507_v10  ;;  %v12901_v48 = vld [vmem:[#allocation80_spill] sm:$0xff] }
 0x45c   : > { %12891 = vst [vmem:[#allocation114_spill] sm:$0xff] %v10632_v32  ;;  %v10638_v12 = vpop.f32.mrb[229].mxu1  ;;  %4814 = vadd.xlane.f32.xlu0 %v4674_v23  ;;  %v4424_v32 = vmul.f32 0.0078125, %v10492_v2  ;;  %v12896_v23 = vld [vmem:[#allocation78_spill] sm:$0xff] }
 0x45d   : > { %12892 = vst [vmem:[#allocation115_spill] sm:$0xff] %v10638_v12  ;;  %v10642_v35 = vpop.f32.mrb[230].mxu1  ;;  %v10644_v9 = vpop.xlane.xlu0 %4209  ;;  %12894 = vst [vmem:[#allocation81_spill] sm:$0xff] %v10647_v58  ;;  %v10657_v12 = vadd.f32 %v3874_v13, %v12896_v23  ;;  %v10683_v57 = vadd.f32 %v3866_v7, %v12901_v48  ;;  %v4409_v48 = vmul.f32 0.0078125, %v10555_v56  ;;  %v4407_v56 = vmul.f32 0.0078125, %v10548_v47 }
 0x45e   : > { %v10652_v18 = vpop.f32.mrb[231].mxu1  ;;  %4816 = vadd.xlane.f32.xlu1 %v4675_v37  ;;  %v10671_v37 = vadd.f32 %v3863_v28, %v12898_v36  ;;  %v10674_v13 = vsub.f32 %v10116_v55, %v4424_v32  ;;  %v4423_v28 = vmul.f32 0.0078125, %v10541_v40  ;;  %v4408_v32 = vmul.f32 0.0078125, %v10500_v49 }
 0x45f   : > { %12895 = vst [vmem:[#allocation116_spill] sm:$0xff] %v10652_v18  ;;  %v10654_v53 = vpop.xlane.xlu1 %4211  ;;  %12897 = vst [vmem:[#allocation78_spill] sm:$0xff] %v10657_v12 }
 0x460   : > { %4329 = vadd.xlane.f32.xlu0 %v10647_v58  ;;  %12899 = vst [vmem:[#allocation79_spill] sm:$0xff] %v10671_v37  ;;  %12900 = vst [vmem:[#allocation117_spill] sm:$0xff] %v10674_v13  ;;  %v10686_v58 = vsub.f32 %v10131_v17, %v4425_v15  ;;  %v4680_v17 = vmul.f32 %v10674_v13, %v10674_v13  ;;  %v10708_v15 = vsub.f32 %v10141_v3, %v4423_v28 }
 0x461   : > { %v10668_v2 = vpop.xlane.xlu0 %4205  ;;  %12902 = vst [vmem:[#allocation80_spill] sm:$0xff] %v10683_v57  ;;  %v10727_v28 = vsub.f32 %v10151_v29, %v4409_v48 }
 0x462   : > { %4331 = vadd.xlane.f32.xlu1 %v10657_v12  ;;  %12903 = vst [vmem:[#allocation118_spill] sm:$0xff] %v10686_v58  ;;  %v10698_v12 = vsub.f32 %v10126_v54, %v4422_v43  ;;  %12905 = vst [vmem:[#allocation120_spill] sm:$0xff] %v10708_v15  ;;  %v4681_v49 = vmul.f32 %v10686_v58, %v10686_v58  ;;  %v10716_v43 = vsub.f32 %v10121_v14, %v4408_v32 }
 0x463   : > { %v10678_v23 = vpop.f32.mrb[232].mxu1  ;;  %v10680_v18 = vpop.xlane.xlu1 %4207  ;;  %12907 = vst [vmem:[#allocation122_spill] sm:$0xff] %v10727_v28  ;;  %v4679_v14 = vmul.f32 %v10708_v15, %v10708_v15  ;;  %v4665_v48 = vmul.f32 %v10727_v28, %v10727_v28  ;;  %v4428_v58 = vmul.f32 0.0078125, %v10564_v6 }
 0x464   : > { %v10689_v36 = vpop.f32.mrb[233].mxu1  ;;  %4325 = vadd.xlane.f32.xlu0 %v10671_v37  ;;  %12904 = vst [vmem:[#allocation119_spill] sm:$0xff] %v10698_v12  ;;  %12906 = vst [vmem:[#allocation121_spill] sm:$0xff] %v10716_v43  ;;  %v4678_v37 = vmul.f32 %v10698_v12, %v10698_v12  ;;  %v4664_v29 = vmul.f32 %v10716_v43, %v10716_v43 }
 0x465   : > { %v10692_v55 = vpop.f32.mrb[234].mxu1  ;;  %v10694_v10 = vpop.xlane.xlu0 %4217  ;;  %v10794_v6 = vsub.f32 %v10156_v60, %v4428_v58 }
 0x466   : > { %v10700_v7 = vpop.f32.mrb[235].mxu1  ;;  %4327 = vadd.xlane.f32.xlu1 %v10683_v57  ;;  %v4406_v57 = vmul.f32 0.0078125, %v10531_v25 }
 0x467   : > { %v10705_v40 = vpop.xlane.xlu1 %4219  ;;  %12916 = vst [vmem:[#allocation129_spill] sm:$0xff] %v10794_v6 }
 0x468   : > { %4826 = vadd.xlane.f32.xlu0 %v4680_v17 }
 0x469   : > { %v10713_v54 = vpop.xlane.xlu0 %4213 }
 0x46a   : > { %4828 = vadd.xlane.f32.xlu1 %v4681_v49  ;;  %v10738_v49 = vsub.f32 %v10136_v20, %v4406_v57  ;;  %v3887_v20 = vadd.f32 %v10662_v52, %v10516_v46 }
 0x46b   : > { %v10721_v13 = vpop.f32.mrb[236].mxu1  ;;  %v10723_v3 = vpop.xlane.xlu1 %4215 }
 0x46c   : > { %v10729_v17 = vpop.f32.mrb[237].mxu1  ;;  %4822 = vadd.xlane.f32.xlu0 %v4678_v37  ;;  %12908 = vst [vmem:[#allocation123_spill] sm:$0xff] %v10738_v49  ;;  %v10747_v37 = vsub.f32 %v10146_v31, %v4407_v56  ;;  %v4662_v57 = vmul.f32 %v10738_v49, %v10738_v49  ;;  %v3890_v31 = vadd.f32 %v10662_v52, %v10529_v11 }
 0x46d   : > { %v10733_v25 = vpop.f32.mrb[238].mxu1  ;;  %v10735_v32 = vpop.xlane.xlu0 %4225  ;;  %v3879_v49 = vadd.f32 %v10662_v52, %v10520_v51  ;;  %v12914_v51 = vld [vmem:[#allocation82_spill] sm:$0xff] }
 0x46e   : > { %v10740_v12 = vpop.f32.mrb[239].mxu1  ;;  %4824 = vadd.xlane.f32.xlu1 %v4679_v14  ;;  %12909 = vst [vmem:[#allocation124_spill] sm:$0xff] %v10747_v37 }
 0x46f   : > { %v10744_v47 = vpop.xlane.xlu1 %4227 }
 0x470   : > { %4794 = vadd.xlane.f32.xlu0 %v4664_v29  ;;  %v4663_v29 = vmul.f32 %v10747_v37, %v10747_v37  ;;  %v3882_v37 = vadd.f32 %v10662_v52, %v10533_v8  ;;  %v12917_v8 = vld [vmem:[#allocation83_spill] sm:$0xff] }
 0x471   : > { %v10751_v15 = vpop.xlane.xlu0 %4221 }
 0x472   : > { %4796 = vadd.xlane.f32.xlu1 %v4665_v48  ;;  %v10772_v48 = vadd.f32 %v3887_v20, %v9606_v22  ;;  %v10791_v20 = vadd.f32 %v3879_v49, %v12914_v51  ;;  %v4427_v49 = vmul.f32 0.0078125, %v10595_v33 }
 0x473   : > { %v10757_v14 = vpop.f32.mrb[240].mxu1  ;;  %v10759_v43 = vpop.xlane.xlu1 %4223 }
 0x474   : > { %12910 = vst [vmem:[#allocation125_spill] sm:$0xff] %v10757_v14  ;;  %v10763_v56 = vpop.f32.mrb[241].mxu1  ;;  %4790 = vadd.xlane.f32.xlu0 %v4662_v57  ;;  %12912 = vst [vmem:[#allocation127_spill] sm:$0xff] %v10772_v48  ;;  %v10782_v57 = vadd.f32 %v3890_v31, %v9597_v24  ;;  %v10827_v33 = vsub.f32 %v10171_v4, %v4427_v49  ;;  %v3906_v4 = vadd.f32 %v10662_v52, %v10562_v34 }
 0x475   : > { %v10767_v28 = vpop.f32.mrb[242].mxu1  ;;  %v10769_v46 = vpop.xlane.xlu0 %4233  ;;  %12915 = vst [vmem:[#allocation82_spill] sm:$0xff] %v10791_v20 }
 0x476   : > { %12911 = vst [vmem:[#allocation126_spill] sm:$0xff] %v10767_v28  ;;  %v10777_v14 = vpop.f32.mrb[243].mxu1  ;;  %4792 = vadd.xlane.f32.xlu1 %v4663_v29  ;;  %12913 = vst [vmem:[#allocation128_spill] sm:$0xff] %v10782_v57  ;;  %v4429_v28 = vmul.f32 0.0078125, %v10574_v38  ;;  %v4426_v29 = vmul.f32 0.0078125, %v10583_v62  ;;  %v10803_v38 = vadd.f32 %v3882_v37, %v12917_v8 }
 0x477   : > { %v10779_v11 = vpop.xlane.xlu1 %4235  ;;  %12921 = vst [vmem:[#allocation132_spill] sm:$0xff] %v10827_v33 }
 0x478   : > { %4337 = vadd.xlane.f32.xlu0 %v10772_v48  ;;  %12918 = vst [vmem:[#allocation83_spill] sm:$0xff] %v10803_v38  ;;  %v10806_v48 = vsub.f32 %v10161_v50, %v4429_v28  ;;  %v10817_v58 = vsub.f32 %v10166_v39, %v4426_v29  ;;  %v4684_v50 = vmul.f32 %v10794_v6, %v10794_v6  ;;  %v4432_v6 = vmul.f32 0.0078125, %v10609_v42 }
 0x479   : > { %v10788_v22 = vpop.xlane.xlu0 %4229  ;;  %v3903_v39 = vadd.f32 %v10662_v52, %v10553_v19 }
 0x47a   : > { %4339 = vadd.xlane.f32.xlu1 %v10782_v57  ;;  %12919 = vst [vmem:[#allocation130_spill] sm:$0xff] %v10806_v48  ;;  %12920 = vst [vmem:[#allocation131_spill] sm:$0xff] %v10817_v58  ;;  %v4685_v37 = vmul.f32 %v10806_v48, %v10806_v48  ;;  %v4682_v29 = vmul.f32 %v10817_v58, %v10817_v58  ;;  %v3895_v58 = vadd.f32 %v10662_v52, %v10558_v63 }
 0x47b   : > { %v10798_v24 = vpop.f32.mrb[244].mxu1  ;;  %v10800_v31 = vpop.xlane.xlu1 %4231  ;;  %v10874_v42 = vsub.f32 %v10176_v26, %v4432_v6  ;;  %v12930_v26 = vld [vmem:[#allocation8_spill] sm:$0xff] }
 0x47c   : > { %v10809_v51 = vpop.f32.mrb[245].mxu1  ;;  %4333 = vadd.xlane.f32.xlu0 %v10791_v20  ;;  %v10871_v63 = vadd.f32 %v3895_v58, %v9616_v45 }
 0x47d   : > { %v10812_v60 = vpop.f32.mrb[246].mxu1  ;;  %v10814_v62 = vpop.xlane.xlu0 %4241  ;;  %12927 = vst [vmem:[#allocation138_spill] sm:$0xff] %v10874_v42 }
 0x47e   : > { %v10819_v57 = vpop.f32.mrb[247].mxu1  ;;  %4335 = vadd.xlane.f32.xlu1 %v10803_v38  ;;  %12926 = vst [vmem:[#allocation137_spill] sm:$0xff] %v10871_v63 }
 0x47f   : > { %v10824_v28 = vpop.xlane.xlu1 %4243 }
 0x480   : > { %4834 = vadd.xlane.f32.xlu0 %v4684_v50  ;;  %v4683_v50 = vmul.f32 %v10827_v33, %v10827_v33  ;;  %v3898_v33 = vadd.f32 %v10662_v52, %v10569_v27 }
 0x481   : > { %v10831_v8 = vpop.xlane.xlu0 %4237 }
 0x482   : > { %4836 = vadd.xlane.f32.xlu1 %v4685_v37  ;;  %v10852_v37 = vadd.f32 %v3903_v39, %v9622_v41  ;;  %v4430_v39 = vmul.f32 0.0078125, %v10626_v61  ;;  %v10881_v27 = vadd.f32 %v3898_v33, %v9619_v59  ;;  %v4688_v61 = vmul.f32 %v10874_v42, %v10874_v42  ;;  %v12932_v59 = vld [vmem:[#allocation6_spill] sm:$0xff] }
 0x483   : > { %v10837_v38 = vpop.xlane.xlu1 %4239  ;;  %v10839_v20 = vpop.f32.mrb[248].mxu1 }
 0x484   : > { %4830 = vadd.xlane.f32.xlu0 %v4682_v29  ;;  %v10843_v49 = vpop.f32.mrb[249].mxu1  ;;  %12924 = vst [vmem:[#allocation135_spill] sm:$0xff] %v10852_v37  ;;  %12928 = vst [vmem:[#allocation139_spill] sm:$0xff] %v10881_v27  ;;  %v10891_v6 = vsub.f32 %v12930_v26, %v4430_v39  ;;  %v3922_v26 = vadd.f32 %v10662_v52, %v10607_v30  ;;  %v12938_v30 = vld [vmem:[#allocation112_spill] sm:$0xff] }
 0x485   : > { %12922 = vst [vmem:[#allocation133_spill] sm:$0xff] %v10843_v49  ;;  %v10847_v48 = vpop.xlane.xlu0 %4249  ;;  %v10849_v19 = vpop.f32.mrb[250].mxu1  ;;  %v10862_v49 = vadd.f32 %v3906_v4, %v9613_v21  ;;  %v4431_v4 = vmul.f32 0.0078125, %v10634_v44 }
 0x486   : > { %12923 = vst [vmem:[#allocation134_spill] sm:$0xff] %v10849_v19  ;;  %4832 = vadd.xlane.f32.xlu1 %v4683_v50  ;;  %v10857_v34 = vpop.f32.mrb[251].mxu1  ;;  %v4433_v19 = vmul.f32 0.0078125, %v10619_v5  ;;  %12931 = vst [vmem:[#allocation8_spill] sm:$0xff] %v10891_v6  ;;  %v3919_v50 = vadd.f32 %v10662_v52, %v10593_v1  ;;  %v3911_v1 = vadd.f32 %v10662_v52, %v10598_v16  ;;  %v12941_v16 = vld [vmem:[#allocation9_spill] sm:$0xff] }
 0x487   : > { %v10859_v29 = vpop.xlane.xlu1 %4251  ;;  %12925 = vst [vmem:[#allocation136_spill] sm:$0xff] %v10862_v49  ;;  %v10899_v33 = vsub.f32 %v12932_v59, %v4431_v4  ;;  %v12934_v59 = vld [vmem:[#allocation87_spill] sm:$0xff] }
 0x488   : > { %4345 = vadd.xlane.f32.xlu0 %v10852_v37  ;;  %v10884_v5 = vsub.f32 %v10181_v0, %v4433_v19  ;;  %v4686_v19 = vmul.f32 %v10891_v6, %v10891_v6 }
 0x489   : > { %v10868_v41 = vpop.xlane.xlu0 %4245  ;;  %12933 = vst [vmem:[#allocation6_spill] sm:$0xff] %v10899_v33  ;;  %v4687_v4 = vmul.f32 %v10899_v33, %v10899_v33  ;;  %v4437_v33 = vmul.f32 0.0078125, %v10654_v53  ;;  %v12945_v53 = vld [vmem:[#allocation7_spill] sm:$0xff] }
 0x48a   : > { %4347 = vadd.xlane.f32.xlu1 %v10862_v49  ;;  %12929 = vst [vmem:[#allocation140_spill] sm:$0xff] %v10884_v5  ;;  %v4689_v0 = vmul.f32 %v10884_v5, %v10884_v5  ;;  %v12936_v49 = vld [vmem:[#allocation84_spill] sm:$0xff] }
 0x48b   : > { %v10878_v21 = vpop.xlane.xlu1 %4247  ;;  %v10926_v37 = vadd.f32 %v3922_v26, %v12936_v49  ;;  %v12943_v26 = vld [vmem:[#allocation86_spill] sm:$0xff]  ;;  %v10948_v5 = vsub.f32 %v12945_v53, %v4437_v33 }
 0x48c   : > { %4341 = vadd.xlane.f32.xlu0 %v10871_v63  ;;  %v12951_v53 = vld [vmem:[#allocation114_spill] sm:$0xff] }
 0x48d   : > { %v10888_v45 = vpop.xlane.xlu0 %4257  ;;  %12937 = vst [vmem:[#allocation84_spill] sm:$0xff] %v10926_v37  ;;  %12946 = vst [vmem:[#allocation86_spill] sm:$0xff] %v10948_v5 }
 0x48e   : > { %4343 = vadd.xlane.f32.xlu1 %v10881_v27  ;;  %v10918_v27 = vadd.f32 %v3919_v50, %v12934_v59  ;;  %v12939_v59 = vld [vmem:[#allocation85_spill] sm:$0xff] }
 0x48f   : > { %v10896_v58 = vpop.xlane.xlu1 %4259  ;;  %v10935_v6 = vadd.f32 %v3911_v1, %v12939_v59 }
 0x490   : > { %4842 = vadd.xlane.f32.xlu0 %v4688_v61  ;;  %12935 = vst [vmem:[#allocation87_spill] sm:$0xff] %v10918_v27 }
 0x491   : > { %v10903_v44 = vpop.xlane.xlu0 %4253  ;;  %12940 = vst [vmem:[#allocation112_spill] sm:$0xff] %v10935_v6 }
 0x492   : > { %4844 = vadd.xlane.f32.xlu1 %v4689_v0  ;;  %v4436_v0 = vmul.f32 0.0078125, %v10644_v9 }
 0x493   : > { %v10909_v39 = vpop.xlane.xlu1 %4255 }
 0x494   : > { %4838 = vadd.xlane.f32.xlu0 %v4686_v19  ;;  %v3914_v19 = vadd.f32 %v10662_v52, %v12938_v30  ;;  %v10938_v9 = vsub.f32 %v12941_v16, %v4436_v0  ;;  %v12947_v0 = vld [vmem:[#allocation5_spill] sm:$0xff] }
 0x495   : > { %v10915_v61 = vpop.xlane.xlu0 %4265 }
 0x496   : > { %4840 = vadd.xlane.f32.xlu1 %v4687_v4  ;;  %12942 = vst [vmem:[#allocation85_spill] sm:$0xff] %v10938_v9  ;;  %v4434_v4 = vmul.f32 0.0078125, %v10668_v2  ;;  %v10945_v30 = vadd.f32 %v3914_v19, %v12943_v26  ;;  %v4692_v2 = vmul.f32 %v10938_v9, %v10938_v9  ;;  %v12949_v19 = vld [vmem:[#allocation13_spill] sm:$0xff]  ;;  %v12957_v9 = vld [vmem:[#allocation88_spill] sm:$0xff] }
 0x497   : > { %v10923_v63 = vpop.xlane.xlu1 %4267 }
 0x498   : > { %4353 = vadd.xlane.f32.xlu0 %v10918_v27  ;;  %12944 = vst [vmem:[#allocation9_spill] sm:$0xff] %v10945_v30  ;;  %v4435_v27 = vmul.f32 0.0078125, %v10680_v18  ;;  %v10955_v59 = vsub.f32 %v12947_v0, %v4434_v4  ;;  %v4693_v18 = vmul.f32 %v10948_v5, %v10948_v5  ;;  %v3935_v4 = vadd.f32 %v10662_v52, %v12951_v53  ;;  %v12955_v5 = vld [vmem:[#allocation115_spill] sm:$0xff] }
 0x499   : > { %v10932_v50 = vpop.xlane.xlu0 %4261  ;;  %v4440_v53 = vmul.f32 0.0078125, %v10694_v10 }
 0x49a   : > { %4355 = vadd.xlane.f32.xlu1 %v10926_v37  ;;  %12948 = vst [vmem:[#allocation7_spill] sm:$0xff] %v10955_v59  ;;  %v10963_v26 = vsub.f32 %v12949_v19, %v4435_v27  ;;  %v4690_v0 = vmul.f32 %v10955_v59, %v10955_v59  ;;  %v12953_v19 = vld [vmem:[#allocation91_spill] sm:$0xff] }
 0x49b   : > { %v10942_v49 = vpop.xlane.xlu1 %4263  ;;  %v10982_v37 = vadd.f32 %v3935_v4, %v12953_v19  ;;  %v12960_v19 = vld [vmem:[#allocation89_spill] sm:$0xff] }
 0x49c   : > { %4349 = vadd.xlane.f32.xlu0 %v10935_v6  ;;  %12950 = vst [vmem:[#allocation5_spill] sm:$0xff] %v10963_v26  ;;  %v3938_v6 = vadd.f32 %v10662_v52, %v10642_v35  ;;  %v4691_v27 = vmul.f32 %v10963_v26, %v10963_v26  ;;  %v12959_v35 = vld [vmem:[#allocation116_spill] sm:$0xff]  ;;  %v4441_v26 = vmul.f32 0.0078125, %v10705_v40  ;;  %v12966_v40 = vld [vmem:[#allocation11_spill] sm:$0xff] }
 0x49d   : > { %v10952_v1 = vpop.xlane.xlu0 %4273  ;;  %12954 = vst [vmem:[#allocation114_spill] sm:$0xff] %v10982_v37 }
 0x49e   : > { %4351 = vadd.xlane.f32.xlu1 %v10945_v30  ;;  %v10990_v42 = vadd.f32 %v3938_v6, %v12957_v9  ;;  %v12964_v9 = vld [vmem:[#allocation90_spill] sm:$0xff] }
 0x49f   : > { %v10960_v16 = vpop.xlane.xlu1 %4275 }
 0x4a0   : > { %4850 = vadd.xlane.f32.xlu0 %v4692_v2  ;;  %12958 = vst [vmem:[#allocation115_spill] sm:$0xff] %v10990_v42 }
 0x4a1   : > { %v10967_v33 = vpop.xlane.xlu0 %4269 }
 0x4a2   : > { %4852 = vadd.xlane.f32.xlu1 %v4693_v18  ;;  %v3927_v18 = vadd.f32 %v10662_v52, %v12955_v5  ;;  %v12962_v5 = vld [vmem:[#allocation10_spill] sm:$0xff] }
 0x4a3   : > { %v10973_v30 = vpop.xlane.xlu1 %4271  ;;  %v11002_v10 = vsub.f32 %v12962_v5, %v4440_v53  ;;  %v12968_v53 = vld [vmem:[#allocation12_spill] sm:$0xff] }
 0x4a4   : > { %4846 = vadd.xlane.f32.xlu0 %v4690_v0  ;;  %v3930_v0 = vadd.f32 %v10662_v52, %v12959_v35 }
 0x4a5   : > { %v10979_v2 = vpop.xlane.xlu0 %4281  ;;  %12963 = vst [vmem:[#allocation116_spill] sm:$0xff] %v11002_v10 }
 0x4a6   : > { %12952 = vst [vmem:[#allocation13_spill] sm:$0xff] %v10979_v2  ;;  %4848 = vadd.xlane.f32.xlu1 %v4691_v27  ;;  %v10999_v2 = vadd.f32 %v3927_v18, %v12960_v19  ;;  %v4438_v27 = vmul.f32 0.0078125, %v10713_v54  ;;  %v11009_v35 = vadd.f32 %v3930_v0, %v12964_v9  ;;  %v4696_v54 = vmul.f32 %v11002_v10, %v11002_v10  ;;  %v12970_v0 = vld [vmem:[#allocation17_spill] sm:$0xff] }
 0x4a7   : > { %v10987_v59 = vpop.xlane.xlu1 %4283 }
 0x4a8   : > { %12956 = vst [vmem:[#allocation91_spill] sm:$0xff] %v10987_v59  ;;  %4361 = vadd.xlane.f32.xlu0 %v10982_v37  ;;  %12961 = vst [vmem:[#allocation88_spill] sm:$0xff] %v10999_v2  ;;  %v11012_v59 = vsub.f32 %v12966_v40, %v4441_v26  ;;  %v4439_v37 = vmul.f32 0.0078125, %v10723_v3  ;;  %v11019_v19 = vsub.f32 %v12968_v53, %v4438_v27 }
 0x4a9   : > { %v10996_v4 = vpop.xlane.xlu0 %4277  ;;  %12965 = vst [vmem:[#allocation89_spill] sm:$0xff] %v11009_v35  ;;  %v3951_v27 = vadd.f32 %v10662_v52, %v10678_v23  ;;  %v3943_v23 = vadd.f32 %v10662_v52, %v10689_v36  ;;  %v12978_v36 = vld [vmem:[#allocation14_spill] sm:$0xff] }
 0x4aa   : > { %4363 = vadd.xlane.f32.xlu1 %v10990_v42  ;;  %12967 = vst [vmem:[#allocation10_spill] sm:$0xff] %v11012_v59  ;;  %12969 = vst [vmem:[#allocation90_spill] sm:$0xff] %v11019_v19  ;;  %v11027_v9 = vsub.f32 %v12970_v0, %v4439_v37  ;;  %v4697_v3 = vmul.f32 %v11012_v59, %v11012_v59  ;;  %v4694_v40 = vmul.f32 %v11019_v19, %v11019_v19  ;;  %v12972_v0 = vld [vmem:[#allocation95_spill] sm:$0xff]  ;;  %v12974_v19 = vld [vmem:[#allocation92_spill] sm:$0xff] }
 0x4ab   : > { %v11006_v6 = vpop.xlane.xlu1 %4279 }
 0x4ac   : > { %4357 = vadd.xlane.f32.xlu0 %v10999_v2  ;;  %12971 = vst [vmem:[#allocation11_spill] sm:$0xff] %v11027_v9  ;;  %v4695_v37 = vmul.f32 %v11027_v9, %v11027_v9  ;;  %v11046_v2 = vadd.f32 %v3951_v27, %v12972_v0  ;;  %v12976_v0 = vld [vmem:[#allocation93_spill] sm:$0xff] }
 0x4ad   : > { %v11016_v18 = vpop.xlane.xlu0 %4289  ;;  %v11063_v9 = vadd.f32 %v3943_v23, %v12976_v0 }
 0x4ae   : > { %4359 = vadd.xlane.f32.xlu1 %v11009_v35  ;;  %v3954_v35 = vadd.f32 %v10662_v52, %v10692_v55  ;;  %12973 = vst [vmem:[#allocation12_spill] sm:$0xff] %v11046_v2  ;;  %v3946_v55 = vadd.f32 %v10662_v52, %v10700_v7 }
 0x4af   : > { %v11024_v5 = vpop.xlane.xlu1 %4291  ;;  %12977 = vst [vmem:[#allocation95_spill] sm:$0xff] %v11063_v9 }
 0x4b0   : > { %4858 = vadd.xlane.f32.xlu0 %v4696_v54  ;;  %v11054_v59 = vadd.f32 %v3954_v35, %v12974_v19  ;;  %v12980_v19 = vld [vmem:[#allocation94_spill] sm:$0xff] }
 0x4b1   : > { %v11031_v26 = vpop.xlane.xlu0 %4285  ;;  %v11073_v7 = vadd.f32 %v3946_v55, %v12980_v19  ;;  %v12986_v55 = vld [vmem:[#allocation21_spill] sm:$0xff] }
 0x4b2   : > { %4860 = vadd.xlane.f32.xlu1 %v4697_v3  ;;  %v4444_v3 = vmul.f32 0.0078125, %v10735_v32  ;;  %12975 = vst [vmem:[#allocation17_spill] sm:$0xff] %v11054_v59 }
 0x4b3   : > { %v11037_v53 = vpop.xlane.xlu1 %4287  ;;  %12981 = vst [vmem:[#allocation93_spill] sm:$0xff] %v11073_v7 }
 0x4b4   : > { %4854 = vadd.xlane.f32.xlu0 %v4694_v40  ;;  %v4445_v40 = vmul.f32 0.0078125, %v10744_v47  ;;  %v11066_v32 = vsub.f32 %v12978_v36, %v4444_v3  ;;  %v12982_v47 = vld [vmem:[#allocation15_spill] sm:$0xff]  ;;  %v12984_v3 = vld [vmem:[#allocation16_spill] sm:$0xff] }
 0x4b5   : > { %v11043_v54 = vpop.xlane.xlu0 %4297 }
 0x4b6   : > { %4856 = vadd.xlane.f32.xlu1 %v4695_v37  ;;  %12979 = vst [vmem:[#allocation92_spill] sm:$0xff] %v11066_v32  ;;  %v4442_v37 = vmul.f32 0.0078125, %v10751_v15  ;;  %v11076_v10 = vsub.f32 %v12982_v47, %v4445_v40  ;;  %v4700_v15 = vmul.f32 %v11066_v32, %v11066_v32 }
 0x4b7   : > { %v11051_v42 = vpop.xlane.xlu1 %4299 }
 0x4b8   : > { %4369 = vadd.xlane.f32.xlu0 %v11046_v2  ;;  %12983 = vst [vmem:[#allocation14_spill] sm:$0xff] %v11076_v10  ;;  %v4443_v2 = vmul.f32 0.0078125, %v10759_v43  ;;  %v11083_v0 = vsub.f32 %v12984_v3, %v4442_v37  ;;  %v4701_v43 = vmul.f32 %v11076_v10, %v11076_v10  ;;  %v3967_v37 = vadd.f32 %v10662_v52, %v10721_v13  ;;  %v12989_v13 = vld [vmem:[#allocation99_spill] sm:$0xff]  ;;  %v12991_v10 = vld [vmem:[#allocation96_spill] sm:$0xff] }
 0x4b9   : > { %v11060_v27 = vpop.xlane.xlu0 %4293 }
 0x4ba   : > { %4371 = vadd.xlane.f32.xlu1 %v11054_v59  ;;  %12985 = vst [vmem:[#allocation94_spill] sm:$0xff] %v11083_v0  ;;  %v11091_v19 = vsub.f32 %v12986_v55, %v4443_v2  ;;  %v4698_v47 = vmul.f32 %v11083_v0, %v11083_v0  ;;  %v4448_v55 = vmul.f32 0.0078125, %v10769_v46  ;;  %v3962_v0 = vadd.f32 %v10662_v52, %v10740_v12 }
 0x4bb   : > { %v11070_v35 = vpop.xlane.xlu1 %4295 }
 0x4bc   : > { %4365 = vadd.xlane.f32.xlu0 %v11063_v9  ;;  %12987 = vst [vmem:[#allocation15_spill] sm:$0xff] %v11091_v19  ;;  %v4699_v2 = vmul.f32 %v11091_v19, %v11091_v19 }
 0x4bd   : > { %v11080_v23 = vpop.xlane.xlu0 %4305 }
 0x4be   : > { %4367 = vadd.xlane.f32.xlu1 %v11073_v7  ;;  %v3970_v7 = vadd.f32 %v10662_v52, %v10733_v25  ;;  %v4449_v25 = vmul.f32 0.0078125, %v10779_v11 }
 0x4bf   : > { %v11088_v36 = vpop.xlane.xlu1 %4307 }
 0x4c0   : > { %4866 = vadd.xlane.f32.xlu0 %v4700_v15  ;;  %v3959_v15 = vadd.f32 %v10662_v52, %v10729_v17  ;;  %v11117_v32 = vadd.f32 %v3970_v7, %v12991_v10  ;;  %v12993_v17 = vld [vmem:[#allocation97_spill] sm:$0xff]  ;;  %v12997_v10 = vld [vmem:[#allocation98_spill] sm:$0xff] }
 0x4c1   : > { %v11095_v40 = vpop.xlane.xlu0 %4301  ;;  %v11129_v7 = vadd.f32 %v3962_v0, %v12997_v10 }
 0x4c2   : > { %4868 = vadd.xlane.f32.xlu1 %v4701_v43  ;;  %v11111_v43 = vadd.f32 %v3967_v37, %v12989_v13  ;;  %12992 = vst [vmem:[#allocation99_spill] sm:$0xff] %v11117_v32  ;;  %v11121_v46 = vadd.f32 %v3959_v15, %v12993_v17  ;;  %v12995_v37 = vld [vmem:[#allocation18_spill] sm:$0xff]  ;;  %v4447_v15 = vmul.f32 0.0078125, %v10800_v31  ;;  %v13005_v31 = vld [vmem:[#allocation25_spill] sm:$0xff] }
 0x4c3   : > { %v11101_v3 = vpop.xlane.xlu1 %4303  ;;  %v11124_v13 = vsub.f32 %v12995_v37, %v4448_v55  ;;  %12998 = vst [vmem:[#allocation18_spill] sm:$0xff] %v11129_v7 }
 0x4c4   : > { %12988 = vst [vmem:[#allocation16_spill] sm:$0xff] %v11101_v3  ;;  %4862 = vadd.xlane.f32.xlu0 %v4698_v47  ;;  %12990 = vst [vmem:[#allocation21_spill] sm:$0xff] %v11111_v43 }
 0x4c5   : > { %v4803_v9 = vpop.xlane.xlu0 %4802  ;;  %12994 = vst [vmem:[#allocation96_spill] sm:$0xff] %v11121_v46  ;;  %12996 = vst [vmem:[#allocation97_spill] sm:$0xff] %v11124_v13  ;;  %v4704_v0 = vmul.f32 %v11124_v13, %v11124_v13  ;;  %v13015_v13 = vld [vmem:[#allocation59_spill] sm:$0xff] }
 0x4c6   : > { %v5052_v59 = vmul.f32 0.0078125, %v4803_v9  ;;  %4864 = vadd.xlane.f32.xlu1 %v4699_v2  ;;  %v4446_v2 = vmul.f32 0.0078125, %v10788_v22 }
 0x4c7   : > { %v4805_v47 = vpop.xlane.xlu1 %4804 }
 0x4c8   : > { %v5180_v19 = vadd.f32 1e-05, %v5052_v59  ;;  %v5053_v3 = vmul.f32 0.0078125, %v4805_v47  ;;  %4377 = vadd.xlane.f32.xlu0 %v11111_v43  ;;  %v12999_v59 = vld [vmem:[#allocation19_spill] sm:$0xff] }
 0x4c9   : > { %v4799_v9 = vpop.xlane.xlu0 %4798  ;;  %v11132_v47 = vsub.f32 %v12999_v59, %v4449_v25  ;;  %v3975_v59 = vadd.f32 %v10662_v52, %v10763_v56  ;;  %v4452_v56 = vmul.f32 0.0078125, %v10814_v62 }
 0x4ca   : > { %8478 = vrsqrt.f32 %v5180_v19  ;;  %v5181_v12 = vadd.f32 1e-05, %v5053_v3  ;;  %v5050_v11 = vmul.f32 0.0078125, %v4799_v9  ;;  %4379 = vadd.xlane.f32.xlu1 %v11117_v32  ;;  %v13002_v19 = vld [vmem:[#allocation20_spill] sm:$0xff]  ;;  %v11147_v9 = vsub.f32 %v13005_v31, %v4447_v15 }
 0x4cb   : > { %13000 = vst [vmem:[#allocation98_spill] sm:$0xff] %v11132_v47  ;;  %v4801_v43 = vpop.xlane.xlu1 %4800  ;;  %v11139_v3 = vsub.f32 %v13002_v19, %v4446_v2  ;;  %v13008_v2 = vld [vmem:[#allocation125_spill] sm:$0xff] }
 0x4cc   : > { %8480 = vrsqrt.f32 %v5181_v12  ;;  %v5178_v55 = vadd.f32 1e-05, %v5050_v11  ;;  %v5051_v17 = vmul.f32 0.0078125, %v4801_v43  ;;  %4373 = vadd.xlane.f32.xlu0 %v11121_v46  ;;  %13006 = vst [vmem:[#allocation25_spill] sm:$0xff] %v11147_v9  ;;  %v4705_v43 = vmul.f32 %v11132_v47, %v11132_v47  ;;  %v13014_v47 = vld [vmem:[#allocation101_spill] sm:$0xff] }
 0x4cd   : > { %v11136_v22 = vpop.xlane.xlu0 %4313  ;;  %13003 = vst [vmem:[#allocation20_spill] sm:$0xff] %v11139_v3  ;;  %v3983_v11 = vadd.f32 %v10662_v52, %v13008_v2  ;;  %v4702_v10 = vmul.f32 %v11139_v3, %v11139_v3  ;;  %v4703_v31 = vmul.f32 %v11147_v9, %v11147_v9  ;;  %v13011_v2 = vld [vmem:[#allocation61_spill] sm:$0xff]  ;;  %v13012_v3 = vld [vmem:[#allocation103_spill] sm:$0xff] }
 0x4ce   : > { %13001 = vst [vmem:[#allocation19_spill] sm:$0xff] %v11136_v22  ;;  %8482 = vrsqrt.f32 %v5178_v55  ;;  %v5179_v37 = vadd.f32 1e-05, %v5051_v17  ;;  %4375 = vadd.xlane.f32.xlu1 %v11129_v7  ;;  %v13010_v17 = vld [vmem:[#allocation126_spill] sm:$0xff] }
 0x4cf   : > { %v11144_v25 = vpop.xlane.xlu1 %4315  ;;  %v3986_v19 = vadd.f32 %v10662_v52, %v13010_v17  ;;  %v11176_v32 = vadd.f32 %v3983_v11, %v13012_v3 }
 0x4d0   : > { %13004 = vst [vmem:[#allocation141_spill] sm:$0xff] %v11144_v25  ;;  %8484 = vrsqrt.f32 %v5179_v37  ;;  %4874 = vadd.xlane.f32.xlu0 %v4704_v0  ;;  %v3978_v37 = vadd.f32 %v10662_v52, %v10777_v14  ;;  %v11168_v0 = vld [vmem:[%s12343_s6 + $0x3] ss:$0 sm:$0xff] }
 0x4d1   : > { %v11151_v12 = vpop.xlane.xlu0 %4309  ;;  %13013 = vst [vmem:[#allocation126_spill] sm:$0xff] %v11176_v32 }
 0x4d2   : > { %13007 = vst [vmem:[#allocation142_spill] sm:$0xff] %v11151_v12  ;;  %4876 = vadd.xlane.f32.xlu1 %v4705_v43  ;;  %v4453_v43 = vmul.f32 0.0078125, %v10824_v28  ;;  %v13016_v12 = vld [vmem:[#allocation100_spill] sm:$0xff] }
 0x4d3   : > { %v11159_v15 = vpop.xlane.xlu1 %4311 }
 0x4d4   : > { %13009 = vst [vmem:[#allocation125_spill] sm:$0xff] %v11159_v15  ;;  %v8479_v55 = vpop.eup %8478  ;;  %4870 = vadd.xlane.f32.xlu0 %v4702_v10  ;;  %v11180_v10 = vadd.f32 %v3975_v59, %v13014_v47 }
 0x4d5   : > { %v5436_v7 = vmul.f32 %v8479_v55, %v13011_v2  ;;  %v4811_v46 = vpop.xlane.xlu0 %4810  ;;  %v11185_v55 = vadd.f32 %v3986_v19, %v13016_v12  ;;  %v13017_v2 = vld [vmem:[#allocation102_spill] sm:$0xff]  ;;  %v13022_v19 = vld [vmem:[#allocation60_spill] sm:$0xff] }
 0x4d6   : > { %v8481_v17 = vpop.eup %8480  ;;  %v5056_v14 = vmul.f32 0.0078125, %v4811_v46  ;;  %4872 = vadd.xlane.f32.xlu1 %v4703_v31  ;;  %v11188_v25 = vadd.f32 %v3978_v37, %v13017_v2  ;;  %v11193_v46 = vld [vmem:[%s12343_s6 + $0x4] ss:$0 sm:$0xff]  ;;  %v4450_v2 = vmul.f32 0.0078125, %v10831_v8 }
 0x4d7   : > { %v5568_v9 = vmul.f32 %v11168_v0, %v5436_v7  ;;  %v5437_v62 = vmul.f32 %v8481_v17, %v13015_v13  ;;  %v4813_v15 = vpop.xlane.xlu1 %4812  ;;  %v13018_v7 = vld [vmem:[#allocation22_spill] sm:$0xff]  ;;  %v13020_v13 = vld [vmem:[#allocation23_spill] sm:$0xff] }
 0x4d8   : > { %v8483_v28 = vpop.eup %8482  ;;  %v5184_v3 = vadd.f32 1e-05, %v5056_v14  ;;  %v5057_v47 = vmul.f32 0.0078125, %v4813_v15  ;;  %4385 = vadd.xlane.f32.xlu0 %v11176_v32  ;;  %v11197_v11 = vsub.f32 %v13018_v7, %v4452_v56  ;;  %v11200_v59 = vsub.f32 %v13020_v13, %v4453_v43  ;;  %v13023_v13 = vld [vmem:[#allocation65_spill] sm:$0xff] }
 0x4d9   : > { %v5569_v12 = vmul.f32 %v11168_v0, %v5437_v62  ;;  %v5434_v37 = vmul.f32 %v8483_v28, %v13022_v19  ;;  %v4807_v31 = vpop.xlane.xlu0 %4806  ;;  %v5700_v56 = vadd.f32 %v11193_v46, %v5568_v9  ;;  %v4451_v28 = vmul.f32 0.0078125, %v10837_v38  ;;  %v13024_v9 = vld [vmem:[#allocation24_spill] sm:$0xff] }
 0x4da   : > { %13019 = vst [vmem:[#allocation61_spill] sm:$0xff] %v11197_v11  ;;  %13021 = vst [vmem:[#allocation103_spill] sm:$0xff] %v11200_v59  ;;  %v8485_v17 = vpop.eup %8484  ;;  %8486 = vrsqrt.f32 %v5184_v3  ;;  %v5185_v15 = vadd.f32 1e-05, %v5057_v47  ;;  %v5054_v14 = vmul.f32 0.0078125, %v4807_v31  ;;  %4387 = vadd.xlane.f32.xlu1 %v11185_v55  ;;  %v11218_v31 = vsub.f32 %v13024_v9, %v4450_v2  ;;  %v13026_v2 = vld [vmem:[#allocation29_spill] sm:$0xff] }
 0x4db   : > { %v5701_v43 = vadd.f32 %v11193_v46, %v5569_v12  ;;  %v5566_v7 = vmul.f32 %v11168_v0, %v5434_v37  ;;  %v5435_v32 = vmul.f32 %v8485_v17, %v13023_v13  ;;  %v4809_v62 = vpop.xlane.xlu1 %4808  ;;  %v4708_v38 = vmul.f32 %v11197_v11, %v11197_v11 }
 0x4dc   : > { %8488 = vrsqrt.f32 %v5185_v15  ;;  %v5182_v19 = vadd.f32 1e-05, %v5054_v14  ;;  %v5055_v22 = vmul.f32 0.0078125, %v4809_v62  ;;  %4381 = vadd.xlane.f32.xlu0 %v11180_v10  ;;  %13025 = vst [vmem:[#allocation101_spill] sm:$0xff] %v11218_v31  ;;  %v11231_v15 = vsub.f32 %v13026_v2, %v4451_v28 }
 0x4dd   : > { %v7088_v8 = vpack.c.bf16 %v5701_v43, %v5700_v56  ;;  %v5567_v3 = vmul.f32 %v11168_v0, %v5435_v32  ;;  %v11215_v47 = vpop.xlane.xlu0 %4321  ;;  %v5698_v37 = vadd.f32 %v11193_v46, %v5566_v7  ;;  %v3999_v43 = vadd.f32 %v10662_v52, %v10798_v24 }
 0x4de   : > { %8490 = vrsqrt.f32 %v5182_v19  ;;  %v5183_v12 = vadd.f32 1e-05, %v5055_v22  ;;  %4383 = vadd.xlane.f32.xlu1 %v11188_v25  ;;  %13027 = vst [vmem:[#allocation59_spill] sm:$0xff] %v11231_v15  ;;  %v4709_v22 = vmul.f32 %v11200_v59, %v11200_v59  ;;  %v4706_v7 = vmul.f32 %v11218_v31, %v11218_v31  ;;  %v13032_v59 = vld [vmem:[#allocation104_spill] sm:$0xff] }
 0x4df   : > { %7407 = vst [vmem:[%s11223_s20 + $0x18] sm:$0xff] %v7088_v8   ;;  %v5699_v32 = vadd.f32 %v11193_v46, %v5567_v3  ;;  %v11228_v17 = vpop.xlane.xlu1 %4323  ;;  %v3991_v13 = vadd.f32 %v10662_v52, %v10809_v51  ;;  %v4002_v19 = vadd.f32 %v10662_v52, %v10812_v60  ;;  %v3994_v8 = vadd.f32 %v10662_v52, %v10819_v57  ;;  %v13030_v60 = vld [vmem:[#allocation105_spill] sm:$0xff] }
 0x4e0   : > { %8492 = vrsqrt.f32 %v5183_v12  ;;  %4882 = vadd.xlane.f32.xlu0 %v4708_v38  ;;  %v4707_v24 = vmul.f32 %v11231_v15, %v11231_v15  ;;  %v4456_v3 = vmul.f32 0.0078125, %v10847_v48  ;;  %v4457_v9 = vmul.f32 0.0078125, %v10859_v29  ;;  %v13028_v12 = vld [vmem:[#allocation69_spill] sm:$0xff] }
 0x4e1   : > { %v7083_v14 = vpack.c.bf16 %v5699_v32, %v5698_v37  ;;  %v11235_v56 = vpop.xlane.xlu0 %4317  ;;  %v13029_v32 = vld [vmem:[#allocation107_spill] sm:$0xff]  ;;  %v11264_v29 = vadd.f32 %v4002_v19, %v13032_v59  ;;  %v4454_v19 = vmul.f32 0.0078125, %v10868_v41 }
 0x4e2   : > { %4884 = vadd.xlane.f32.xlu1 %v4709_v22  ;;  %v11256_v2 = vadd.f32 %v3999_v43, %v13029_v32 }
 0x4e3   : > { %7406 = vst [vmem:[%s11223_s20 + $0x10] sm:$0xff] %v7083_v14   ;;  %v11244_v62 = vpop.xlane.xlu1 %4319  ;;  %v11259_v14 = vadd.f32 %v3991_v13, %v13030_v60  ;;  %v13036_v13 = vld [vmem:[#allocation27_spill] sm:$0xff] }
 0x4e4   : > { %v8487_v28 = vpop.eup %8486  ;;  %4878 = vadd.xlane.f32.xlu0 %v4706_v7  ;;  %v13031_v7 = vld [vmem:[#allocation67_spill] sm:$0xff]  ;;  %v11274_v32 = vsub.f32 %v13036_v13, %v4457_v9 }
 0x4e5   : > { %v5440_v51 = vmul.f32 %v8487_v28, %v13028_v12  ;;  %v4819_v38 = vpop.xlane.xlu0 %4818  ;;  %v13033_v28 = vld [vmem:[#allocation106_spill] sm:$0xff] }
 0x4e6   : > { %v8489_v37 = vpop.eup %8488  ;;  %v5060_v22 = vmul.f32 0.0078125, %v4819_v38  ;;  %4880 = vadd.xlane.f32.xlu1 %v4707_v24  ;;  %v11267_v12 = vadd.f32 %v3994_v8, %v13033_v28  ;;  %v13034_v24 = vld [vmem:[#allocation26_spill] sm:$0xff]  ;;  %13037 = vst [vmem:[#allocation102_spill] sm:$0xff] %v11274_v32  ;;  %v13039_v28 = vld [vmem:[#allocation73_spill] sm:$0xff] }
 0x4e7   : > { %v5572_v57 = vmul.f32 %v11168_v0, %v5440_v51  ;;  %v5441_v15 = vmul.f32 %v8489_v37, %v13031_v7  ;;  %v4821_v31 = vpop.xlane.xlu1 %4820  ;;  %v11271_v38 = vsub.f32 %v13034_v24, %v4456_v3  ;;  %v13038_v37 = vld [vmem:[#allocation68_spill] sm:$0xff] }
 0x4e8   : > { %v8491_v48 = vpop.eup %8490  ;;  %v5188_v11 = vadd.f32 1e-05, %v5060_v22  ;;  %v5061_v43 = vmul.f32 0.0078125, %v4821_v31  ;;  %4393 = vadd.xlane.f32.xlu0 %v11256_v2 }
 0x4e9   : > { %13035 = vst [vmem:[#allocation100_spill] sm:$0xff] %v11271_v38  ;;  %v5573_v51 = vmul.f32 %v11168_v0, %v5441_v15  ;;  %v5438_v60 = vmul.f32 %v8491_v48, %v13038_v37  ;;  %v4815_v7 = vpop.xlane.xlu0 %4814  ;;  %v5704_v31 = vadd.f32 %v11193_v46, %v5572_v57  ;;  %v4455_v48 = vmul.f32 0.0078125, %v10878_v21  ;;  %v13040_v57 = vld [vmem:[#allocation28_spill] sm:$0xff] }
 0x4ea   : > { %v8493_v59 = vpop.eup %8492  ;;  %8494 = vrsqrt.f32 %v5188_v11  ;;  %v5189_v8 = vadd.f32 1e-05, %v5061_v43  ;;  %v5058_v22 = vmul.f32 0.0078125, %v4815_v7  ;;  %4395 = vadd.xlane.f32.xlu1 %v11264_v29  ;;  %v4712_v21 = vmul.f32 %v11271_v38, %v11271_v38 }
 0x4eb   : > { %v5705_v3 = vadd.f32 %v11193_v46, %v5573_v51  ;;  %v5570_v9 = vmul.f32 %v11168_v0, %v5438_v60  ;;  %v5439_v15 = vmul.f32 %v8493_v59, %v13039_v28  ;;  %v4817_v24 = vpop.xlane.xlu1 %4816  ;;  %v11290_v51 = vsub.f32 %v13040_v57, %v4454_v19 }
 0x4ec   : > { %8496 = vrsqrt.f32 %v5189_v8  ;;  %v5186_v13 = vadd.f32 1e-05, %v5058_v22  ;;  %v5059_v41 = vmul.f32 0.0078125, %v4817_v24  ;;  %4389 = vadd.xlane.f32.xlu0 %v11259_v14  ;;  %v13042_v22 = vld [vmem:[#allocation33_spill] sm:$0xff]  ;;  %v4713_v19 = vmul.f32 %v11274_v32, %v11274_v32  ;;  %v13050_v32 = vld [vmem:[#allocation108_spill] sm:$0xff] }
 0x4ed   : > { %v7098_v11 = vpack.c.bf16 %v5705_v3, %v5704_v31  ;;  %v5571_v43 = vmul.f32 %v11168_v0, %v5439_v15  ;;  %v11287_v37 = vpop.xlane.xlu0 %4329  ;;  %13041 = vst [vmem:[#allocation22_spill] sm:$0xff] %v11290_v51  ;;  %v5702_v7 = vadd.f32 %v11193_v46, %v5570_v9  ;;  %v11301_v31 = vsub.f32 %v13042_v22, %v4455_v48  ;;  %v13044_v24 = vld [vmem:[#allocation133_spill] sm:$0xff]  ;;  %v13045_v48 = vld [vmem:[#allocation134_spill] sm:$0xff] }
 0x4ee   : > { %8498 = vrsqrt.f32 %v5186_v13  ;;  %v5187_v60 = vadd.f32 1e-05, %v5059_v41  ;;  %4391 = vadd.xlane.f32.xlu1 %v11267_v12  ;;  %v4015_v15 = vadd.f32 %v10662_v52, %v10839_v20  ;;  %v4710_v9 = vmul.f32 %v11290_v51, %v11290_v51 }
 0x4ef   : > { %7409 = vst [vmem:[%s11223_s20 + $0x28] sm:$0xff] %v7098_v11   ;;  %v5703_v59 = vadd.f32 %v11193_v46, %v5571_v43  ;;  %v11298_v8 = vpop.xlane.xlu1 %4331  ;;  %13043 = vst [vmem:[#allocation23_spill] sm:$0xff] %v11301_v31  ;;  %v4007_v13 = vadd.f32 %v10662_v52, %v13044_v24  ;;  %v4018_v41 = vadd.f32 %v10662_v52, %v13045_v48  ;;  %v13049_v48 = vld [vmem:[#allocation109_spill] sm:$0xff] }
 0x4f0   : > { %8500 = vrsqrt.f32 %v5187_v60  ;;  %4890 = vadd.xlane.f32.xlu0 %v4712_v21  ;;  %v4010_v57 = vadd.f32 %v10662_v52, %v10857_v34  ;;  %v4711_v20 = vmul.f32 %v11301_v31, %v11301_v31  ;;  %v4460_v60 = vmul.f32 0.0078125, %v10888_v45  ;;  %v13046_v21 = vld [vmem:[#allocation77_spill] sm:$0xff] }
 0x4f1   : > { %v7093_v3 = vpack.c.bf16 %v5703_v59, %v5702_v7  ;;  %v11305_v28 = vpop.xlane.xlu0 %4325  ;;  %v11328_v51 = vadd.f32 %v4007_v13, %v13049_v48  ;;  %v11331_v52 = vadd.f32 %v4018_v41, %v13050_v32  ;;  %v13053_v13 = vld [vmem:[#allocation30_spill] sm:$0xff]  ;;  %v4458_v32 = vmul.f32 0.0078125, %v10903_v44  ;;  %v13055_v44 = vld [vmem:[#allocation113_spill] sm:$0xff] }
 0x4f2   : > { %4892 = vadd.xlane.f32.xlu1 %v4713_v19  ;;  %v13047_v19 = vld [vmem:[#allocation111_spill] sm:$0xff] }
 0x4f3   : > { %7408 = vst [vmem:[%s11223_s20 + $0x20] sm:$0xff] %v7093_v3   ;;  %v11316_v11 = vpop.xlane.xlu1 %4327  ;;  %v11325_v24 = vadd.f32 %v4015_v15, %v13047_v19  ;;  %v4461_v15 = vmul.f32 0.0078125, %v10896_v58 }
 0x4f4   : > { %v8495_v43 = vpop.eup %8494  ;;  %4886 = vadd.xlane.f32.xlu0 %v4710_v9  ;;  %v13051_v9 = vld [vmem:[#allocation75_spill] sm:$0xff] }
 0x4f5   : > { %v5444_v7 = vmul.f32 %v8495_v43, %v13046_v21  ;;  %v4827_v59 = vpop.xlane.xlu0 %4826  ;;  %13048 = vst [vmem:[#allocation60_spill] sm:$0xff] %v11325_v24  ;;  %v13052_v43 = vld [vmem:[#allocation110_spill] sm:$0xff] }
 0x4f6   : > { %v8497_v22 = vpop.eup %8496  ;;  %v5064_v3 = vmul.f32 0.0078125, %v4827_v59  ;;  %4888 = vadd.xlane.f32.xlu1 %v4711_v20  ;;  %v11336_v21 = vadd.f32 %v4010_v57, %v13052_v43  ;;  %v11341_v20 = vsub.f32 %v13053_v13, %v4460_v60  ;;  %v4459_v57 = vmul.f32 0.0078125, %v10909_v39 }
 0x4f7   : > { %v5576_v34 = vmul.f32 %v11168_v0, %v5444_v7  ;;  %v5445_v31 = vmul.f32 %v8497_v22, %v13051_v9  ;;  %v4829_v45 = vpop.xlane.xlu1 %4828  ;;  %v13054_v7 = vld [vmem:[#allocation76_spill] sm:$0xff] }
 0x4f8   : > { %v8499_v38 = vpop.eup %8498  ;;  %v5192_v19 = vadd.f32 1e-05, %v5064_v3  ;;  %v5065_v59 = vmul.f32 0.0078125, %v4829_v45  ;;  %4401 = vadd.xlane.f32.xlu0 %v11325_v24  ;;  %v13056_v24 = vld [vmem:[#allocation31_spill] sm:$0xff] }
 0x4f9   : > { %v5577_v41 = vmul.f32 %v11168_v0, %v5445_v31  ;;  %v5442_v22 = vmul.f32 %v8499_v38, %v13054_v7  ;;  %v4823_v48 = vpop.xlane.xlu0 %4822  ;;  %v5708_v3 = vadd.f32 %v11193_v46, %v5576_v34  ;;  %v11353_v38 = vsub.f32 %v13056_v24, %v4461_v15 }
 0x4fa   : > { %v8501_v9 = vpop.eup %8500  ;;  %8502 = vrsqrt.f32 %v5192_v19  ;;  %v5193_v43 = vadd.f32 1e-05, %v5065_v59  ;;  %v5062_v58 = vmul.f32 0.0078125, %v4823_v48  ;;  %4403 = vadd.xlane.f32.xlu1 %v11331_v52  ;;  %v4464_v59 = vmul.f32 0.0078125, %v10915_v61  ;;  %v13058_v48 = vld [vmem:[#allocation32_spill] sm:$0xff] }
 0x4fb   : > { %v5709_v60 = vadd.f32 %v11193_v46, %v5577_v41  ;;  %v5574_v45 = vmul.f32 %v11168_v0, %v5442_v22  ;;  %v5443_v13 = vmul.f32 %v8501_v9, %v13055_v44  ;;  %v4825_v31 = vpop.xlane.xlu1 %4824  ;;  %13057 = vst [vmem:[#allocation65_spill] sm:$0xff] %v11353_v38  ;;  %v4716_v22 = vmul.f32 %v11341_v20, %v11341_v20 }
 0x4fc   : > { %8504 = vrsqrt.f32 %v5193_v43  ;;  %v5190_v39 = vadd.f32 1e-05, %v5062_v58  ;;  %v5063_v19 = vmul.f32 0.0078125, %v4825_v31  ;;  %4397 = vadd.xlane.f32.xlu0 %v11328_v51  ;;  %v11361_v9 = vsub.f32 %v13058_v48, %v4458_v32  ;;  %v13060_v43 = vld [vmem:[#allocation37_spill] sm:$0xff]  ;;  %v13064_v48 = vld [vmem:[#allocation35_spill] sm:$0xff] }
 0x4fd   : > { %v7108_v7 = vpack.c.bf16 %v5709_v60, %v5708_v3  ;;  %v5575_v34 = vmul.f32 %v11168_v0, %v5443_v13  ;;  %v4795_v41 = vpop.xlane.xlu0 %4794  ;;  %v11365_v58 = vsub.f32 %v13060_v43, %v4459_v57  ;;  %v4465_v61 = vmul.f32 0.0078125, %v10923_v63 }
 0x4fe   : > { %13059 = vst [vmem:[#allocation24_spill] sm:$0xff] %v11361_v9  ;;  %8506 = vrsqrt.f32 %v5190_v39  ;;  %v5191_v24 = vadd.f32 1e-05, %v5063_v19  ;;  %v5048_v15 = vmul.f32 0.0078125, %v4795_v41  ;;  %4399 = vadd.xlane.f32.xlu1 %v11336_v21  ;;  %v5706_v3 = vadd.f32 %v11193_v46, %v5574_v45  ;;  %v13062_v39 = vld [vmem:[#allocation34_spill] sm:$0xff] }
 0x4ff   : > { %13061 = vst [vmem:[#allocation29_spill] sm:$0xff] %v11365_v58  ;;  %7411 = vst [vmem:[%s11223_s20 + $0x38] sm:$0xff] %v7108_v7   ;;  %v5707_v60 = vadd.f32 %v11193_v46, %v5575_v34  ;;  %v4797_v44 = vpop.xlane.xlu1 %4796  ;;  %v4717_v31 = vmul.f32 %v11353_v38, %v11353_v38  ;;  %v11374_v19 = vsub.f32 %v13062_v39, %v4464_v59  ;;  %v4462_v57 = vmul.f32 0.0078125, %v10932_v50 }
 0x500   : > { %8508 = vrsqrt.f32 %v5191_v24  ;;  %v5176_v32 = vadd.f32 1e-05, %v5048_v15  ;;  %v5049_v13 = vmul.f32 0.0078125, %v4797_v44  ;;  %4898 = vadd.xlane.f32.xlu0 %v4716_v22  ;;  %v4714_v34 = vmul.f32 %v11361_v9, %v11361_v9 }
 0x501   : > { %13063 = vst [vmem:[#allocation69_spill] sm:$0xff] %v11374_v19  ;;  %v7103_v63 = vpack.c.bf16 %v5707_v60, %v5706_v3  ;;  %v4791_v7 = vpop.xlane.xlu0 %4790  ;;  %v11380_v24 = vsub.f32 %v13064_v48, %v4465_v61  ;;  %v4715_v59 = vmul.f32 %v11365_v58, %v11365_v58  ;;  %v4463_v50 = vmul.f32 0.0078125, %v10942_v49  ;;  %v13066_v60 = vld [vmem:[#allocation36_spill] sm:$0xff] }
 0x502   : > { %8510 = vrsqrt.f32 %v5176_v32  ;;  %v5177_v45 = vadd.f32 1e-05, %v5049_v13  ;;  %v5046_v41 = vmul.f32 0.0078125, %v4791_v7  ;;  %4900 = vadd.xlane.f32.xlu1 %v4717_v31  ;;  %v11387_v44 = vsub.f32 %v13066_v60, %v4462_v57  ;;  %v13068_v13 = vld [vmem:[#allocation117_spill] sm:$0xff] }
 0x503   : > { %13065 = vst [vmem:[#allocation107_spill] sm:$0xff] %v11380_v24  ;;  %7410 = vst [vmem:[%s11223_s20 + $0x30] sm:$0xff] %v7103_v63   ;;  %v4793_v22 = vpop.xlane.xlu1 %4792  ;;  %v4468_v32 = vmul.f32 0.0078125, %v10952_v1  ;;  %v4720_v39 = vmul.f32 %v11374_v19, %v11374_v19  ;;  %v4469_v7 = vmul.f32 0.0078125, %v10960_v16  ;;  %v4466_v49 = vmul.f32 0.0078125, %v10967_v33  ;;  %v13083_v19 = vld [vmem:[#allocation121_spill] sm:$0xff] }
 0x504   : > { %v8503_v15 = vpop.eup %8502  ;;  %8512 = vrsqrt.f32 %v5177_v45  ;;  %v5174_v43 = vadd.f32 1e-05, %v5046_v41  ;;  %v5047_v3 = vmul.f32 0.0078125, %v4793_v22  ;;  %4894 = vadd.xlane.f32.xlu0 %v4714_v34  ;;  %13067 = vst [vmem:[#allocation105_spill] sm:$0xff] %v11387_v44  ;;  %v13069_v41 = vld [vmem:[#allocation118_spill] sm:$0xff]  ;;  %v13070_v22 = vld [vmem:[#allocation41_spill] sm:$0xff]  ;;  %v4721_v16 = vmul.f32 %v11380_v24, %v11380_v24 }
 0x505   : > { %v5448_v61 = vmul.f32 %v8503_v15, %v13068_v13  ;;  %v11391_v31 = vpop.xlane.xlu0 %4337  ;;  %v11402_v15 = vsub.f32 %v13070_v22, %v4463_v50  ;;  %v4467_v60 = vmul.f32 0.0078125, %v10973_v30  ;;  %v13077_v22 = vld [vmem:[#allocation40_spill] sm:$0xff] }
 0x506   : > { %v8505_v63 = vpop.eup %8504  ;;  %8514 = vrsqrt.f32 %v5174_v43  ;;  %v5175_v45 = vadd.f32 1e-05, %v5047_v3  ;;  %4896 = vadd.xlane.f32.xlu1 %v4715_v59  ;;  %v13072_v59 = vld [vmem:[#allocation119_spill] sm:$0xff]  ;;  %v11418_v30 = vsub.f32 %v13077_v22, %v4466_v49  ;;  %v13081_v49 = vld [vmem:[#allocation13_spill] sm:$0xff] }
 0x507   : > { %v5580_v57 = vmul.f32 %v11168_v0, %v5448_v61  ;;  %v5449_v34 = vmul.f32 %v8505_v63, %v13069_v41  ;;  %v11399_v1 = vpop.xlane.xlu1 %4339  ;;  %13071 = vst [vmem:[#allocation67_spill] sm:$0xff] %v11402_v15  ;;  %v13073_v61 = vld [vmem:[#allocation38_spill] sm:$0xff]  ;;  %v13075_v41 = vld [vmem:[#allocation39_spill] sm:$0xff]  ;;  %v4719_v22 = vmul.f32 %v11402_v15, %v11402_v15 }
 0x508   : > { %v8507_v48 = vpop.eup %8506  ;;  %8516 = vrsqrt.f32 %v5175_v45  ;;  %4906 = vadd.xlane.f32.xlu0 %v4720_v39  ;;  %v11412_v63 = vsub.f32 %v13073_v61, %v4468_v32  ;;  %v11415_v50 = vsub.f32 %v13075_v41, %v4469_v7  ;;  %13078 = vst [vmem:[#allocation26_spill] sm:$0xff] %v11418_v30  ;;  %v4718_v39 = vmul.f32 %v11387_v44, %v11387_v44  ;;  %v13080_v7 = vld [vmem:[#allocation45_spill] sm:$0xff]  ;;  %v13087_v15 = vld [vmem:[#allocation123_spill] sm:$0xff] }
 0x509   : > { %v5581_v33 = vmul.f32 %v11168_v0, %v5449_v34  ;;  %v5446_v43 = vmul.f32 %v8507_v48, %v13072_v59  ;;  %v11409_v3 = vpop.xlane.xlu0 %4333  ;;  %v5712_v45 = vadd.f32 %v11193_v46, %v5580_v57  ;;  %v13079_v59 = vld [vmem:[#allocation120_spill] sm:$0xff]  ;;  %v11429_v41 = vsub.f32 %v13080_v7, %v4467_v60  ;;  %v13082_v57 = vld [vmem:[#allocation91_spill] sm:$0xff] }
 0x50a   : > { %v8509_v13 = vpop.eup %8508  ;;  %13074 = vst [vmem:[#allocation104_spill] sm:$0xff] %v11412_v63  ;;  %13076 = vst [vmem:[#allocation106_spill] sm:$0xff] %v11415_v50  ;;  %4908 = vadd.xlane.f32.xlu1 %v4721_v16  ;;  %v4472_v16 = vmul.f32 0.0078125, %v13081_v49  ;;  %v4473_v44 = vmul.f32 0.0078125, %v13082_v57  ;;  %v4724_v60 = vmul.f32 %v11412_v63, %v11412_v63  ;;  %v4722_v7 = vmul.f32 %v11418_v30, %v11418_v30  ;;  %v13085_v57 = vld [vmem:[#allocation42_spill] sm:$0xff]  ;;  %v13086_v30 = vld [vmem:[#allocation43_spill] sm:$0xff] }
 0x50b   : > { %v5713_v34 = vadd.f32 %v11193_v46, %v5581_v33  ;;  %v5578_v48 = vmul.f32 %v11168_v0, %v5446_v43  ;;  %v5447_v24 = vmul.f32 %v8509_v13, %v13079_v59  ;;  %v11426_v32 = vpop.xlane.xlu1 %4335 }
 0x50c   : > { %v8511_v61 = vpop.eup %8510  ;;  %4902 = vadd.xlane.f32.xlu0 %v4718_v39  ;;  %v4725_v39 = vmul.f32 %v11415_v50, %v11415_v50 }
 0x50d   : > { %v7118_v33 = vpack.c.bf16 %v5713_v34, %v5712_v45  ;;  %v5579_v43 = vmul.f32 %v11168_v0, %v5447_v24  ;;  %v5432_v13 = vmul.f32 %v8511_v61, %v13083_v19  ;;  %v4835_v59 = vpop.xlane.xlu0 %4834  ;;  %v5710_v45 = vadd.f32 %v11193_v46, %v5578_v48  ;;  %v13084_v34 = vld [vmem:[#allocation122_spill] sm:$0xff] }
 0x50e   : > { %v8513_v58 = vpop.eup %8512  ;;  %v5068_v9 = vmul.f32 0.0078125, %v4835_v59  ;;  %4904 = vadd.xlane.f32.xlu1 %v4719_v22  ;;  %v11449_v59 = vsub.f32 %v13085_v57, %v4472_v16  ;;  %v11454_v48 = vsub.f32 %v13086_v30, %v4473_v44  ;;  %v4470_v16 = vmul.f32 0.0078125, %v10996_v4  ;;  %v13088_v30 = vld [vmem:[#allocation124_spill] sm:$0xff] }
 0x50f   : > { %7413 = vst [vmem:[%s11223_s20 + $0x48] sm:$0xff] %v7118_v33   ;;  %v5711_v24 = vadd.f32 %v11193_v46, %v5579_v43  ;;  %v5564_v19 = vmul.f32 %v11168_v0, %v5432_v13  ;;  %v5433_v61 = vmul.f32 %v8513_v58, %v13084_v34  ;;  %v4837_v49 = vpop.xlane.xlu1 %4836  ;;  %v4723_v33 = vmul.f32 %v11429_v41, %v11429_v41 }
 0x510   : > { %v8515_v22 = vpop.eup %8514  ;;  %v5196_v63 = vadd.f32 1e-05, %v5068_v9  ;;  %v5069_v50 = vmul.f32 0.0078125, %v4837_v49  ;;  %4914 = vadd.xlane.f32.xlu0 %v4724_v60 }
 0x511   : > { %v7113_v43 = vpack.c.bf16 %v5711_v24, %v5710_v45  ;;  %v5565_v13 = vmul.f32 %v11168_v0, %v5433_v61  ;;  %v5430_v58 = vmul.f32 %v8515_v22, %v13087_v15  ;;  %v4831_v34 = vpop.xlane.xlu0 %4830  ;;  %v5696_v60 = vadd.f32 %v11193_v46, %v5564_v19  ;;  %v13089_v22 = vld [vmem:[#allocation44_spill] sm:$0xff] }
 0x512   : > { %v8517_v38 = vpop.eup %8516  ;;  %8518 = vrsqrt.f32 %v5196_v63  ;;  %v5197_v57 = vadd.f32 1e-05, %v5069_v50  ;;  %v5066_v9 = vmul.f32 0.0078125, %v4831_v34  ;;  %4916 = vadd.xlane.f32.xlu1 %v4725_v39  ;;  %v4471_v15 = vmul.f32 0.0078125, %v11006_v6 }
 0x513   : > { %7412 = vst [vmem:[%s11223_s20 + $0x40] sm:$0xff] %v7113_v43   ;;  %v5697_v49 = vadd.f32 %v11193_v46, %v5565_v13  ;;  %v5562_v44 = vmul.f32 %v11168_v0, %v5430_v58  ;;  %v5431_v45 = vmul.f32 %v8517_v38, %v13088_v30  ;;  %v4833_v24 = vpop.xlane.xlu1 %4832  ;;  %v4728_v19 = vmul.f32 %v11449_v59, %v11449_v59 }
 0x514   : > { %8520 = vrsqrt.f32 %v5197_v57  ;;  %v5194_v61 = vadd.f32 1e-05, %v5066_v9  ;;  %v5067_v4 = vmul.f32 0.0078125, %v4833_v24  ;;  %4910 = vadd.xlane.f32.xlu0 %v4722_v7  ;;  %v11471_v43 = vsub.f32 %v13089_v22, %v4470_v16  ;;  %v13090_v57 = vld [vmem:[#allocation49_spill] sm:$0xff] }
 0x515   : > { %v7078_v63 = vpack.c.bf16 %v5697_v49, %v5696_v60  ;;  %v5563_v50 = vmul.f32 %v11168_v0, %v5431_v45  ;;  %v11466_v39 = vpop.xlane.xlu0 %4345  ;;  %v4476_v38 = vmul.f32 0.0078125, %v11016_v18  ;;  %v4477_v6 = vmul.f32 0.0078125, %v11024_v5  ;;  %v13091_v49 = vld [vmem:[#allocation46_spill] sm:$0xff]  ;;  %v13093_v45 = vld [vmem:[#allocation47_spill] sm:$0xff] }
 0x516   : > { %8522 = vrsqrt.f32 %v5194_v61  ;;  %v5195_v13 = vadd.f32 1e-05, %v5067_v4  ;;  %4912 = vadd.xlane.f32.xlu1 %v4723_v33  ;;  %v5694_v7 = vadd.f32 %v11193_v46, %v5562_v44  ;;  %v11481_v9 = vsub.f32 %v13090_v57, %v4471_v15  ;;  %v13095_v61 = vld [vmem:[#allocation48_spill] sm:$0xff] }
 0x517   : > { %7405 = vst [vmem:[%s11223_s20 + $0x8] sm:$0xff] %v7078_v63   ;;  %v5695_v58 = vadd.f32 %v11193_v46, %v5563_v50  ;;  %v11478_v34 = vpop.xlane.xlu1 %4347  ;;  %v4474_v16 = vmul.f32 0.0078125, %v11031_v26  ;;  %v4729_v18 = vmul.f32 %v11454_v48, %v11454_v48  ;;  %v4475_v5 = vmul.f32 0.0078125, %v11037_v53  ;;  %v13097_v50 = vld [vmem:[#allocation53_spill] sm:$0xff] }
 0x518   : > { %8524 = vrsqrt.f32 %v5195_v13  ;;  %4922 = vadd.xlane.f32.xlu0 %v4728_v19  ;;  %v11490_v44 = vsub.f32 %v13091_v49, %v4476_v38  ;;  %v4726_v30 = vmul.f32 %v11471_v43, %v11471_v43  ;;  %v11495_v24 = vsub.f32 %v13093_v45, %v4477_v6  ;;  %v13099_v38 = vld [vmem:[#allocation129_spill] sm:$0xff] }
 0x519   : > { %v7073_v33 = vpack.c.bf16 %v5695_v58, %v5694_v7  ;;  %v11487_v60 = vpop.xlane.xlu0 %4341  ;;  %v11501_v4 = vsub.f32 %v13095_v61, %v4474_v16  ;;  %v4480_v53 = vmul.f32 0.0078125, %v11043_v54  ;;  %v4727_v63 = vmul.f32 %v11481_v9, %v11481_v9  ;;  %v13100_v16 = vld [vmem:[#allocation130_spill] sm:$0xff] }
 0x51a   : > { %13092 = vst [vmem:[#allocation27_spill] sm:$0xff] %v11490_v44  ;;  %4924 = vadd.xlane.f32.xlu1 %v4729_v18  ;;  %13094 = vst [vmem:[#allocation68_spill] sm:$0xff] %v11495_v24  ;;  %v11507_v19 = vsub.f32 %v13097_v50, %v4475_v5  ;;  %v4481_v22 = vmul.f32 0.0078125, %v11051_v42  ;;  %v4732_v57 = vmul.f32 %v11490_v44, %v11490_v44 }
 0x51b   : > { %7074 = vst [vmem:[%s11223_s20] sm:$0xff] %v7073_v33   ;;  %v11498_v26 = vpop.xlane.xlu1 %4343  ;;  %13096 = vst [vmem:[#allocation73_spill] sm:$0xff] %v11501_v4  ;;  %v4733_v5 = vmul.f32 %v11495_v24, %v11495_v24  ;;  %v4730_v61 = vmul.f32 %v11501_v4, %v11501_v4 }
 0x51c   : > { %v8519_v15 = vpop.eup %8518  ;;  %4918 = vadd.xlane.f32.xlu0 %v4726_v30  ;;  %13098 = vst [vmem:[#allocation28_spill] sm:$0xff] %v11507_v19  ;;  %v13101_v30 = vld [vmem:[#allocation50_spill] sm:$0xff] }
 0x51d   : > { %v5452_v13 = vmul.f32 %v8519_v15, %v13099_v38  ;;  %v4843_v6 = vpop.xlane.xlu0 %4842  ;;  %v11518_v42 = vsub.f32 %v13101_v30, %v4480_v53  ;;  %v4478_v53 = vmul.f32 0.0078125, %v11060_v27 }
 0x51e   : > { %v8521_v7 = vpop.eup %8520  ;;  %v5072_v58 = vmul.f32 0.0078125, %v4843_v6  ;;  %4920 = vadd.xlane.f32.xlu1 %v4727_v63  ;;  %v13103_v63 = vld [vmem:[#allocation51_spill] sm:$0xff] }
 0x51f   : > { %v5584_v54 = vmul.f32 %v11168_v0, %v5452_v13  ;;  %v5453_v18 = vmul.f32 %v8521_v7, %v13100_v16  ;;  %v4845_v33 = vpop.xlane.xlu1 %4844  ;;  %13102 = vst [vmem:[#allocation33_spill] sm:$0xff] %v11518_v42  ;;  %v11523_v50 = vsub.f32 %v13103_v63, %v4481_v22  ;;  %v13105_v13 = vld [vmem:[#allocation131_spill] sm:$0xff]  ;;  %v4731_v16 = vmul.f32 %v11507_v19, %v11507_v19 }
 0x520   : > { %v8523_v49 = vpop.eup %8522  ;;  %v5200_v45 = vadd.f32 1e-05, %v5072_v58  ;;  %v5073_v15 = vmul.f32 0.0078125, %v4845_v33  ;;  %4930 = vadd.xlane.f32.xlu0 %v4732_v57 }
 0x521   : > { %13104 = vst [vmem:[#allocation133_spill] sm:$0xff] %v11523_v50  ;;  %v5585_v38 = vmul.f32 %v11168_v0, %v5453_v18  ;;  %v5450_v6 = vmul.f32 %v8523_v49, %v13105_v13  ;;  %v4839_v7 = vpop.xlane.xlu0 %4838  ;;  %v5716_v33 = vadd.f32 %v11193_v46, %v5584_v54  ;;  %v13106_v18 = vld [vmem:[#allocation132_spill] sm:$0xff]  ;;  %v4479_v13 = vmul.f32 0.0078125, %v11070_v35 }
 0x522   : > { %v8525_v24 = vpop.eup %8524  ;;  %8526 = vrsqrt.f32 %v5200_v45  ;;  %v5201_v58 = vadd.f32 1e-05, %v5073_v15  ;;  %v5070_v57 = vmul.f32 0.0078125, %v4839_v7  ;;  %4932 = vadd.xlane.f32.xlu1 %v4733_v5  ;;  %v4736_v54 = vmul.f32 %v11518_v42, %v11518_v42  ;;  %v13107_v15 = vld [vmem:[#allocation52_spill] sm:$0xff] }
 0x523   : > { %v5717_v22 = vadd.f32 %v11193_v46, %v5585_v38  ;;  %v5582_v30 = vmul.f32 %v11168_v0, %v5450_v6  ;;  %v5451_v63 = vmul.f32 %v8525_v24, %v13106_v18  ;;  %v4841_v49 = vpop.xlane.xlu1 %4840  ;;  %v11541_v38 = vsub.f32 %v13107_v15, %v4478_v53  ;;  %v13109_v53 = vld [vmem:[#allocation57_spill] sm:$0xff] }
 0x524   : > { %8528 = vrsqrt.f32 %v5201_v58  ;;  %v5198_v19 = vadd.f32 1e-05, %v5070_v57  ;;  %v5071_v4 = vmul.f32 0.0078125, %v4841_v49  ;;  %4926 = vadd.xlane.f32.xlu0 %v4730_v61  ;;  %v4484_v24 = vmul.f32 0.0078125, %v11080_v23 }
 0x525   : > { %v7128_v27 = vpack.c.bf16 %v5717_v22, %v5716_v33  ;;  %v5583_v45 = vmul.f32 %v11168_v0, %v5451_v63  ;;  %v11536_v5 = vpop.xlane.xlu0 %4353  ;;  %13108 = vst [vmem:[#allocation134_spill] sm:$0xff] %v11541_v38  ;;  %v4485_v35 = vmul.f32 0.0078125, %v11088_v36  ;;  %v5714_v61 = vadd.f32 %v11193_v46, %v5582_v30  ;;  %v13112_v22 = vld [vmem:[#allocation54_spill] sm:$0xff]  ;;  %v13114_v63 = vld [vmem:[#allocation55_spill] sm:$0xff] }
 0x526   : > { %8530 = vrsqrt.f32 %v5198_v19  ;;  %v5199_v6 = vadd.f32 1e-05, %v5071_v4  ;;  %4928 = vadd.xlane.f32.xlu1 %v4731_v16  ;;  %v4737_v57 = vmul.f32 %v11523_v50, %v11523_v50  ;;  %v11553_v33 = vsub.f32 %v13109_v53, %v4479_v13  ;;  %v13111_v4 = vld [vmem:[#allocation16_spill] sm:$0xff] }
 0x527   : > { %7415 = vst [vmem:[%s11223_s20 + $0x58] sm:$0xff] %v7128_v27   ;;  %v5715_v7 = vadd.f32 %v11193_v46, %v5583_v45  ;;  %v11548_v58 = vpop.xlane.xlu1 %4355  ;;  %v4482_v23 = vmul.f32 0.0078125, %v11095_v40  ;;  %v4483_v19 = vmul.f32 0.0078125, %v13111_v4  ;;  %v11560_v30 = vsub.f32 %v13112_v22, %v4484_v24  ;;  %v13116_v27 = vld [vmem:[#allocation56_spill] sm:$0xff] }
 0x528   : > { %13110 = vst [vmem:[#allocation77_spill] sm:$0xff] %v11553_v33  ;;  %8532 = vrsqrt.f32 %v5199_v6  ;;  %4938 = vadd.xlane.f32.xlu0 %v4736_v54  ;;  %v4734_v18 = vmul.f32 %v11541_v38, %v11541_v38  ;;  %v11565_v49 = vsub.f32 %v13114_v63, %v4485_v35  ;;  %v13118_v54 = vld [vmem:[#allocation58_spill] sm:$0xff]  ;;  %v4735_v24 = vmul.f32 %v11553_v33, %v11553_v33  ;;  %v13120_v6 = vld [vmem:[#allocation19_spill] sm:$0xff]  ;;  %v13123_v63 = vld [vmem:[#allocation140_spill] sm:$0xff] }
 0x529   : > { %v7123_v36 = vpack.c.bf16 %v5715_v7, %v5714_v61  ;;  %v11557_v16 = vpop.xlane.xlu0 %4349  ;;  %13113 = vst [vmem:[#allocation111_spill] sm:$0xff] %v11560_v30  ;;  %v11571_v45 = vsub.f32 %v13116_v27, %v4482_v23  ;;  %v11574_v15 = vsub.f32 %v13118_v54, %v4483_v19  ;;  %v4488_v61 = vmul.f32 0.0078125, %v13120_v6  ;;  %v13121_v7 = vld [vmem:[#allocation141_spill] sm:$0xff]  ;;  %v13122_v35 = vld [vmem:[#allocation138_spill] sm:$0xff] }
 0x52a   : > { %4940 = vadd.xlane.f32.xlu1 %v4737_v57  ;;  %13115 = vst [vmem:[#allocation109_spill] sm:$0xff] %v11565_v49  ;;  %v4489_v57 = vmul.f32 0.0078125, %v13121_v7  ;;  %v4740_v23 = vmul.f32 %v11560_v30, %v11560_v30  ;;  %v4741_v54 = vmul.f32 %v11565_v49, %v11565_v49 }
 0x52b   : > { %7414 = vst [vmem:[%s11223_s20 + $0x50] sm:$0xff] %v7123_v36   ;;  %v11568_v13 = vpop.xlane.xlu1 %4351  ;;  %13117 = vst [vmem:[#allocation108_spill] sm:$0xff] %v11571_v45 }
 0x52c   : > { %v8527_v40 = vpop.eup %8526  ;;  %13119 = vst [vmem:[#allocation75_spill] sm:$0xff] %v11574_v15  ;;  %4934 = vadd.xlane.f32.xlu0 %v4734_v18 }
 0x52d   : > { %v5456_v53 = vmul.f32 %v8527_v40, %v13122_v35  ;;  %v4851_v4 = vpop.xlane.xlu0 %4850  ;;  %v4738_v40 = vmul.f32 %v11571_v45, %v11571_v45  ;;  %v13124_v35 = vld [vmem:[#allocation62_spill] sm:$0xff] }
 0x52e   : > { %v8529_v36 = vpop.eup %8528  ;;  %v5076_v22 = vmul.f32 0.0078125, %v4851_v4  ;;  %4936 = vadd.xlane.f32.xlu1 %v4735_v24  ;;  %v4739_v24 = vmul.f32 %v11574_v15, %v11574_v15  ;;  %v11592_v4 = vsub.f32 %v13124_v35, %v4488_v61 }
 0x52f   : > { %v5588_v19 = vmul.f32 %v11168_v0, %v5456_v53  ;;  %v5457_v18 = vmul.f32 %v8529_v36, %v13123_v63  ;;  %v4853_v27 = vpop.xlane.xlu1 %4852  ;;  %v13125_v53 = vld [vmem:[#allocation63_spill] sm:$0xff]  ;;  %v13126_v63 = vld [vmem:[#allocation8_spill] sm:$0xff] }
 0x530   : > { %v8531_v6 = vpop.eup %8530  ;;  %v5204_v33 = vadd.f32 1e-05, %v5076_v22  ;;  %v5077_v7 = vmul.f32 0.0078125, %v4853_v27  ;;  %4946 = vadd.xlane.f32.xlu0 %v4740_v23  ;;  %v11595_v30 = vsub.f32 %v13125_v53, %v4489_v57  ;;  %v13127_v27 = vld [vmem:[#allocation142_spill] sm:$0xff] }
 0x531   : > { %v5589_v36 = vmul.f32 %v11168_v0, %v5457_v18  ;;  %v5454_v49 = vmul.f32 %v8531_v6, %v13126_v63  ;;  %v4847_v38 = vpop.xlane.xlu0 %4846  ;;  %v4486_v23 = vmul.f32 0.0078125, %v13127_v27  ;;  %v5720_v15 = vadd.f32 %v11193_v46, %v5588_v19  ;;  %v13128_v57 = vld [vmem:[#allocation6_spill] sm:$0xff]  ;;  %v13129_v18 = vld [vmem:[#allocation125_spill] sm:$0xff] }
 0x532   : > { %v8533_v22 = vpop.eup %8532  ;;  %8534 = vrsqrt.f32 %v5204_v33  ;;  %v5205_v50 = vadd.f32 1e-05, %v5077_v7  ;;  %v5074_v45 = vmul.f32 0.0078125, %v4847_v38  ;;  %4948 = vadd.xlane.f32.xlu1 %v4741_v54  ;;  %v4487_v6 = vmul.f32 0.0078125, %v13129_v18  ;;  %v13130_v7 = vld [vmem:[#allocation64_spill] sm:$0xff]  ;;  %v13131_v27 = vld [vmem:[#allocation66_spill] sm:$0xff] }
 0x533   : > { %v5721_v61 = vadd.f32 %v11193_v46, %v5589_v36  ;;  %v5586_v35 = vmul.f32 %v11168_v0, %v5454_v49  ;;  %v5455_v53 = vmul.f32 %v8533_v22, %v13128_v57  ;;  %v4849_v42 = vpop.xlane.xlu1 %4848  ;;  %v4744_v19 = vmul.f32 %v11592_v4, %v11592_v4 }
 0x534   : > { %8536 = vrsqrt.f32 %v5205_v50  ;;  %v5202_v63 = vadd.f32 1e-05, %v5074_v45  ;;  %v5075_v44 = vmul.f32 0.0078125, %v4849_v42  ;;  %4942 = vadd.xlane.f32.xlu0 %v4738_v40  ;;  %v11611_v49 = vsub.f32 %v13130_v7, %v4486_v23 }
 0x535   : > { %v7138_v33 = vpack.c.bf16 %v5721_v61, %v5720_v15  ;;  %v5587_v38 = vmul.f32 %v11168_v0, %v5455_v53  ;;  %v11606_v54 = vpop.xlane.xlu0 %4361  ;;  %v4492_v36 = vmul.f32 0.0078125, %v11215_v47  ;;  %v4493_v50 = vmul.f32 0.0078125, %v11228_v17  ;;  %v13132_v61 = vld [vmem:[#allocation70_spill] sm:$0xff]  ;;  %v13133_v53 = vld [vmem:[#allocation71_spill] sm:$0xff] }
 0x536   : > { %8538 = vrsqrt.f32 %v5202_v63  ;;  %v5203_v22 = vadd.f32 1e-05, %v5075_v44  ;;  %4944 = vadd.xlane.f32.xlu1 %v4739_v24  ;;  %v5718_v42 = vadd.f32 %v11193_v46, %v5586_v35  ;;  %v4745_v40 = vmul.f32 %v11595_v30, %v11595_v30 }
 0x537   : > { %7417 = vst [vmem:[%s11223_s20 + $0x68] sm:$0xff] %v7138_v33   ;;  %v5719_v45 = vadd.f32 %v11193_v46, %v5587_v38  ;;  %v11618_v15 = vpop.xlane.xlu1 %4363  ;;  %v11623_v23 = vsub.f32 %v13131_v27, %v4487_v6  ;;  %v4490_v47 = vmul.f32 0.0078125, %v11235_v56  ;;  %v4491_v44 = vmul.f32 0.0078125, %v11244_v62  ;;  %v13135_v62 = vld [vmem:[#allocation72_spill] sm:$0xff]  ;;  %v13137_v33 = vld [vmem:[#allocation74_spill] sm:$0xff] }
 0x538   : > { %8540 = vrsqrt.f32 %v5203_v22  ;;  %4954 = vadd.xlane.f32.xlu0 %v4744_v19  ;;  %v11630_v35 = vsub.f32 %v13132_v61, %v4492_v36  ;;  %v4742_v57 = vmul.f32 %v11611_v49, %v11611_v49  ;;  %v11635_v18 = vsub.f32 %v13133_v53, %v4493_v50  ;;  %v13139_v22 = vld [vmem:[#allocation85_spill] sm:$0xff] }
 0x539   : > { %v7133_v17 = vpack.c.bf16 %v5719_v45, %v5718_v42  ;;  %v11627_v24 = vpop.xlane.xlu0 %4357  ;;  %v11641_v63 = vsub.f32 %v13135_v62, %v4490_v47  ;;  %v11644_v38 = vsub.f32 %v13137_v33, %v4491_v44  ;;  %v4743_v19 = vmul.f32 %v11623_v23, %v11623_v23  ;;  %v13140_v44 = vld [vmem:[#allocation86_spill] sm:$0xff]  ;;  %v13141_v33 = vld [vmem:[#allocation81_spill] sm:$0xff] }
 0x53a   : > { %4956 = vadd.xlane.f32.xlu1 %v4745_v40  ;;  %13134 = vst [vmem:[#allocation110_spill] sm:$0xff] %v11635_v18  ;;  %v4496_v7 = vmul.f32 0.0078125, %v11287_v37  ;;  %v4497_v36 = vmul.f32 0.0078125, %v11298_v8  ;;  %v4748_v27 = vmul.f32 %v11630_v35, %v11630_v35 }
 0x53b   : > { %7416 = vst [vmem:[%s11223_s20 + $0x60] sm:$0xff] %v7133_v17   ;;  %v11638_v6 = vpop.xlane.xlu1 %4359  ;;  %13136 = vst [vmem:[#allocation30_spill] sm:$0xff] %v11641_v63  ;;  %v4747_v62 = vmul.f32 %v11644_v38, %v11644_v38 }
 0x53c   : > { %v8535_v56 = vpop.eup %8534  ;;  %13138 = vst [vmem:[#allocation76_spill] sm:$0xff] %v11644_v38  ;;  %4950 = vadd.xlane.f32.xlu0 %v4742_v57  ;;  %v4749_v57 = vmul.f32 %v11635_v18, %v11635_v18 }
 0x53d   : > { %v5460_v50 = vmul.f32 %v8535_v56, %v13139_v22  ;;  %v4859_v42 = vpop.xlane.xlu0 %4858  ;;  %v4746_v56 = vmul.f32 %v11641_v63, %v11641_v63  ;;  %v13142_v22 = vld [vmem:[#allocation78_spill] sm:$0xff] }
 0x53e   : > { %v8537_v45 = vpop.eup %8536  ;;  %v5080_v40 = vmul.f32 0.0078125, %v4859_v42  ;;  %4952 = vadd.xlane.f32.xlu1 %v4743_v19  ;;  %v11662_v19 = vsub.f32 %v13141_v33, %v4496_v7 }
 0x53f   : > { %v5592_v47 = vmul.f32 %v11168_v0, %v5460_v50  ;;  %v5461_v17 = vmul.f32 %v8537_v45, %v13140_v44  ;;  %v4861_v61 = vpop.xlane.xlu1 %4860  ;;  %v11665_v50 = vsub.f32 %v13142_v22, %v4497_v36  ;;  %v13143_v45 = vld [vmem:[#allocation7_spill] sm:$0xff]  ;;  %v11675_v36 = vld [vmem:[%s12343_s6 + $0x3] ss:$0 sm:$0xff] }
 0x540   : > { %v8539_v37 = vpop.eup %8538  ;;  %v5208_v53 = vadd.f32 1e-05, %v5080_v40  ;;  %v5081_v8 = vmul.f32 0.0078125, %v4861_v61  ;;  %4962 = vadd.xlane.f32.xlu0 %v4748_v27  ;;  %v4494_v27 = vmul.f32 0.0078125, %v11305_v28  ;;  %v4495_v28 = vmul.f32 0.0078125, %v11316_v11  ;;  %v13145_v22 = vld [vmem:[#allocation79_spill] sm:$0xff] }
 0x541   : > { %v5593_v42 = vmul.f32 %v11168_v0, %v5461_v17  ;;  %v5458_v44 = vmul.f32 %v8539_v37, %v13143_v45  ;;  %v4855_v18 = vpop.xlane.xlu0 %4854  ;;  %v5724_v38 = vadd.f32 %v11193_v46, %v5592_v47  ;;  %v13144_v17 = vld [vmem:[#allocation5_spill] sm:$0xff]  ;;  %v4500_v45 = vmul.f32 0.0078125, %v11391_v31 }
 0x542   : > { %v8541_v40 = vpop.eup %8540  ;;  %8542 = vrsqrt.f32 %v5208_v53  ;;  %v5209_v61 = vadd.f32 1e-05, %v5081_v8  ;;  %v5078_v63 = vmul.f32 0.0078125, %v4855_v18  ;;  %4964 = vadd.xlane.f32.xlu1 %v4749_v57  ;;  %v4752_v8 = vmul.f32 %v11662_v19, %v11662_v19 }
 0x543   : > { %v5725_v7 = vadd.f32 %v11193_v46, %v5593_v42  ;;  %v5590_v0 = vmul.f32 %v11675_v36, %v5458_v44  ;;  %v5459_v37 = vmul.f32 %v8541_v40, %v13144_v17  ;;  %v4857_v33 = vpop.xlane.xlu1 %4856  ;;  %v11686_v42 = vsub.f32 %v13145_v22, %v4494_v27  ;;  %v13146_v27 = vld [vmem:[#allocation80_spill] sm:$0xff] }
 0x544   : > { %8544 = vrsqrt.f32 %v5209_v61  ;;  %v5206_v18 = vadd.f32 1e-05, %v5078_v63  ;;  %v5079_v57 = vmul.f32 0.0078125, %v4857_v33  ;;  %4958 = vadd.xlane.f32.xlu0 %v4746_v56  ;;  %v4501_v11 = vmul.f32 0.0078125, %v11399_v1  ;;  %v11694_v63 = vld [vmem:[%s12343_s6 + $0x4] ss:$0 sm:$0xff] }
 0x545   : > { %v7148_v47 = vpack.c.bf16 %v5725_v7, %v5724_v38  ;;  %v5591_v46 = vmul.f32 %v11675_v36, %v5459_v37  ;;  %v11681_v53 = vpop.xlane.xlu0 %4369  ;;  %v5722_v38 = vadd.f32 %v11694_v63, %v5590_v0  ;;  %v4753_v31 = vmul.f32 %v11665_v50, %v11665_v50  ;;  %v13148_v0 = vld [vmem:[#allocation127_spill] sm:$0xff] }
 0x546   : > { %8546 = vrsqrt.f32 %v5206_v18  ;;  %v5207_v44 = vadd.f32 1e-05, %v5079_v57  ;;  %4960 = vadd.xlane.f32.xlu1 %v4747_v62  ;;  %v11703_v62 = vsub.f32 %v13146_v27, %v4495_v28  ;;  %v4498_v1 = vmul.f32 0.0078125, %v11409_v3  ;;  %v13150_v18 = vld [vmem:[#allocation128_spill] sm:$0xff] }
 0x547   : > { %7419 = vst [vmem:[%s11223_s20 + $0x78] sm:$0xff] %v7148_v47   ;;  %v5723_v56 = vadd.f32 %v11694_v63, %v5591_v46  ;;  %v11698_v40 = vpop.xlane.xlu1 %4371  ;;  %v4499_v61 = vmul.f32 0.0078125, %v11426_v32  ;;  %v11710_v37 = vsub.f32 %v13148_v0, %v4500_v45  ;;  %v4750_v33 = vmul.f32 %v11686_v42, %v11686_v42  ;;  %v13152_v32 = vld [vmem:[#allocation82_spill] sm:$0xff]  ;;  %v13154_v46 = vld [vmem:[#allocation83_spill] sm:$0xff] }
 0x548   : > { %13147 = vst [vmem:[#allocation113_spill] sm:$0xff] %v11703_v62  ;;  %8548 = vrsqrt.f32 %v5207_v44  ;;  %4970 = vadd.xlane.f32.xlu0 %v4752_v8  ;;  %v11715_v57 = vsub.f32 %v13150_v18, %v4501_v11  ;;  %v11721_v47 = vsub.f32 %v13152_v32, %v4498_v1  ;;  %v4751_v22 = vmul.f32 %v11703_v62, %v11703_v62  ;;  %v13156_v11 = vld [vmem:[#allocation116_spill] sm:$0xff] }
 0x549   : > { %v7143_v7 = vpack.c.bf16 %v5723_v56, %v5722_v38  ;;  %v11707_v17 = vpop.xlane.xlu0 %4365  ;;  %13149 = vst [vmem:[#allocation31_spill] sm:$0xff] %v11710_v37  ;;  %v11724_v8 = vsub.f32 %v13154_v46, %v4499_v61  ;;  %v4504_v45 = vmul.f32 0.0078125, %v11466_v39  ;;  %v4505_v44 = vmul.f32 0.0078125, %v11478_v34 }
 0x54a   : > { %4972 = vadd.xlane.f32.xlu1 %v4753_v31  ;;  %13151 = vst [vmem:[#allocation32_spill] sm:$0xff] %v11715_v57  ;;  %13153 = vst [vmem:[#allocation37_spill] sm:$0xff] %v11721_v47  ;;  %v4756_v1 = vmul.f32 %v11710_v37, %v11710_v37  ;;  %v4757_v18 = vmul.f32 %v11715_v57, %v11715_v57 }
 0x54b   : > { %7418 = vst [vmem:[%s11223_s20 + $0x70] sm:$0xff] %v7143_v7   ;;  %v11718_v28 = vpop.xlane.xlu1 %4367  ;;  %13155 = vst [vmem:[#allocation34_spill] sm:$0xff] %v11724_v8  ;;  %v13157_v7 = vld [vmem:[#allocation10_spill] sm:$0xff]  ;;  %v4755_v46 = vmul.f32 %v11724_v8, %v11724_v8 }
 0x54c   : > { %v8543_v3 = vpop.eup %8542  ;;  %4966 = vadd.xlane.f32.xlu0 %v4750_v33 }
 0x54d   : > { %v5464_v38 = vmul.f32 %v8543_v3, %v13156_v11  ;;  %v4867_v56 = vpop.xlane.xlu0 %4866  ;;  %v4754_v3 = vmul.f32 %v11721_v47, %v11721_v47 }
 0x54e   : > { %v8545_v31 = vpop.eup %8544  ;;  %v5084_v27 = vmul.f32 0.0078125, %v4867_v56  ;;  %4968 = vadd.xlane.f32.xlu1 %v4751_v22  ;;  %v13158_v22 = vld [vmem:[#allocation135_spill] sm:$0xff] }
 0x54f   : > { %v5596_v61 = vmul.f32 %v11675_v36, %v5464_v38  ;;  %v5465_v0 = vmul.f32 %v8545_v31, %v13157_v7  ;;  %v4869_v33 = vpop.xlane.xlu1 %4868  ;;  %v11742_v11 = vsub.f32 %v13158_v22, %v4504_v45  ;;  %v13159_v38 = vld [vmem:[#allocation136_spill] sm:$0xff]  ;;  %v13160_v7 = vld [vmem:[#allocation90_spill] sm:$0xff] }
 0x550   : > { %v8547_v39 = vpop.eup %8546  ;;  %v5212_v32 = vadd.f32 1e-05, %v5084_v27  ;;  %v5085_v34 = vmul.f32 0.0078125, %v4869_v33  ;;  %4978 = vadd.xlane.f32.xlu0 %v4756_v1  ;;  %v11745_v56 = vsub.f32 %v13159_v38, %v4505_v44  ;;  %v4502_v1 = vmul.f32 0.0078125, %v11487_v60  ;;  %v13161_v44 = vld [vmem:[#allocation11_spill] sm:$0xff] }
 0x551   : > { %v5597_v31 = vmul.f32 %v11675_v36, %v5465_v0  ;;  %v5462_v57 = vmul.f32 %v8547_v39, %v13160_v7  ;;  %v4863_v37 = vpop.xlane.xlu0 %4862  ;;  %v5728_v8 = vadd.f32 %v11694_v63, %v5596_v61  ;;  %v4503_v0 = vmul.f32 0.0078125, %v11498_v26 }
 0x552   : > { %v8549_v27 = vpop.eup %8548  ;;  %8550 = vrsqrt.f32 %v5212_v32  ;;  %v5213_v33 = vadd.f32 1e-05, %v5085_v34  ;;  %v5082_v47 = vmul.f32 0.0078125, %v4863_v37  ;;  %4980 = vadd.xlane.f32.xlu1 %v4757_v18  ;;  %v4760_v61 = vmul.f32 %v11742_v11, %v11742_v11  ;;  %v13162_v32 = vld [vmem:[#allocation137_spill] sm:$0xff] }
 0x553   : > { %v5729_v45 = vadd.f32 %v11694_v63, %v5597_v31  ;;  %v5594_v22 = vmul.f32 %v11675_v36, %v5462_v57  ;;  %v5463_v38 = vmul.f32 %v8549_v27, %v13161_v44  ;;  %v4865_v62 = vpop.xlane.xlu1 %4864  ;;  %v11761_v57 = vsub.f32 %v13162_v32, %v4502_v1  ;;  %v13163_v27 = vld [vmem:[#allocation139_spill] sm:$0xff] }
 0x554   : > { %8552 = vrsqrt.f32 %v5213_v33  ;;  %v5210_v39 = vadd.f32 1e-05, %v5082_v47  ;;  %v5083_v7 = vmul.f32 0.0078125, %v4865_v62  ;;  %4974 = vadd.xlane.f32.xlu0 %v4754_v3  ;;  %v4508_v34 = vmul.f32 0.0078125, %v11536_v5 }
 0x555   : > { %v7158_v60 = vpack.c.bf16 %v5729_v45, %v5728_v8  ;;  %v5595_v37 = vmul.f32 %v11675_v36, %v5463_v38  ;;  %v11756_v18 = vpop.xlane.xlu0 %4377  ;;  %v4509_v26 = vmul.f32 0.0078125, %v11548_v58  ;;  %v5726_v62 = vadd.f32 %v11694_v63, %v5594_v22  ;;  %v13164_v45 = vld [vmem:[#allocation87_spill] sm:$0xff]  ;;  %v13166_v38 = vld [vmem:[#allocation84_spill] sm:$0xff] }
 0x556   : > { %8554 = vrsqrt.f32 %v5210_v39  ;;  %v5211_v31 = vadd.f32 1e-05, %v5083_v7  ;;  %4976 = vadd.xlane.f32.xlu1 %v4755_v46  ;;  %v4761_v3 = vmul.f32 %v11745_v56, %v11745_v56  ;;  %v11773_v1 = vsub.f32 %v13163_v27, %v4503_v0 }
 0x557   : > { %7421 = vst [vmem:[%s11223_s20 + $0x88] sm:$0xff] %v7158_v60   ;;  %v5727_v47 = vadd.f32 %v11694_v63, %v5595_v37  ;;  %v11768_v8 = vpop.xlane.xlu1 %4379  ;;  %v4506_v5 = vmul.f32 0.0078125, %v11557_v16  ;;  %v4507_v46 = vmul.f32 0.0078125, %v11568_v13  ;;  %v11780_v22 = vsub.f32 %v13164_v45, %v4508_v34  ;;  %v13168_v13 = vld [vmem:[#allocation112_spill] sm:$0xff]  ;;  %v13170_v60 = vld [vmem:[#allocation9_spill] sm:$0xff] }
 0x558   : > { %8556 = vrsqrt.f32 %v5211_v31  ;;  %4986 = vadd.xlane.f32.xlu0 %v4760_v61  ;;  %v4758_v44 = vmul.f32 %v11761_v57, %v11761_v57  ;;  %v11785_v39 = vsub.f32 %v13166_v38, %v4509_v26  ;;  %v4759_v61 = vmul.f32 %v11773_v1, %v11773_v1  ;;  %v13172_v31 = vld [vmem:[#allocation92_spill] sm:$0xff] }
 0x559   : > { %v7153_v58 = vpack.c.bf16 %v5727_v47, %v5726_v62  ;;  %v11777_v33 = vpop.xlane.xlu0 %4373  ;;  %13165 = vst [vmem:[#allocation35_spill] sm:$0xff] %v11780_v22  ;;  %v11791_v7 = vsub.f32 %v13168_v13, %v4506_v5  ;;  %v11794_v37 = vsub.f32 %v13170_v60, %v4507_v46  ;;  %v4512_v32 = vmul.f32 0.0078125, %v11606_v54  ;;  %v13173_v46 = vld [vmem:[#allocation14_spill] sm:$0xff] }
 0x55a   : > { %4988 = vadd.xlane.f32.xlu1 %v4761_v3  ;;  %13167 = vst [vmem:[#allocation36_spill] sm:$0xff] %v11785_v39  ;;  %v4513_v34 = vmul.f32 0.0078125, %v11618_v15  ;;  %v4764_v27 = vmul.f32 %v11780_v22, %v11780_v22  ;;  %v13174_v60 = vld [vmem:[#allocation114_spill] sm:$0xff] }
 0x55b   : > { %7420 = vst [vmem:[%s11223_s20 + $0x80] sm:$0xff] %v7153_v58   ;;  %v11788_v0 = vpop.xlane.xlu1 %4375  ;;  %13169 = vst [vmem:[#allocation117_spill] sm:$0xff] %v11791_v7  ;;  %v4763_v13 = vmul.f32 %v11794_v37, %v11794_v37 }
 0x55c   : > { %v8551_v16 = vpop.eup %8550  ;;  %13171 = vst [vmem:[#allocation118_spill] sm:$0xff] %v11794_v37  ;;  %4982 = vadd.xlane.f32.xlu0 %v4758_v44  ;;  %v4765_v44 = vmul.f32 %v11785_v39, %v11785_v39 }
 0x55d   : > { %v5468_v26 = vmul.f32 %v8551_v16, %v13172_v31  ;;  %v4875_v62 = vpop.xlane.xlu0 %4874  ;;  %v4762_v16 = vmul.f32 %v11791_v7, %v11791_v7  ;;  %v13175_v31 = vld [vmem:[#allocation115_spill] sm:$0xff] }
 0x55e   : > { %v8553_v47 = vpop.eup %8552  ;;  %v5088_v3 = vmul.f32 0.0078125, %v4875_v62  ;;  %4984 = vadd.xlane.f32.xlu1 %v4759_v61  ;;  %v11812_v61 = vsub.f32 %v13174_v60, %v4512_v32 }
 0x55f   : > { %v5600_v5 = vmul.f32 %v11675_v36, %v5468_v26  ;;  %v5469_v58 = vmul.f32 %v8553_v47, %v13173_v46  ;;  %v4877_v45 = vpop.xlane.xlu1 %4876  ;;  %v11815_v26 = vsub.f32 %v13175_v31, %v4513_v34  ;;  %v13176_v47 = vld [vmem:[#allocation94_spill] sm:$0xff]  ;;  %v13177_v34 = vld [vmem:[#allocation15_spill] sm:$0xff] }
 0x560   : > { %v8555_v54 = vpop.eup %8554  ;;  %v5216_v38 = vadd.f32 1e-05, %v5088_v3  ;;  %v5089_v15 = vmul.f32 0.0078125, %v4877_v45  ;;  %4994 = vadd.xlane.f32.xlu0 %v4764_v27  ;;  %v4510_v27 = vmul.f32 0.0078125, %v11627_v24 }
 0x561   : > { %v5601_v62 = vmul.f32 %v11675_v36, %v5469_v58  ;;  %v5466_v46 = vmul.f32 %v8555_v54, %v13176_v47  ;;  %v4871_v39 = vpop.xlane.xlu0 %4870  ;;  %v5732_v37 = vadd.f32 %v11694_v63, %v5600_v5  ;;  %v4511_v58 = vmul.f32 0.0078125, %v11638_v6 }
 0x562   : > { %v8557_v3 = vpop.eup %8556  ;;  %8558 = vrsqrt.f32 %v5216_v38  ;;  %v5217_v45 = vadd.f32 1e-05, %v5089_v15  ;;  %v5086_v7 = vmul.f32 0.0078125, %v4871_v39  ;;  %4996 = vadd.xlane.f32.xlu1 %v4765_v44  ;;  %v4768_v5 = vmul.f32 %v11812_v61, %v11812_v61  ;;  %v13178_v38 = vld [vmem:[#allocation88_spill] sm:$0xff] }
 0x563   : > { %v5733_v32 = vadd.f32 %v11694_v63, %v5601_v62  ;;  %v5598_v60 = vmul.f32 %v11675_v36, %v5466_v46  ;;  %v5467_v31 = vmul.f32 %v8557_v3, %v13177_v34  ;;  %v4873_v22 = vpop.xlane.xlu1 %4872  ;;  %v11831_v15 = vsub.f32 %v13178_v38, %v4510_v27  ;;  %v13179_v3 = vld [vmem:[#allocation89_spill] sm:$0xff] }
 0x564   : > { %8560 = vrsqrt.f32 %v5217_v45  ;;  %v5214_v54 = vadd.f32 1e-05, %v5086_v7  ;;  %v5087_v47 = vmul.f32 0.0078125, %v4873_v22  ;;  %4990 = vadd.xlane.f32.xlu0 %v4762_v16  ;;  %v4516_v62 = vmul.f32 0.0078125, %v11681_v53 }
 0x565   : > { %v7168_v24 = vpack.c.bf16 %v5733_v32, %v5732_v37  ;;  %v5599_v39 = vmul.f32 %v11675_v36, %v5467_v31  ;;  %v11826_v44 = vpop.xlane.xlu0 %4385  ;;  %v4517_v6 = vmul.f32 0.0078125, %v11698_v40  ;;  %v5730_v22 = vadd.f32 %v11694_v63, %v5598_v60  ;;  %v13180_v32 = vld [vmem:[#allocation12_spill] sm:$0xff]  ;;  %v13182_v31 = vld [vmem:[#allocation17_spill] sm:$0xff] }
 0x566   : > { %8562 = vrsqrt.f32 %v5214_v54  ;;  %v5215_v46 = vadd.f32 1e-05, %v5087_v47  ;;  %4992 = vadd.xlane.f32.xlu1 %v4763_v13  ;;  %v4769_v16 = vmul.f32 %v11815_v26, %v11815_v26  ;;  %v11843_v27 = vsub.f32 %v13179_v3, %v4511_v58  ;;  %v13184_v47 = vld [vmem:[#allocation95_spill] sm:$0xff] }
 0x567   : > { %7423 = vst [vmem:[%s11223_s20 + $0x98] sm:$0xff] %v7168_v24   ;;  %v5731_v7 = vadd.f32 %v11694_v63, %v5599_v39  ;;  %v11838_v37 = vpop.xlane.xlu1 %4387  ;;  %v4514_v53 = vmul.f32 0.0078125, %v11707_v17  ;;  %v4515_v13 = vmul.f32 0.0078125, %v11718_v28  ;;  %v11850_v60 = vsub.f32 %v13180_v32, %v4516_v62  ;;  %v13186_v24 = vld [vmem:[#allocation93_spill] sm:$0xff] }
 0x568   : > { %8564 = vrsqrt.f32 %v5215_v46  ;;  %5002 = vadd.xlane.f32.xlu0 %v4768_v5  ;;  %v4766_v34 = vmul.f32 %v11831_v15, %v11831_v15  ;;  %v11855_v54 = vsub.f32 %v13182_v31, %v4517_v6  ;;  %v4767_v5 = vmul.f32 %v11843_v27, %v11843_v27  ;;  %v13188_v46 = vld [vmem:[#allocation97_spill] sm:$0xff] }
 0x569   : > { %v7163_v40 = vpack.c.bf16 %v5731_v7, %v5730_v22  ;;  %v11847_v45 = vpop.xlane.xlu0 %4381  ;;  %13181 = vst [vmem:[#allocation41_spill] sm:$0xff] %v11850_v60  ;;  %v11859_v28 = vsub.f32 %v13184_v47, %v4514_v53  ;;  %v11862_v39 = vsub.f32 %v13186_v24, %v4515_v13  ;;  %v4520_v38 = vmul.f32 0.0078125, %v11756_v18  ;;  %v13189_v13 = vld [vmem:[#allocation98_spill] sm:$0xff]  ;;  %v13190_v24 = vld [vmem:[#allocation21_spill] sm:$0xff] }
 0x56a   : > { %5004 = vadd.xlane.f32.xlu1 %v4769_v16  ;;  %13183 = vst [vmem:[#allocation119_spill] sm:$0xff] %v11855_v54  ;;  %v4521_v62 = vmul.f32 0.0078125, %v11768_v8  ;;  %v4772_v3 = vmul.f32 %v11850_v60, %v11850_v60 }
 0x56b   : > { %7422 = vst [vmem:[%s11223_s20 + $0x90] sm:$0xff] %v7163_v40   ;;  %v4384_v58 = vpop.xlane.xlu1 %4383  ;;  %13185 = vst [vmem:[#allocation38_spill] sm:$0xff] %v11859_v28  ;;  %v4771_v47 = vmul.f32 %v11862_v39, %v11862_v39 }
 0x56c   : > { %v8559_v17 = vpop.eup %8558  ;;  %13187 = vst [vmem:[#allocation39_spill] sm:$0xff] %v11862_v39  ;;  %4998 = vadd.xlane.f32.xlu0 %v4766_v34  ;;  %v4773_v34 = vmul.f32 %v11855_v54, %v11855_v54 }
 0x56d   : > { %v5472_v6 = vmul.f32 %v8559_v17, %v13188_v46  ;;  %v4883_v22 = vpop.xlane.xlu0 %4882  ;;  %v4770_v17 = vmul.f32 %v11859_v28, %v11859_v28  ;;  %v13191_v46 = vld [vmem:[#allocation99_spill] sm:$0xff] }
 0x56e   : > { %v8561_v7 = vpop.eup %8560  ;;  %v5092_v16 = vmul.f32 0.0078125, %v4883_v22  ;;  %5000 = vadd.xlane.f32.xlu1 %v4767_v5  ;;  %v11880_v5 = vsub.f32 %v13190_v24, %v4520_v38 }
 0x56f   : > { %v5604_v53 = vmul.f32 %v11675_v36, %v5472_v6  ;;  %v5473_v40 = vmul.f32 %v8561_v7, %v13189_v13  ;;  %v4885_v32 = vpop.xlane.xlu1 %4884  ;;  %v11883_v6 = vsub.f32 %v13191_v46, %v4521_v62  ;;  %v13192_v7 = vld [vmem:[#allocation20_spill] sm:$0xff]  ;;  %v13193_v62 = vld [vmem:[#allocation25_spill] sm:$0xff] }
 0x570   : > { %v8563_v18 = vpop.eup %8562  ;;  %v5220_v31 = vadd.f32 1e-05, %v5092_v16  ;;  %v5093_v8 = vmul.f32 0.0078125, %v4885_v32  ;;  %5010 = vadd.xlane.f32.xlu0 %v4772_v3  ;;  %v4518_v3 = vmul.f32 0.0078125, %v11777_v33 }
 0x571   : > { %v5605_v22 = vmul.f32 %v11675_v36, %v5473_v40  ;;  %v5470_v13 = vmul.f32 %v8563_v18, %v13192_v7  ;;  %v4879_v54 = vpop.xlane.xlu0 %4878  ;;  %v5736_v39 = vadd.f32 %v11694_v63, %v5604_v53  ;;  %v4519_v18 = vmul.f32 0.0078125, %v11788_v0 }
 0x572   : > { %v8565_v16 = vpop.eup %8564  ;;  %8566 = vrsqrt.f32 %v5220_v31  ;;  %v5221_v32 = vadd.f32 1e-05, %v5093_v8  ;;  %v5090_v28 = vmul.f32 0.0078125, %v4879_v54  ;;  %5012 = vadd.xlane.f32.xlu1 %v4773_v34  ;;  %v4776_v53 = vmul.f32 %v11880_v5, %v11880_v5  ;;  %v13194_v31 = vld [vmem:[#allocation96_spill] sm:$0xff] }
 0x573   : > { %v5737_v38 = vadd.f32 %v11694_v63, %v5605_v22  ;;  %v5602_v24 = vmul.f32 %v11675_v36, %v5470_v13  ;;  %v5471_v46 = vmul.f32 %v8565_v16, %v13193_v62  ;;  %v4881_v40 = vpop.xlane.xlu1 %4880  ;;  %v11897_v8 = vsub.f32 %v13194_v31, %v4518_v3  ;;  %v13196_v62 = vld [vmem:[#allocation126_spill] sm:$0xff] }
 0x574   : > { %8568 = vrsqrt.f32 %v5221_v32  ;;  %v5218_v7 = vadd.f32 1e-05, %v5090_v28  ;;  %v5091_v60 = vmul.f32 0.0078125, %v4881_v40  ;;  %5006 = vadd.xlane.f32.xlu0 %v4770_v17  ;;  %v4524_v22 = vmul.f32 0.0078125, %v11826_v44  ;;  %v13195_v32 = vld [vmem:[#allocation18_spill] sm:$0xff] }
 0x575   : > { %v7178_v33 = vpack.c.bf16 %v5737_v38, %v5736_v39  ;;  %v5603_v54 = vmul.f32 %v11675_v36, %v5471_v46  ;;  %v4394_v34 = vpop.xlane.xlu0 %4393  ;;  %v5734_v0 = vadd.f32 %v11694_v63, %v5602_v24  ;;  %v4525_v39 = vmul.f32 0.0078125, %v11838_v37 }
 0x576   : > { %8570 = vrsqrt.f32 %v5218_v7  ;;  %v5219_v13 = vadd.f32 1e-05, %v5091_v60  ;;  %5008 = vadd.xlane.f32.xlu1 %v4771_v47  ;;  %v4777_v16 = vmul.f32 %v11883_v6, %v11883_v6  ;;  %v11907_v3 = vsub.f32 %v13195_v32, %v4519_v18 }
 0x577   : > { %7425 = vst [vmem:[%s11223_s20 + $0xa8] sm:$0xff] %v7178_v33   ;;  %v5735_v28 = vadd.f32 %v11694_v63, %v5603_v54  ;;  %v4396_v17 = vpop.xlane.xlu1 %4395  ;;  %v4522_v44 = vmul.f32 0.0078125, %v11847_v45  ;;  %v4523_v38 = vmul.f32 0.0078125, %v4384_v58  ;;  %v11911_v24 = vsub.f32 %v13196_v62, %v4524_v22  ;;  %v13197_v33 = vld [vmem:[#allocation61_spill] sm:$0xff] }
 0x578   : > { %8572 = vrsqrt.f32 %v5219_v13  ;;  %5018 = vadd.xlane.f32.xlu0 %v4776_v53  ;;  %v4774_v37 = vmul.f32 %v11897_v8, %v11897_v8  ;;  %v11917_v46 = vsub.f32 %v11185_v55, %v4525_v39  ;;  %v4775_v7 = vmul.f32 %v11907_v3, %v11907_v3  ;;  %v13199_v62 = vld [vmem:[#allocation101_spill] sm:$0xff] }
 0x579   : > { %v7173_v60 = vpack.c.bf16 %v5735_v28, %v5734_v0  ;;  %v4390_v47 = vpop.xlane.xlu0 %4389  ;;  %v11920_v45 = vsub.f32 %v11180_v10, %v4522_v44  ;;  %v11923_v58 = vsub.f32 %v11188_v25, %v4523_v38  ;;  %v4528_v53 = vmul.f32 0.0078125, %v4394_v34  ;;  %v13198_v28 = vld [vmem:[#allocation103_spill] sm:$0xff] }
 0x57a   : > { %5020 = vadd.xlane.f32.xlu1 %v4777_v16  ;;  %v4529_v31 = vmul.f32 0.0078125, %v4396_v17  ;;  %v4780_v0 = vmul.f32 %v11911_v24, %v11911_v24  ;;  %v4781_v16 = vmul.f32 %v11917_v46, %v11917_v46 }
 0x57b   : > { %7424 = vst [vmem:[%s11223_s20 + $0xa0] sm:$0xff] %v7173_v60   ;;  %v4392_v40 = vpop.xlane.xlu1 %4391  ;;  %v4778_v34 = vmul.f32 %v11920_v45, %v11920_v45  ;;  %v4779_v17 = vmul.f32 %v11923_v58, %v11923_v58 }
 0x57c   : > { %v8567_v18 = vpop.eup %8566  ;;  %5014 = vadd.xlane.f32.xlu0 %v4774_v37 }
 0x57d   : > { %v5476_v54 = vmul.f32 %v8567_v18, %v13197_v33  ;;  %v4891_v22 = vpop.xlane.xlu0 %4890  ;;  %v11941_v18 = vsub.f32 %v11256_v2, %v4528_v53 }
 0x57e   : > { %v8569_v13 = vpop.eup %8568  ;;  %v5096_v55 = vmul.f32 0.0078125, %v4891_v22  ;;  %5016 = vadd.xlane.f32.xlu1 %v4775_v7  ;;  %v11944_v7 = vsub.f32 %v11264_v29, %v4529_v31  ;;  %v4526_v22 = vmul.f32 0.0078125, %v4390_v47 }
 0x57f   : > { %v5608_v10 = vmul.f32 %v11675_v36, %v5476_v54  ;;  %v5477_v25 = vmul.f32 %v8569_v13, %v13198_v28  ;;  %v4893_v39 = vpop.xlane.xlu1 %4892 }
 0x580   : > { %v8571_v32 = vpop.eup %8570  ;;  %v5224_v44 = vadd.f32 1e-05, %v5096_v55  ;;  %v5097_v38 = vmul.f32 0.0078125, %v4893_v39  ;;  %5026 = vadd.xlane.f32.xlu0 %v4780_v0  ;;  %v13200_v39 = vld [vmem:[#allocation59_spill] sm:$0xff] }
 0x581   : > { %v5609_v60 = vmul.f32 %v11675_v36, %v5477_v25  ;;  %v5474_v37 = vmul.f32 %v8571_v32, %v13199_v62  ;;  %v4887_v33 = vpop.xlane.xlu0 %4886  ;;  %v5740_v0 = vadd.f32 %v11694_v63, %v5608_v10  ;;  %v4527_v32 = vmul.f32 0.0078125, %v4392_v40 }
 0x582   : > { %v8573_v54 = vpop.eup %8572  ;;  %8574 = vrsqrt.f32 %v5224_v44  ;;  %v5225_v13 = vadd.f32 1e-05, %v5097_v38  ;;  %v5094_v55 = vmul.f32 0.0078125, %v4887_v33  ;;  %5028 = vadd.xlane.f32.xlu1 %v4781_v16  ;;  %v11952_v16 = vsub.f32 %v11259_v14, %v4526_v22 }
 0x583   : > { %v5741_v28 = vadd.f32 %v11694_v63, %v5609_v60  ;;  %v5606_v25 = vmul.f32 %v11675_v36, %v5474_v37  ;;  %v5475_v2 = vmul.f32 %v8573_v54, %v13200_v39  ;;  %v4889_v53 = vpop.xlane.xlu1 %4888  ;;  %v4784_v60 = vmul.f32 %v11941_v18, %v11941_v18 }
 0x584   : > { %8576 = vrsqrt.f32 %v5225_v13  ;;  %v5222_v29 = vadd.f32 1e-05, %v5094_v55  ;;  %v5095_v31 = vmul.f32 0.0078125, %v4889_v53  ;;  %5022 = vadd.xlane.f32.xlu0 %v4778_v34  ;;  %v11960_v37 = vsub.f32 %v11267_v12, %v4527_v32 }
 0x585   : > { %v7188_v47 = vpack.c.bf16 %v5741_v28, %v5740_v0  ;;  %v5607_v44 = vmul.f32 %v11675_v36, %v5475_v2  ;;  %v4402_v38 = vpop.xlane.xlu0 %4401  ;;  %v5738_v40 = vadd.f32 %v11694_v63, %v5606_v25  ;;  %v4785_v14 = vmul.f32 %v11944_v7, %v11944_v7  ;;  %v13201_v2 = vld [vmem:[#allocation100_spill] sm:$0xff] }
 0x586   : > { %8578 = vrsqrt.f32 %v5222_v29  ;;  %v5223_v10 = vadd.f32 1e-05, %v5095_v31  ;;  %5024 = vadd.xlane.f32.xlu1 %v4779_v17  ;;  %v4532_v54 = vmul.f32 0.0078125, %v4402_v38  ;;  %v4782_v13 = vmul.f32 %v11952_v16, %v11952_v16  ;;  %v13202_v31 = vld [vmem:[#allocation60_spill] sm:$0xff] }
 0x587   : > { %7427 = vst [vmem:[%s11223_s20 + $0xb8] sm:$0xff] %v7188_v47   ;;  %v5739_v62 = vadd.f32 %v11694_v63, %v5607_v44  ;;  %v4404_v34 = vpop.xlane.xlu1 %4403  ;;  %v4783_v39 = vmul.f32 %v11960_v37, %v11960_v37 }
 0x588   : > { %8580 = vrsqrt.f32 %v5223_v10  ;;  %5034 = vadd.xlane.f32.xlu0 %v4784_v60  ;;  %v4533_v28 = vmul.f32 0.0078125, %v4404_v34  ;;  %v11974_v47 = vsub.f32 %v13202_v31, %v4532_v54  ;;  %v13203_v60 = vld [vmem:[#allocation102_spill] sm:$0xff] }
 0x589   : > { %v7183_v33 = vpack.c.bf16 %v5739_v62, %v5738_v40  ;;  %v4398_v17 = vpop.xlane.xlu0 %4397 }
 0x58a   : > { %v4530_v22 = vmul.f32 0.0078125, %v4398_v17  ;;  %5036 = vadd.xlane.f32.xlu1 %v4785_v14  ;;  %v11984_v14 = vsub.f32 %v11331_v52, %v4533_v28  ;;  %v4788_v52 = vmul.f32 %v11974_v47, %v11974_v47 }
 0x58b   : > { %7426 = vst [vmem:[%s11223_s20 + $0xb0] sm:$0xff] %v7183_v33   ;;  %v4400_v55 = vpop.xlane.xlu1 %4399 }
 0x58c   : > { %v8575_v0 = vpop.eup %8574  ;;  %v11968_v12 = vsub.f32 %v11328_v51, %v4530_v22  ;;  %v4531_v25 = vmul.f32 0.0078125, %v4400_v55  ;;  %5030 = vadd.xlane.f32.xlu0 %v4782_v13  ;;  %v13204_v22 = vld [vmem:[#allocation22_spill] sm:$0xff] }
 0x58d   : > { %v5480_v53 = vmul.f32 %v8575_v0, %v13201_v2  ;;  %v4899_v32 = vpop.xlane.xlu0 %4898 }
 0x58e   : > { %v8577_v29 = vpop.eup %8576  ;;  %v11977_v44 = vsub.f32 %v11336_v21, %v4531_v25  ;;  %v5100_v38 = vmul.f32 0.0078125, %v4899_v32  ;;  %5032 = vadd.xlane.f32.xlu1 %v4783_v39  ;;  %v4786_v51 = vmul.f32 %v11968_v12, %v11968_v12  ;;  %v13205_v32 = vld [vmem:[#allocation23_spill] sm:$0xff] }
 0x58f   : > { %v5612_v10 = vmul.f32 %v11675_v36, %v5480_v53  ;;  %v5481_v40 = vmul.f32 %v8577_v29, %v13203_v60  ;;  %v4901_v62 = vpop.xlane.xlu1 %4900  ;;  %v4789_v60 = vmul.f32 %v11984_v14, %v11984_v14 }
 0x590   : > { %v8579_v34 = vpop.eup %8578  ;;  %v5228_v33 = vadd.f32 1e-05, %v5100_v38  ;;  %v5101_v17 = vmul.f32 0.0078125, %v4901_v62  ;;  %5038 = vadd.xlane.f32.xlu0 %v4786_v51  ;;  %v4787_v21 = vmul.f32 %v11977_v44, %v11977_v44 }
 0x591   : > { %v5613_v54 = vmul.f32 %v11675_v36, %v5481_v40  ;;  %v5478_v13 = vmul.f32 %v8579_v34, %v13204_v22  ;;  %v4895_v55 = vpop.xlane.xlu0 %4894  ;;  %v5744_v28 = vadd.f32 %v11694_v63, %v5612_v10 }
 0x592   : > { %v8581_v0 = vpop.eup %8580  ;;  %8582 = vrsqrt.f32 %v5228_v33  ;;  %v5229_v25 = vadd.f32 1e-05, %v5101_v17  ;;  %v5098_v39 = vmul.f32 0.0078125, %v4895_v55  ;;  %5040 = vadd.xlane.f32.xlu1 %v4787_v21 }
 0x593   : > { %v5745_v2 = vadd.f32 %v11694_v63, %v5613_v54  ;;  %v5610_v53 = vmul.f32 %v11675_v36, %v5478_v13  ;;  %v5479_v29 = vmul.f32 %v8581_v0, %v13205_v32  ;;  %v4897_v31 = vpop.xlane.xlu1 %4896 }
 0x594   : > { %8584 = vrsqrt.f32 %v5229_v25  ;;  %v5226_v38 = vadd.f32 1e-05, %v5098_v39  ;;  %v5099_v51 = vmul.f32 0.0078125, %v4897_v31  ;;  %5042 = vadd.xlane.f32.xlu0 %v4788_v52 }
 0x595   : > { %v7198_v40 = vpack.c.bf16 %v5745_v2, %v5744_v28  ;;  %v5611_v62 = vmul.f32 %v11675_v36, %v5479_v29  ;;  %v4907_v34 = vpop.xlane.xlu0 %4906  ;;  %v5742_v17 = vadd.f32 %v11694_v63, %v5610_v53 }
 0x596   : > { %8586 = vrsqrt.f32 %v5226_v38  ;;  %v5227_v10 = vadd.f32 1e-05, %v5099_v51  ;;  %v5104_v33 = vmul.f32 0.0078125, %v4907_v34  ;;  %5044 = vadd.xlane.f32.xlu1 %v4789_v60 }
 0x597   : > { %7429 = vst [vmem:[%s11223_s20 + $0xc8] sm:$0xff] %v7198_v40   ;;  %v5743_v21 = vadd.f32 %v11694_v63, %v5611_v62  ;;  %v4909_v54 = vpop.xlane.xlu1 %4908  ;;  %v13206_v40 = vld [vmem:[#allocation65_spill] sm:$0xff] }
 0x598   : > { %8588 = vrsqrt.f32 %v5227_v10  ;;  %v5232_v22 = vadd.f32 1e-05, %v5104_v33  ;;  %v5105_v13 = vmul.f32 0.0078125, %v4909_v54  ;;  %v13207_v54 = vld [vmem:[#allocation24_spill] sm:$0xff] }
 0x599   : > { %v7193_v55 = vpack.c.bf16 %v5743_v21, %v5742_v17  ;;  %v4903_v0 = vpop.xlane.xlu0 %4902 }
 0x59a   : > { %8590 = vrsqrt.f32 %v5232_v22  ;;  %v5233_v25 = vadd.f32 1e-05, %v5105_v13  ;;  %v5102_v39 = vmul.f32 0.0078125, %v4903_v0 }
 0x59b   : > { %7428 = vst [vmem:[%s11223_s20 + $0xc0] sm:$0xff] %v7193_v55   ;;  %v4905_v52 = vpop.xlane.xlu1 %4904 }
 0x59c   : > { %v8583_v28 = vpop.eup %8582  ;;  %8592 = vrsqrt.f32 %v5233_v25  ;;  %v5230_v2 = vadd.f32 1e-05, %v5102_v39  ;;  %v5103_v32 = vmul.f32 0.0078125, %v4905_v52 }
 0x59d   : > { %v5484_v29 = vmul.f32 %v8583_v28, %v11341_v20  ;;  %v4915_v53 = vpop.xlane.xlu0 %4914  ;;  %v13208_v28 = vld [vmem:[#allocation29_spill] sm:$0xff] }
 0x59e   : > { %v8585_v31 = vpop.eup %8584  ;;  %8594 = vrsqrt.f32 %v5230_v2  ;;  %v5231_v38 = vadd.f32 1e-05, %v5103_v32  ;;  %v5108_v51 = vmul.f32 0.0078125, %v4915_v53 }
 0x59f   : > { %v5616_v60 = vmul.f32 %v11675_v36, %v5484_v29  ;;  %v5485_v62 = vmul.f32 %v8585_v31, %v13206_v40  ;;  %v4917_v34 = vpop.xlane.xlu1 %4916  ;;  %v13209_v40 = vld [vmem:[#allocation69_spill] sm:$0xff] }
 0x5a0   : > { %v8587_v10 = vpop.eup %8586  ;;  %8596 = vrsqrt.f32 %v5231_v38  ;;  %v5236_v33 = vadd.f32 1e-05, %v5108_v51  ;;  %v5109_v17 = vmul.f32 0.0078125, %v4917_v34 }
 0x5a1   : > { %v5617_v21 = vmul.f32 %v11675_v36, %v5485_v62  ;;  %v5482_v22 = vmul.f32 %v8587_v10, %v13207_v54  ;;  %v4911_v13 = vpop.xlane.xlu0 %4910  ;;  %v5748_v25 = vadd.f32 %v11694_v63, %v5616_v60 }
 0x5a2   : > { %v8589_v20 = vpop.eup %8588  ;;  %8598 = vrsqrt.f32 %v5236_v33  ;;  %v5237_v55 = vadd.f32 1e-05, %v5109_v17  ;;  %v5106_v0 = vmul.f32 0.0078125, %v4911_v13 }
 0x5a3   : > { %v5749_v39 = vadd.f32 %v11694_v63, %v5617_v21  ;;  %v5614_v52 = vmul.f32 %v11675_v36, %v5482_v22  ;;  %v5483_v2 = vmul.f32 %v8589_v20, %v13208_v28  ;;  %v4913_v32 = vpop.xlane.xlu1 %4912  ;;  %v13210_v22 = vld [vmem:[#allocation107_spill] sm:$0xff] }
 0x5a4   : > { %v8591_v29 = vpop.eup %8590  ;;  %8600 = vrsqrt.f32 %v5237_v55  ;;  %v5234_v53 = vadd.f32 1e-05, %v5106_v0  ;;  %v5107_v31 = vmul.f32 0.0078125, %v4913_v32 }
 0x5a5   : > { %v7208_v38 = vpack.c.bf16 %v5749_v39, %v5748_v25  ;;  %v5615_v51 = vmul.f32 %v11675_v36, %v5483_v2  ;;  %v5488_v62 = vmul.f32 %v8591_v29, %v13209_v40  ;;  %v4923_v34 = vpop.xlane.xlu0 %4922  ;;  %v5746_v17 = vadd.f32 %v11694_v63, %v5614_v52  ;;  %v13211_v2 = vld [vmem:[#allocation105_spill] sm:$0xff] }
 0x5a6   : > { %v8593_v10 = vpop.eup %8592  ;;  %8602 = vrsqrt.f32 %v5234_v53  ;;  %v5235_v60 = vadd.f32 1e-05, %v5107_v31  ;;  %v5112_v33 = vmul.f32 0.0078125, %v4923_v34 }
 0x5a7   : > { %7431 = vst [vmem:[%s11223_s20 + $0xd8] sm:$0xff] %v7208_v38   ;;  %v5747_v21 = vadd.f32 %v11694_v63, %v5615_v51  ;;  %v5620_v54 = vmul.f32 %v11675_v36, %v5488_v62  ;;  %v5489_v13 = vmul.f32 %v8593_v10, %v13210_v22  ;;  %v4925_v20 = vpop.xlane.xlu1 %4924  ;;  %v13212_v62 = vld [vmem:[#allocation67_spill] sm:$0xff] }
 0x5a8   : > { %v8595_v55 = vpop.eup %8594  ;;  %8604 = vrsqrt.f32 %v5235_v60  ;;  %v5240_v0 = vadd.f32 1e-05, %v5112_v33  ;;  %v5113_v25 = vmul.f32 0.0078125, %v4925_v20 }
 0x5a9   : > { %v7203_v39 = vpack.c.bf16 %v5747_v21, %v5746_v17  ;;  %v5621_v28 = vmul.f32 %v11675_v36, %v5489_v13  ;;  %v5486_v32 = vmul.f32 %v8595_v55, %v13211_v2  ;;  %v4919_v29 = vpop.xlane.xlu0 %4918  ;;  %v5752_v38 = vadd.f32 %v11694_v63, %v5620_v54  ;;  %v13213_v13 = vld [vmem:[#allocation104_spill] sm:$0xff] }
 0x5aa   : > { %v8597_v53 = vpop.eup %8596  ;;  %8606 = vrsqrt.f32 %v5240_v0  ;;  %v5241_v52 = vadd.f32 1e-05, %v5113_v25  ;;  %v5110_v31 = vmul.f32 0.0078125, %v4919_v29 }
 0x5ab   : > { %7430 = vst [vmem:[%s11223_s20 + $0xd0] sm:$0xff] %v7203_v39   ;;  %v5753_v51 = vadd.f32 %v11694_v63, %v5621_v28  ;;  %v5618_v40 = vmul.f32 %v11675_v36, %v5486_v32  ;;  %v5487_v34 = vmul.f32 %v8597_v53, %v13212_v62  ;;  %v4921_v10 = vpop.xlane.xlu1 %4920  ;;  %v13214_v32 = vld [vmem:[#allocation106_spill] sm:$0xff] }
 0x5ac   : > { %v8599_v60 = vpop.eup %8598  ;;  %8608 = vrsqrt.f32 %v5241_v52  ;;  %v5238_v33 = vadd.f32 1e-05, %v5110_v31  ;;  %v5111_v17 = vmul.f32 0.0078125, %v4921_v10 }
 0x5ad   : > { %v7218_v21 = vpack.c.bf16 %v5753_v51, %v5752_v38  ;;  %v5619_v22 = vmul.f32 %v11675_v36, %v5487_v34  ;;  %v5492_v20 = vmul.f32 %v8599_v60, %v13213_v13  ;;  %v4931_v55 = vpop.xlane.xlu0 %4930  ;;  %v5750_v39 = vadd.f32 %v11694_v63, %v5618_v40  ;;  %v13215_v34 = vld [vmem:[#allocation26_spill] sm:$0xff] }
 0x5ae   : > { %v8601_v0 = vpop.eup %8600  ;;  %8610 = vrsqrt.f32 %v5238_v33  ;;  %v5239_v54 = vadd.f32 1e-05, %v5111_v17  ;;  %v5116_v25 = vmul.f32 0.0078125, %v4931_v55 }
 0x5af   : > { %7433 = vst [vmem:[%s11223_s20 + $0xe8] sm:$0xff] %v7218_v21   ;;  %v5751_v28 = vadd.f32 %v11694_v63, %v5619_v22  ;;  %v5624_v2 = vmul.f32 %v11675_v36, %v5492_v20  ;;  %v5493_v29 = vmul.f32 %v8601_v0, %v13214_v32  ;;  %v4933_v53 = vpop.xlane.xlu1 %4932 }
 0x5b0   : > { %v8603_v52 = vpop.eup %8602  ;;  %8612 = vrsqrt.f32 %v5239_v54  ;;  %v5244_v31 = vadd.f32 1e-05, %v5116_v25  ;;  %v5117_v38 = vmul.f32 0.0078125, %v4933_v53 }
 0x5b1   : > { %v7213_v51 = vpack.c.bf16 %v5751_v28, %v5750_v39  ;;  %v5625_v62 = vmul.f32 %v11675_v36, %v5493_v29  ;;  %v5490_v10 = vmul.f32 %v8603_v52, %v13215_v34  ;;  %v4927_v60 = vpop.xlane.xlu0 %4926  ;;  %v5756_v21 = vadd.f32 %v11694_v63, %v5624_v2 }
 0x5b2   : > { %v8605_v33 = vpop.eup %8604  ;;  %8614 = vrsqrt.f32 %v5244_v31  ;;  %v5245_v40 = vadd.f32 1e-05, %v5117_v38  ;;  %v5114_v17 = vmul.f32 0.0078125, %v4927_v60 }
 0x5b3   : > { %7432 = vst [vmem:[%s11223_s20 + $0xe0] sm:$0xff] %v7213_v51   ;;  %v5757_v22 = vadd.f32 %v11694_v63, %v5625_v62  ;;  %v5622_v13 = vmul.f32 %v11675_v36, %v5490_v10  ;;  %v5491_v20 = vmul.f32 %v8605_v33, %v11429_v41  ;;  %v4929_v55 = vpop.xlane.xlu1 %4928 }
 0x5b4   : > { %v8607_v0 = vpop.eup %8606  ;;  %8616 = vrsqrt.f32 %v5245_v40  ;;  %v5242_v54 = vadd.f32 1e-05, %v5114_v17  ;;  %v5115_v25 = vmul.f32 0.0078125, %v4929_v55  ;;  %v12055_v55 = vld [vmem:[%s12343_s6 + $0x3] ss:$0 sm:$0xff] }
 0x5b5   : > { %v7228_v39 = vpack.c.bf16 %v5757_v22, %v5756_v21  ;;  %v5623_v28 = vmul.f32 %v11675_v36, %v5491_v20  ;;  %v5496_v32 = vmul.f32 %v8607_v0, %v11449_v59  ;;  %v4939_v29 = vpop.xlane.xlu0 %4938  ;;  %v5754_v31 = vadd.f32 %v11694_v63, %v5622_v13 }
 0x5b6   : > { %v8609_v53 = vpop.eup %8608  ;;  %8618 = vrsqrt.f32 %v5242_v54  ;;  %v5243_v2 = vadd.f32 1e-05, %v5115_v25  ;;  %v5120_v52 = vmul.f32 0.0078125, %v4939_v29  ;;  %v13216_v29 = vld [vmem:[#allocation27_spill] sm:$0xff] }
 0x5b7   : > { %7435 = vst [vmem:[%s11223_s20 + $0xf8] sm:$0xff] %v7228_v39   ;;  %v5755_v41 = vadd.f32 %v11694_v63, %v5623_v28  ;;  %v5628_v38 = vmul.f32 %v11675_v36, %v5496_v32  ;;  %v5497_v51 = vmul.f32 %v8609_v53, %v11454_v48  ;;  %v4941_v62 = vpop.xlane.xlu1 %4940 }
 0x5b8   : > { %v8611_v34 = vpop.eup %8610  ;;  %8620 = vrsqrt.f32 %v5243_v2  ;;  %v5248_v10 = vadd.f32 1e-05, %v5120_v52  ;;  %v5121_v59 = vmul.f32 0.0078125, %v4941_v62  ;;  %v13217_v62 = vld [vmem:[#allocation68_spill] sm:$0xff] }
 0x5b9   : > { %v7223_v60 = vpack.c.bf16 %v5755_v41, %v5754_v31  ;;  %v5629_v33 = vmul.f32 %v11675_v36, %v5497_v51  ;;  %v5494_v40 = vmul.f32 %v8611_v34, %v11471_v43  ;;  %v4935_v17 = vpop.xlane.xlu0 %4934  ;;  %v5760_v20 = vadd.f32 %v11694_v63, %v5628_v38 }
 0x5ba   : > { %v8613_v21 = vpop.eup %8612  ;;  %8622 = vrsqrt.f32 %v5248_v10  ;;  %v5249_v22 = vadd.f32 1e-05, %v5121_v59  ;;  %v5118_v13 = vmul.f32 0.0078125, %v4935_v17 }
 0x5bb   : > { %7434 = vst [vmem:[%s11223_s20 + $0xf0] sm:$0xff] %v7223_v60   ;;  %v5761_v48 = vadd.f32 %v11694_v63, %v5629_v33  ;;  %v5626_v36 = vmul.f32 %v12055_v55, %v5494_v40  ;;  %v5495_v43 = vmul.f32 %v8613_v21, %v11481_v9  ;;  %v4937_v0 = vpop.xlane.xlu1 %4936  ;;  %v12065_v9 = vld [vmem:[%s12343_s6 + $0x4] ss:$0 sm:$0xff] }
 0x5bc   : > { %v8615_v54 = vpop.eup %8614  ;;  %8624 = vrsqrt.f32 %v5249_v22  ;;  %v5246_v25 = vadd.f32 1e-05, %v5118_v13  ;;  %v5119_v39 = vmul.f32 0.0078125, %v4937_v0  ;;  %v13218_v21 = vld [vmem:[#allocation73_spill] sm:$0xff] }
 0x5bd   : > { %v7238_v28 = vpack.c.bf16 %v5761_v48, %v5760_v20  ;;  %v5627_v32 = vmul.f32 %v12055_v55, %v5495_v43  ;;  %v5500_v63 = vmul.f32 %v8615_v54, %v13216_v29  ;;  %v4947_v53 = vpop.xlane.xlu0 %4946  ;;  %v5758_v41 = vadd.f32 %v12065_v9, %v5626_v36 }
 0x5be   : > { %v8617_v2 = vpop.eup %8616  ;;  %8626 = vrsqrt.f32 %v5246_v25  ;;  %v5247_v52 = vadd.f32 1e-05, %v5119_v39  ;;  %v5124_v31 = vmul.f32 0.0078125, %v4947_v53  ;;  %v13219_v25 = vld [vmem:[#allocation28_spill] sm:$0xff] }
 0x5bf   : > { %7437 = vst [vmem:[%s11223_s20 + $0x108] sm:$0xff] %v7238_v28   ;;  %v5759_v38 = vadd.f32 %v12065_v9, %v5627_v32  ;;  %v5632_v51 = vmul.f32 %v12055_v55, %v5500_v63  ;;  %v5501_v34 = vmul.f32 %v8617_v2, %v13217_v62  ;;  %v4949_v10 = vpop.xlane.xlu1 %4948 }
 0x5c0   : > { %v8619_v59 = vpop.eup %8618  ;;  %8628 = vrsqrt.f32 %v5247_v52  ;;  %v5252_v60 = vadd.f32 1e-05, %v5124_v31  ;;  %v5125_v33 = vmul.f32 0.0078125, %v4949_v10  ;;  %v13220_v52 = vld [vmem:[#allocation33_spill] sm:$0xff] }
 0x5c1   : > { %v7233_v40 = vpack.c.bf16 %v5759_v38, %v5758_v41  ;;  %v5633_v17 = vmul.f32 %v12055_v55, %v5501_v34  ;;  %v5498_v22 = vmul.f32 %v8619_v59, %v13218_v21  ;;  %v4943_v13 = vpop.xlane.xlu0 %4942  ;;  %v5764_v43 = vadd.f32 %v12065_v9, %v5632_v51 }
 0x5c2   : > { %v8621_v20 = vpop.eup %8620  ;;  %8630 = vrsqrt.f32 %v5252_v60  ;;  %v5253_v48 = vadd.f32 1e-05, %v5125_v33  ;;  %v5122_v36 = vmul.f32 0.0078125, %v4943_v13  ;;  %v13221_v60 = vld [vmem:[#allocation133_spill] sm:$0xff] }
 0x5c3   : > { %7436 = vst [vmem:[%s11223_s20 + $0x100] sm:$0xff] %v7233_v40   ;;  %v5765_v0 = vadd.f32 %v12065_v9, %v5633_v17  ;;  %v5630_v54 = vmul.f32 %v12055_v55, %v5498_v22  ;;  %v5499_v39 = vmul.f32 %v8621_v20, %v13219_v25  ;;  %v4945_v28 = vpop.xlane.xlu1 %4944 }
 0x5c4   : > { %v8623_v32 = vpop.eup %8622  ;;  %8632 = vrsqrt.f32 %v5253_v48  ;;  %v5250_v29 = vadd.f32 1e-05, %v5122_v36  ;;  %v5123_v63 = vmul.f32 0.0078125, %v4945_v28  ;;  %v13222_v48 = vld [vmem:[#allocation134_spill] sm:$0xff] }
 0x5c5   : > { %v7248_v53 = vpack.c.bf16 %v5765_v0, %v5764_v43  ;;  %v5631_v2 = vmul.f32 %v12055_v55, %v5499_v39  ;;  %v5504_v31 = vmul.f32 %v8623_v32, %v13220_v52  ;;  %v4955_v41 = vpop.xlane.xlu0 %4954  ;;  %v5762_v34 = vadd.f32 %v12065_v9, %v5630_v54 }
 0x5c6   : > { %v8625_v38 = vpop.eup %8624  ;;  %8634 = vrsqrt.f32 %v5250_v29  ;;  %v5251_v51 = vadd.f32 1e-05, %v5123_v63  ;;  %v5128_v62 = vmul.f32 0.0078125, %v4955_v41  ;;  %v13223_v29 = vld [vmem:[#allocation77_spill] sm:$0xff] }
 0x5c7   : > { %7439 = vst [vmem:[%s11223_s20 + $0x118] sm:$0xff] %v7248_v53   ;;  %v5763_v10 = vadd.f32 %v12065_v9, %v5631_v2  ;;  %v5636_v59 = vmul.f32 %v12055_v55, %v5504_v31  ;;  %v5505_v33 = vmul.f32 %v8625_v38, %v13221_v60  ;;  %v4957_v40 = vpop.xlane.xlu1 %4956 }
 0x5c8   : > { %v8627_v17 = vpop.eup %8626  ;;  %8636 = vrsqrt.f32 %v5251_v51  ;;  %v5256_v21 = vadd.f32 1e-05, %v5128_v62  ;;  %v5129_v22 = vmul.f32 0.0078125, %v4957_v40  ;;  %v13224_v51 = vld [vmem:[#allocation111_spill] sm:$0xff] }
 0x5c9   : > { %v7243_v13 = vpack.c.bf16 %v5763_v10, %v5762_v34  ;;  %v5637_v20 = vmul.f32 %v12055_v55, %v5505_v33  ;;  %v5502_v36 = vmul.f32 %v8627_v17, %v13222_v48  ;;  %v4951_v43 = vpop.xlane.xlu0 %4950  ;;  %v5768_v39 = vadd.f32 %v12065_v9, %v5636_v59 }
 0x5ca   : > { %v8629_v0 = vpop.eup %8628  ;;  %8638 = vrsqrt.f32 %v5256_v21  ;;  %v5257_v54 = vadd.f32 1e-05, %v5129_v22  ;;  %v5126_v25 = vmul.f32 0.0078125, %v4951_v43  ;;  %v13225_v21 = vld [vmem:[#allocation109_spill] sm:$0xff] }
 0x5cb   : > { %7438 = vst [vmem:[%s11223_s20 + $0x110] sm:$0xff] %v7243_v13   ;;  %v5769_v28 = vadd.f32 %v12065_v9, %v5637_v20  ;;  %v5634_v32 = vmul.f32 %v12055_v55, %v5502_v36  ;;  %v5503_v63 = vmul.f32 %v8629_v0, %v13223_v29  ;;  %v4953_v53 = vpop.xlane.xlu1 %4952 }
 0x5cc   : > { %v8631_v2 = vpop.eup %8630  ;;  %8640 = vrsqrt.f32 %v5257_v54  ;;  %v5254_v52 = vadd.f32 1e-05, %v5126_v25  ;;  %v5127_v31 = vmul.f32 0.0078125, %v4953_v53  ;;  %v13226_v54 = vld [vmem:[#allocation108_spill] sm:$0xff] }
 0x5cd   : > { %v7258_v41 = vpack.c.bf16 %v5769_v28, %v5768_v39  ;;  %v5635_v38 = vmul.f32 %v12055_v55, %v5503_v63  ;;  %v5508_v62 = vmul.f32 %v8631_v2, %v13224_v51  ;;  %v4963_v34 = vpop.xlane.xlu0 %4962  ;;  %v5766_v33 = vadd.f32 %v12065_v9, %v5634_v32 }
 0x5ce   : > { %v8633_v10 = vpop.eup %8632  ;;  %8642 = vrsqrt.f32 %v5254_v52  ;;  %v5255_v59 = vadd.f32 1e-05, %v5127_v31  ;;  %v5132_v60 = vmul.f32 0.0078125, %v4963_v34  ;;  %v13227_v52 = vld [vmem:[#allocation75_spill] sm:$0xff] }
 0x5cf   : > { %7441 = vst [vmem:[%s11223_s20 + $0x128] sm:$0xff] %v7258_v41   ;;  %v5767_v40 = vadd.f32 %v12065_v9, %v5635_v38  ;;  %v5640_v17 = vmul.f32 %v12055_v55, %v5508_v62  ;;  %v5509_v22 = vmul.f32 %v8633_v10, %v13225_v21  ;;  %v4965_v13 = vpop.xlane.xlu1 %4964 }
 0x5d0   : > { %v8635_v20 = vpop.eup %8634  ;;  %8644 = vrsqrt.f32 %v5255_v59  ;;  %v5260_v48 = vadd.f32 1e-05, %v5132_v60  ;;  %v5133_v36 = vmul.f32 0.0078125, %v4965_v13 }
 0x5d1   : > { %v7253_v43 = vpack.c.bf16 %v5767_v40, %v5766_v33  ;;  %v5641_v0 = vmul.f32 %v12055_v55, %v5509_v22  ;;  %v5506_v25 = vmul.f32 %v8635_v20, %v13226_v54  ;;  %v4959_v39 = vpop.xlane.xlu0 %4958  ;;  %v5772_v63 = vadd.f32 %v12065_v9, %v5640_v17 }
 0x5d2   : > { %v8637_v28 = vpop.eup %8636  ;;  %8646 = vrsqrt.f32 %v5260_v48  ;;  %v5261_v32 = vadd.f32 1e-05, %v5133_v36  ;;  %v5130_v29 = vmul.f32 0.0078125, %v4959_v39 }
 0x5d3   : > { %7440 = vst [vmem:[%s11223_s20 + $0x120] sm:$0xff] %v7253_v43   ;;  %v5773_v53 = vadd.f32 %v12065_v9, %v5641_v0  ;;  %v5638_v2 = vmul.f32 %v12055_v55, %v5506_v25  ;;  %v5507_v31 = vmul.f32 %v8637_v28, %v13227_v52  ;;  %v4961_v41 = vpop.xlane.xlu1 %4960 }
 0x5d4   : > { %v8639_v38 = vpop.eup %8638  ;;  %8648 = vrsqrt.f32 %v5261_v32  ;;  %v5258_v51 = vadd.f32 1e-05, %v5130_v29  ;;  %v5131_v62 = vmul.f32 0.0078125, %v4961_v41 }
 0x5d5   : > { %v7268_v34 = vpack.c.bf16 %v5773_v53, %v5772_v63  ;;  %v5639_v10 = vmul.f32 %v12055_v55, %v5507_v31  ;;  %v5512_v59 = vmul.f32 %v8639_v38, %v11592_v4  ;;  %v4971_v60 = vpop.xlane.xlu0 %4970  ;;  %v5770_v21 = vadd.f32 %v12065_v9, %v5638_v2 }
 0x5d6   : > { %v8641_v33 = vpop.eup %8640  ;;  %8650 = vrsqrt.f32 %v5258_v51  ;;  %v5259_v40 = vadd.f32 1e-05, %v5131_v62  ;;  %v5136_v17 = vmul.f32 0.0078125, %v4971_v60 }
 0x5d7   : > { %7443 = vst [vmem:[%s11223_s20 + $0x138] sm:$0xff] %v7268_v34   ;;  %v5771_v22 = vadd.f32 %v12065_v9, %v5639_v10  ;;  %v5644_v13 = vmul.f32 %v12055_v55, %v5512_v59  ;;  %v5513_v20 = vmul.f32 %v8641_v33, %v11595_v30  ;;  %v4973_v48 = vpop.xlane.xlu1 %4972 }
 0x5d8   : > { %v8643_v36 = vpop.eup %8642  ;;  %8652 = vrsqrt.f32 %v5259_v40  ;;  %v5264_v43 = vadd.f32 1e-05, %v5136_v17  ;;  %v5137_v4 = vmul.f32 0.0078125, %v4973_v48  ;;  %v13228_v17 = vld [vmem:[#allocation110_spill] sm:$0xff] }
 0x5d9   : > { %v7263_v0 = vpack.c.bf16 %v5771_v22, %v5770_v21  ;;  %v5645_v54 = vmul.f32 %v12055_v55, %v5513_v20  ;;  %v5510_v25 = vmul.f32 %v8643_v36, %v11611_v49  ;;  %v4967_v39 = vpop.xlane.xlu0 %4966  ;;  %v5776_v63 = vadd.f32 %v12065_v9, %v5644_v13 }
 0x5da   : > { %v8645_v28 = vpop.eup %8644  ;;  %8654 = vrsqrt.f32 %v5264_v43  ;;  %v5265_v32 = vadd.f32 1e-05, %v5137_v4  ;;  %v5134_v29 = vmul.f32 0.0078125, %v4967_v39  ;;  %v13229_v43 = vld [vmem:[#allocation30_spill] sm:$0xff] }
 0x5db   : > { %7442 = vst [vmem:[%s11223_s20 + $0x130] sm:$0xff] %v7263_v0   ;;  %v5777_v30 = vadd.f32 %v12065_v9, %v5645_v54  ;;  %v5642_v53 = vmul.f32 %v12055_v55, %v5510_v25  ;;  %v5511_v2 = vmul.f32 %v8645_v28, %v11623_v23  ;;  %v4969_v52 = vpop.xlane.xlu1 %4968 }
 0x5dc   : > { %v8647_v31 = vpop.eup %8646  ;;  %8656 = vrsqrt.f32 %v5265_v32  ;;  %v5262_v41 = vadd.f32 1e-05, %v5134_v29  ;;  %v5135_v49 = vmul.f32 0.0078125, %v4969_v52 }
 0x5dd   : > { %v7278_v38 = vpack.c.bf16 %v5777_v30, %v5776_v63  ;;  %v5643_v51 = vmul.f32 %v12055_v55, %v5511_v2  ;;  %v5516_v62 = vmul.f32 %v8647_v31, %v11630_v35  ;;  %v4979_v34 = vpop.xlane.xlu0 %4978  ;;  %v5774_v33 = vadd.f32 %v12065_v9, %v5642_v53  ;;  %v13230_v63 = vld [vmem:[#allocation76_spill] sm:$0xff] }
 0x5de   : > { %v8649_v10 = vpop.eup %8648  ;;  %8658 = vrsqrt.f32 %v5262_v41  ;;  %v5263_v59 = vadd.f32 1e-05, %v5135_v49  ;;  %v5140_v60 = vmul.f32 0.0078125, %v4979_v34 }
 0x5df   : > { %7445 = vst [vmem:[%s11223_s20 + $0x148] sm:$0xff] %v7278_v38   ;;  %v5775_v23 = vadd.f32 %v12065_v9, %v5643_v51  ;;  %v5648_v40 = vmul.f32 %v12055_v55, %v5516_v62  ;;  %v5517_v21 = vmul.f32 %v8649_v10, %v13228_v17  ;;  %v4981_v22 = vpop.xlane.xlu1 %4980 }
 0x5e0   : > { %v8651_v13 = vpop.eup %8650  ;;  %8660 = vrsqrt.f32 %v5263_v59  ;;  %v5268_v20 = vadd.f32 1e-05, %v5140_v60  ;;  %v5141_v35 = vmul.f32 0.0078125, %v4981_v22 }
 0x5e1   : > { %v7273_v48 = vpack.c.bf16 %v5775_v23, %v5774_v33  ;;  %v5649_v36 = vmul.f32 %v12055_v55, %v5517_v21  ;;  %v5514_v4 = vmul.f32 %v8651_v13, %v13229_v43  ;;  %v4975_v0 = vpop.xlane.xlu0 %4974  ;;  %v5780_v28 = vadd.f32 %v12065_v9, %v5648_v40 }
 0x5e2   : > { %v8653_v54 = vpop.eup %8652  ;;  %8662 = vrsqrt.f32 %v5268_v20  ;;  %v5269_v25 = vadd.f32 1e-05, %v5141_v35  ;;  %v5138_v39 = vmul.f32 0.0078125, %v4975_v0 }
 0x5e3   : > { %7444 = vst [vmem:[%s11223_s20 + $0x140] sm:$0xff] %v7273_v48   ;;  %v5781_v32 = vadd.f32 %v12065_v9, %v5649_v36  ;;  %v5646_v29 = vmul.f32 %v12055_v55, %v5514_v4  ;;  %v5515_v30 = vmul.f32 %v8653_v54, %v13230_v63  ;;  %v4977_v53 = vpop.xlane.xlu1 %4976  ;;  %v13231_v54 = vld [vmem:[#allocation113_spill] sm:$0xff] }
 0x5e4   : > { %v8655_v2 = vpop.eup %8654  ;;  %8664 = vrsqrt.f32 %v5269_v25  ;;  %v5266_v52 = vadd.f32 1e-05, %v5138_v39  ;;  %v5139_v31 = vmul.f32 0.0078125, %v4977_v53 }
 0x5e5   : > { %v7288_v41 = vpack.c.bf16 %v5781_v32, %v5780_v28  ;;  %v5647_v49 = vmul.f32 %v12055_v55, %v5515_v30  ;;  %v5520_v38 = vmul.f32 %v8655_v2, %v11662_v19  ;;  %v4987_v51 = vpop.xlane.xlu0 %4986  ;;  %v5778_v59 = vadd.f32 %v12065_v9, %v5646_v29  ;;  %v13232_v30 = vld [vmem:[#allocation31_spill] sm:$0xff] }
 0x5e6   : > { %v8657_v62 = vpop.eup %8656  ;;  %8666 = vrsqrt.f32 %v5266_v52  ;;  %v5267_v34 = vadd.f32 1e-05, %v5139_v31  ;;  %v5144_v10 = vmul.f32 0.0078125, %v4987_v51 }
 0x5e7   : > { %7447 = vst [vmem:[%s11223_s20 + $0x158] sm:$0xff] %v7288_v41   ;;  %v5779_v60 = vadd.f32 %v12065_v9, %v5647_v49  ;;  %v5652_v33 = vmul.f32 %v12055_v55, %v5520_v38  ;;  %v5521_v23 = vmul.f32 %v8657_v62, %v11665_v50  ;;  %v4989_v40 = vpop.xlane.xlu1 %4988  ;;  %v13233_v62 = vld [vmem:[#allocation32_spill] sm:$0xff] }
 0x5e8   : > { %v8659_v17 = vpop.eup %8658  ;;  %8668 = vrsqrt.f32 %v5267_v34  ;;  %v5272_v21 = vadd.f32 1e-05, %v5144_v10  ;;  %v5145_v19 = vmul.f32 0.0078125, %v4989_v40 }
 0x5e9   : > { %v7283_v22 = vpack.c.bf16 %v5779_v60, %v5778_v59  ;;  %v5653_v13 = vmul.f32 %v12055_v55, %v5521_v23  ;;  %v5518_v20 = vmul.f32 %v8659_v17, %v11686_v42  ;;  %v4983_v35 = vpop.xlane.xlu0 %4982  ;;  %v5784_v4 = vadd.f32 %v12065_v9, %v5652_v33  ;;  %v13234_v17 = vld [vmem:[#allocation37_spill] sm:$0xff] }
 0x5ea   : > { %v8661_v48 = vpop.eup %8660  ;;  %8670 = vrsqrt.f32 %v5272_v21  ;;  %v5273_v36 = vadd.f32 1e-05, %v5145_v19  ;;  %v5142_v43 = vmul.f32 0.0078125, %v4983_v35 }
 0x5eb   : > { %7446 = vst [vmem:[%s11223_s20 + $0x150] sm:$0xff] %v7283_v22   ;;  %v5785_v50 = vadd.f32 %v12065_v9, %v5653_v13  ;;  %v5650_v0 = vmul.f32 %v12055_v55, %v5518_v20  ;;  %v5519_v25 = vmul.f32 %v8661_v48, %v13231_v54  ;;  %v4985_v39 = vpop.xlane.xlu1 %4984 }
 0x5ec   : > { %v8663_v28 = vpop.eup %8662  ;;  %8672 = vrsqrt.f32 %v5273_v36  ;;  %v5270_v32 = vadd.f32 1e-05, %v5142_v43  ;;  %v5143_v42 = vmul.f32 0.0078125, %v4985_v39  ;;  %v13235_v43 = vld [vmem:[#allocation34_spill] sm:$0xff] }
 0x5ed   : > { %v7298_v29 = vpack.c.bf16 %v5785_v50, %v5784_v4  ;;  %v5651_v63 = vmul.f32 %v12055_v55, %v5519_v25  ;;  %v5524_v53 = vmul.f32 %v8663_v28, %v13232_v30  ;;  %v4995_v2 = vpop.xlane.xlu0 %4994  ;;  %v5782_v49 = vadd.f32 %v12065_v9, %v5650_v0 }
 0x5ee   : > { %v8665_v52 = vpop.eup %8664  ;;  %8674 = vrsqrt.f32 %v5270_v32  ;;  %v5271_v31 = vadd.f32 1e-05, %v5143_v42  ;;  %v5148_v41 = vmul.f32 0.0078125, %v4995_v2 }
 0x5ef   : > { %7449 = vst [vmem:[%s11223_s20 + $0x168] sm:$0xff] %v7298_v29   ;;  %v5783_v38 = vadd.f32 %v12065_v9, %v5651_v63  ;;  %v5656_v51 = vmul.f32 %v12055_v55, %v5524_v53  ;;  %v5525_v34 = vmul.f32 %v8665_v52, %v13233_v62  ;;  %v4997_v10 = vpop.xlane.xlu1 %4996 }
 0x5f0   : > { %v8667_v59 = vpop.eup %8666  ;;  %8676 = vrsqrt.f32 %v5271_v31  ;;  %v5276_v60 = vadd.f32 1e-05, %v5148_v41  ;;  %v5149_v33 = vmul.f32 0.0078125, %v4997_v10 }
 0x5f1   : > { %v7293_v23 = vpack.c.bf16 %v5783_v38, %v5782_v49  ;;  %v5657_v40 = vmul.f32 %v12055_v55, %v5525_v34  ;;  %v5522_v21 = vmul.f32 %v8667_v59, %v13234_v17  ;;  %v4991_v19 = vpop.xlane.xlu0 %4990  ;;  %v5788_v35 = vadd.f32 %v12065_v9, %v5656_v51 }
 0x5f2   : > { %v8669_v22 = vpop.eup %8668  ;;  %8678 = vrsqrt.f32 %v5276_v60  ;;  %v5277_v13 = vadd.f32 1e-05, %v5149_v33  ;;  %v5146_v20 = vmul.f32 0.0078125, %v4991_v19 }
 0x5f3   : > { %7448 = vst [vmem:[%s11223_s20 + $0x160] sm:$0xff] %v7293_v23   ;;  %v5789_v48 = vadd.f32 %v12065_v9, %v5657_v40  ;;  %v5654_v36 = vmul.f32 %v12055_v55, %v5522_v21  ;;  %v5523_v4 = vmul.f32 %v8669_v22, %v13235_v43  ;;  %v4993_v50 = vpop.xlane.xlu1 %4992 }
 0x5f4   : > { %v8671_v0 = vpop.eup %8670  ;;  %8680 = vrsqrt.f32 %v5277_v13  ;;  %v5274_v54 = vadd.f32 1e-05, %v5146_v20  ;;  %v5147_v25 = vmul.f32 0.0078125, %v4993_v50 }
 0x5f5   : > { %v7308_v39 = vpack.c.bf16 %v5789_v48, %v5788_v35  ;;  %v5655_v28 = vmul.f32 %v12055_v55, %v5523_v4  ;;  %v5528_v32 = vmul.f32 %v8671_v0, %v11742_v11  ;;  %v5003_v42 = vpop.xlane.xlu0 %5002  ;;  %v5786_v53 = vadd.f32 %v12065_v9, %v5654_v36  ;;  %v13236_v35 = vld [vmem:[#allocation35_spill] sm:$0xff] }
 0x5f6   : > { %v8673_v29 = vpop.eup %8672  ;;  %8682 = vrsqrt.f32 %v5274_v54  ;;  %v5275_v63 = vadd.f32 1e-05, %v5147_v25  ;;  %v5152_v30 = vmul.f32 0.0078125, %v5003_v42  ;;  %v13237_v25 = vld [vmem:[#allocation36_spill] sm:$0xff] }
 0x5f7   : > { %7451 = vst [vmem:[%s11223_s20 + $0x178] sm:$0xff] %v7308_v39   ;;  %v5787_v2 = vadd.f32 %v12065_v9, %v5655_v28  ;;  %v5660_v52 = vmul.f32 %v12055_v55, %v5528_v32  ;;  %v5529_v31 = vmul.f32 %v8673_v29, %v11745_v56  ;;  %v5005_v41 = vpop.xlane.xlu1 %5004 }
 0x5f8   : > { %v8675_v49 = vpop.eup %8674  ;;  %8684 = vrsqrt.f32 %v5275_v63  ;;  %v5280_v38 = vadd.f32 1e-05, %v5152_v30  ;;  %v5153_v11 = vmul.f32 0.0078125, %v5005_v41 }
 0x5f9   : > { %v7303_v51 = vpack.c.bf16 %v5787_v2, %v5786_v53  ;;  %v5661_v62 = vmul.f32 %v12055_v55, %v5529_v31  ;;  %v5526_v34 = vmul.f32 %v8675_v49, %v11761_v57  ;;  %v4999_v10 = vpop.xlane.xlu0 %4998  ;;  %v5792_v23 = vadd.f32 %v12065_v9, %v5660_v52  ;;  %v13238_v53 = vld [vmem:[#allocation117_spill] sm:$0xff] }
 0x5fa   : > { %v8677_v59 = vpop.eup %8676  ;;  %8686 = vrsqrt.f32 %v5280_v38  ;;  %v5281_v60 = vadd.f32 1e-05, %v5153_v11  ;;  %v5150_v33 = vmul.f32 0.0078125, %v4999_v10 }
 0x5fb   : > { %7450 = vst [vmem:[%s11223_s20 + $0x170] sm:$0xff] %v7303_v51   ;;  %v5793_v56 = vadd.f32 %v12065_v9, %v5661_v62  ;;  %v5658_v40 = vmul.f32 %v12055_v55, %v5526_v34  ;;  %v5527_v17 = vmul.f32 %v8677_v59, %v11773_v1  ;;  %v5001_v21 = vpop.xlane.xlu1 %5000  ;;  %v13239_v62 = vld [vmem:[#allocation118_spill] sm:$0xff] }
 0x5fc   : > { %v8679_v19 = vpop.eup %8678  ;;  %8688 = vrsqrt.f32 %v5281_v60  ;;  %v5278_v22 = vadd.f32 1e-05, %v5150_v33  ;;  %v5151_v57 = vmul.f32 0.0078125, %v5001_v21 }
 0x5fd   : > { %v7318_v13 = vpack.c.bf16 %v5793_v56, %v5792_v23  ;;  %v5659_v20 = vmul.f32 %v12055_v55, %v5527_v17  ;;  %v5532_v48 = vmul.f32 %v8679_v19, %v13236_v35  ;;  %v5011_v36 = vpop.xlane.xlu0 %5010  ;;  %v5790_v0 = vadd.f32 %v12065_v9, %v5658_v40 }
 0x5fe   : > { %v8681_v43 = vpop.eup %8680  ;;  %8690 = vrsqrt.f32 %v5278_v22  ;;  %v5279_v4 = vadd.f32 1e-05, %v5151_v57  ;;  %v5156_v50 = vmul.f32 0.0078125, %v5011_v36 }
 0x5ff   : > { %7453 = vst [vmem:[%s11223_s20 + $0x188] sm:$0xff] %v7318_v13   ;;  %v5791_v1 = vadd.f32 %v12065_v9, %v5659_v20  ;;  %v5664_v54 = vmul.f32 %v12055_v55, %v5532_v48  ;;  %v5533_v39 = vmul.f32 %v8681_v43, %v13237_v25  ;;  %v5013_v28 = vpop.xlane.xlu1 %5012 }
 0x600   : > { %v8683_v32 = vpop.eup %8682  ;;  %8692 = vrsqrt.f32 %v5279_v4  ;;  %v5284_v42 = vadd.f32 1e-05, %v5156_v50  ;;  %v5157_v29 = vmul.f32 0.0078125, %v5013_v28 }
 0x601   : > { %v7313_v63 = vpack.c.bf16 %v5791_v1, %v5790_v0  ;;  %v5665_v30 = vmul.f32 %v12055_v55, %v5533_v39  ;;  %v5530_v2 = vmul.f32 %v8683_v32, %v13238_v53  ;;  %v5007_v52 = vpop.xlane.xlu0 %5006  ;;  %v5796_v38 = vadd.f32 %v12065_v9, %v5664_v54 }
 0x602   : > { %v8685_v31 = vpop.eup %8684  ;;  %8694 = vrsqrt.f32 %v5284_v42  ;;  %v5285_v41 = vadd.f32 1e-05, %v5157_v29  ;;  %v5154_v49 = vmul.f32 0.0078125, %v5007_v52  ;;  %v13240_v52 = vld [vmem:[#allocation41_spill] sm:$0xff] }
 0x603   : > { %7452 = vst [vmem:[%s11223_s20 + $0x180] sm:$0xff] %v7313_v63   ;;  %v5797_v11 = vadd.f32 %v12065_v9, %v5665_v30  ;;  %v5662_v51 = vmul.f32 %v12055_v55, %v5530_v2  ;;  %v5531_v34 = vmul.f32 %v8685_v31, %v13239_v62  ;;  %v5009_v10 = vpop.xlane.xlu1 %5008 }
 0x604   : > { %v8687_v59 = vpop.eup %8686  ;;  %8696 = vrsqrt.f32 %v5285_v41  ;;  %v5282_v60 = vadd.f32 1e-05, %v5154_v49  ;;  %v5155_v33 = vmul.f32 0.0078125, %v5009_v10 }
 0x605   : > { %v7328_v23 = vpack.c.bf16 %v5797_v11, %v5796_v38  ;;  %v5663_v56 = vmul.f32 %v12055_v55, %v5531_v34  ;;  %v5536_v40 = vmul.f32 %v8687_v59, %v11812_v61  ;;  %v5019_v17 = vpop.xlane.xlu0 %5018  ;;  %v5794_v57 = vadd.f32 %v12065_v9, %v5662_v51  ;;  %v13241_v34 = vld [vmem:[#allocation119_spill] sm:$0xff] }
 0x606   : > { %v8689_v21 = vpop.eup %8688  ;;  %8698 = vrsqrt.f32 %v5282_v60  ;;  %v5283_v19 = vadd.f32 1e-05, %v5155_v33  ;;  %v5160_v22 = vmul.f32 0.0078125, %v5019_v17  ;;  %v13242_v17 = vld [vmem:[#allocation38_spill] sm:$0xff] }
 0x607   : > { %7455 = vst [vmem:[%s11223_s20 + $0x198] sm:$0xff] %v7328_v23   ;;  %v5795_v13 = vadd.f32 %v12065_v9, %v5663_v56  ;;  %v5668_v20 = vmul.f32 %v12055_v55, %v5536_v40  ;;  %v5537_v35 = vmul.f32 %v8689_v21, %v11815_v26  ;;  %v5021_v48 = vpop.xlane.xlu1 %5020 }
 0x608   : > { %v8691_v36 = vpop.eup %8690  ;;  %8700 = vrsqrt.f32 %v5283_v19  ;;  %v5288_v43 = vadd.f32 1e-05, %v5160_v22  ;;  %v5161_v61 = vmul.f32 0.0078125, %v5021_v48 }
 0x609   : > { %v7323_v4 = vpack.c.bf16 %v5795_v13, %v5794_v57  ;;  %v5669_v50 = vmul.f32 %v12055_v55, %v5537_v35  ;;  %v5534_v0 = vmul.f32 %v8691_v36, %v11831_v15  ;;  %v5015_v1 = vpop.xlane.xlu0 %5014  ;;  %v5800_v28 = vadd.f32 %v12065_v9, %v5668_v20  ;;  %v13243_v36 = vld [vmem:[#allocation39_spill] sm:$0xff] }
 0x60a   : > { %v8693_v54 = vpop.eup %8692  ;;  %8702 = vrsqrt.f32 %v5288_v43  ;;  %v5289_v25 = vadd.f32 1e-05, %v5161_v61  ;;  %v5158_v39 = vmul.f32 0.0078125, %v5015_v1 }
 0x60b   : > { %7454 = vst [vmem:[%s11223_s20 + $0x190] sm:$0xff] %v7323_v4   ;;  %v5801_v26 = vadd.f32 %v12065_v9, %v5669_v50  ;;  %v5666_v32 = vmul.f32 %v12055_v55, %v5534_v0  ;;  %v5535_v42 = vmul.f32 %v8693_v54, %v11843_v27  ;;  %v5017_v29 = vpop.xlane.xlu1 %5016 }
 0x60c   : > { %v8695_v63 = vpop.eup %8694  ;;  %8704 = vrsqrt.f32 %v5289_v25  ;;  %v5286_v30 = vadd.f32 1e-05, %v5158_v39  ;;  %v5159_v15 = vmul.f32 0.0078125, %v5017_v29 }
 0x60d   : > { %v7338_v53 = vpack.c.bf16 %v5801_v26, %v5800_v28  ;;  %v5667_v2 = vmul.f32 %v12055_v55, %v5535_v42  ;;  %v5540_v31 = vmul.f32 %v8695_v63, %v13240_v52  ;;  %v5027_v41 = vpop.xlane.xlu0 %5026  ;;  %v5798_v51 = vadd.f32 %v12065_v9, %v5666_v32 }
 0x60e   : > { %v8697_v49 = vpop.eup %8696  ;;  %8706 = vrsqrt.f32 %v5286_v30  ;;  %v5287_v38 = vadd.f32 1e-05, %v5159_v15  ;;  %v5164_v11 = vmul.f32 0.0078125, %v5027_v41 }
 0x60f   : > { %7457 = vst [vmem:[%s11223_s20 + $0x1a8] sm:$0xff] %v7338_v53   ;;  %v5799_v27 = vadd.f32 %v12065_v9, %v5667_v2  ;;  %v5672_v62 = vmul.f32 %v12055_v55, %v5540_v31  ;;  %v5541_v10 = vmul.f32 %v8697_v49, %v13241_v34  ;;  %v5029_v59 = vpop.xlane.xlu1 %5028 }
 0x610   : > { %v8699_v60 = vpop.eup %8698  ;;  %8708 = vrsqrt.f32 %v5287_v38  ;;  %v5292_v33 = vadd.f32 1e-05, %v5164_v11  ;;  %v5165_v23 = vmul.f32 0.0078125, %v5029_v59 }
 0x611   : > { %v7333_v56 = vpack.c.bf16 %v5799_v27, %v5798_v51  ;;  %v5673_v40 = vmul.f32 %v12055_v55, %v5541_v10  ;;  %v5538_v21 = vmul.f32 %v8699_v60, %v13242_v17  ;;  %v5023_v19 = vpop.xlane.xlu0 %5022  ;;  %v5804_v20 = vadd.f32 %v12065_v9, %v5672_v62 }
 0x612   : > { %v8701_v22 = vpop.eup %8700  ;;  %8710 = vrsqrt.f32 %v5292_v33  ;;  %v5293_v57 = vadd.f32 1e-05, %v5165_v23  ;;  %v5162_v13 = vmul.f32 0.0078125, %v5023_v19 }
 0x613   : > { %7456 = vst [vmem:[%s11223_s20 + $0x1a0] sm:$0xff] %v7333_v56   ;;  %v5805_v35 = vadd.f32 %v12065_v9, %v5673_v40  ;;  %v5670_v48 = vmul.f32 %v12055_v55, %v5538_v21  ;;  %v5539_v43 = vmul.f32 %v8701_v22, %v13243_v36  ;;  %v5025_v61 = vpop.xlane.xlu1 %5024 }
 0x614   : > { %v8703_v4 = vpop.eup %8702  ;;  %8712 = vrsqrt.f32 %v5293_v57  ;;  %v5290_v50 = vadd.f32 1e-05, %v5162_v13  ;;  %v5163_v0 = vmul.f32 0.0078125, %v5025_v61 }
 0x615   : > { %v7348_v1 = vpack.c.bf16 %v5805_v35, %v5804_v20  ;;  %v5671_v54 = vmul.f32 %v12055_v55, %v5539_v43  ;;  %v5544_v25 = vmul.f32 %v8703_v4, %v11880_v5  ;;  %v5035_v39 = vpop.xlane.xlu0 %5034  ;;  %v5802_v42 = vadd.f32 %v12065_v9, %v5670_v48 }
 0x616   : > { %v8705_v28 = vpop.eup %8704  ;;  %8714 = vrsqrt.f32 %v5290_v50  ;;  %v5291_v26 = vadd.f32 1e-05, %v5163_v0  ;;  %v5168_v32 = vmul.f32 0.0078125, %v5035_v39 }
 0x617   : > { %7459 = vst [vmem:[%s11223_s20 + $0x1b8] sm:$0xff] %v7348_v1   ;;  %v5803_v29 = vadd.f32 %v12065_v9, %v5671_v54  ;;  %v5676_v63 = vmul.f32 %v12055_v55, %v5544_v25  ;;  %v5545_v30 = vmul.f32 %v8705_v28, %v11883_v6  ;;  %v5037_v15 = vpop.xlane.xlu1 %5036 }
 0x618   : > { %v8707_v53 = vpop.eup %8706  ;;  %8716 = vrsqrt.f32 %v5291_v26  ;;  %v5296_v2 = vadd.f32 1e-05, %v5168_v32  ;;  %v5169_v5 = vmul.f32 0.0078125, %v5037_v15 }
 0x619   : > { %v7343_v52 = vpack.c.bf16 %v5803_v29, %v5802_v42  ;;  %v5677_v31 = vmul.f32 %v12055_v55, %v5545_v30  ;;  %v5542_v41 = vmul.f32 %v8707_v53, %v11897_v8  ;;  %v5031_v49 = vpop.xlane.xlu0 %5030  ;;  %v5808_v27 = vadd.f32 %v12065_v9, %v5676_v63 }
 0x61a   : > { %v8709_v38 = vpop.eup %8708  ;;  %8718 = vrsqrt.f32 %v5296_v2  ;;  %v5297_v11 = vadd.f32 1e-05, %v5169_v5  ;;  %v5166_v51 = vmul.f32 0.0078125, %v5031_v49 }
 0x61b   : > { %7458 = vst [vmem:[%s11223_s20 + $0x1b0] sm:$0xff] %v7343_v52   ;;  %v5809_v6 = vadd.f32 %v12065_v9, %v5677_v31  ;;  %v5674_v62 = vmul.f32 %v12055_v55, %v5542_v41  ;;  %v5543_v34 = vmul.f32 %v8709_v38, %v11907_v3  ;;  %v5033_v10 = vpop.xlane.xlu1 %5032 }
 0x61c   : > { %v8711_v59 = vpop.eup %8710  ;;  %8720 = vrsqrt.f32 %v5297_v11  ;;  %v5294_v60 = vadd.f32 1e-05, %v5166_v51  ;;  %v5167_v8 = vmul.f32 0.0078125, %v5033_v10 }
 0x61d   : > { %v7358_v33 = vpack.c.bf16 %v5809_v6, %v5808_v27  ;;  %v5675_v23 = vmul.f32 %v12055_v55, %v5543_v34  ;;  %v5548_v56 = vmul.f32 %v8711_v59, %v11911_v24  ;;  %v5039_v40 = vpop.xlane.xlu0 %5038  ;;  %v5806_v22 = vadd.f32 %v12065_v9, %v5674_v62 }
 0x61e   : > { %v8713_v17 = vpop.eup %8712  ;;  %8722 = vrsqrt.f32 %v5294_v60  ;;  %v5295_v21 = vadd.f32 1e-05, %v5167_v8  ;;  %v5170_v19 = vmul.f32 0.0078125, %v5039_v40 }
 0x61f   : > { %7461 = vst [vmem:[%s11223_s20 + $0x1c8] sm:$0xff] %v7358_v33   ;;  %v5807_v3 = vadd.f32 %v12065_v9, %v5675_v23  ;;  %v5680_v57 = vmul.f32 %v12055_v55, %v5548_v56  ;;  %v5549_v13 = vmul.f32 %v8713_v17, %v11917_v46  ;;  %v5041_v20 = vpop.xlane.xlu1 %5040 }
 0x620   : > { %v8715_v35 = vpop.eup %8714  ;;  %8724 = vrsqrt.f32 %v5295_v21  ;;  %v5298_v48 = vadd.f32 1e-05, %v5170_v19  ;;  %v5171_v24 = vmul.f32 0.0078125, %v5041_v20  ;;  %v8741_v21 = vld [vmem:[%s12343_s6 + $0x3] ss:$0 sm:$0xff] }
 0x621   : > { %v7353_v36 = vpack.c.bf16 %v5807_v3, %v5806_v22  ;;  %v5681_v43 = vmul.f32 %v12055_v55, %v5549_v13  ;;  %v5546_v61 = vmul.f32 %v8715_v35, %v11920_v45  ;;  %v5043_v4 = vpop.xlane.xlu0 %5042  ;;  %v5812_v54 = vadd.f32 %v12065_v9, %v5680_v57 }
 0x622   : > { %v8717_v50 = vpop.eup %8716  ;;  %8726 = vrsqrt.f32 %v5298_v48  ;;  %v5299_v0 = vadd.f32 1e-05, %v5171_v24  ;;  %v5172_v1 = vmul.f32 0.0078125, %v5043_v4 }
 0x623   : > { %7460 = vst [vmem:[%s11223_s20 + $0x1c0] sm:$0xff] %v7353_v36   ;;  %v5813_v46 = vadd.f32 %v12065_v9, %v5681_v43  ;;  %v5678_v25 = vmul.f32 %v12055_v55, %v5546_v61  ;;  %v5547_v39 = vmul.f32 %v8717_v50, %v11923_v58  ;;  %v5045_v28 = vpop.xlane.xlu1 %5044 }
 0x624   : > { %v8719_v26 = vpop.eup %8718  ;;  %8728 = vrsqrt.f32 %v5299_v0  ;;  %v5300_v32 = vadd.f32 1e-05, %v5172_v1  ;;  %v5173_v45 = vmul.f32 0.0078125, %v5045_v28 }
 0x625   : > { %v7368_v42 = vpack.c.bf16 %v5813_v46, %v5812_v54  ;;  %v5679_v29 = vmul.f32 %v12055_v55, %v5547_v39  ;;  %v5552_v63 = vmul.f32 %v8719_v26, %v11941_v18  ;;  %v5810_v53 = vadd.f32 %v12065_v9, %v5678_v25 }
 0x626   : > { %v8721_v30 = vpop.eup %8720  ;;  %8730 = vrsqrt.f32 %v5300_v32  ;;  %v5301_v15 = vadd.f32 1e-05, %v5173_v45 }
 0x627   : > { %7463 = vst [vmem:[%s11223_s20 + $0x1d8] sm:$0xff] %v7368_v42   ;;  %v5811_v2 = vadd.f32 %v12065_v9, %v5679_v29  ;;  %v5684_v58 = vmul.f32 %v12055_v55, %v5552_v63  ;;  %v5553_v5 = vmul.f32 %v8721_v30, %v11944_v7 }
 0x628   : > { %v8723_v52 = vpop.eup %8722  ;;  %8732 = vrsqrt.f32 %v5301_v15 }
 0x629   : > { %v7363_v31 = vpack.c.bf16 %v5811_v2, %v5810_v53  ;;  %v5685_v41 = vmul.f32 %v12055_v55, %v5553_v5  ;;  %v5550_v18 = vmul.f32 %v8723_v52, %v11952_v16  ;;  %v5816_v38 = vadd.f32 %v12065_v9, %v5684_v58 }
 0x62a   : > { %v8725_v49 = vpop.eup %8724 }
 0x62b   : > { %7462 = vst [vmem:[%s11223_s20 + $0x1d0] sm:$0xff] %v7363_v31   ;;  %v5817_v11 = vadd.f32 %v12065_v9, %v5685_v41  ;;  %v5682_v51 = vmul.f32 %v12055_v55, %v5550_v18  ;;  %v5551_v27 = vmul.f32 %v8725_v49, %v11960_v37 }
 0x62c   : > { %v8727_v7 = vpop.eup %8726 }
 0x62d   : > { %v7378_v6 = vpack.c.bf16 %v5817_v11, %v5816_v38  ;;  %v5683_v62 = vmul.f32 %v12055_v55, %v5551_v27  ;;  %v5554_v34 = vmul.f32 %v8727_v7, %v11968_v12  ;;  %v5814_v16 = vadd.f32 %v12065_v9, %v5682_v51 }
 0x62e   : > { %v8729_v10 = vpop.eup %8728 }
 0x62f   : > { %7465 = vst [vmem:[%s11223_s20 + $0x1e8] sm:$0xff] %v7378_v6   ;;  %v5815_v59 = vadd.f32 %v12065_v9, %v5683_v62  ;;  %v5686_v60 = vmul.f32 %v12055_v55, %v5554_v34  ;;  %v5555_v8 = vmul.f32 %v8729_v10, %v11977_v44 }
 0x630   : > { %v8731_v37 = vpop.eup %8730 }
 0x631   : > { %v7373_v33 = vpack.c.bf16 %v5815_v59, %v5814_v16  ;;  %v5687_v23 = vmul.f32 %v12055_v55, %v5555_v8  ;;  %v5556_v56 = vmul.f32 %v8731_v37, %v11974_v47  ;;  %v5818_v40 = vadd.f32 %v12065_v9, %v5686_v60 }
 0x632   : > { %v8733_v12 = vpop.eup %8732 }
 0x633   : > { %7464 = vst [vmem:[%s11223_s20 + $0x1e0] sm:$0xff] %v7373_v33   ;;  %v5819_v17 = vadd.f32 %v12065_v9, %v5687_v23  ;;  %v5688_v44 = vmul.f32 %v8741_v21, %v5556_v56  ;;  %v5557_v19 = vmul.f32 %v8733_v12, %v11984_v14 }
 0x635   : > { %v7383_v22 = vpack.c.bf16 %v5819_v17, %v5818_v40  ;;  %v5689_v55 = vmul.f32 %v8741_v21, %v5557_v19  ;;  %v5820_v47 = vadd.f32 %v12065_v9, %v5688_v44 }
 0x637   : > { %7466 = vst [vmem:[%s11223_s20 + $0x1f0] sm:$0xff] %v7383_v22   ;;  %v5821_v3 = vadd.f32 %v12065_v9, %v5689_v55 }
 0x639   : > { %v7388_v14 = vpack.c.bf16 %v5821_v3, %v5820_v47 }
 0x63b   : > { %7467 = vst [vmem:[%s11223_s20 + $0x1f8] sm:$0xff] %v7388_v14  }
 0x63c   : > { %8755 = shalt.err (!%p8752_p5)
}
 0x63d   : > { %s8756_s16 = scalar_lea.hbm %s12284_s30, 8192  ;;  %s8760_s18 = scalar_lea.hbm %s12344_s7, 16384 }
 0x63e   : > { %p8757_p6 = scmp.ne.s32.totalorder %s12284_s30, %s8756_s16  ;;  %p8761_p10 = scmp.lt.u32.totalorder %s12284_s30, %s12344_s7 }
 0x63f   : > { %p8762_p11 = scmp.lt.u32.totalorder %s8760_s18, %s8756_s16  ;;  %p8764_p13 = scmp.lt.u32.totalorder %s8756_s16, %s12284_s30 }
 0x640   : > { %p8758_p7 = pnand %p8757_p6, %p8906_p4 }
 0x641   : > { %p8763_p12 = por %p8762_p11, %p8761_p10 }
 0x642   : > { %p8759_p9 = pneg %p8758_p7 }
 0x643   : > { %p8765_p0 = por %p8764_p13, %p8763_p12 }
 0x645   : > { %p8766_p1 = pnand %p8765_p0, %p8759_p9 }
 0x647   : > { %8769 = shalt.err (!%p8766_p1)
}
 0x648   : > { %s8824_s22 = smov 64   ;;  %s8825_s8 = smov 4  }
 0x649   : > { %8330 = dma.vmem_to_hbm [thread:$0]  (%p8906_p4), %s12286_s23, 8192, %s12284_s30, %s12291_s27, %s8824_s22, %s8824_s22, %s8825_s8  }
 0x64a PF: > { %p8336_p2 = scmp.ge.s32.totalorder %s8820_s29, 2  ;;  %s6494_s10 = sand.u32 1, %s8800_s24  }
 0x64b   : > { %s6495_s12 = scalar_lea.sflag [#allocation3], %s6494_s10 }
 0x64c   : > { %p8333_p3 = pnand %p8336_p2, %p8913_p8 }
 0x64e   : > { %8795 = dma.done.wait (!%p8333_p3), %s6495_s12, 8192  }
 0x64f   : > { %8797 = vsyncadd (!%p8333_p3), %s6495_s12, 4294959104  ;;  %s20_s29 = sadd.s32 1, %s8820_s29   ;;  %s13244_s24 = smov %s8804_s25 }
 0x650   : > { %p17_p5 = scmp.ge.s32.totalorder %s20_s29, 4   ;;  %s13245_s25 = smov %s8808_s26 }
 0x651   : > { %s13246_s26 = smov %s8919_s14  ;;  %s13247_s27 = smov %s8816_s28 }
 0x652   : > { %s13248_s28 = smov %s13250_s9  ;;  %19 = sbr.rel (!%p17_p5) target bundleno = 4 (0x4), region = 86 }
 0x659   :  { %6500 = vsyncpa [#allocation3], 1 }
 0x65a   :  { %6502 = vsyncpa [#allocation3 + $0x1], 1 }

</bundles_post_ra>
